<compile_context>
chip_gen: v6e
topology: v6e:2x2x1
jax: 0.10.0
libtpu: 0.0.40
codegen_flags: <defaults>
</compile_context>

<pallas_src>
import functools

import jax
import jax.numpy as jnp
from jax.experimental import pallas as pl
from jax.experimental.pallas import tpu as pltpu

_LANE = 128
_TM_MAX = 512                     # rows per M tile (good pipelining point)
_VMEM_LIMIT = 48 * 1024 * 1024    # sized for v7x's 64 MiB VMEM, fine on v5e/v6e
_BN_EPS = 1e-5


def _round_up(x, m):
    return ((x + m - 1) // m) * m


# ----------------------------------------------------------------------------
# Pass 1: tiled matmul (bf16 in, f32 acc) + per-channel sum / sumsq reduction.
# ----------------------------------------------------------------------------
def _conv_stats_kernel(p_ref, w_ref, raw_ref, sum_ref, ssq_ref):
    i = pl.program_id(0)
    x = jnp.dot(p_ref[...], w_ref[...], preferred_element_type=jnp.float32)
    raw_ref[...] = x

    @pl.when(i == 0)
    def _():
        sum_ref[...] = jnp.zeros_like(sum_ref)
        ssq_ref[...] = jnp.zeros_like(ssq_ref)

    sum_ref[...] += jnp.sum(x, axis=0, keepdims=True)
    ssq_ref[...] += jnp.sum(x * x, axis=0, keepdims=True)


# ----------------------------------------------------------------------------
# Pass 2: tiled normalize + affine + ReLU (BN folded into scale/shift).
# ----------------------------------------------------------------------------
def _bn_relu_kernel(x_ref, scale_ref, shift_ref, o_ref):
    y = x_ref[...] * scale_ref[...] + shift_ref[...]
    o_ref[...] = jnp.maximum(y, 0.0).astype(o_ref.dtype)


def _conv_bn_relu(patches, w2, gamma, beta, m_true):
    """patches:(Mp,Kp) bf16, w2:(Kp,Cout) bf16, gamma/beta:(Cout,) f32.

    Returns the (m_true, Cout) bf16 normalized+ReLU'd conv output.
    """
    M_pad, K = patches.shape
    Cout = w2.shape[1]
    TM = M_pad if M_pad <= _TM_MAX else _TM_MAX
    assert M_pad % TM == 0 and K % _LANE == 0 and Cout % _LANE == 0
    n_tiles = M_pad // TM

    bytes_accessed = (M_pad * K * 2 + K * Cout * 2 + M_pad * Cout * 4
                      + 2 * Cout * 4)
    raw, s, ssq = pl.pallas_call(
        _conv_stats_kernel,
        out_shape=(
            jax.ShapeDtypeStruct((M_pad, Cout), jnp.float32),   # raw conv out
            jax.ShapeDtypeStruct((1, Cout), jnp.float32),       # sum
            jax.ShapeDtypeStruct((1, Cout), jnp.float32),       # sum of squares
        ),
        grid_spec=pltpu.PrefetchScalarGridSpec(
            num_scalar_prefetch=0,
            grid=(n_tiles,),
            in_specs=[
                pl.BlockSpec((TM, K), lambda i: (i, 0)),        # patches tile
                pl.BlockSpec((K, Cout), lambda i: (0, 0)),      # resident W
            ],
            out_specs=[
                pl.BlockSpec((TM, Cout), lambda i: (i, 0)),     # raw tile
                pl.BlockSpec((1, Cout), lambda i: (0, 0)),      # accumulator
                pl.BlockSpec((1, Cout), lambda i: (0, 0)),      # accumulator
            ],
        ),
        compiler_params=pltpu.CompilerParams(
            dimension_semantics=("arbitrary",),                 # M reduction
            vmem_limit_bytes=_VMEM_LIMIT),
        cost_estimate=pl.CostEstimate(
            flops=2 * M_pad * K * Cout, transcendentals=0,
            bytes_accessed=bytes_accessed),
    )(patches, w2)

    # Fold training-mode BN (biased variance, eps=1e-5) into scale/shift.
    mean = s[0] / m_true
    var = jnp.maximum(ssq[0] / m_true - mean * mean, 0.0)  # clamp f32 cancel
    inv = jax.lax.rsqrt(var + _BN_EPS)
    scale = (gamma * inv).reshape(1, Cout)
    shift = (beta - mean * gamma * inv).reshape(1, Cout)

    out = pl.pallas_call(
        _bn_relu_kernel,
        out_shape=jax.ShapeDtypeStruct((M_pad, Cout), jnp.bfloat16),
        grid_spec=pltpu.PrefetchScalarGridSpec(
            num_scalar_prefetch=0,
            grid=(n_tiles,),
            in_specs=[
                pl.BlockSpec((TM, Cout), lambda i: (i, 0)),
                pl.BlockSpec((1, Cout), lambda i: (0, 0)),
                pl.BlockSpec((1, Cout), lambda i: (0, 0)),
            ],
            out_specs=pl.BlockSpec((TM, Cout), lambda i: (i, 0)),
        ),
        compiler_params=pltpu.CompilerParams(
            dimension_semantics=("parallel",),                  # megacore on v7x
            vmem_limit_bytes=_VMEM_LIMIT),
    )(raw, scale, shift)
    return out[:m_true]


# ----------------------------------------------------------------------------
# Plain-JAX glue: padding + im2col (data movement only) + weight prep.
# ----------------------------------------------------------------------------
def _im2col(x_nhwc, k, stride, pad, pad_mode):
    """x:(N,H,W,C) -> (patches:(N*Ho*Wo, k*k*C), (N,Ho,Wo))."""
    if pad > 0:
        x = jnp.pad(x_nhwc, ((0, 0), (pad, pad), (pad, pad), (0, 0)),
                    mode=pad_mode)
    else:
        x = x_nhwc
    N, H, W, C = x.shape
    Ho = (H - k) // stride + 1
    Wo = (W - k) // stride + 1
    cols = []
    for i in range(k):
        for j in range(k):
            cols.append(x[:, i:i + stride * Ho:stride,
                          j:j + stride * Wo:stride, :])
    patches = jnp.stack(cols, axis=3)                 # (N,Ho,Wo,k*k,C)
    patches = patches.reshape(N * Ho * Wo, k * k * C)
    return patches, (N, Ho, Wo)


def _prep_weight(w_oihw, cin_pad=None, cout_pad=None):
    """(Cout,Cin,kH,kW) -> (kH*kW*Cin_p, Cout_p) bf16, matching im2col order."""
    cout, cin, kh, kw = w_oihw.shape
    w = jnp.transpose(w_oihw, (2, 3, 1, 0))           # (kh, kw, cin, cout)
    if cin_pad is not None and cin_pad > cin:
        w = jnp.pad(w, ((0, 0), (0, 0), (0, cin_pad - cin), (0, 0)))
    if cout_pad is not None and cout_pad > cout:
        w = jnp.pad(w, ((0, 0), (0, 0), (0, 0), (0, cout_pad - cout)))
    return w.reshape(kh * kw * w.shape[2], w.shape[3]).astype(jnp.bfloat16)


def _layer(x_nhwc, params, k, stride, pad, pad_mode,
           cin_pad=None, cout_pad=None):
    w, gamma, beta = params
    cout = w.shape[0]
    cout_p = cout_pad if (cout_pad is not None and cout_pad > cout) else cout
    w2 = _prep_weight(w, cin_pad=cin_pad, cout_pad=cout_p)
    if cout_p > cout:
        # Padded channels: zero conv output -> BN/ReLU keeps them exactly zero.
        gamma = jnp.concatenate(
            [gamma, jnp.ones((cout_p - cout,), jnp.float32)])
        beta = jnp.concatenate(
            [beta, jnp.zeros((cout_p - cout,), jnp.float32)])

    patches, (N, Ho, Wo) = _im2col(x_nhwc.astype(jnp.bfloat16),
                                   k, stride, pad, pad_mode)
    M, K = patches.shape
    K_p = _round_up(K, _LANE)
    M_p = _round_up(M, 8) if M <= _TM_MAX else _round_up(M, _TM_MAX)
    patches = jnp.pad(patches, ((0, M_p - M), (0, K_p - K)))
    w2 = jnp.pad(w2, ((0, K_p - w2.shape[0]), (0, 0)))

    out = _conv_bn_relu(patches, w2, gamma, beta, M)
    return out.reshape(N, Ho, Wo, cout_p)


# ----------------------------------------------------------------------------
# Encoder
# ----------------------------------------------------------------------------
def init_encoder_params(input_nc, deep=False, scale=0.05):
    """Deterministic synthetic init (conv weight, BN gamma/beta).

    Conv biases are omitted: they cancel exactly under training-mode
    BatchNorm, so the forward output is identical.
    """
    key = jax.random.PRNGKey(42)
    specs = [
        ("first", input_nc, 64, 7),
        ("down1", 64, 128, 3),
        ("down2", 128, 256, 3),
        ("down3", 256, 512, 3),
    ]
    if deep:
        specs.append(("down4", 512, 512, 3))
    params = {}
    for name, cin, cout, k in specs:
        key, kw = jax.random.split(key)
        w = jax.random.normal(kw, (cout, cin, k, k), jnp.float32) * scale
        gamma = jnp.ones((cout,), jnp.float32)   # nn.BatchNorm2d default init
        beta = jnp.zeros((cout,), jnp.float32)
        params[name] = (w, gamma, beta)
    return params


@functools.partial(jax.jit, static_argnames=("deep",))
def encoder_forward(x_nchw, params, deep=False):
    """Mirrors Encoder.forward.  Input/outputs are NCHW f32 like PyTorch."""
    x = jnp.transpose(x_nchw, (0, 2, 3, 1))                      # -> NHWC

    # first_layer: ReflectionPad2d(3) + Conv2d(k=7) + BN + ReLU
    # Cout padded 64 -> 128 (padded channels are exactly zero).
    x = _layer(x, params["first"], k=7, stride=1, pad=3,
               pad_mode="reflect", cout_pad=128)
    # down1/2/3: Conv2d(k=3, stride=2, pad=1) + BN + ReLU
    y1 = _layer(x, params["down1"], k=3, stride=2, pad=1,
                pad_mode="constant", cin_pad=128)
    y2 = _layer(y1, params["down2"], k=3, stride=2, pad=1,
                pad_mode="constant")
    out = _layer(y2, params["down3"], k=3, stride=2, pad=1,
                 pad_mode="constant")
    if deep:
        out = _layer(out, params["down4"], k=3, stride=2, pad=1,
                     pad_mode="constant")

    to_nchw = lambda t: jnp.transpose(t.astype(jnp.float32), (0, 3, 1, 2))
    return to_nchw(out), to_nchw(y2), to_nchw(y1)


if __name__ == "__main__":
    # Small shapes consistent with the module: batch=2, input_nc=3, 16x16.
    input_nc = 3
    deep = False
    x = jax.random.normal(jax.random.PRNGKey(0), (2, input_nc, 16, 16),
                          jnp.float32)
    params = init_encoder_params(input_nc, deep=deep)

    out, y2, y1 = encoder_forward(x, params, deep=deep)
    jax.block_until_ready((out, y2, y1))

    assert out.shape == (2, 512, 2, 2), out.shape
    assert y2.shape == (2, 256, 4, 4), y2.shape
    assert y1.shape == (2, 128, 8, 8), y1.shape
    assert bool(jnp.all(jnp.isfinite(out)))
    assert bool(jnp.all(jnp.isfinite(y2)))
    assert bool(jnp.all(jnp.isfinite(y1)))
    print("KERNEL_OK")
</pallas_src>

<mosaic_0001>
module attributes {stable_mosaic.version = 11 : i64} {
  func.func @_bn_relu_kernel(%arg0: i32, %arg1: memref<512x128xf32, #tpu.memory_space<vmem>>, %arg2: memref<1x128xf32, #tpu.memory_space<vmem>>, %arg3: memref<1x128xf32, #tpu.memory_space<vmem>>, %arg4: memref<512x128xbf16, #tpu.memory_space<vmem>>) attributes {dimension_semantics = [#tpu.dimension_semantics<parallel>], iteration_bounds = array<i64: 1>, scalar_prefetch = 0 : i64, scratch_operands = 0 : i64, tpu.core_type = #tpu.core_type<tc>, window_params = [{transform_indices = @transform_0, window_bounds = array<i64: 512, 128>}, {pipeline_mode = #tpu.pipeline_mode<synchronous>, transform_indices = @transform_1, window_bounds = array<i64: 1, 128>}, {pipeline_mode = #tpu.pipeline_mode<synchronous>, transform_indices = @transform_2, window_bounds = array<i64: 1, 128>}, {transform_indices = @transform_3, window_bounds = array<i64: 512, 128>}]} {
    %c0 = arith.constant 0 : index
    %c0_0 = arith.constant 0 : index
    %0 = vector.load %arg1[%c0, %c0_0] : memref<512x128xf32, #tpu.memory_space<vmem>>, vector<512x128xf32>
    %c0_1 = arith.constant 0 : index
    %c0_2 = arith.constant 0 : index
    %1 = vector.load %arg2[%c0_1, %c0_2] : memref<1x128xf32, #tpu.memory_space<vmem>>, vector<1x128xf32>
    %2 = vector.broadcast %1 : vector<1x128xf32> to vector<512x128xf32>
    %3 = arith.mulf %0, %2 : vector<512x128xf32>
    %c0_3 = arith.constant 0 : index
    %c0_4 = arith.constant 0 : index
    %4 = vector.load %arg3[%c0_3, %c0_4] : memref<1x128xf32, #tpu.memory_space<vmem>>, vector<1x128xf32>
    %5 = vector.broadcast %4 : vector<1x128xf32> to vector<512x128xf32>
    %6 = arith.addf %3, %5 : vector<512x128xf32>
    %cst = arith.constant 0.000000e+00 : f32
    %7 = vector.broadcast %cst : f32 to vector<512x128xf32>
    %8 = arith.maximumf %6, %7 : vector<512x128xf32>
    %9 = arith.truncf %8 : vector<512x128xf32> to vector<512x128xbf16>
    %c0_5 = arith.constant 0 : index
    %c0_6 = arith.constant 0 : index
    %10 = vector.load %arg4[%c0_5, %c0_6] : memref<512x128xbf16, #tpu.memory_space<vmem>>, vector<512x128xbf16>
    tpu.vector_store %arg4[%c0_5, %c0_6], %9 {strides = array<i32>} : memref<512x128xbf16, #tpu.memory_space<vmem>>, vector<512x128xbf16>,
    return
  }
  func.func @transform_0(%arg0: i32) -> (i32, i32) {
    %c0_i32 = arith.constant 0 : i32
    %c0_i32_0 = arith.constant 0 : i32
    return %arg0, %c0_i32 : i32, i32
  }
  func.func @transform_1(%arg0: i32) -> (i32, i32) {
    %c0_i32 = arith.constant 0 : i32
    %c0_i32_0 = arith.constant 0 : i32
    %c0_i32_1 = arith.constant 0 : i32
    return %c0_i32, %c0_i32_0 : i32, i32
  }
  func.func @transform_2(%arg0: i32) -> (i32, i32) {
    %c0_i32 = arith.constant 0 : i32
    %c0_i32_0 = arith.constant 0 : i32
    %c0_i32_1 = arith.constant 0 : i32
    return %c0_i32, %c0_i32_0 : i32, i32
  }
  func.func @transform_3(%arg0: i32) -> (i32, i32) {
    %c0_i32 = arith.constant 0 : i32
    %c0_i32_0 = arith.constant 0 : i32
    return %arg0, %c0_i32 : i32, i32
  }
}

module attributes {stable_mosaic.version = 11 : i64} {
  func.func @_conv_stats_kernel(%arg0: i32, %arg1: memref<512x256xbf16, #tpu.memory_space<vmem>>, %arg2: memref<256x128xbf16, #tpu.memory_space<vmem>>, %arg3: memref<512x128xf32, #tpu.memory_space<vmem>>, %arg4: memref<1x128xf32, #tpu.memory_space<vmem>>, %arg5: memref<1x128xf32, #tpu.memory_space<vmem>>) attributes {dimension_semantics = [#tpu.dimension_semantics<arbitrary>], iteration_bounds = array<i64: 1>, scalar_prefetch = 0 : i64, scratch_operands = 0 : i64, tpu.core_type = #tpu.core_type<tc>, window_params = [{transform_indices = @transform_0, window_bounds = array<i64: 512, 256>}, {pipeline_mode = #tpu.pipeline_mode<synchronous>, transform_indices = @transform_1, window_bounds = array<i64: 256, 128>}, {transform_indices = @transform_2, window_bounds = array<i64: 512, 128>}, {pipeline_mode = #tpu.pipeline_mode<synchronous>, transform_indices = @transform_3, window_bounds = array<i64: 1, 128>}, {pipeline_mode = #tpu.pipeline_mode<synchronous>, transform_indices = @transform_4, window_bounds = array<i64: 1, 128>}]} {
    %c0 = arith.constant 0 : index
    %c0_0 = arith.constant 0 : index
    %0 = vector.load %arg1[%c0, %c0_0] : memref<512x256xbf16, #tpu.memory_space<vmem>>, vector<512x256xbf16>
    %c0_1 = arith.constant 0 : index
    %c0_2 = arith.constant 0 : index
    %1 = vector.load %arg2[%c0_1, %c0_2] : memref<256x128xbf16, #tpu.memory_space<vmem>>, vector<256x128xbf16>
    %cst = arith.constant dense<0.000000e+00> : vector<512x128xf32>
    %2 = tpu.matmul %0, %1, %cst {dimension_numbers = #tpu.dot_dimension_numbers<[1], [0], [0], [1], [0, 0, 1, 1], [], []>} : vector<512x256xbf16>, vector<256x128xbf16>, vector<512x128xf32> -> vector<512x128xf32>
    %c0_3 = arith.constant 0 : index
    %c0_4 = arith.constant 0 : index
    %3 = vector.load %arg3[%c0_3, %c0_4] : memref<512x128xf32, #tpu.memory_space<vmem>>, vector<512x128xf32>
    tpu.vector_store %arg3[%c0_3, %c0_4], %2 {strides = array<i32>} : memref<512x128xf32, #tpu.memory_space<vmem>>, vector<512x128xf32>,
    %c0_i32 = arith.constant 0 : i32
    %4 = arith.cmpi eq, %arg0, %c0_i32 : i32
    %5 = arith.extui %4 : i1 to i32
    %c0_i32_5 = arith.constant 0 : i32
    %6 = arith.cmpi ne, %5, %c0_i32_5 : i32
    scf.if %6 {
      %cst_16 = arith.constant 0.000000e+00 : f32
      %18 = vector.broadcast %cst_16 : f32 to vector<1x128xf32>
      %c0_17 = arith.constant 0 : index
      %c0_18 = arith.constant 0 : index
      %19 = vector.load %arg4[%c0_17, %c0_18] : memref<1x128xf32, #tpu.memory_space<vmem>>, vector<1x128xf32>
      tpu.vector_store %arg4[%c0_17, %c0_18], %18 {strides = array<i32>} : memref<1x128xf32, #tpu.memory_space<vmem>>, vector<1x128xf32>,
      %cst_19 = arith.constant 0.000000e+00 : f32
      %20 = vector.broadcast %cst_19 : f32 to vector<1x128xf32>
      %c0_20 = arith.constant 0 : index
      %c0_21 = arith.constant 0 : index
      %21 = vector.load %arg5[%c0_20, %c0_21] : memref<1x128xf32, #tpu.memory_space<vmem>>, vector<1x128xf32>
      tpu.vector_store %arg5[%c0_20, %c0_21], %20 {strides = array<i32>} : memref<1x128xf32, #tpu.memory_space<vmem>>, vector<1x128xf32>,
    } else {
    }
    %c0_6 = arith.constant 0 : index
    %c0_7 = arith.constant 0 : index
    %7 = vector.load %arg4[%c0_6, %c0_7] : memref<1x128xf32, #tpu.memory_space<vmem>>, vector<1x128xf32>
    %cst_8 = arith.constant dense<0.000000e+00> : vector<128xf32>
    %8 = vector.multi_reduction <add>, %2, %cst_8 [0] : vector<512x128xf32> to vector<128xf32>
    %9 = vector.shape_cast %8 : vector<128xf32> to vector<1x128xf32>
    %10 = arith.addf %7, %9 : vector<1x128xf32>
    %c0_9 = arith.constant 0 : index
    %c0_10 = arith.constant 0 : index
    %11 = vector.load %arg4[%c0_9, %c0_10] : memref<1x128xf32, #tpu.memory_space<vmem>>, vector<1x128xf32>
    tpu.vector_store %arg4[%c0_9, %c0_10], %10 {strides = array<i32>} : memref<1x128xf32, #tpu.memory_space<vmem>>, vector<1x128xf32>,
    %c0_11 = arith.constant 0 : index
    %c0_12 = arith.constant 0 : index
    %12 = vector.load %arg5[%c0_11, %c0_12] : memref<1x128xf32, #tpu.memory_space<vmem>>, vector<1x128xf32>
    %13 = arith.mulf %2, %2 : vector<512x128xf32>
    %cst_13 = arith.constant dense<0.000000e+00> : vector<128xf32>
    %14 = vector.multi_reduction <add>, %13, %cst_13 [0] : vector<512x128xf32> to vector<128xf32>
    %15 = vector.shape_cast %14 : vector<128xf32> to vector<1x128xf32>
    %16 = arith.addf %12, %15 : vector<1x128xf32>
    %c0_14 = arith.constant 0 : index
    %c0_15 = arith.constant 0 : index
    %17 = vector.load %arg5[%c0_14, %c0_15] : memref<1x128xf32, #tpu.memory_space<vmem>>, vector<1x128xf32>
    tpu.vector_store %arg5[%c0_14, %c0_15], %16 {strides = array<i32>} : memref<1x128xf32, #tpu.memory_space<vmem>>, vector<1x128xf32>,
    return
  }
  func.func @transform_0(%arg0: i32) -> (i32, i32) {
    %c0_i32 = arith.constant 0 : i32
    %c0_i32_0 = arith.constant 0 : i32
    return %arg0, %c0_i32 : i32, i32
  }
  func.func @transform_1(%arg0: i32) -> (i32, i32) {
    %c0_i32 = arith.constant 0 : i32
    %c0_i32_0 = arith.constant 0 : i32
    %c0_i32_1 = arith.constant 0 : i32
    return %c0_i32, %c0_i32_0 : i32, i32
  }
  func.func @transform_2(%arg0: i32) -> (i32, i32) {
    %c0_i32 = arith.constant 0 : i32
    %c0_i32_0 = arith.constant 0 : i32
    return %arg0, %c0_i32 : i32, i32
  }
  func.func @transform_3(%arg0: i32) -> (i32, i32) {
    %c0_i32 = arith.constant 0 : i32
    %c0_i32_0 = arith.constant 0 : i32
    %c0_i32_1 = arith.constant 0 : i32
    return %c0_i32, %c0_i32_0 : i32, i32
  }
  func.func @transform_4(%arg0: i32) -> (i32, i32) {
    %c0_i32 = arith.constant 0 : i32
    %c0_i32_0 = arith.constant 0 : i32
    %c0_i32_1 = arith.constant 0 : i32
    return %c0_i32, %c0_i32_0 : i32, i32
  }
}

module attributes {stable_mosaic.version = 11 : i64} {
  func.func @_bn_relu_kernel(%arg0: i32, %arg1: memref<128x128xf32, #tpu.memory_space<vmem>>, %arg2: memref<1x128xf32, #tpu.memory_space<vmem>>, %arg3: memref<1x128xf32, #tpu.memory_space<vmem>>, %arg4: memref<128x128xbf16, #tpu.memory_space<vmem>>) attributes {dimension_semantics = [#tpu.dimension_semantics<parallel>], iteration_bounds = array<i64: 1>, scalar_prefetch = 0 : i64, scratch_operands = 0 : i64, tpu.core_type = #tpu.core_type<tc>, window_params = [{transform_indices = @transform_0, window_bounds = array<i64: 128, 128>}, {pipeline_mode = #tpu.pipeline_mode<synchronous>, transform_indices = @transform_1, window_bounds = array<i64: 1, 128>}, {pipeline_mode = #tpu.pipeline_mode<synchronous>, transform_indices = @transform_2, window_bounds = array<i64: 1, 128>}, {transform_indices = @transform_3, window_bounds = array<i64: 128, 128>}]} {
    %c0 = arith.constant 0 : index
    %c0_0 = arith.constant 0 : index
    %0 = vector.load %arg1[%c0, %c0_0] : memref<128x128xf32, #tpu.memory_space<vmem>>, vector<128x128xf32>
    %c0_1 = arith.constant 0 : index
    %c0_2 = arith.constant 0 : index
    %1 = vector.load %arg2[%c0_1, %c0_2] : memref<1x128xf32, #tpu.memory_space<vmem>>, vector<1x128xf32>
    %2 = vector.broadcast %1 : vector<1x128xf32> to vector<128x128xf32>
    %3 = arith.mulf %0, %2 : vector<128x128xf32>
    %c0_3 = arith.constant 0 : index
    %c0_4 = arith.constant 0 : index
    %4 = vector.load %arg3[%c0_3, %c0_4] : memref<1x128xf32, #tpu.memory_space<vmem>>, vector<1x128xf32>
    %5 = vector.broadcast %4 : vector<1x128xf32> to vector<128x128xf32>
    %6 = arith.addf %3, %5 : vector<128x128xf32>
    %cst = arith.constant 0.000000e+00 : f32
    %7 = vector.broadcast %cst : f32 to vector<128x128xf32>
    %8 = arith.maximumf %6, %7 : vector<128x128xf32>
    %9 = arith.truncf %8 : vector<128x128xf32> to vector<128x128xbf16>
    %c0_5 = arith.constant 0 : index
    %c0_6 = arith.constant 0 : index
    %10 = vector.load %arg4[%c0_5, %c0_6] : memref<128x128xbf16, #tpu.memory_space<vmem>>, vector<128x128xbf16>
    tpu.vector_store %arg4[%c0_5, %c0_6], %9 {strides = array<i32>} : memref<128x128xbf16, #tpu.memory_space<vmem>>, vector<128x128xbf16>,
    return
  }
  func.func @transform_0(%arg0: i32) -> (i32, i32) {
    %c0_i32 = arith.constant 0 : i32
    %c0_i32_0 = arith.constant 0 : i32
    return %arg0, %c0_i32 : i32, i32
  }
  func.func @transform_1(%arg0: i32) -> (i32, i32) {
    %c0_i32 = arith.constant 0 : i32
    %c0_i32_0 = arith.constant 0 : i32
    %c0_i32_1 = arith.constant 0 : i32
    return %c0_i32, %c0_i32_0 : i32, i32
  }
  func.func @transform_2(%arg0: i32) -> (i32, i32) {
    %c0_i32 = arith.constant 0 : i32
    %c0_i32_0 = arith.constant 0 : i32
    %c0_i32_1 = arith.constant 0 : i32
    return %c0_i32, %c0_i32_0 : i32, i32
  }
  func.func @transform_3(%arg0: i32) -> (i32, i32) {
    %c0_i32 = arith.constant 0 : i32
    %c0_i32_0 = arith.constant 0 : i32
    return %arg0, %c0_i32 : i32, i32
  }
}

module attributes {stable_mosaic.version = 11 : i64} {
  func.func @_conv_stats_kernel(%arg0: i32, %arg1: memref<128x1152xbf16, #tpu.memory_space<vmem>>, %arg2: memref<1152x128xbf16, #tpu.memory_space<vmem>>, %arg3: memref<128x128xf32, #tpu.memory_space<vmem>>, %arg4: memref<1x128xf32, #tpu.memory_space<vmem>>, %arg5: memref<1x128xf32, #tpu.memory_space<vmem>>) attributes {dimension_semantics = [#tpu.dimension_semantics<arbitrary>], iteration_bounds = array<i64: 1>, scalar_prefetch = 0 : i64, scratch_operands = 0 : i64, tpu.core_type = #tpu.core_type<tc>, window_params = [{transform_indices = @transform_0, window_bounds = array<i64: 128, 1152>}, {pipeline_mode = #tpu.pipeline_mode<synchronous>, transform_indices = @transform_1, window_bounds = array<i64: 1152, 128>}, {transform_indices = @transform_2, window_bounds = array<i64: 128, 128>}, {pipeline_mode = #tpu.pipeline_mode<synchronous>, transform_indices = @transform_3, window_bounds = array<i64: 1, 128>}, {pipeline_mode = #tpu.pipeline_mode<synchronous>, transform_indices = @transform_4, window_bounds = array<i64: 1, 128>}]} {
    %c0 = arith.constant 0 : index
    %c0_0 = arith.constant 0 : index
    %0 = vector.load %arg1[%c0, %c0_0] : memref<128x1152xbf16, #tpu.memory_space<vmem>>, vector<128x1152xbf16>
    %c0_1 = arith.constant 0 : index
    %c0_2 = arith.constant 0 : index
    %1 = vector.load %arg2[%c0_1, %c0_2] : memref<1152x128xbf16, #tpu.memory_space<vmem>>, vector<1152x128xbf16>
    %cst = arith.constant dense<0.000000e+00> : vector<128x128xf32>
    %2 = tpu.matmul %0, %1, %cst {dimension_numbers = #tpu.dot_dimension_numbers<[1], [0], [0], [1], [0, 0, 1, 1], [], []>} : vector<128x1152xbf16>, vector<1152x128xbf16>, vector<128x128xf32> -> vector<128x128xf32>
    %c0_3 = arith.constant 0 : index
    %c0_4 = arith.constant 0 : index
    %3 = vector.load %arg3[%c0_3, %c0_4] : memref<128x128xf32, #tpu.memory_space<vmem>>, vector<128x128xf32>
    tpu.vector_store %arg3[%c0_3, %c0_4], %2 {strides = array<i32>} : memref<128x128xf32, #tpu.memory_space<vmem>>, vector<128x128xf32>,
    %c0_i32 = arith.constant 0 : i32
    %4 = arith.cmpi eq, %arg0, %c0_i32 : i32
    %5 = arith.extui %4 : i1 to i32
    %c0_i32_5 = arith.constant 0 : i32
    %6 = arith.cmpi ne, %5, %c0_i32_5 : i32
    scf.if %6 {
      %cst_16 = arith.constant 0.000000e+00 : f32
      %18 = vector.broadcast %cst_16 : f32 to vector<1x128xf32>
      %c0_17 = arith.constant 0 : index
      %c0_18 = arith.constant 0 : index
      %19 = vector.load %arg4[%c0_17, %c0_18] : memref<1x128xf32, #tpu.memory_space<vmem>>, vector<1x128xf32>
      tpu.vector_store %arg4[%c0_17, %c0_18], %18 {strides = array<i32>} : memref<1x128xf32, #tpu.memory_space<vmem>>, vector<1x128xf32>,
      %cst_19 = arith.constant 0.000000e+00 : f32
      %20 = vector.broadcast %cst_19 : f32 to vector<1x128xf32>
      %c0_20 = arith.constant 0 : index
      %c0_21 = arith.constant 0 : index
      %21 = vector.load %arg5[%c0_20, %c0_21] : memref<1x128xf32, #tpu.memory_space<vmem>>, vector<1x128xf32>
      tpu.vector_store %arg5[%c0_20, %c0_21], %20 {strides = array<i32>} : memref<1x128xf32, #tpu.memory_space<vmem>>, vector<1x128xf32>,
    } else {
    }
    %c0_6 = arith.constant 0 : index
    %c0_7 = arith.constant 0 : index
    %7 = vector.load %arg4[%c0_6, %c0_7] : memref<1x128xf32, #tpu.memory_space<vmem>>, vector<1x128xf32>
    %cst_8 = arith.constant dense<0.000000e+00> : vector<128xf32>
    %8 = vector.multi_reduction <add>, %2, %cst_8 [0] : vector<128x128xf32> to vector<128xf32>
    %9 = vector.shape_cast %8 : vector<128xf32> to vector<1x128xf32>
    %10 = arith.addf %7, %9 : vector<1x128xf32>
    %c0_9 = arith.constant 0 : index
    %c0_10 = arith.constant 0 : index
    %11 = vector.load %arg4[%c0_9, %c0_10] : memref<1x128xf32, #tpu.memory_space<vmem>>, vector<1x128xf32>
    tpu.vector_store %arg4[%c0_9, %c0_10], %10 {strides = array<i32>} : memref<1x128xf32, #tpu.memory_space<vmem>>, vector<1x128xf32>,
    %c0_11 = arith.constant 0 : index
    %c0_12 = arith.constant 0 : index
    %12 = vector.load %arg5[%c0_11, %c0_12] : memref<1x128xf32, #tpu.memory_space<vmem>>, vector<1x128xf32>
    %13 = arith.mulf %2, %2 : vector<128x128xf32>
    %cst_13 = arith.constant dense<0.000000e+00> : vector<128xf32>
    %14 = vector.multi_reduction <add>, %13, %cst_13 [0] : vector<128x128xf32> to vector<128xf32>
    %15 = vector.shape_cast %14 : vector<128xf32> to vector<1x128xf32>
    %16 = arith.addf %12, %15 : vector<1x128xf32>
    %c0_14 = arith.constant 0 : index
    %c0_15 = arith.constant 0 : index
    %17 = vector.load %arg5[%c0_14, %c0_15] : memref<1x128xf32, #tpu.memory_space<vmem>>, vector<1x128xf32>
    tpu.vector_store %arg5[%c0_14, %c0_15], %16 {strides = array<i32>} : memref<1x128xf32, #tpu.memory_space<vmem>>, vector<1x128xf32>,
    return
  }
  func.func @transform_0(%arg0: i32) -> (i32, i32) {
    %c0_i32 = arith.constant 0 : i32
    %c0_i32_0 = arith.constant 0 : i32
    return %arg0, %c0_i32 : i32, i32
  }
  func.func @transform_1(%arg0: i32) -> (i32, i32) {
    %c0_i32 = arith.constant 0 : i32
    %c0_i32_0 = arith.constant 0 : i32
    %c0_i32_1 = arith.constant 0 : i32
    return %c0_i32, %c0_i32_0 : i32, i32
  }
  func.func @transform_2(%arg0: i32) -> (i32, i32) {
    %c0_i32 = arith.constant 0 : i32
    %c0_i32_0 = arith.constant 0 : i32
    return %arg0, %c0_i32 : i32, i32
  }
  func.func @transform_3(%arg0: i32) -> (i32, i32) {
    %c0_i32 = arith.constant 0 : i32
    %c0_i32_0 = arith.constant 0 : i32
    %c0_i32_1 = arith.constant 0 : i32
    return %c0_i32, %c0_i32_0 : i32, i32
  }
  func.func @transform_4(%arg0: i32) -> (i32, i32) {
    %c0_i32 = arith.constant 0 : i32
    %c0_i32_0 = arith.constant 0 : i32
    %c0_i32_1 = arith.constant 0 : i32
    return %c0_i32, %c0_i32_0 : i32, i32
  }
}

module attributes {stable_mosaic.version = 11 : i64} {
  func.func @_conv_stats_kernel(%arg0: i32, %arg1: memref<32x1152xbf16, #tpu.memory_space<vmem>>, %arg2: memref<1152x256xbf16, #tpu.memory_space<vmem>>, %arg3: memref<32x256xf32, #tpu.memory_space<vmem>>, %arg4: memref<1x256xf32, #tpu.memory_space<vmem>>, %arg5: memref<1x256xf32, #tpu.memory_space<vmem>>) attributes {dimension_semantics = [#tpu.dimension_semantics<arbitrary>], iteration_bounds = array<i64: 1>, scalar_prefetch = 0 : i64, scratch_operands = 0 : i64, tpu.core_type = #tpu.core_type<tc>, window_params = [{transform_indices = @transform_0, window_bounds = array<i64: 32, 1152>}, {pipeline_mode = #tpu.pipeline_mode<synchronous>, transform_indices = @transform_1, window_bounds = array<i64: 1152, 256>}, {transform_indices = @transform_2, window_bounds = array<i64: 32, 256>}, {pipeline_mode = #tpu.pipeline_mode<synchronous>, transform_indices = @transform_3, window_bounds = array<i64: 1, 256>}, {pipeline_mode = #tpu.pipeline_mode<synchronous>, transform_indices = @transform_4, window_bounds = array<i64: 1, 256>}]} {
    %c0 = arith.constant 0 : index
    %c0_0 = arith.constant 0 : index
    %0 = vector.load %arg1[%c0, %c0_0] : memref<32x1152xbf16, #tpu.memory_space<vmem>>, vector<32x1152xbf16>
    %c0_1 = arith.constant 0 : index
    %c0_2 = arith.constant 0 : index
    %1 = vector.load %arg2[%c0_1, %c0_2] : memref<1152x256xbf16, #tpu.memory_space<vmem>>, vector<1152x256xbf16>
    %cst = arith.constant dense<0.000000e+00> : vector<32x256xf32>
    %2 = tpu.matmul %0, %1, %cst {dimension_numbers = #tpu.dot_dimension_numbers<[1], [0], [0], [1], [0, 0, 1, 1], [], []>} : vector<32x1152xbf16>, vector<1152x256xbf16>, vector<32x256xf32> -> vector<32x256xf32>
    %c0_3 = arith.constant 0 : index
    %c0_4 = arith.constant 0 : index
    %3 = vector.load %arg3[%c0_3, %c0_4] : memref<32x256xf32, #tpu.memory_space<vmem>>, vector<32x256xf32>
    tpu.vector_store %arg3[%c0_3, %c0_4], %2 {strides = array<i32>} : memref<32x256xf32, #tpu.memory_space<vmem>>, vector<32x256xf32>,
    %c0_i32 = arith.constant 0 : i32
    %4 = arith.cmpi eq, %arg0, %c0_i32 : i32
    %5 = arith.extui %4 : i1 to i32
    %c0_i32_5 = arith.constant 0 : i32
    %6 = arith.cmpi ne, %5, %c0_i32_5 : i32
    scf.if %6 {
      %cst_16 = arith.constant 0.000000e+00 : f32
      %18 = vector.broadcast %cst_16 : f32 to vector<1x256xf32>
      %c0_17 = arith.constant 0 : index
      %c0_18 = arith.constant 0 : index
      %19 = vector.load %arg4[%c0_17, %c0_18] : memref<1x256xf32, #tpu.memory_space<vmem>>, vector<1x256xf32>
      tpu.vector_store %arg4[%c0_17, %c0_18], %18 {strides = array<i32>} : memref<1x256xf32, #tpu.memory_space<vmem>>, vector<1x256xf32>,
      %cst_19 = arith.constant 0.000000e+00 : f32
      %20 = vector.broadcast %cst_19 : f32 to vector<1x256xf32>
      %c0_20 = arith.constant 0 : index
      %c0_21 = arith.constant 0 : index
      %21 = vector.load %arg5[%c0_20, %c0_21] : memref<1x256xf32, #tpu.memory_space<vmem>>, vector<1x256xf32>
      tpu.vector_store %arg5[%c0_20, %c0_21], %20 {strides = array<i32>} : memref<1x256xf32, #tpu.memory_space<vmem>>, vector<1x256xf32>,
    } else {
    }
    %c0_6 = arith.constant 0 : index
    %c0_7 = arith.constant 0 : index
    %7 = vector.load %arg4[%c0_6, %c0_7] : memref<1x256xf32, #tpu.memory_space<vmem>>, vector<1x256xf32>
    %cst_8 = arith.constant dense<0.000000e+00> : vector<256xf32>
    %8 = vector.multi_reduction <add>, %2, %cst_8 [0] : vector<32x256xf32> to vector<256xf32>
    %9 = vector.shape_cast %8 : vector<256xf32> to vector<1x256xf32>
    %10 = arith.addf %7, %9 : vector<1x256xf32>
    %c0_9 = arith.constant 0 : index
    %c0_10 = arith.constant 0 : index
    %11 = vector.load %arg4[%c0_9, %c0_10] : memref<1x256xf32, #tpu.memory_space<vmem>>, vector<1x256xf32>
    tpu.vector_store %arg4[%c0_9, %c0_10], %10 {strides = array<i32>} : memref<1x256xf32, #tpu.memory_space<vmem>>, vector<1x256xf32>,
    %c0_11 = arith.constant 0 : index
    %c0_12 = arith.constant 0 : index
    %12 = vector.load %arg5[%c0_11, %c0_12] : memref<1x256xf32, #tpu.memory_space<vmem>>, vector<1x256xf32>
    %13 = arith.mulf %2, %2 : vector<32x256xf32>
    %cst_13 = arith.constant dense<0.000000e+00> : vector<256xf32>
    %14 = vector.multi_reduction <add>, %13, %cst_13 [0] : vector<32x256xf32> to vector<256xf32>
    %15 = vector.shape_cast %14 : vector<256xf32> to vector<1x256xf32>
    %16 = arith.addf %12, %15 : vector<1x256xf32>
    %c0_14 = arith.constant 0 : index
    %c0_15 = arith.constant 0 : index
    %17 = vector.load %arg5[%c0_14, %c0_15] : memref<1x256xf32, #tpu.memory_space<vmem>>, vector<1x256xf32>
    tpu.vector_store %arg5[%c0_14, %c0_15], %16 {strides = array<i32>} : memref<1x256xf32, #tpu.memory_space<vmem>>, vector<1x256xf32>,
    return
  }
  func.func @transform_0(%arg0: i32) -> (i32, i32) {
    %c0_i32 = arith.constant 0 : i32
    %c0_i32_0 = arith.constant 0 : i32
    return %arg0, %c0_i32 : i32, i32
  }
  func.func @transform_1(%arg0: i32) -> (i32, i32) {
    %c0_i32 = arith.constant 0 : i32
    %c0_i32_0 = arith.constant 0 : i32
    %c0_i32_1 = arith.constant 0 : i32
    return %c0_i32, %c0_i32_0 : i32, i32
  }
  func.func @transform_2(%arg0: i32) -> (i32, i32) {
    %c0_i32 = arith.constant 0 : i32
    %c0_i32_0 = arith.constant 0 : i32
    return %arg0, %c0_i32 : i32, i32
  }
  func.func @transform_3(%arg0: i32) -> (i32, i32) {
    %c0_i32 = arith.constant 0 : i32
    %c0_i32_0 = arith.constant 0 : i32
    %c0_i32_1 = arith.constant 0 : i32
    return %c0_i32, %c0_i32_0 : i32, i32
  }
  func.func @transform_4(%arg0: i32) -> (i32, i32) {
    %c0_i32 = arith.constant 0 : i32
    %c0_i32_0 = arith.constant 0 : i32
    %c0_i32_1 = arith.constant 0 : i32
    return %c0_i32, %c0_i32_0 : i32, i32
  }
}

module attributes {stable_mosaic.version = 11 : i64} {
  func.func @_bn_relu_kernel(%arg0: i32, %arg1: memref<32x256xf32, #tpu.memory_space<vmem>>, %arg2: memref<1x256xf32, #tpu.memory_space<vmem>>, %arg3: memref<1x256xf32, #tpu.memory_space<vmem>>, %arg4: memref<32x256xbf16, #tpu.memory_space<vmem>>) attributes {dimension_semantics = [#tpu.dimension_semantics<parallel>], iteration_bounds = array<i64: 1>, scalar_prefetch = 0 : i64, scratch_operands = 0 : i64, tpu.core_type = #tpu.core_type<tc>, window_params = [{transform_indices = @transform_0, window_bounds = array<i64: 32, 256>}, {pipeline_mode = #tpu.pipeline_mode<synchronous>, transform_indices = @transform_1, window_bounds = array<i64: 1, 256>}, {pipeline_mode = #tpu.pipeline_mode<synchronous>, transform_indices = @transform_2, window_bounds = array<i64: 1, 256>}, {transform_indices = @transform_3, window_bounds = array<i64: 32, 256>}]} {
    %c0 = arith.constant 0 : index
    %c0_0 = arith.constant 0 : index
    %0 = vector.load %arg1[%c0, %c0_0] : memref<32x256xf32, #tpu.memory_space<vmem>>, vector<32x256xf32>
    %c0_1 = arith.constant 0 : index
    %c0_2 = arith.constant 0 : index
    %1 = vector.load %arg2[%c0_1, %c0_2] : memref<1x256xf32, #tpu.memory_space<vmem>>, vector<1x256xf32>
    %2 = vector.broadcast %1 : vector<1x256xf32> to vector<32x256xf32>
    %3 = arith.mulf %0, %2 : vector<32x256xf32>
    %c0_3 = arith.constant 0 : index
    %c0_4 = arith.constant 0 : index
    %4 = vector.load %arg3[%c0_3, %c0_4] : memref<1x256xf32, #tpu.memory_space<vmem>>, vector<1x256xf32>
    %5 = vector.broadcast %4 : vector<1x256xf32> to vector<32x256xf32>
    %6 = arith.addf %3, %5 : vector<32x256xf32>
    %cst = arith.constant 0.000000e+00 : f32
    %7 = vector.broadcast %cst : f32 to vector<32x256xf32>
    %8 = arith.maximumf %6, %7 : vector<32x256xf32>
    %9 = arith.truncf %8 : vector<32x256xf32> to vector<32x256xbf16>
    %c0_5 = arith.constant 0 : index
    %c0_6 = arith.constant 0 : index
    %10 = vector.load %arg4[%c0_5, %c0_6] : memref<32x256xbf16, #tpu.memory_space<vmem>>, vector<32x256xbf16>
    tpu.vector_store %arg4[%c0_5, %c0_6], %9 {strides = array<i32>} : memref<32x256xbf16, #tpu.memory_space<vmem>>, vector<32x256xbf16>,
    return
  }
  func.func @transform_0(%arg0: i32) -> (i32, i32) {
    %c0_i32 = arith.constant 0 : i32
    %c0_i32_0 = arith.constant 0 : i32
    return %arg0, %c0_i32 : i32, i32
  }
  func.func @transform_1(%arg0: i32) -> (i32, i32) {
    %c0_i32 = arith.constant 0 : i32
    %c0_i32_0 = arith.constant 0 : i32
    %c0_i32_1 = arith.constant 0 : i32
    return %c0_i32, %c0_i32_0 : i32, i32
  }
  func.func @transform_2(%arg0: i32) -> (i32, i32) {
    %c0_i32 = arith.constant 0 : i32
    %c0_i32_0 = arith.constant 0 : i32
    %c0_i32_1 = arith.constant 0 : i32
    return %c0_i32, %c0_i32_0 : i32, i32
  }
  func.func @transform_3(%arg0: i32) -> (i32, i32) {
    %c0_i32 = arith.constant 0 : i32
    %c0_i32_0 = arith.constant 0 : i32
    return %arg0, %c0_i32 : i32, i32
  }
}

module attributes {stable_mosaic.version = 11 : i64} {
  func.func @_conv_stats_kernel(%arg0: i32, %arg1: memref<8x2304xbf16, #tpu.memory_space<vmem>>, %arg2: memref<2304x512xbf16, #tpu.memory_space<vmem>>, %arg3: memref<8x512xf32, #tpu.memory_space<vmem>>, %arg4: memref<1x512xf32, #tpu.memory_space<vmem>>, %arg5: memref<1x512xf32, #tpu.memory_space<vmem>>) attributes {dimension_semantics = [#tpu.dimension_semantics<arbitrary>], iteration_bounds = array<i64: 1>, scalar_prefetch = 0 : i64, scratch_operands = 0 : i64, tpu.core_type = #tpu.core_type<tc>, window_params = [{transform_indices = @transform_0, window_bounds = array<i64: 8, 2304>}, {pipeline_mode = #tpu.pipeline_mode<synchronous>, transform_indices = @transform_1, window_bounds = array<i64: 2304, 512>}, {transform_indices = @transform_2, window_bounds = array<i64: 8, 512>}, {pipeline_mode = #tpu.pipeline_mode<synchronous>, transform_indices = @transform_3, window_bounds = array<i64: 1, 512>}, {pipeline_mode = #tpu.pipeline_mode<synchronous>, transform_indices = @transform_4, window_bounds = array<i64: 1, 512>}]} {
    %c0 = arith.constant 0 : index
    %c0_0 = arith.constant 0 : index
    %0 = vector.load %arg1[%c0, %c0_0] : memref<8x2304xbf16, #tpu.memory_space<vmem>>, vector<8x2304xbf16>
    %c0_1 = arith.constant 0 : index
    %c0_2 = arith.constant 0 : index
    %1 = vector.load %arg2[%c0_1, %c0_2] : memref<2304x512xbf16, #tpu.memory_space<vmem>>, vector<2304x512xbf16>
    %cst = arith.constant dense<0.000000e+00> : vector<8x512xf32>
    %2 = tpu.matmul %0, %1, %cst {dimension_numbers = #tpu.dot_dimension_numbers<[1], [0], [0], [1], [0, 0, 1, 1], [], []>} : vector<8x2304xbf16>, vector<2304x512xbf16>, vector<8x512xf32> -> vector<8x512xf32>
    %c0_3 = arith.constant 0 : index
    %c0_4 = arith.constant 0 : index
    %3 = vector.load %arg3[%c0_3, %c0_4] : memref<8x512xf32, #tpu.memory_space<vmem>>, vector<8x512xf32>
    tpu.vector_store %arg3[%c0_3, %c0_4], %2 {strides = array<i32>} : memref<8x512xf32, #tpu.memory_space<vmem>>, vector<8x512xf32>,
    %c0_i32 = arith.constant 0 : i32
    %4 = arith.cmpi eq, %arg0, %c0_i32 : i32
    %5 = arith.extui %4 : i1 to i32
    %c0_i32_5 = arith.constant 0 : i32
    %6 = arith.cmpi ne, %5, %c0_i32_5 : i32
    scf.if %6 {
      %cst_16 = arith.constant 0.000000e+00 : f32
      %18 = vector.broadcast %cst_16 : f32 to vector<1x512xf32>
      %c0_17 = arith.constant 0 : index
      %c0_18 = arith.constant 0 : index
      %19 = vector.load %arg4[%c0_17, %c0_18] : memref<1x512xf32, #tpu.memory_space<vmem>>, vector<1x512xf32>
      tpu.vector_store %arg4[%c0_17, %c0_18], %18 {strides = array<i32>} : memref<1x512xf32, #tpu.memory_space<vmem>>, vector<1x512xf32>,
      %cst_19 = arith.constant 0.000000e+00 : f32
      %20 = vector.broadcast %cst_19 : f32 to vector<1x512xf32>
      %c0_20 = arith.constant 0 : index
      %c0_21 = arith.constant 0 : index
      %21 = vector.load %arg5[%c0_20, %c0_21] : memref<1x512xf32, #tpu.memory_space<vmem>>, vector<1x512xf32>
      tpu.vector_store %arg5[%c0_20, %c0_21], %20 {strides = array<i32>} : memref<1x512xf32, #tpu.memory_space<vmem>>, vector<1x512xf32>,
    } else {
    }
    %c0_6 = arith.constant 0 : index
    %c0_7 = arith.constant 0 : index
    %7 = vector.load %arg4[%c0_6, %c0_7] : memref<1x512xf32, #tpu.memory_space<vmem>>, vector<1x512xf32>
    %cst_8 = arith.constant dense<0.000000e+00> : vector<512xf32>
    %8 = vector.multi_reduction <add>, %2, %cst_8 [0] : vector<8x512xf32> to vector<512xf32>
    %9 = vector.shape_cast %8 : vector<512xf32> to vector<1x512xf32>
    %10 = arith.addf %7, %9 : vector<1x512xf32>
    %c0_9 = arith.constant 0 : index
    %c0_10 = arith.constant 0 : index
    %11 = vector.load %arg4[%c0_9, %c0_10] : memref<1x512xf32, #tpu.memory_space<vmem>>, vector<1x512xf32>
    tpu.vector_store %arg4[%c0_9, %c0_10], %10 {strides = array<i32>} : memref<1x512xf32, #tpu.memory_space<vmem>>, vector<1x512xf32>,
    %c0_11 = arith.constant 0 : index
    %c0_12 = arith.constant 0 : index
    %12 = vector.load %arg5[%c0_11, %c0_12] : memref<1x512xf32, #tpu.memory_space<vmem>>, vector<1x512xf32>
    %13 = arith.mulf %2, %2 : vector<8x512xf32>
    %cst_13 = arith.constant dense<0.000000e+00> : vector<512xf32>
    %14 = vector.multi_reduction <add>, %13, %cst_13 [0] : vector<8x512xf32> to vector<512xf32>
    %15 = vector.shape_cast %14 : vector<512xf32> to vector<1x512xf32>
    %16 = arith.addf %12, %15 : vector<1x512xf32>
    %c0_14 = arith.constant 0 : index
    %c0_15 = arith.constant 0 : index
    %17 = vector.load %arg5[%c0_14, %c0_15] : memref<1x512xf32, #tpu.memory_space<vmem>>, vector<1x512xf32>
    tpu.vector_store %arg5[%c0_14, %c0_15], %16 {strides = array<i32>} : memref<1x512xf32, #tpu.memory_space<vmem>>, vector<1x512xf32>,
    return
  }
  func.func @transform_0(%arg0: i32) -> (i32, i32) {
    %c0_i32 = arith.constant 0 : i32
    %c0_i32_0 = arith.constant 0 : i32
    return %arg0, %c0_i32 : i32, i32
  }
  func.func @transform_1(%arg0: i32) -> (i32, i32) {
    %c0_i32 = arith.constant 0 : i32
    %c0_i32_0 = arith.constant 0 : i32
    %c0_i32_1 = arith.constant 0 : i32
    return %c0_i32, %c0_i32_0 : i32, i32
  }
  func.func @transform_2(%arg0: i32) -> (i32, i32) {
    %c0_i32 = arith.constant 0 : i32
    %c0_i32_0 = arith.constant 0 : i32
    return %arg0, %c0_i32 : i32, i32
  }
  func.func @transform_3(%arg0: i32) -> (i32, i32) {
    %c0_i32 = arith.constant 0 : i32
    %c0_i32_0 = arith.constant 0 : i32
    %c0_i32_1 = arith.constant 0 : i32
    return %c0_i32, %c0_i32_0 : i32, i32
  }
  func.func @transform_4(%arg0: i32) -> (i32, i32) {
    %c0_i32 = arith.constant 0 : i32
    %c0_i32_0 = arith.constant 0 : i32
    %c0_i32_1 = arith.constant 0 : i32
    return %c0_i32, %c0_i32_0 : i32, i32
  }
}

module attributes {stable_mosaic.version = 11 : i64} {
  func.func @_bn_relu_kernel(%arg0: i32, %arg1: memref<8x512xf32, #tpu.memory_space<vmem>>, %arg2: memref<1x512xf32, #tpu.memory_space<vmem>>, %arg3: memref<1x512xf32, #tpu.memory_space<vmem>>, %arg4: memref<8x512xbf16, #tpu.memory_space<vmem>>) attributes {dimension_semantics = [#tpu.dimension_semantics<parallel>], iteration_bounds = array<i64: 1>, scalar_prefetch = 0 : i64, scratch_operands = 0 : i64, tpu.core_type = #tpu.core_type<tc>, window_params = [{transform_indices = @transform_0, window_bounds = array<i64: 8, 512>}, {pipeline_mode = #tpu.pipeline_mode<synchronous>, transform_indices = @transform_1, window_bounds = array<i64: 1, 512>}, {pipeline_mode = #tpu.pipeline_mode<synchronous>, transform_indices = @transform_2, window_bounds = array<i64: 1, 512>}, {transform_indices = @transform_3, window_bounds = array<i64: 8, 512>}]} {
    %c0 = arith.constant 0 : index
    %c0_0 = arith.constant 0 : index
    %0 = vector.load %arg1[%c0, %c0_0] : memref<8x512xf32, #tpu.memory_space<vmem>>, vector<8x512xf32>
    %c0_1 = arith.constant 0 : index
    %c0_2 = arith.constant 0 : index
    %1 = vector.load %arg2[%c0_1, %c0_2] : memref<1x512xf32, #tpu.memory_space<vmem>>, vector<1x512xf32>
    %2 = vector.broadcast %1 : vector<1x512xf32> to vector<8x512xf32>
    %3 = arith.mulf %0, %2 : vector<8x512xf32>
    %c0_3 = arith.constant 0 : index
    %c0_4 = arith.constant 0 : index
    %4 = vector.load %arg3[%c0_3, %c0_4] : memref<1x512xf32, #tpu.memory_space<vmem>>, vector<1x512xf32>
    %5 = vector.broadcast %4 : vector<1x512xf32> to vector<8x512xf32>
    %6 = arith.addf %3, %5 : vector<8x512xf32>
    %cst = arith.constant 0.000000e+00 : f32
    %7 = vector.broadcast %cst : f32 to vector<8x512xf32>
    %8 = arith.maximumf %6, %7 : vector<8x512xf32>
    %9 = arith.truncf %8 : vector<8x512xf32> to vector<8x512xbf16>
    %c0_5 = arith.constant 0 : index
    %c0_6 = arith.constant 0 : index
    %10 = vector.load %arg4[%c0_5, %c0_6] : memref<8x512xbf16, #tpu.memory_space<vmem>>, vector<8x512xbf16>
    tpu.vector_store %arg4[%c0_5, %c0_6], %9 {strides = array<i32>} : memref<8x512xbf16, #tpu.memory_space<vmem>>, vector<8x512xbf16>,
    return
  }
  func.func @transform_0(%arg0: i32) -> (i32, i32) {
    %c0_i32 = arith.constant 0 : i32
    %c0_i32_0 = arith.constant 0 : i32
    return %arg0, %c0_i32 : i32, i32
  }
  func.func @transform_1(%arg0: i32) -> (i32, i32) {
    %c0_i32 = arith.constant 0 : i32
    %c0_i32_0 = arith.constant 0 : i32
    %c0_i32_1 = arith.constant 0 : i32
    return %c0_i32, %c0_i32_0 : i32, i32
  }
  func.func @transform_2(%arg0: i32) -> (i32, i32) {
    %c0_i32 = arith.constant 0 : i32
    %c0_i32_0 = arith.constant 0 : i32
    %c0_i32_1 = arith.constant 0 : i32
    return %c0_i32, %c0_i32_0 : i32, i32
  }
  func.func @transform_3(%arg0: i32) -> (i32, i32) {
    %c0_i32 = arith.constant 0 : i32
    %c0_i32_0 = arith.constant 0 : i32
    return %arg0, %c0_i32 : i32, i32
  }
}

</mosaic_0001>

<bundles_post_ra>
// kernel: encoder_forward.9
= control target key start
LH: loop header
LB: loop body
LE: loop exit
PB: predicated region body
PF: predicated region fallthrough
CT: control target
= control target key end

     0   :  { %s1375_s0 = inlined_call_operand.vmem [shape: f32[512,128], index: 0, kind: input, shape index: {}]   ;;  %s1376_s1 = inlined_call_operand.vmem [shape: f32[1,128], index: 1, kind: input, shape index: {}]   ;;  %s1377_s2 = inlined_call_operand.vmem [shape: f32[1,128], index: 2, kind: input, shape index: {}]   ;;  %s1378_s3 = inlined_call_operand.vmem [shape: bf16[512,128], index: 3, kind: output, shape index: {}]  }
   0x1   :  { %v14_v0 = vld [vmem:[%s1375_s0] sm:$0xff]  ;;  %v15_v1 = vld [vmem:[%s1375_s0 + $0x8] sm:$0xff]  ;;  %v16_v6 = vld [vmem:[%s1375_s0 + $0x10] sm:$0xff] }
   0x2   :  { %v958_v2 = vld [vmem:[%s1376_s1] ss:$0 sm:$0xff]  ;;  %v17_v7 = vld [vmem:[%s1375_s0 + $0x18] sm:$0xff]  ;;  %v19_v11 = vld [vmem:[%s1375_s0 + $0x28] sm:$0xff] }
   0x3   :  { %v85_v3 = vmul.f32 %v958_v2, %v14_v0  ;;  %v86_v4 = vmul.f32 %v958_v2, %v15_v1  ;;  %v965_v5 = vld [vmem:[%s1377_s2] ss:$0 sm:$0xff]  ;;  %v87_v8 = vmul.f32 %v958_v2, %v16_v6  ;;  %v88_v9 = vmul.f32 %v958_v2, %v17_v7  ;;  %v20_v12 = vld [vmem:[%s1375_s0 + $0x30] sm:$0xff]  ;;  %v21_v17 = vld [vmem:[%s1375_s0 + $0x38] sm:$0xff] }
   0x4   :  { %v18_v10 = vld [vmem:[%s1375_s0 + $0x20] sm:$0xff]  ;;  %v90_v16 = vmul.f32 %v958_v2, %v19_v11  ;;  %v91_v20 = vmul.f32 %v958_v2, %v20_v12  ;;  %v92_v21 = vmul.f32 %v958_v2, %v21_v17  ;;  %v23_v27 = vld [vmem:[%s1375_s0 + $0x48] sm:$0xff]  ;;  %v24_v32 = vld [vmem:[%s1375_s0 + $0x50] sm:$0xff] }
   0x5   :  { %v156_v13 = vadd.f32 %v965_v5, %v85_v3  ;;  %v157_v14 = vadd.f32 %v965_v5, %v86_v4  ;;  %v89_v15 = vmul.f32 %v958_v2, %v18_v10  ;;  %v158_v18 = vadd.f32 %v965_v5, %v87_v8  ;;  %v22_v22 = vld [vmem:[%s1375_s0 + $0x40] sm:$0xff]  ;;  %v25_v33 = vld [vmem:[%s1375_s0 + $0x58] sm:$0xff]  ;;  %v27_v39 = vld [vmem:[%s1375_s0 + $0x68] sm:$0xff] }
   0x6   :  { %v159_v19 = vadd.f32 %v965_v5, %v88_v9  ;;  %v161_v26 = vadd.f32 %v965_v5, %v90_v16  ;;  %v162_v30 = vadd.f32 %v965_v5, %v91_v20  ;;  %v163_v31 = vadd.f32 %v965_v5, %v92_v21  ;;  %v26_v38 = vld [vmem:[%s1375_s0 + $0x60] sm:$0xff]  ;;  %v28_v44 = vld [vmem:[%s1375_s0 + $0x70] sm:$0xff]  ;;  %v29_v49 = vld [vmem:[%s1375_s0 + $0x78] sm:$0xff] }
   0x7   :  { %v220_v23 = vmax.f32 %v156_v13, 0.0  ;;  %v221_v24 = vmax.f32 %v157_v14, 0.0  ;;  %v160_v25 = vadd.f32 %v965_v5, %v89_v15  ;;  %v222_v28 = vmax.f32 %v158_v18, 0.0  ;;  %v30_v54 = vld [vmem:[%s1375_s0 + $0x80] sm:$0xff]  ;;  %v31_v63 = vld [vmem:[%s1375_s0 + $0x88] sm:$0xff]  ;;  %v32_v6 = vld [vmem:[%s1375_s0 + $0x90] sm:$0xff] }
   0x8   :  { %v223_v29 = vmax.f32 %v159_v19, 0.0  ;;  %v225_v36 = vmax.f32 %v161_v26, 0.0  ;;  %v93_v37 = vmul.f32 %v958_v2, %v22_v22  ;;  %v226_v41 = vmax.f32 %v162_v30, 0.0  ;;  %v33_v7 = vld [vmem:[%s1375_s0 + $0x98] sm:$0xff]  ;;  %v34_v12 = vld [vmem:[%s1375_s0 + $0xa0] sm:$0xff]  ;;  %v35_v13 = vld [vmem:[%s1375_s0 + $0xa8] sm:$0xff] }
   0x9   :  { %v741_v34 = vpack.c.bf16 %v221_v24, %v220_v23  ;;  %v224_v35 = vmax.f32 %v160_v25, 0.0  ;;  %v227_v42 = vmax.f32 %v163_v31, 0.0  ;;  %v94_v43 = vmul.f32 %v958_v2, %v23_v27  ;;  %v36_v18 = vld [vmem:[%s1375_s0 + $0xb0] sm:$0xff]  ;;  %v37_v23 = vld [vmem:[%s1375_s0 + $0xb8] sm:$0xff] }
   0xa   :  { %v746_v40 = vpack.c.bf16 %v223_v29, %v222_v28  ;;  %v164_v46 = vadd.f32 %v965_v5, %v93_v37  ;;  %v95_v47 = vmul.f32 %v958_v2, %v24_v32  ;;  %v96_v48 = vmul.f32 %v958_v2, %v25_v33  ;;  %v38_v28 = vld [vmem:[%s1375_s0 + $0xc0] sm:$0xff]  ;;  %v39_v37 = vld [vmem:[%s1375_s0 + $0xc8] sm:$0xff] }
   0xb   :  { %742 = vst [vmem:[%s1378_s3] sm:$0xff] %v741_v34   ;;  %v751_v45 = vpack.c.bf16 %v225_v36, %v224_v35  ;;  %v756_v50 = vpack.c.bf16 %v227_v42, %v226_v41  ;;  %v165_v51 = vadd.f32 %v965_v5, %v94_v43  ;;  %v97_v52 = vmul.f32 %v958_v2, %v26_v38  ;;  %v40_v42 = vld [vmem:[%s1375_s0 + $0xd0] sm:$0xff]  ;;  %v41_v43 = vld [vmem:[%s1375_s0 + $0xd8] sm:$0xff] }
   0xc   :  { %898 = vst [vmem:[%s1378_s3 + $0x8] sm:$0xff] %v746_v40   ;;  %v98_v53 = vmul.f32 %v958_v2, %v27_v39  ;;  %v228_v55 = vmax.f32 %v164_v46, 0.0  ;;  %v166_v56 = vadd.f32 %v965_v5, %v95_v47  ;;  %v167_v57 = vadd.f32 %v965_v5, %v96_v48  ;;  %v42_v48 = vld [vmem:[%s1375_s0 + $0xe0] sm:$0xff] }
   0xd   :  { %899 = vst [vmem:[%s1378_s3 + $0x10] sm:$0xff] %v751_v45   ;;  %v99_v58 = vmul.f32 %v958_v2, %v28_v44  ;;  %900 = vst [vmem:[%s1378_s3 + $0x18] sm:$0xff] %v756_v50   ;;  %v229_v59 = vmax.f32 %v165_v51, 0.0  ;;  %v168_v60 = vadd.f32 %v965_v5, %v97_v52  ;;  %v100_v62 = vmul.f32 %v958_v2, %v29_v49  ;;  %v43_v49 = vld [vmem:[%s1375_s0 + $0xe8] sm:$0xff] }
   0xe   :  { %v169_v61 = vadd.f32 %v965_v5, %v98_v53  ;;  %v230_v0 = vmax.f32 %v166_v56, 0.0  ;;  %v231_v1 = vmax.f32 %v167_v57, 0.0  ;;  %v101_v4 = vmul.f32 %v958_v2, %v30_v54  ;;  %v44_v54 = vld [vmem:[%s1375_s0 + $0xf0] sm:$0xff] }
   0xf   :  { %v170_v3 = vadd.f32 %v965_v5, %v99_v58  ;;  %v761_v8 = vpack.c.bf16 %v229_v59, %v228_v55  ;;  %v232_v9 = vmax.f32 %v168_v60, 0.0  ;;  %v171_v11 = vadd.f32 %v965_v5, %v100_v62  ;;  %v45_v59 = vld [vmem:[%s1375_s0 + $0xf8] sm:$0xff] }
  0x10   :  { %v233_v10 = vmax.f32 %v169_v61, 0.0  ;;  %v766_v14 = vpack.c.bf16 %v231_v1, %v230_v0  ;;  %v102_v16 = vmul.f32 %v958_v2, %v31_v63  ;;  %v172_v17 = vadd.f32 %v965_v5, %v101_v4  ;;  %v46_v0 = vld [vmem:[%s1375_s0 + $0x100] sm:$0xff] }
  0x11   :  { %v234_v15 = vmax.f32 %v170_v3, 0.0  ;;  %901 = vst [vmem:[%s1378_s3 + $0x20] sm:$0xff] %v761_v8   ;;  %v235_v20 = vmax.f32 %v171_v11, 0.0  ;;  %v103_v21 = vmul.f32 %v958_v2, %v32_v6  ;;  %v104_v22 = vmul.f32 %v958_v2, %v33_v7  ;;  %v47_v11 = vld [vmem:[%s1375_s0 + $0x108] sm:$0xff] }
  0x12   :  { %v771_v19 = vpack.c.bf16 %v233_v10, %v232_v9  ;;  %902 = vst [vmem:[%s1378_s3 + $0x28] sm:$0xff] %v766_v14   ;;  %v173_v24 = vadd.f32 %v965_v5, %v102_v16  ;;  %v236_v25 = vmax.f32 %v172_v17, 0.0  ;;  %v105_v26 = vmul.f32 %v958_v2, %v34_v12  ;;  %v48_v16 = vld [vmem:[%s1375_s0 + $0x110] sm:$0xff]  ;;  %v49_v17 = vld [vmem:[%s1375_s0 + $0x118] sm:$0xff] }
  0x13   :  { %v106_v27 = vmul.f32 %v958_v2, %v35_v13  ;;  %v776_v29 = vpack.c.bf16 %v235_v20, %v234_v15  ;;  %v174_v30 = vadd.f32 %v965_v5, %v103_v21  ;;  %v175_v31 = vadd.f32 %v965_v5, %v104_v22  ;;  %v50_v22 = vld [vmem:[%s1375_s0 + $0x120] sm:$0xff] }
  0x14   :  { %903 = vst [vmem:[%s1378_s3 + $0x30] sm:$0xff] %v771_v19   ;;  %v107_v32 = vmul.f32 %v958_v2, %v36_v18  ;;  %v237_v33 = vmax.f32 %v173_v24, 0.0  ;;  %v176_v34 = vadd.f32 %v965_v5, %v105_v26  ;;  %v108_v36 = vmul.f32 %v958_v2, %v37_v23  ;;  %v51_v23 = vld [vmem:[%s1375_s0 + $0x128] sm:$0xff] }
  0x15   :  { %v177_v35 = vadd.f32 %v965_v5, %v106_v27  ;;  %904 = vst [vmem:[%s1378_s3 + $0x38] sm:$0xff] %v776_v29   ;;  %v238_v38 = vmax.f32 %v174_v30, 0.0  ;;  %v239_v39 = vmax.f32 %v175_v31, 0.0  ;;  %v109_v41 = vmul.f32 %v958_v2, %v38_v28  ;;  %v52_v28 = vld [vmem:[%s1375_s0 + $0x130] sm:$0xff] }
  0x16   :  { %v178_v40 = vadd.f32 %v965_v5, %v107_v32  ;;  %v781_v44 = vpack.c.bf16 %v237_v33, %v236_v25  ;;  %v240_v45 = vmax.f32 %v176_v34, 0.0  ;;  %v179_v47 = vadd.f32 %v965_v5, %v108_v36  ;;  %v53_v33 = vld [vmem:[%s1375_s0 + $0x138] sm:$0xff] }
  0x17   :  { %v241_v46 = vmax.f32 %v177_v35, 0.0  ;;  %v786_v50 = vpack.c.bf16 %v239_v39, %v238_v38  ;;  %v110_v52 = vmul.f32 %v958_v2, %v39_v37  ;;  %v180_v53 = vadd.f32 %v965_v5, %v109_v41  ;;  %v54_v38 = vld [vmem:[%s1375_s0 + $0x140] sm:$0xff] }
  0x18   :  { %v242_v51 = vmax.f32 %v178_v40, 0.0  ;;  %905 = vst [vmem:[%s1378_s3 + $0x40] sm:$0xff] %v781_v44   ;;  %v243_v56 = vmax.f32 %v179_v47, 0.0  ;;  %v111_v57 = vmul.f32 %v958_v2, %v40_v42  ;;  %v112_v58 = vmul.f32 %v958_v2, %v41_v43  ;;  %v55_v47 = vld [vmem:[%s1375_s0 + $0x148] sm:$0xff] }
  0x19   :  { %v791_v55 = vpack.c.bf16 %v241_v46, %v240_v45  ;;  %906 = vst [vmem:[%s1378_s3 + $0x48] sm:$0xff] %v786_v50   ;;  %v181_v60 = vadd.f32 %v965_v5, %v110_v52  ;;  %v244_v61 = vmax.f32 %v180_v53, 0.0  ;;  %v113_v62 = vmul.f32 %v958_v2, %v42_v48  ;;  %v56_v52 = vld [vmem:[%s1375_s0 + $0x150] sm:$0xff]  ;;  %v57_v53 = vld [vmem:[%s1375_s0 + $0x158] sm:$0xff] }
  0x1a   :  { %v114_v63 = vmul.f32 %v958_v2, %v43_v49  ;;  %v796_v1 = vpack.c.bf16 %v243_v56, %v242_v51  ;;  %v182_v3 = vadd.f32 %v965_v5, %v111_v57  ;;  %v183_v4 = vadd.f32 %v965_v5, %v112_v58  ;;  %v58_v58 = vld [vmem:[%s1375_s0 + $0x160] sm:$0xff] }
  0x1b   :  { %907 = vst [vmem:[%s1378_s3 + $0x50] sm:$0xff] %v791_v55   ;;  %v115_v6 = vmul.f32 %v958_v2, %v44_v54  ;;  %v245_v7 = vmax.f32 %v181_v60, 0.0  ;;  %v184_v8 = vadd.f32 %v965_v5, %v113_v62  ;;  %v116_v10 = vmul.f32 %v958_v2, %v45_v59  ;;  %v59_v59 = vld [vmem:[%s1375_s0 + $0x168] sm:$0xff] }
  0x1c   :  { %v185_v9 = vadd.f32 %v965_v5, %v114_v63  ;;  %908 = vst [vmem:[%s1378_s3 + $0x58] sm:$0xff] %v796_v1   ;;  %v246_v12 = vmax.f32 %v182_v3, 0.0  ;;  %v247_v13 = vmax.f32 %v183_v4, 0.0  ;;  %v117_v15 = vmul.f32 %v958_v2, %v46_v0  ;;  %v60_v0 = vld [vmem:[%s1375_s0 + $0x170] sm:$0xff] }
  0x1d   :  { %v186_v14 = vadd.f32 %v965_v5, %v115_v6  ;;  %v801_v18 = vpack.c.bf16 %v245_v7, %v244_v61  ;;  %v248_v19 = vmax.f32 %v184_v8, 0.0  ;;  %v187_v21 = vadd.f32 %v965_v5, %v116_v10  ;;  %v61_v7 = vld [vmem:[%s1375_s0 + $0x178] sm:$0xff] }
  0x1e   :  { %v249_v20 = vmax.f32 %v185_v9, 0.0  ;;  %v806_v24 = vpack.c.bf16 %v247_v13, %v246_v12  ;;  %v118_v26 = vmul.f32 %v958_v2, %v47_v11  ;;  %v188_v27 = vadd.f32 %v965_v5, %v117_v15  ;;  %v62_v12 = vld [vmem:[%s1375_s0 + $0x180] sm:$0xff] }
  0x1f   :  { %v250_v25 = vmax.f32 %v186_v14, 0.0  ;;  %909 = vst [vmem:[%s1378_s3 + $0x60] sm:$0xff] %v801_v18   ;;  %v251_v30 = vmax.f32 %v187_v21, 0.0  ;;  %v119_v31 = vmul.f32 %v958_v2, %v48_v16  ;;  %v120_v32 = vmul.f32 %v958_v2, %v49_v17  ;;  %v63_v21 = vld [vmem:[%s1375_s0 + $0x188] sm:$0xff] }
  0x20   :  { %v811_v29 = vpack.c.bf16 %v249_v20, %v248_v19  ;;  %910 = vst [vmem:[%s1378_s3 + $0x68] sm:$0xff] %v806_v24   ;;  %v189_v34 = vadd.f32 %v965_v5, %v118_v26  ;;  %v252_v35 = vmax.f32 %v188_v27, 0.0  ;;  %v121_v36 = vmul.f32 %v958_v2, %v50_v22  ;;  %v64_v26 = vld [vmem:[%s1375_s0 + $0x190] sm:$0xff]  ;;  %v65_v27 = vld [vmem:[%s1375_s0 + $0x198] sm:$0xff] }
  0x21   :  { %v122_v37 = vmul.f32 %v958_v2, %v51_v23  ;;  %v816_v39 = vpack.c.bf16 %v251_v30, %v250_v25  ;;  %v190_v40 = vadd.f32 %v965_v5, %v119_v31  ;;  %v191_v41 = vadd.f32 %v965_v5, %v120_v32  ;;  %v66_v32 = vld [vmem:[%s1375_s0 + $0x1a0] sm:$0xff] }
  0x22   :  { %911 = vst [vmem:[%s1378_s3 + $0x70] sm:$0xff] %v811_v29   ;;  %v123_v42 = vmul.f32 %v958_v2, %v52_v28  ;;  %v253_v43 = vmax.f32 %v189_v34, 0.0  ;;  %v192_v44 = vadd.f32 %v965_v5, %v121_v36  ;;  %v124_v46 = vmul.f32 %v958_v2, %v53_v33  ;;  %v67_v33 = vld [vmem:[%s1375_s0 + $0x1a8] sm:$0xff] }
  0x23   :  { %v193_v45 = vadd.f32 %v965_v5, %v122_v37  ;;  %912 = vst [vmem:[%s1378_s3 + $0x78] sm:$0xff] %v816_v39   ;;  %v254_v48 = vmax.f32 %v190_v40, 0.0  ;;  %v255_v49 = vmax.f32 %v191_v41, 0.0  ;;  %v125_v51 = vmul.f32 %v958_v2, %v54_v38  ;;  %v68_v38 = vld [vmem:[%s1375_s0 + $0x1b0] sm:$0xff] }
  0x24   :  { %v194_v50 = vadd.f32 %v965_v5, %v123_v42  ;;  %v821_v54 = vpack.c.bf16 %v253_v43, %v252_v35  ;;  %v256_v55 = vmax.f32 %v192_v44, 0.0  ;;  %v195_v57 = vadd.f32 %v965_v5, %v124_v46  ;;  %v69_v43 = vld [vmem:[%s1375_s0 + $0x1b8] sm:$0xff] }
  0x25   :  { %v257_v56 = vmax.f32 %v193_v45, 0.0  ;;  %v826_v60 = vpack.c.bf16 %v255_v49, %v254_v48  ;;  %v126_v62 = vmul.f32 %v958_v2, %v55_v47  ;;  %v196_v63 = vadd.f32 %v965_v5, %v125_v51  ;;  %v70_v48 = vld [vmem:[%s1375_s0 + $0x1c0] sm:$0xff] }
  0x26   :  { %v258_v61 = vmax.f32 %v194_v50, 0.0  ;;  %913 = vst [vmem:[%s1378_s3 + $0x80] sm:$0xff] %v821_v54   ;;  %v259_v3 = vmax.f32 %v195_v57, 0.0  ;;  %v127_v4 = vmul.f32 %v958_v2, %v56_v52  ;;  %v128_v6 = vmul.f32 %v958_v2, %v57_v53  ;;  %v71_v57 = vld [vmem:[%s1375_s0 + $0x1c8] sm:$0xff] }
  0x27   :  { %v831_v1 = vpack.c.bf16 %v257_v56, %v256_v55  ;;  %914 = vst [vmem:[%s1378_s3 + $0x88] sm:$0xff] %v826_v60   ;;  %v197_v8 = vadd.f32 %v965_v5, %v126_v62  ;;  %v260_v9 = vmax.f32 %v196_v63, 0.0  ;;  %v129_v10 = vmul.f32 %v958_v2, %v58_v58  ;;  %v72_v62 = vld [vmem:[%s1375_s0 + $0x1d0] sm:$0xff]  ;;  %v73_v63 = vld [vmem:[%s1375_s0 + $0x1d8] sm:$0xff] }
  0x28   :  { %v130_v11 = vmul.f32 %v958_v2, %v59_v59  ;;  %v836_v13 = vpack.c.bf16 %v259_v3, %v258_v61  ;;  %v198_v14 = vadd.f32 %v965_v5, %v127_v4  ;;  %v199_v15 = vadd.f32 %v965_v5, %v128_v6  ;;  %v74_v6 = vld [vmem:[%s1375_s0 + $0x1e0] sm:$0xff] }
  0x29   :  { %915 = vst [vmem:[%s1378_s3 + $0x90] sm:$0xff] %v831_v1   ;;  %v131_v16 = vmul.f32 %v958_v2, %v60_v0  ;;  %v261_v17 = vmax.f32 %v197_v8, 0.0  ;;  %v200_v18 = vadd.f32 %v965_v5, %v129_v10  ;;  %v132_v20 = vmul.f32 %v958_v2, %v61_v7  ;;  %v75_v7 = vld [vmem:[%s1375_s0 + $0x1e8] sm:$0xff] }
  0x2a   :  { %v201_v19 = vadd.f32 %v965_v5, %v130_v11  ;;  %916 = vst [vmem:[%s1378_s3 + $0x98] sm:$0xff] %v836_v13   ;;  %v262_v22 = vmax.f32 %v198_v14, 0.0  ;;  %v263_v23 = vmax.f32 %v199_v15, 0.0  ;;  %v133_v25 = vmul.f32 %v958_v2, %v62_v12  ;;  %v76_v12 = vld [vmem:[%s1375_s0 + $0x1f0] sm:$0xff] }
  0x2b   :  { %v202_v24 = vadd.f32 %v965_v5, %v131_v16  ;;  %v841_v28 = vpack.c.bf16 %v261_v17, %v260_v9  ;;  %v264_v29 = vmax.f32 %v200_v18, 0.0  ;;  %v203_v31 = vadd.f32 %v965_v5, %v132_v20  ;;  %v77_v17 = vld [vmem:[%s1375_s0 + $0x1f8] sm:$0xff] }
  0x2c   :  { %v265_v30 = vmax.f32 %v201_v19, 0.0  ;;  %v846_v34 = vpack.c.bf16 %v263_v23, %v262_v22  ;;  %v134_v36 = vmul.f32 %v958_v2, %v63_v21  ;;  %v204_v37 = vadd.f32 %v965_v5, %v133_v25 }
  0x2d   :  { %v266_v35 = vmax.f32 %v202_v24, 0.0  ;;  %917 = vst [vmem:[%s1378_s3 + $0xa0] sm:$0xff] %v841_v28   ;;  %v267_v40 = vmax.f32 %v203_v31, 0.0  ;;  %v135_v41 = vmul.f32 %v958_v2, %v64_v26  ;;  %v136_v42 = vmul.f32 %v958_v2, %v65_v27 }
  0x2e   :  { %v851_v39 = vpack.c.bf16 %v265_v30, %v264_v29  ;;  %918 = vst [vmem:[%s1378_s3 + $0xa8] sm:$0xff] %v846_v34   ;;  %v205_v44 = vadd.f32 %v965_v5, %v134_v36  ;;  %v268_v45 = vmax.f32 %v204_v37, 0.0  ;;  %v137_v46 = vmul.f32 %v958_v2, %v66_v32 }
  0x2f   :  { %v138_v47 = vmul.f32 %v958_v2, %v67_v33  ;;  %v856_v49 = vpack.c.bf16 %v267_v40, %v266_v35  ;;  %v206_v50 = vadd.f32 %v965_v5, %v135_v41  ;;  %v207_v51 = vadd.f32 %v965_v5, %v136_v42 }
  0x30   :  { %919 = vst [vmem:[%s1378_s3 + $0xb0] sm:$0xff] %v851_v39   ;;  %v139_v52 = vmul.f32 %v958_v2, %v68_v38  ;;  %v269_v53 = vmax.f32 %v205_v44, 0.0  ;;  %v208_v54 = vadd.f32 %v965_v5, %v137_v46  ;;  %v140_v56 = vmul.f32 %v958_v2, %v69_v43 }
  0x31   :  { %v209_v55 = vadd.f32 %v965_v5, %v138_v47  ;;  %920 = vst [vmem:[%s1378_s3 + $0xb8] sm:$0xff] %v856_v49   ;;  %v270_v58 = vmax.f32 %v206_v50, 0.0  ;;  %v271_v59 = vmax.f32 %v207_v51, 0.0  ;;  %v141_v61 = vmul.f32 %v958_v2, %v70_v48 }
  0x32   :  { %v210_v60 = vadd.f32 %v965_v5, %v139_v52  ;;  %v861_v0 = vpack.c.bf16 %v269_v53, %v268_v45  ;;  %v272_v1 = vmax.f32 %v208_v54, 0.0  ;;  %v211_v4 = vadd.f32 %v965_v5, %v140_v56 }
  0x33   :  { %v273_v3 = vmax.f32 %v209_v55, 0.0  ;;  %v866_v8 = vpack.c.bf16 %v271_v59, %v270_v58  ;;  %v142_v10 = vmul.f32 %v958_v2, %v71_v57  ;;  %v212_v11 = vadd.f32 %v965_v5, %v141_v61 }
  0x34   :  { %v274_v9 = vmax.f32 %v210_v60, 0.0  ;;  %921 = vst [vmem:[%s1378_s3 + $0xc0] sm:$0xff] %v861_v0   ;;  %v275_v14 = vmax.f32 %v211_v4, 0.0  ;;  %v143_v15 = vmul.f32 %v958_v2, %v72_v62  ;;  %v144_v16 = vmul.f32 %v958_v2, %v73_v63 }
  0x35   :  { %v871_v13 = vpack.c.bf16 %v273_v3, %v272_v1  ;;  %922 = vst [vmem:[%s1378_s3 + $0xc8] sm:$0xff] %v866_v8   ;;  %v213_v18 = vadd.f32 %v965_v5, %v142_v10  ;;  %v276_v19 = vmax.f32 %v212_v11, 0.0  ;;  %v145_v20 = vmul.f32 %v958_v2, %v74_v6 }
  0x36   :  { %v146_v21 = vmul.f32 %v958_v2, %v75_v7  ;;  %v876_v22 = vpack.c.bf16 %v275_v14, %v274_v9  ;;  %v214_v23 = vadd.f32 %v965_v5, %v143_v15  ;;  %v215_v24 = vadd.f32 %v965_v5, %v144_v16 }
  0x37   :  { %923 = vst [vmem:[%s1378_s3 + $0xd0] sm:$0xff] %v871_v13   ;;  %v147_v25 = vmul.f32 %v958_v2, %v76_v12  ;;  %v277_v26 = vmax.f32 %v213_v18, 0.0  ;;  %v216_v27 = vadd.f32 %v965_v5, %v145_v20  ;;  %v148_v29 = vmul.f32 %v958_v2, %v77_v17 }
  0x38   :  { %v217_v28 = vadd.f32 %v965_v5, %v146_v21  ;;  %924 = vst [vmem:[%s1378_s3 + $0xd8] sm:$0xff] %v876_v22   ;;  %v278_v30 = vmax.f32 %v214_v23, 0.0  ;;  %v279_v31 = vmax.f32 %v215_v24, 0.0 }
  0x39   :  { %v218_v32 = vadd.f32 %v965_v5, %v147_v25  ;;  %v881_v33 = vpack.c.bf16 %v277_v26, %v276_v19  ;;  %v280_v34 = vmax.f32 %v216_v27, 0.0  ;;  %v219_v36 = vadd.f32 %v965_v5, %v148_v29 }
  0x3a   :  { %v281_v35 = vmax.f32 %v217_v28, 0.0  ;;  %v886_v37 = vpack.c.bf16 %v279_v31, %v278_v30 }
  0x3b   :  { %v282_v38 = vmax.f32 %v218_v32, 0.0  ;;  %925 = vst [vmem:[%s1378_s3 + $0xe0] sm:$0xff] %v881_v33   ;;  %v283_v39 = vmax.f32 %v219_v36, 0.0 }
  0x3c   :  { %v891_v2 = vpack.c.bf16 %v281_v35, %v280_v34  ;;  %926 = vst [vmem:[%s1378_s3 + $0xe8] sm:$0xff] %v886_v37  }
  0x3d   :  { %v896_v40 = vpack.c.bf16 %v283_v39, %v282_v38 }
  0x3e   :  { %927 = vst [vmem:[%s1378_s3 + $0xf0] sm:$0xff] %v891_v2  }
  0x3f   :  { %928 = vst [vmem:[%s1378_s3 + $0xf8] sm:$0xff] %v896_v40  }

// kernel: encoder_forward.8
= control target key start
LH: loop header
LB: loop body
LE: loop exit
PB: predicated region body
PF: predicated region fallthrough
CT: control target
= control target key end

     0   :  { %v1332_v0 = vmov 0   ;;  %s2165_s1 = inlined_call_operand.vmem [shape: bf16[256,128], index: 1, kind: input, shape index: {}]   ;;  %s2166_s0 = inlined_call_operand.vmem [shape: bf16[512,256], index: 0, kind: input, shape index: {}]   ;;  %s2167_s2 = inlined_call_operand.vmem [shape: f32[512,128], index: 2, kind: output, shape index: {0}]   ;;  %s2168_s3 = inlined_call_operand.vmem [shape: f32[1,128], index: 3, kind: output, shape index: {1}]   ;;  %s2169_s4 = inlined_call_operand.vmem [shape: f32[1,128], index: 4, kind: output, shape index: {2}]  }
   0x1   :  { %527 = vmatprep.subr.bf16.mxu0 %v1332_v0  ;;  %v1220_v1 = vld [vmem:[%s2165_s1 + $0x38] sm:$0xff]   ;;  %1186 = vmatprep.subr.bf16.mxu1 %v1332_v0  ;;  %v1221_v2 = vld [vmem:[%s2165_s1 + $0x30] sm:$0xff]   ;;  %v1222_v3 = vld [vmem:[%s2165_s1 + $0x28] sm:$0xff]  }
   0x2   :  { %528 = vmatpush1.bf16.msra.mxu0 %v1220_v1  ;;  %1202 = vmatpush1.bf16.msra.mxu1 %v1220_v1  ;;  %v1223_v4 = vld [vmem:[%s2165_s1 + $0x20] sm:$0xff]   ;;  %v1224_v5 = vld [vmem:[%s2165_s1 + $0x18] sm:$0xff]   ;;  %v1225_v7 = vld [vmem:[%s2165_s1 + $0x10] sm:$0xff]  }
   0x3   :  { %529 = vmatprep.subr.bf16.mxu0 %v1332_v0  ;;  %1187 = vmatprep.subr.bf16.mxu1 %v1332_v0  ;;  %v1238_v6 = vld [vmem:[%s2166_s0 + $0x4] ss:$8 sps:$4 sm:$0xff]   ;;  %v1228_v11 = vld [vmem:[%s2165_s1 + $0x78] sm:$0xff]   ;;  %v1229_v12 = vld [vmem:[%s2165_s1 + $0x70] sm:$0xff]  }
   0x4   :  { %559 = vmatprep.mubr.bf16.mxu0 %v1238_v6  ;;  %v1226_v8 = vld [vmem:[%s2165_s1 + $0x8] sm:$0xff]   ;;  %v1227_v9 = vld [vmem:[%s2165_s1] sm:$0xff]   ;;  %v1232_v15 = vld [vmem:[%s2165_s1 + $0x58] sm:$0xff]  }
   0x5   :  { %v1262_v10 = vld [vmem:[%s2166_s0 + $0x104] ss:$8 sps:$4 sm:$0xff]   ;;  %v1233_v16 = vld [vmem:[%s2165_s1 + $0x50] sm:$0xff]   ;;  %v1236_v19 = vld [vmem:[%s2166_s0] ss:$8 sps:$4 sm:$0xff]  }
   0x6   :  { %530 = vmatpush1.bf16.msra.mxu0 %v1221_v2  ;;  %1203 = vmatpush1.bf16.msra.mxu1 %v1221_v2  ;;  %v1230_v13 = vld [vmem:[%s2165_s1 + $0x68] sm:$0xff]   ;;  %v1231_v14 = vld [vmem:[%s2165_s1 + $0x60] sm:$0xff]   ;;  %v1239_v21 = vld [vmem:[%s2166_s0 + $0x14] ss:$8 sps:$4 sm:$0xff]  }
   0x7   :  { %531 = vmatprep.subr.bf16.mxu0 %v1332_v0  ;;  %1188 = vmatprep.subr.bf16.mxu1 %v1332_v0  ;;  %v1234_v17 = vld [vmem:[%s2165_s1 + $0x48] sm:$0xff]   ;;  %v1235_v18 = vld [vmem:[%s2165_s1 + $0x40] sm:$0xff]   ;;  %v1266_v22 = vld [vmem:[%s2166_s0 + $0x114] ss:$8 sps:$4 sm:$0xff]  }
   0x8   :  { %687 = vmatprep.mubr.bf16.mxu1 %v1262_v10  ;;  %v1260_v20 = vld [vmem:[%s2166_s0 + $0x100] ss:$8 sps:$4 sm:$0xff]   ;;  %v1241_v23 = vld [vmem:[%s2166_s0 + $0x10] ss:$8 sps:$4 sm:$0xff]   ;;  %v1242_v25 = vld [vmem:[%s2166_s0 + $0x24] ss:$8 sps:$4 sm:$0xff]  }
   0x9   :  { %v1268_v24 = vld [vmem:[%s2166_s0 + $0x110] ss:$8 sps:$4 sm:$0xff]   ;;  %v1272_v26 = vld [vmem:[%s2166_s0 + $0x124] ss:$8 sps:$4 sm:$0xff]   ;;  %v1244_v27 = vld [vmem:[%s2166_s0 + $0x20] ss:$8 sps:$4 sm:$0xff]  }
   0xa   :  { %532 = vmatpush1.bf16.msra.mxu0 %v1222_v3  ;;  %1204 = vmatpush1.bf16.msra.mxu1 %v1222_v3  ;;  %v1274_v28 = vld [vmem:[%s2166_s0 + $0x120] ss:$8 sps:$4 sm:$0xff]   ;;  %v1245_v29 = vld [vmem:[%s2166_s0 + $0x34] ss:$8 sps:$4 sm:$0xff]   ;;  %v1247_v31 = vld [vmem:[%s2166_s0 + $0x30] ss:$8 sps:$4 sm:$0xff]  }
   0xb   :  { %533 = vmatprep.subr.bf16.mxu0 %v1332_v0  ;;  %1189 = vmatprep.subr.bf16.mxu1 %v1332_v0  ;;  %v1278_v30 = vld [vmem:[%s2166_s0 + $0x134] ss:$8 sps:$4 sm:$0xff]   ;;  %v1280_v32 = vld [vmem:[%s2166_s0 + $0x130] ss:$8 sps:$4 sm:$0xff]   ;;  %v1248_v33 = vld [vmem:[%s2166_s0 + $0x44] ss:$8 sps:$4 sm:$0xff]  }
   0xc   :  { %v1284_v34 = vld [vmem:[%s2166_s0 + $0x144] ss:$8 sps:$4 sm:$0xff]   ;;  %v1250_v35 = vld [vmem:[%s2166_s0 + $0x40] ss:$8 sps:$4 sm:$0xff]   ;;  %v1251_v37 = vld [vmem:[%s2166_s0 + $0x54] ss:$8 sps:$4 sm:$0xff]  }
   0xd   :  { %v1286_v36 = vld [vmem:[%s2166_s0 + $0x140] ss:$8 sps:$4 sm:$0xff]   ;;  %v1290_v38 = vld [vmem:[%s2166_s0 + $0x154] ss:$8 sps:$4 sm:$0xff]   ;;  %v1253_v39 = vld [vmem:[%s2166_s0 + $0x50] ss:$8 sps:$4 sm:$0xff]  }
   0xe   :  { %534 = vmatpush1.bf16.msra.mxu0 %v1223_v4  ;;  %1205 = vmatpush1.bf16.msra.mxu1 %v1223_v4  ;;  %v1292_v40 = vld [vmem:[%s2166_s0 + $0x150] ss:$8 sps:$4 sm:$0xff]   ;;  %v1254_v41 = vld [vmem:[%s2166_s0 + $0x64] ss:$8 sps:$4 sm:$0xff]   ;;  %v1256_v43 = vld [vmem:[%s2166_s0 + $0x60] ss:$8 sps:$4 sm:$0xff]  }
   0xf   :  { %535 = vmatprep.subr.bf16.mxu0 %v1332_v0  ;;  %1190 = vmatprep.subr.bf16.mxu1 %v1332_v0  ;;  %v1296_v42 = vld [vmem:[%s2166_s0 + $0x164] ss:$8 sps:$4 sm:$0xff]   ;;  %v1298_v44 = vld [vmem:[%s2166_s0 + $0x160] ss:$8 sps:$4 sm:$0xff]   ;;  %v1257_v45 = vld [vmem:[%s2166_s0 + $0x74] ss:$8 sps:$4 sm:$0xff]  }
  0x10   :  { %v1302_v46 = vld [vmem:[%s2166_s0 + $0x174] ss:$8 sps:$4 sm:$0xff]   ;;  %v1259_v47 = vld [vmem:[%s2166_s0 + $0x70] ss:$8 sps:$4 sm:$0xff]   ;;  %v1263_v49 = vld [vmem:[%s2166_s0 + $0x84] ss:$8 sps:$4 sm:$0xff]  }
  0x11   :  { %v1304_v48 = vld [vmem:[%s2166_s0 + $0x170] ss:$8 sps:$4 sm:$0xff]   ;;  %v1308_v50 = vld [vmem:[%s2166_s0 + $0x184] ss:$8 sps:$4 sm:$0xff]   ;;  %v1265_v51 = vld [vmem:[%s2166_s0 + $0x80] ss:$8 sps:$4 sm:$0xff]  }
  0x12   :  { %536 = vmatpush1.bf16.msra.mxu0 %v1224_v5  ;;  %1206 = vmatpush1.bf16.msra.mxu1 %v1224_v5  ;;  %v1310_v52 = vld [vmem:[%s2166_s0 + $0x180] ss:$8 sps:$4 sm:$0xff]   ;;  %v1269_v53 = vld [vmem:[%s2166_s0 + $0x94] ss:$8 sps:$4 sm:$0xff]   ;;  %v1271_v55 = vld [vmem:[%s2166_s0 + $0x90] ss:$8 sps:$4 sm:$0xff]  }
  0x13   :  { %537 = vmatprep.subr.bf16.mxu0 %v1332_v0  ;;  %1191 = vmatprep.subr.bf16.mxu1 %v1332_v0  ;;  %v1311_v54 = vld [vmem:[%s2166_s0 + $0x194] ss:$8 sps:$4 sm:$0xff]   ;;  %v1313_v56 = vld [vmem:[%s2166_s0 + $0x190] ss:$8 sps:$4 sm:$0xff]   ;;  %v1275_v57 = vld [vmem:[%s2166_s0 + $0xa4] ss:$8 sps:$4 sm:$0xff]  }
  0x14   :  { %v1314_v58 = vld [vmem:[%s2166_s0 + $0x1a4] ss:$8 sps:$4 sm:$0xff]   ;;  %v1277_v59 = vld [vmem:[%s2166_s0 + $0xa0] ss:$8 sps:$4 sm:$0xff]   ;;  %v1281_v61 = vld [vmem:[%s2166_s0 + $0xb4] ss:$8 sps:$4 sm:$0xff]  }
  0x15   :  { %v1316_v60 = vld [vmem:[%s2166_s0 + $0x1a0] ss:$8 sps:$4 sm:$0xff]   ;;  %v1317_v62 = vld [vmem:[%s2166_s0 + $0x1b4] ss:$8 sps:$4 sm:$0xff]   ;;  %v1283_v63 = vld [vmem:[%s2166_s0 + $0xb0] ss:$8 sps:$4 sm:$0xff]  }
  0x16   :  { %538 = vmatpush1.bf16.msra.mxu0 %v1225_v7  ;;  %1207 = vmatpush1.bf16.msra.mxu1 %v1225_v7  ;;  %v1287_v1 = vld [vmem:[%s2166_s0 + $0xc4] ss:$8 sps:$4 sm:$0xff]   ;;  %v1289_v3 = vld [vmem:[%s2166_s0 + $0xc0] ss:$8 sps:$4 sm:$0xff]   ;;  %v1293_v5 = vld [vmem:[%s2166_s0 + $0xd4] ss:$8 sps:$4 sm:$0xff]  }
  0x17   :  { %539 = vmatprep.subr.bf16.mxu0 %v1332_v0  ;;  %1192 = vmatprep.subr.bf16.mxu1 %v1332_v0  ;;  %v1320_v2 = vld [vmem:[%s2166_s0 + $0x1c4] ss:$8 sps:$4 sm:$0xff]   ;;  %v1322_v4 = vld [vmem:[%s2166_s0 + $0x1c0] ss:$8 sps:$4 sm:$0xff]   ;;  %v1323_v6 = vld [vmem:[%s2166_s0 + $0x1d4] ss:$8 sps:$4 sm:$0xff]  }
  0x18   :  { %v1295_v7 = vld [vmem:[%s2166_s0 + $0xd0] ss:$8 sps:$4 sm:$0xff]   ;;  %v1326_v10 = vld [vmem:[%s2166_s0 + $0x1e4] ss:$8 sps:$4 sm:$0xff]  }
  0x1a   :  { %540 = vmatpush1.bf16.msra.mxu0 %v1226_v8  ;;  %1208 = vmatpush1.bf16.msra.mxu1 %v1226_v8  ;;  %v1325_v8 = vld [vmem:[%s2166_s0 + $0x1d0] ss:$8 sps:$4 sm:$0xff]  }
  0x1b   :  { %541 = vmatprep.subr.bf16.mxu0 %v1332_v0  ;;  %1193 = vmatprep.subr.bf16.mxu1 %v1332_v0 }
  0x1e   :  { %542 = vmatpush1.bf16.msra.mxu0 %v1227_v9  ;;  %1209 = vmatpush1.bf16.msra.mxu1 %v1227_v9  ;;  %v1299_v9 = vld [vmem:[%s2166_s0 + $0xe4] ss:$8 sps:$4 sm:$0xff]  }
  0x1f   :  { %543 = vmatprep.subr.bf16.mxu0 %v1332_v0  ;;  %1194 = vmatprep.subr.bf16.mxu1 %v1332_v0 }
  0x22   :  { %544 = vmatpush2.bf16.msra.mxu0 %v1228_v11  ;;  %1210 = vmatpush2.bf16.msra.mxu1 %v1228_v11  ;;  %v1301_v11 = vld [vmem:[%s2166_s0 + $0xe0] ss:$8 sps:$4 sm:$0xff]  }
  0x23   :  { %545 = vmatprep.subr.bf16.mxu0 %v1332_v0  ;;  %1195 = vmatprep.subr.bf16.mxu1 %v1332_v0 }
  0x26   :  { %546 = vmatpush2.bf16.msra.mxu0 %v1229_v12  ;;  %1211 = vmatpush2.bf16.msra.mxu1 %v1229_v12  ;;  %v1328_v12 = vld [vmem:[%s2166_s0 + $0x1e0] ss:$8 sps:$4 sm:$0xff]  }
  0x27   :  { %547 = vmatprep.subr.bf16.mxu0 %v1332_v0  ;;  %1196 = vmatprep.subr.bf16.mxu1 %v1332_v0 }
  0x2a   :  { %548 = vmatpush2.bf16.msra.mxu0 %v1230_v13  ;;  %1212 = vmatpush2.bf16.msra.mxu1 %v1230_v13  ;;  %v1305_v13 = vld [vmem:[%s2166_s0 + $0xf4] ss:$8 sps:$4 sm:$0xff]  }
  0x2b   :  { %549 = vmatprep.subr.bf16.mxu0 %v1332_v0  ;;  %1197 = vmatprep.subr.bf16.mxu1 %v1332_v0 }
  0x2e   :  { %550 = vmatpush2.bf16.msra.mxu0 %v1231_v14  ;;  %1213 = vmatpush2.bf16.msra.mxu1 %v1231_v14  ;;  %v1329_v14 = vld [vmem:[%s2166_s0 + $0x1f4] ss:$8 sps:$4 sm:$0xff]  }
  0x2f   :  { %551 = vmatprep.subr.bf16.mxu0 %v1332_v0  ;;  %1198 = vmatprep.subr.bf16.mxu1 %v1332_v0 }
  0x32   :  { %552 = vmatpush2.bf16.msra.mxu0 %v1232_v15  ;;  %1214 = vmatpush2.bf16.msra.mxu1 %v1232_v15  ;;  %v1307_v15 = vld [vmem:[%s2166_s0 + $0xf0] ss:$8 sps:$4 sm:$0xff]  }
  0x33   :  { %553 = vmatprep.subr.bf16.mxu0 %v1332_v0  ;;  %1199 = vmatprep.subr.bf16.mxu1 %v1332_v0 }
  0x36   :  { %554 = vmatpush2.bf16.msra.mxu0 %v1233_v16  ;;  %1215 = vmatpush2.bf16.msra.mxu1 %v1233_v16  ;;  %v1331_v16 = vld [vmem:[%s2166_s0 + $0x1f0] ss:$8 sps:$4 sm:$0xff]  }
  0x37   :  { %555 = vmatprep.subr.bf16.mxu0 %v1332_v0  ;;  %1200 = vmatprep.subr.bf16.mxu1 %v1332_v0 }
  0x3a   :  { %556 = vmatpush2.bf16.msra.mxu0 %v1234_v17  ;;  %1216 = vmatpush2.bf16.msra.mxu1 %v1234_v17 }
  0x3b   :  { %557 = vmatprep.subr.bf16.mxu0 %v1332_v0  ;;  %1201 = vmatprep.subr.bf16.mxu1 %v1332_v0  ;;  %v1319_v0 = vld [vmem:[%s2166_s0 + $0x1b0] ss:$8 sps:$4 sm:$0xff]  }
  0x3e   :  { %558 = vmatpush2.bf16.msra.mxu0 %v1235_v18  ;;  %1217 = vmatpush2.bf16.msra.mxu1 %v1235_v18 }
  0x41   :  { %560 = vmatmul.mubr.bf16.vlgmr.msra.gmra.mxu0 %v1236_v19  ;;  %688 = vmatmul.mubr.bf16.vlgmr.msra.gmra.mxu1 %v1260_v20 }
  0x42   :  { %567 = vmatprep.mubr.bf16.mxu0 %v1239_v21  ;;  %695 = vmatprep.mubr.bf16.mxu1 %v1266_v22 }
  0x49   :  { %568 = vmatmul.mubr.bf16.gmra.mxu0 %v1241_v23  ;;  %696 = vmatmul.mubr.bf16.gmra.mxu1 %v1268_v24 }
  0x4a   :  { %575 = vmatprep.mubr.bf16.mxu0 %v1242_v25  ;;  %703 = vmatprep.mubr.bf16.mxu1 %v1272_v26 }
  0x51   :  { %576 = vmatmul.mubr.bf16.gmra.mxu0 %v1244_v27  ;;  %704 = vmatmul.mubr.bf16.gmra.mxu1 %v1274_v28 }
  0x52   :  { %583 = vmatprep.mubr.bf16.mxu0 %v1245_v29  ;;  %711 = vmatprep.mubr.bf16.mxu1 %v1278_v30 }
  0x59   :  { %584 = vmatmul.mubr.bf16.gmra.mxu0 %v1247_v31  ;;  %712 = vmatmul.mubr.bf16.gmra.mxu1 %v1280_v32 }
  0x5a   :  { %591 = vmatprep.mubr.bf16.mxu0 %v1248_v33  ;;  %719 = vmatprep.mubr.bf16.mxu1 %v1284_v34 }
  0x61   :  { %592 = vmatmul.mubr.bf16.gmra.mxu0 %v1250_v35  ;;  %720 = vmatmul.mubr.bf16.gmra.mxu1 %v1286_v36 }
  0x62   :  { %599 = vmatprep.mubr.bf16.mxu0 %v1251_v37  ;;  %727 = vmatprep.mubr.bf16.mxu1 %v1290_v38 }
  0x69   :  { %600 = vmatmul.mubr.bf16.gmra.mxu0 %v1253_v39  ;;  %728 = vmatmul.mubr.bf16.gmra.mxu1 %v1292_v40 }
  0x6a   :  { %607 = vmatprep.mubr.bf16.mxu0 %v1254_v41  ;;  %735 = vmatprep.mubr.bf16.mxu1 %v1296_v42 }
  0x71   :  { %608 = vmatmul.mubr.bf16.gmra.mxu0 %v1256_v43  ;;  %736 = vmatmul.mubr.bf16.gmra.mxu1 %v1298_v44 }
  0x72   :  { %615 = vmatprep.mubr.bf16.mxu0 %v1257_v45  ;;  %743 = vmatprep.mubr.bf16.mxu1 %v1302_v46 }
  0x79   :  { %616 = vmatmul.mubr.bf16.gmra.mxu0 %v1259_v47  ;;  %744 = vmatmul.mubr.bf16.gmra.mxu1 %v1304_v48 }
  0x7a   :  { %623 = vmatprep.mubr.bf16.mxu0 %v1263_v49  ;;  %751 = vmatprep.mubr.bf16.mxu1 %v1308_v50 }
  0x81   :  { %624 = vmatmul.mubr.bf16.gmra.mxu0 %v1265_v51  ;;  %752 = vmatmul.mubr.bf16.gmra.mxu1 %v1310_v52 }
  0x82   :  { %631 = vmatprep.mubr.bf16.mxu0 %v1269_v53  ;;  %759 = vmatprep.mubr.bf16.mxu1 %v1311_v54 }
  0x89   :  { %632 = vmatmul.mubr.bf16.gmra.mxu0 %v1271_v55  ;;  %760 = vmatmul.mubr.bf16.gmra.mxu1 %v1313_v56 }
  0x8a   :  { %639 = vmatprep.mubr.bf16.mxu0 %v1275_v57  ;;  %767 = vmatprep.mubr.bf16.mxu1 %v1314_v58 }
  0x91   :  { %640 = vmatmul.mubr.bf16.gmra.mxu0 %v1277_v59  ;;  %768 = vmatmul.mubr.bf16.gmra.mxu1 %v1316_v60 }
  0x92   :  { %647 = vmatprep.mubr.bf16.mxu0 %v1281_v61  ;;  %775 = vmatprep.mubr.bf16.mxu1 %v1317_v62 }
  0x99   :  { %648 = vmatmul.mubr.bf16.gmra.mxu0 %v1283_v63  ;;  %776 = vmatmul.mubr.bf16.gmra.mxu1 %v1319_v0 }
  0x9a   :  { %655 = vmatprep.mubr.bf16.mxu0 %v1287_v1  ;;  %783 = vmatprep.mubr.bf16.mxu1 %v1320_v2 }
  0xa1   :  { %656 = vmatmul.mubr.bf16.gmra.mxu0 %v1289_v3  ;;  %784 = vmatmul.mubr.bf16.gmra.mxu1 %v1322_v4 }
  0xa2   :  { %663 = vmatprep.mubr.bf16.mxu0 %v1293_v5  ;;  %791 = vmatprep.mubr.bf16.mxu1 %v1323_v6 }
  0xa9   :  { %664 = vmatmul.mubr.bf16.gmra.mxu0 %v1295_v7  ;;  %792 = vmatmul.mubr.bf16.gmra.mxu1 %v1325_v8 }
  0xaa   :  { %671 = vmatprep.mubr.bf16.mxu0 %v1299_v9  ;;  %799 = vmatprep.mubr.bf16.mxu1 %v1326_v10 }
  0xb1   :  { %672 = vmatmul.mubr.bf16.gmra.mxu0 %v1301_v11  ;;  %800 = vmatmul.mubr.bf16.gmra.mxu1 %v1328_v12 }
  0xb2   :  { %679 = vmatprep.mubr.bf16.mxu0 %v1305_v13  ;;  %807 = vmatprep.mubr.bf16.mxu1 %v1329_v14 }
  0xb9   :  { %680 = vmatmul.mubr.bf16.gmra.mxu0 %v1307_v15  ;;  %808 = vmatmul.mubr.bf16.gmra.mxu1 %v1331_v16 }
 0x101   :  { %v1631_v17 = vpop.f32.mrf.mxu0  ;;  %v1633_v18 = vpop.f32.mrf.mxu1 }
 0x102   :  { %816 = vst [vmem:[%s2167_s2] sm:$0xff] %v1631_v17  ;;  %848 = vst [vmem:[%s2167_s2 + $0x100] sm:$0xff] %v1633_v18 }
 0x103   :  { %v563_v19 = vpop.f32.mrf.mxu0  ;;  %v691_v20 = vpop.f32.mrf.mxu1 }
 0x104   :  { %v1333_v19 = vmov 0.0  }
 0x105   :  { %v1643_v21 = vpop.f32.mrf.mxu0  ;;  %v1645_v22 = vpop.f32.mrf.mxu1  ;;  %884 = vst [vmem:[%s2168_s3] sm:$0x1] %v1333_v19  ;;  %885 = vst [vmem:[%s2169_s4] sm:$0x1] %v1333_v19 }
 0x106   :  { %817 = vst [vmem:[%s2167_s2 + $0x8] sm:$0xff] %v1643_v21  ;;  %849 = vst [vmem:[%s2167_s2 + $0x108] sm:$0xff] %v1645_v22  ;;  %v960_v20 = vmul.f32 %v1643_v21, %v1643_v21 }
 0x107   :  { %v566_v23 = vpop.f32.mrf.mxu0  ;;  %v694_v24 = vpop.f32.mrf.mxu1 }
 0x109   :  { %v1655_v25 = vpop.f32.mrf.mxu0  ;;  %v1657_v26 = vpop.f32.mrf.mxu1 }
 0x10a   :  { %818 = vst [vmem:[%s2167_s2 + $0x10] sm:$0xff] %v1655_v25  ;;  %850 = vst [vmem:[%s2167_s2 + $0x110] sm:$0xff] %v1657_v26 }
 0x10b   :  { %v571_v27 = vpop.f32.mrf.mxu0  ;;  %v699_v28 = vpop.f32.mrf.mxu1 }
 0x10c   :  { %v959_v27 = vmul.f32 %v1631_v17, %v1631_v17  ;;  %v887_v28 = vadd.f32 %v1643_v21, %v1631_v17 }
 0x10d   :  { %v1667_v29 = vpop.f32.mrf.mxu0  ;;  %v1669_v30 = vpop.f32.mrf.mxu1 }
 0x10e   :  { %819 = vst [vmem:[%s2167_s2 + $0x18] sm:$0xff] %v1667_v29  ;;  %851 = vst [vmem:[%s2167_s2 + $0x118] sm:$0xff] %v1669_v30  ;;  %v962_v17 = vmul.f32 %v1667_v29, %v1667_v29 }
 0x10f   :  { %v574_v31 = vpop.f32.mrf.mxu0  ;;  %v702_v32 = vpop.f32.mrf.mxu1 }
 0x110   :  { %v961_v31 = vmul.f32 %v1655_v25, %v1655_v25 }
 0x111   :  { %v1679_v33 = vpop.f32.mrf.mxu0  ;;  %v1681_v34 = vpop.f32.mrf.mxu1 }
 0x112   :  { %820 = vst [vmem:[%s2167_s2 + $0x20] sm:$0xff] %v1679_v33  ;;  %852 = vst [vmem:[%s2167_s2 + $0x120] sm:$0xff] %v1681_v34 }
 0x113   :  { %v579_v35 = vpop.f32.mrf.mxu0  ;;  %v707_v36 = vpop.f32.mrf.mxu1 }
 0x114   :  { %v1023_v36 = vadd.f32 %v960_v20, %v959_v27 }
 0x115   :  { %v1691_v37 = vpop.f32.mrf.mxu0  ;;  %v1693_v38 = vpop.f32.mrf.mxu1 }
 0x116   :  { %821 = vst [vmem:[%s2167_s2 + $0x28] sm:$0xff] %v1691_v37  ;;  %853 = vst [vmem:[%s2167_s2 + $0x128] sm:$0xff] %v1693_v38 }
 0x117   :  { %v582_v39 = vpop.f32.mrf.mxu0  ;;  %v710_v40 = vpop.f32.mrf.mxu1 }
 0x118   :  { %v888_v39 = vadd.f32 %v887_v28, %v1655_v25 }
 0x119   :  { %v1703_v41 = vpop.f32.mrf.mxu0  ;;  %v1705_v42 = vpop.f32.mrf.mxu1 }
 0x11a   :  { %822 = vst [vmem:[%s2167_s2 + $0x30] sm:$0xff] %v1703_v41  ;;  %854 = vst [vmem:[%s2167_s2 + $0x130] sm:$0xff] %v1705_v42 }
 0x11b   :  { %v587_v43 = vpop.f32.mrf.mxu0  ;;  %v715_v44 = vpop.f32.mrf.mxu1 }
 0x11c   :  { %v1024_v43 = vadd.f32 %v1023_v36, %v961_v31  ;;  %v889_v44 = vadd.f32 %v888_v39, %v1667_v29  ;;  %v964_v29 = vmul.f32 %v1691_v37, %v1691_v37 }
 0x11d   :  { %v1715_v45 = vpop.f32.mrf.mxu0  ;;  %v1717_v46 = vpop.f32.mrf.mxu1 }
 0x11e   :  { %823 = vst [vmem:[%s2167_s2 + $0x38] sm:$0xff] %v1715_v45  ;;  %855 = vst [vmem:[%s2167_s2 + $0x138] sm:$0xff] %v1717_v46 }
 0x11f   :  { %v590_v47 = vpop.f32.mrf.mxu0  ;;  %v718_v48 = vpop.f32.mrf.mxu1 }
 0x120   :  { %v963_v47 = vmul.f32 %v1679_v33, %v1679_v33 }
 0x121   :  { %v1727_v49 = vpop.f32.mrf.mxu0  ;;  %v1729_v50 = vpop.f32.mrf.mxu1 }
 0x122   :  { %824 = vst [vmem:[%s2167_s2 + $0x40] sm:$0xff] %v1727_v49  ;;  %856 = vst [vmem:[%s2167_s2 + $0x140] sm:$0xff] %v1729_v50 }
 0x123   :  { %v595_v51 = vpop.f32.mrf.mxu0  ;;  %v723_v52 = vpop.f32.mrf.mxu1 }
 0x124   :  { %v1025_v51 = vadd.f32 %v1024_v43, %v962_v17  ;;  %v890_v52 = vadd.f32 %v889_v44, %v1679_v33 }
 0x125   :  { %v1739_v53 = vpop.f32.mrf.mxu0  ;;  %v1741_v54 = vpop.f32.mrf.mxu1 }
 0x126   :  { %825 = vst [vmem:[%s2167_s2 + $0x48] sm:$0xff] %v1739_v53  ;;  %857 = vst [vmem:[%s2167_s2 + $0x148] sm:$0xff] %v1741_v54 }
 0x127   :  { %v598_v55 = vpop.f32.mrf.mxu0  ;;  %v726_v56 = vpop.f32.mrf.mxu1 }
 0x129   :  { %v1751_v57 = vpop.f32.mrf.mxu0  ;;  %v1753_v58 = vpop.f32.mrf.mxu1 }
 0x12a   :  { %826 = vst [vmem:[%s2167_s2 + $0x50] sm:$0xff] %v1751_v57  ;;  %858 = vst [vmem:[%s2167_s2 + $0x150] sm:$0xff] %v1753_v58 }
 0x12b   :  { %v603_v59 = vpop.f32.mrf.mxu0  ;;  %v731_v60 = vpop.f32.mrf.mxu1 }
 0x12c   :  { %v1026_v59 = vadd.f32 %v1025_v51, %v963_v47  ;;  %v891_v60 = vadd.f32 %v890_v52, %v1691_v37  ;;  %v966_v37 = vmul.f32 %v1715_v45, %v1715_v45 }
 0x12d   :  { %v1763_v61 = vpop.f32.mrf.mxu0  ;;  %v1765_v62 = vpop.f32.mrf.mxu1 }
 0x12e   :  { %827 = vst [vmem:[%s2167_s2 + $0x58] sm:$0xff] %v1763_v61  ;;  %859 = vst [vmem:[%s2167_s2 + $0x158] sm:$0xff] %v1765_v62 }
 0x12f   :  { %v606_v63 = vpop.f32.mrf.mxu0  ;;  %v734_v0 = vpop.f32.mrf.mxu1 }
 0x130   :  { %v965_v63 = vmul.f32 %v1703_v41, %v1703_v41 }
 0x131   :  { %v1775_v1 = vpop.f32.mrf.mxu0  ;;  %v1777_v2 = vpop.f32.mrf.mxu1 }
 0x132   :  { %828 = vst [vmem:[%s2167_s2 + $0x60] sm:$0xff] %v1775_v1  ;;  %860 = vst [vmem:[%s2167_s2 + $0x160] sm:$0xff] %v1777_v2 }
 0x133   :  { %v611_v3 = vpop.f32.mrf.mxu0  ;;  %v739_v4 = vpop.f32.mrf.mxu1 }
 0x134   :  { %v1027_v3 = vadd.f32 %v1026_v59, %v964_v29  ;;  %v892_v4 = vadd.f32 %v891_v60, %v1703_v41 }
 0x135   :  { %v1787_v5 = vpop.f32.mrf.mxu0  ;;  %v1789_v6 = vpop.f32.mrf.mxu1 }
 0x136   :  { %829 = vst [vmem:[%s2167_s2 + $0x68] sm:$0xff] %v1787_v5  ;;  %861 = vst [vmem:[%s2167_s2 + $0x168] sm:$0xff] %v1789_v6 }
 0x137   :  { %v614_v7 = vpop.f32.mrf.mxu0  ;;  %v742_v8 = vpop.f32.mrf.mxu1 }
 0x139   :  { %v1799_v9 = vpop.f32.mrf.mxu0  ;;  %v1801_v10 = vpop.f32.mrf.mxu1 }
 0x13a   :  { %830 = vst [vmem:[%s2167_s2 + $0x70] sm:$0xff] %v1799_v9  ;;  %862 = vst [vmem:[%s2167_s2 + $0x170] sm:$0xff] %v1801_v10 }
 0x13b   :  { %v619_v11 = vpop.f32.mrf.mxu0  ;;  %v747_v12 = vpop.f32.mrf.mxu1 }
 0x13c   :  { %v1028_v11 = vadd.f32 %v1027_v3, %v965_v63  ;;  %v893_v12 = vadd.f32 %v892_v4, %v1715_v45  ;;  %v968_v45 = vmul.f32 %v1739_v53, %v1739_v53 }
 0x13d   :  { %v1811_v13 = vpop.f32.mrf.mxu0  ;;  %v1813_v14 = vpop.f32.mrf.mxu1 }
 0x13e   :  { %831 = vst [vmem:[%s2167_s2 + $0x78] sm:$0xff] %v1811_v13  ;;  %863 = vst [vmem:[%s2167_s2 + $0x178] sm:$0xff] %v1813_v14  ;;  %v1029_v19 = vadd.f32 %v1028_v11, %v966_v37  ;;  %v894_v20 = vadd.f32 %v893_v12, %v1727_v49 }
 0x13f   :  { %v622_v15 = vpop.f32.mrf.mxu0  ;;  %v750_v16 = vpop.f32.mrf.mxu1 }
 0x140   :  { %v967_v15 = vmul.f32 %v1727_v49, %v1727_v49 }
 0x141   :  { %v1831_v23 = vpop.f32.mrf.mxu0  ;;  %v1833_v24 = vpop.f32.mrf.mxu1 }
 0x142   :  { %832 = vst [vmem:[%s2167_s2 + $0x80] sm:$0xff] %v1831_v23  ;;  %864 = vst [vmem:[%s2167_s2 + $0x180] sm:$0xff] %v1833_v24  ;;  %v1030_v31 = vadd.f32 %v1029_v19, %v967_v15 }
 0x143   :  { %v627_v32 = vpop.f32.mrf.mxu0  ;;  %v755_v35 = vpop.f32.mrf.mxu1 }
 0x144   :  { %v895_v32 = vadd.f32 %v894_v20, %v1739_v53  ;;  %v969_v35 = vmul.f32 %v1751_v57, %v1751_v57  ;;  %v1031_v39 = vadd.f32 %v1030_v31, %v968_v45  ;;  %v970_v53 = vmul.f32 %v1763_v61, %v1763_v61 }
 0x145   :  { %v1852_v21 = vpop.f32.mrf.mxu0  ;;  %v1854_v40 = vpop.f32.mrf.mxu1 }
 0x146   :  { %833 = vst [vmem:[%s2167_s2 + $0x88] sm:$0xff] %v1852_v21  ;;  %865 = vst [vmem:[%s2167_s2 + $0x188] sm:$0xff] %v1854_v40  ;;  %v896_v17 = vadd.f32 %v895_v32, %v1751_v57  ;;  %v1032_v47 = vadd.f32 %v1031_v39, %v969_v35 }
 0x147   :  { %v630_v25 = vpop.f32.mrf.mxu0  ;;  %v758_v48 = vpop.f32.mrf.mxu1 }
 0x148   :  { %v897_v25 = vadd.f32 %v896_v17, %v1763_v61  ;;  %v971_v48 = vmul.f32 %v1775_v1, %v1775_v1  ;;  %v1033_v52 = vadd.f32 %v1032_v47, %v970_v53  ;;  %v972_v61 = vmul.f32 %v1787_v5, %v1787_v5 }
 0x149   :  { %v1870_v55 = vpop.f32.mrf.mxu0  ;;  %v1872_v56 = vpop.f32.mrf.mxu1 }
 0x14a   :  { %834 = vst [vmem:[%s2167_s2 + $0x90] sm:$0xff] %v1870_v55  ;;  %866 = vst [vmem:[%s2167_s2 + $0x190] sm:$0xff] %v1872_v56  ;;  %v898_v29 = vadd.f32 %v897_v25, %v1775_v1  ;;  %v1034_v63 = vadd.f32 %v1033_v52, %v971_v48 }
 0x14b   :  { %v635_v33 = vpop.f32.mrf.mxu0  ;;  %v763_v0 = vpop.f32.mrf.mxu1 }
 0x14c   :  { %v899_v33 = vadd.f32 %v898_v29, %v1787_v5  ;;  %v973_v0 = vmul.f32 %v1799_v9, %v1799_v9  ;;  %v1035_v4 = vadd.f32 %v1034_v63, %v972_v61  ;;  %v974_v5 = vmul.f32 %v1811_v13, %v1811_v13 }
 0x14d   :  { %v1888_v7 = vpop.f32.mrf.mxu0  ;;  %v1890_v8 = vpop.f32.mrf.mxu1 }
 0x14e   :  { %835 = vst [vmem:[%s2167_s2 + $0x98] sm:$0xff] %v1888_v7  ;;  %867 = vst [vmem:[%s2167_s2 + $0x198] sm:$0xff] %v1890_v8  ;;  %v900_v37 = vadd.f32 %v899_v33, %v1799_v9  ;;  %v1036_v15 = vadd.f32 %v1035_v4, %v973_v0 }
 0x14f   :  { %v638_v41 = vpop.f32.mrf.mxu0  ;;  %v766_v16 = vpop.f32.mrf.mxu1 }
 0x150   :  { %v901_v41 = vadd.f32 %v900_v37, %v1811_v13  ;;  %v975_v16 = vmul.f32 %v1831_v23, %v1831_v23  ;;  %v1037_v20 = vadd.f32 %v1036_v15, %v974_v5  ;;  %v976_v13 = vmul.f32 %v1852_v21, %v1852_v21 }
 0x151   :  { %v1906_v27 = vpop.f32.mrf.mxu0  ;;  %v1908_v28 = vpop.f32.mrf.mxu1 }
 0x152   :  { %836 = vst [vmem:[%s2167_s2 + $0xa0] sm:$0xff] %v1906_v27  ;;  %868 = vst [vmem:[%s2167_s2 + $0x1a0] sm:$0xff] %v1908_v28  ;;  %v902_v45 = vadd.f32 %v901_v41, %v1831_v23  ;;  %v1038_v35 = vadd.f32 %v1037_v20, %v975_v16 }
 0x153   :  { %v643_v49 = vpop.f32.mrf.mxu0  ;;  %v771_v36 = vpop.f32.mrf.mxu1 }
 0x154   :  { %v903_v49 = vadd.f32 %v902_v45, %v1852_v21  ;;  %v977_v36 = vmul.f32 %v1870_v55, %v1870_v55  ;;  %v1039_v17 = vadd.f32 %v1038_v35, %v976_v13  ;;  %v978_v21 = vmul.f32 %v1888_v7, %v1888_v7 }
 0x155   :  { %v1924_v43 = vpop.f32.mrf.mxu0  ;;  %v1926_v44 = vpop.f32.mrf.mxu1 }
 0x156   :  { %837 = vst [vmem:[%s2167_s2 + $0xa8] sm:$0xff] %v1924_v43  ;;  %869 = vst [vmem:[%s2167_s2 + $0x1a8] sm:$0xff] %v1926_v44  ;;  %v904_v53 = vadd.f32 %v903_v49, %v1870_v55  ;;  %v1040_v48 = vadd.f32 %v1039_v17, %v977_v36 }
 0x157   :  { %v646_v57 = vpop.f32.mrf.mxu0  ;;  %v774_v51 = vpop.f32.mrf.mxu1 }
 0x158   :  { %v905_v57 = vadd.f32 %v904_v53, %v1888_v7  ;;  %v979_v51 = vmul.f32 %v1906_v27, %v1906_v27  ;;  %v1041_v29 = vadd.f32 %v1040_v48, %v978_v21  ;;  %v980_v7 = vmul.f32 %v1924_v43, %v1924_v43 }
 0x159   :  { %v649_v59 = vpop.f32.mrf.mxu0  ;;  %v1942_v60 = vpop.f32.mrf.mxu1 }
 0x15a   :  { %838 = vst [vmem:[%s2167_s2 + $0xb0] sm:$0xff] %v649_v59  ;;  %870 = vst [vmem:[%s2167_s2 + $0x1b0] sm:$0xff] %v1942_v60  ;;  %v906_v61 = vadd.f32 %v905_v57, %v1906_v27  ;;  %v1042_v0 = vadd.f32 %v1041_v29, %v979_v51 }
 0x15b   :  { %v651_v1 = vpop.f32.mrf.mxu0  ;;  %v779_v3 = vpop.f32.mrf.mxu1 }
 0x15c   :  { %v907_v1 = vadd.f32 %v906_v61, %v1924_v43  ;;  %v981_v3 = vmul.f32 %v649_v59, %v649_v59  ;;  %v1043_v37 = vadd.f32 %v1042_v0, %v980_v7 }
 0x15d   :  { %v652_v11 = vpop.f32.mrf.mxu0  ;;  %v1957_v12 = vpop.f32.mrf.mxu1 }
 0x15e   :  { %839 = vst [vmem:[%s2167_s2 + $0xb8] sm:$0xff] %v652_v11  ;;  %871 = vst [vmem:[%s2167_s2 + $0x1b8] sm:$0xff] %v1957_v12  ;;  %v908_v5 = vadd.f32 %v907_v1, %v649_v59  ;;  %v982_v15 = vmul.f32 %v652_v11, %v652_v11 }
 0x15f   :  { %v654_v9 = vpop.f32.mrf.mxu0  ;;  %v782_v19 = vpop.f32.mrf.mxu1 }
 0x160   :  { %v1044_v9 = vadd.f32 %v1043_v37, %v981_v3  ;;  %v909_v43 = vadd.f32 %v908_v5, %v652_v11 }
 0x161   :  { %v657_v31 = vpop.f32.mrf.mxu0  ;;  %v1972_v32 = vpop.f32.mrf.mxu1 }
 0x162   :  { %840 = vst [vmem:[%s2167_s2 + $0xc0] sm:$0xff] %v657_v31  ;;  %872 = vst [vmem:[%s2167_s2 + $0x1c0] sm:$0xff] %v1972_v32  ;;  %v983_v19 = vmul.f32 %v657_v31, %v657_v31  ;;  %v1045_v13 = vadd.f32 %v1044_v9, %v982_v15  ;;  %v910_v59 = vadd.f32 %v909_v43, %v657_v31 }
 0x163   :  { %v659_v23 = vpop.f32.mrf.mxu0  ;;  %v787_v39 = vpop.f32.mrf.mxu1 }
 0x164   :  { %v1046_v23 = vadd.f32 %v1045_v13, %v983_v19 }
 0x165   :  { %v660_v47 = vpop.f32.mrf.mxu0  ;;  %v1987_v25 = vpop.f32.mrf.mxu1 }
 0x166   :  { %841 = vst [vmem:[%s2167_s2 + $0xc8] sm:$0xff] %v660_v47  ;;  %873 = vst [vmem:[%s2167_s2 + $0x1c8] sm:$0xff] %v1987_v25  ;;  %v984_v35 = vmul.f32 %v660_v47, %v660_v47  ;;  %v911_v11 = vadd.f32 %v910_v59, %v660_v47 }
 0x167   :  { %v662_v55 = vpop.f32.mrf.mxu0  ;;  %v790_v52 = vpop.f32.mrf.mxu1 }
 0x168   :  { %v1047_v21 = vadd.f32 %v1046_v23, %v984_v35 }
 0x169   :  { %v665_v63 = vpop.f32.mrf.mxu0  ;;  %v2002_v33 = vpop.f32.mrf.mxu1 }
 0x16a   :  { %842 = vst [vmem:[%s2167_s2 + $0xd0] sm:$0xff] %v665_v63  ;;  %874 = vst [vmem:[%s2167_s2 + $0x1d0] sm:$0xff] %v2002_v33  ;;  %v985_v39 = vmul.f32 %v665_v63, %v665_v63  ;;  %v912_v31 = vadd.f32 %v911_v11, %v665_v63 }
 0x16b   :  { %v667_v27 = vpop.f32.mrf.mxu0  ;;  %v795_v4 = vpop.f32.mrf.mxu1 }
 0x16c   :  { %v1048_v55 = vadd.f32 %v1047_v21, %v985_v39  ;;  %v992_v39 = vmul.f32 %v1645_v22, %v1645_v22  ;;  %v993_v21 = vmul.f32 %v1657_v26, %v1657_v26 }
 0x16d   :  { %v668_v41 = vpop.f32.mrf.mxu0  ;;  %v2012_v16 = vpop.f32.mrf.mxu1 }
 0x16e   :  { %843 = vst [vmem:[%s2167_s2 + $0xd8] sm:$0xff] %v668_v41  ;;  %875 = vst [vmem:[%s2167_s2 + $0x1d8] sm:$0xff] %v2012_v16  ;;  %v986_v48 = vmul.f32 %v668_v41, %v668_v41  ;;  %v913_v47 = vadd.f32 %v912_v31, %v668_v41 }
 0x16f   :  { %v670_v20 = vpop.f32.mrf.mxu0  ;;  %v798_v45 = vpop.f32.mrf.mxu1 }
 0x170   :  { %v1049_v7 = vadd.f32 %v1048_v55, %v986_v48 }
 0x171   :  { %v673_v49 = vpop.f32.mrf.mxu0  ;;  %v2021_v36 = vpop.f32.mrf.mxu1 }
 0x172   :  { %844 = vst [vmem:[%s2167_s2 + $0xe0] sm:$0xff] %v673_v49  ;;  %876 = vst [vmem:[%s2167_s2 + $0x1e0] sm:$0xff] %v2021_v36  ;;  %v987_v52 = vmul.f32 %v673_v49, %v673_v49  ;;  %v914_v63 = vadd.f32 %v913_v47, %v673_v49  ;;  %v991_v49 = vmul.f32 %v1633_v18, %v1633_v18 }
 0x173   :  { %v675_v17 = vpop.f32.mrf.mxu0  ;;  %v803_v53 = vpop.f32.mrf.mxu1 }
 0x174   :  { %v1050_v27 = vadd.f32 %v1049_v7, %v987_v52 }
 0x175   :  { %v676_v57 = vpop.f32.mrf.mxu0  ;;  %v2030_v51 = vpop.f32.mrf.mxu1 }
 0x176   :  { %845 = vst [vmem:[%s2167_s2 + $0xe8] sm:$0xff] %v676_v57  ;;  %877 = vst [vmem:[%s2167_s2 + $0x1e8] sm:$0xff] %v2030_v51  ;;  %v988_v0 = vmul.f32 %v676_v57, %v676_v57  ;;  %v915_v4 = vadd.f32 %v914_v63, %v676_v57  ;;  %v994_v57 = vmul.f32 %v1669_v30, %v1669_v30 }
 0x177   :  { %v678_v29 = vpop.f32.mrf.mxu0  ;;  %v806_v61 = vpop.f32.mrf.mxu1 }
 0x178   :  { %v1051_v41 = vadd.f32 %v1050_v27, %v988_v0 }
 0x179   :  { %v681_v1 = vpop.f32.mrf.mxu0  ;;  %v2039_v3 = vpop.f32.mrf.mxu1 }
 0x17a   :  { %846 = vst [vmem:[%s2167_s2 + $0xf0] sm:$0xff] %v681_v1  ;;  %v989_v37 = vmul.f32 %v681_v1, %v681_v1  ;;  %878 = vst [vmem:[%s2167_s2 + $0x1f0] sm:$0xff] %v2039_v3  ;;  %v916_v9 = vadd.f32 %v915_v4, %v681_v1 }
 0x17b   :  { %v683_v5 = vpop.f32.mrf.mxu0  ;;  %v811_v15 = vpop.f32.mrf.mxu1 }
 0x17c   :  { %v1052_v20 = vadd.f32 %v1051_v41, %v989_v37 }
 0x17d   :  { %v684_v43 = vpop.f32.mrf.mxu0  ;;  %v2048_v19 = vpop.f32.mrf.mxu1 }
 0x17e   :  { %847 = vst [vmem:[%s2167_s2 + $0xf8] sm:$0xff] %v684_v43  ;;  %v917_v45 = vadd.f32 %v916_v9, %v684_v43  ;;  %v990_v13 = vmul.f32 %v684_v43, %v684_v43  ;;  %879 = vst [vmem:[%s2167_s2 + $0x1f8] sm:$0xff] %v2048_v19 }
 0x17f   :  { %v686_v59 = vpop.f32.mrf.mxu0  ;;  %v814_v35 = vpop.f32.mrf.mxu1 }
 0x180   :  { %v918_v23 = vadd.f32 %v917_v45, %v1633_v18  ;;  %v1053_v11 = vadd.f32 %v1052_v20, %v990_v13  ;;  %v995_v18 = vmul.f32 %v1681_v34, %v1681_v34 }
 0x182   :  { %v919_v17 = vadd.f32 %v918_v23, %v1645_v22  ;;  %v1054_v53 = vadd.f32 %v1053_v11, %v991_v49  ;;  %v996_v22 = vmul.f32 %v1693_v38, %v1693_v38 }
 0x184   :  { %v920_v31 = vadd.f32 %v919_v17, %v1657_v26  ;;  %v1055_v48 = vadd.f32 %v1054_v53, %v992_v39  ;;  %v997_v26 = vmul.f32 %v1705_v42, %v1705_v42 }
 0x186   :  { %v921_v55 = vadd.f32 %v920_v31, %v1669_v30  ;;  %v1056_v47 = vadd.f32 %v1055_v48, %v993_v21  ;;  %v998_v30 = vmul.f32 %v1717_v46, %v1717_v46  ;;  %v1008_v21 = vmul.f32 %v1854_v40, %v1854_v40 }
 0x188   :  { %v922_v52 = vadd.f32 %v921_v55, %v1681_v34  ;;  %v1057_v29 = vadd.f32 %v1056_v47, %v994_v57  ;;  %v999_v34 = vmul.f32 %v1729_v50, %v1729_v50  ;;  %v1009_v57 = vmul.f32 %v1872_v56, %v1872_v56 }
 0x189   :  { %v1010_v47 = vmul.f32 %v1890_v8, %v1890_v8 }
 0x18a   :  { %v923_v61 = vadd.f32 %v922_v52, %v1693_v38  ;;  %v1058_v7 = vadd.f32 %v1057_v29, %v995_v18  ;;  %v1000_v38 = vmul.f32 %v1741_v54, %v1741_v54  ;;  %v1011_v52 = vmul.f32 %v1908_v28, %v1908_v28 }
 0x18c   :  { %v924_v63 = vadd.f32 %v923_v61, %v1705_v42  ;;  %v1059_v0 = vadd.f32 %v1058_v7, %v996_v22  ;;  %v1001_v42 = vmul.f32 %v1753_v58, %v1753_v58  ;;  %v1012_v22 = vmul.f32 %v1926_v44, %v1926_v44 }
 0x18d   :  { %v1013_v7 = vmul.f32 %v1942_v60, %v1942_v60 }
 0x18e   :  { %v925_v1 = vadd.f32 %v924_v63, %v1717_v46  ;;  %v1060_v27 = vadd.f32 %v1059_v0, %v997_v26  ;;  %v1002_v46 = vmul.f32 %v1765_v62, %v1765_v62  ;;  %v1014_v63 = vmul.f32 %v1957_v12, %v1957_v12 }
 0x190   :  { %v1061_v4 = vadd.f32 %v1060_v27, %v998_v30  ;;  %v926_v37 = vadd.f32 %v925_v1, %v1729_v50  ;;  %v1003_v50 = vmul.f32 %v1777_v2, %v1777_v2  ;;  %v1015_v30 = vmul.f32 %v1972_v32, %v1972_v32 }
 0x191   :  { %v1016_v27 = vmul.f32 %v1987_v25, %v1987_v25 }
 0x192   :  { %v927_v5 = vadd.f32 %v926_v37, %v1741_v54  ;;  %v1062_v15 = vadd.f32 %v1061_v4, %v999_v34  ;;  %v1004_v54 = vmul.f32 %v1789_v6, %v1789_v6  ;;  %v1017_v4 = vmul.f32 %v2002_v33, %v2002_v33 }
 0x194   :  { %v928_v41 = vadd.f32 %v927_v5, %v1753_v58  ;;  %v1063_v9 = vadd.f32 %v1062_v15, %v1000_v38  ;;  %v1005_v58 = vmul.f32 %v1801_v10, %v1801_v10  ;;  %v1018_v38 = vmul.f32 %v2012_v16, %v2012_v16 }
 0x195   :  { %v1019_v15 = vmul.f32 %v2021_v36, %v2021_v36 }
 0x196   :  { %v929_v43 = vadd.f32 %v928_v41, %v1765_v62  ;;  %v1064_v20 = vadd.f32 %v1063_v9, %v1001_v42  ;;  %v1006_v62 = vmul.f32 %v1813_v14, %v1813_v14  ;;  %v1020_v41 = vmul.f32 %v2030_v51, %v2030_v51 }
 0x198   :  { %v930_v45 = vadd.f32 %v929_v43, %v1777_v2  ;;  %v1065_v13 = vadd.f32 %v1064_v20, %v1002_v46  ;;  %v1007_v2 = vmul.f32 %v1833_v24, %v1833_v24  ;;  %v1021_v46 = vmul.f32 %v2039_v3, %v2039_v3 }
 0x199   :  { %v1022_v20 = vmul.f32 %v2048_v19, %v2048_v19 }
 0x19a   :  { %v931_v59 = vadd.f32 %v930_v45, %v1789_v6  ;;  %v1066_v35 = vadd.f32 %v1065_v13, %v1003_v50 }
 0x19c   :  { %v932_v49 = vadd.f32 %v931_v59, %v1801_v10  ;;  %v1067_v23 = vadd.f32 %v1066_v35, %v1004_v54 }
 0x19e   :  { %v933_v11 = vadd.f32 %v932_v49, %v1813_v14  ;;  %v1068_v39 = vadd.f32 %v1067_v23, %v1005_v58 }
 0x1a0   :  { %v934_v17 = vadd.f32 %v933_v11, %v1833_v24  ;;  %v1069_v53 = vadd.f32 %v1068_v39, %v1006_v62 }
 0x1a2   :  { %v935_v6 = vadd.f32 %v934_v17, %v1854_v40  ;;  %v1070_v31 = vadd.f32 %v1069_v53, %v1007_v2 }
 0x1a4   :  { %v1071_v10 = vadd.f32 %v1070_v31, %v1008_v21  ;;  %v936_v48 = vadd.f32 %v935_v6, %v1872_v56 }
 0x1a6   :  { %v1072_v14 = vadd.f32 %v1071_v10, %v1009_v57  ;;  %v937_v55 = vadd.f32 %v936_v48, %v1890_v8 }
 0x1a8   :  { %v1073_v24 = vadd.f32 %v1072_v14, %v1010_v47  ;;  %v938_v18 = vadd.f32 %v937_v55, %v1908_v28 }
 0x1aa   :  { %v1074_v40 = vadd.f32 %v1073_v24, %v1011_v52  ;;  %v939_v29 = vadd.f32 %v938_v18, %v1926_v44 }
 0x1ac   :  { %v1075_v61 = vadd.f32 %v1074_v40, %v1012_v22  ;;  %v940_v56 = vadd.f32 %v939_v29, %v1942_v60 }
 0x1ae   :  { %v1076_v26 = vadd.f32 %v1075_v61, %v1013_v7  ;;  %v941_v8 = vadd.f32 %v940_v56, %v1957_v12 }
 0x1b0   :  { %v1077_v0 = vadd.f32 %v1076_v26, %v1014_v63  ;;  %v942_v28 = vadd.f32 %v941_v8, %v1972_v32 }
 0x1b2   :  { %v1078_v1 = vadd.f32 %v1077_v0, %v1015_v30  ;;  %v943_v44 = vadd.f32 %v942_v28, %v1987_v25 }
 0x1b4   :  { %v1079_v34 = vadd.f32 %v1078_v1, %v1016_v27  ;;  %v944_v60 = vadd.f32 %v943_v44, %v2002_v33 }
 0x1b6   :  { %v1080_v37 = vadd.f32 %v1079_v34, %v1017_v4  ;;  %v945_v12 = vadd.f32 %v944_v60, %v2012_v16 }
 0x1b8   :  { %v1081_v5 = vadd.f32 %v1080_v37, %v1018_v38  ;;  %v946_v32 = vadd.f32 %v945_v12, %v2021_v36 }
 0x1ba   :  { %v1082_v42 = vadd.f32 %v1081_v5, %v1019_v15  ;;  %v947_v25 = vadd.f32 %v946_v32, %v2030_v51 }
 0x1bc   :  { %v1083_v9 = vadd.f32 %v1082_v42, %v1020_v41  ;;  %v948_v33 = vadd.f32 %v947_v25, %v2039_v3  ;;  %v886_v3 = vld [vmem:[%s2168_s3] sm:$0x1] }
 0x1be   :  { %v1084_v43 = vadd.f32 %v1083_v9, %v1021_v46  ;;  %v949_v16 = vadd.f32 %v948_v33, %v2048_v19  ;;  %v958_v19 = vld [vmem:[%s2169_s4] sm:$0x1] }
 0x1c0   :  { %v950_v50 = vrot.slane %v949_v16, 4  ;;  %v1085_v36 = vadd.f32 %v1084_v43, %v1022_v20 }
 0x1c2   :  { %v951_v45 = vadd.f32 %v950_v50, %v949_v16  ;;  %v1086_v13 = vrot.slane %v1085_v36, 4 }
 0x1c4   :  { %v952_v54 = vrot.slane %v951_v45, 2  ;;  %v1087_v59 = vadd.f32 %v1086_v13, %v1085_v36 }
 0x1c6   :  { %v953_v35 = vadd.f32 %v952_v54, %v951_v45  ;;  %v1088_v51 = vrot.slane %v1087_v59, 2 }
 0x1c8   :  { %v954_v58 = vrot.slane %v953_v35, 1  ;;  %v1089_v49 = vadd.f32 %v1088_v51, %v1087_v59 }
 0x1ca   :  { %v955_v23 = vadd.f32 %v954_v58, %v953_v35  ;;  %v1090_v62 = vrot.slane %v1089_v49, 1 }
 0x1cc   :  { %v956_v11 = vadd.f32 %v955_v23, %v886_v3  ;;  %v1091_v39 = vadd.f32 %v1090_v62, %v1089_v49 }
 0x1ce   :  { %957 = vst [vmem:[%s2168_s3] sm:$0x1] %v956_v11  ;;  %v1092_v2 = vadd.f32 %v1091_v39, %v958_v19 }
 0x1d0   :  { %1093 = vst [vmem:[%s2169_s4] sm:$0x1] %v1092_v2 }

// kernel: encoder_forward.11
= control target key start
LH: loop header
LB: loop body
LE: loop exit
PB: predicated region body
PF: predicated region fallthrough
CT: control target
= control target key end

     0   :  { %s391_s0 = inlined_call_operand.vmem [shape: f32[128,128], index: 0, kind: input, shape index: {}]   ;;  %s392_s1 = inlined_call_operand.vmem [shape: f32[1,128], index: 1, kind: input, shape index: {}]   ;;  %s393_s2 = inlined_call_operand.vmem [shape: f32[1,128], index: 2, kind: input, shape index: {}]   ;;  %s394_s3 = inlined_call_operand.vmem [shape: bf16[128,128], index: 3, kind: output, shape index: {}]  }
   0x1   :  { %v14_v0 = vld [vmem:[%s391_s0] sm:$0xff]  ;;  %v15_v1 = vld [vmem:[%s391_s0 + $0x8] sm:$0xff]  ;;  %v16_v6 = vld [vmem:[%s391_s0 + $0x10] sm:$0xff] }
   0x2   :  { %v286_v2 = vld [vmem:[%s392_s1] ss:$0 sm:$0xff]  ;;  %v17_v7 = vld [vmem:[%s391_s0 + $0x18] sm:$0xff]  ;;  %v19_v11 = vld [vmem:[%s391_s0 + $0x28] sm:$0xff] }
   0x3   :  { %v37_v3 = vmul.f32 %v286_v2, %v14_v0  ;;  %v38_v4 = vmul.f32 %v286_v2, %v15_v1  ;;  %v293_v5 = vld [vmem:[%s393_s2] ss:$0 sm:$0xff]  ;;  %v39_v8 = vmul.f32 %v286_v2, %v16_v6  ;;  %v40_v9 = vmul.f32 %v286_v2, %v17_v7  ;;  %v20_v12 = vld [vmem:[%s391_s0 + $0x30] sm:$0xff]  ;;  %v21_v17 = vld [vmem:[%s391_s0 + $0x38] sm:$0xff] }
   0x4   :  { %v18_v10 = vld [vmem:[%s391_s0 + $0x20] sm:$0xff]  ;;  %v42_v16 = vmul.f32 %v286_v2, %v19_v11  ;;  %v43_v20 = vmul.f32 %v286_v2, %v20_v12  ;;  %v44_v21 = vmul.f32 %v286_v2, %v21_v17  ;;  %v23_v27 = vld [vmem:[%s391_s0 + $0x48] sm:$0xff]  ;;  %v24_v32 = vld [vmem:[%s391_s0 + $0x50] sm:$0xff] }
   0x5   :  { %v60_v13 = vadd.f32 %v293_v5, %v37_v3  ;;  %v61_v14 = vadd.f32 %v293_v5, %v38_v4  ;;  %v41_v15 = vmul.f32 %v286_v2, %v18_v10  ;;  %v62_v18 = vadd.f32 %v293_v5, %v39_v8  ;;  %v22_v22 = vld [vmem:[%s391_s0 + $0x40] sm:$0xff]  ;;  %v25_v33 = vld [vmem:[%s391_s0 + $0x58] sm:$0xff]  ;;  %v27_v39 = vld [vmem:[%s391_s0 + $0x68] sm:$0xff] }
   0x6   :  { %v63_v19 = vadd.f32 %v293_v5, %v40_v9  ;;  %v65_v26 = vadd.f32 %v293_v5, %v42_v16  ;;  %v66_v30 = vadd.f32 %v293_v5, %v43_v20  ;;  %v67_v31 = vadd.f32 %v293_v5, %v44_v21  ;;  %v26_v38 = vld [vmem:[%s391_s0 + $0x60] sm:$0xff]  ;;  %v28_v44 = vld [vmem:[%s391_s0 + $0x70] sm:$0xff]  ;;  %v29_v49 = vld [vmem:[%s391_s0 + $0x78] sm:$0xff] }
   0x7   :  { %v76_v23 = vmax.f32 %v60_v13, 0.0  ;;  %v77_v24 = vmax.f32 %v61_v14, 0.0  ;;  %v64_v25 = vadd.f32 %v293_v5, %v41_v15  ;;  %v78_v28 = vmax.f32 %v62_v18, 0.0 }
   0x8   :  { %v79_v29 = vmax.f32 %v63_v19, 0.0  ;;  %v81_v36 = vmax.f32 %v65_v26, 0.0  ;;  %v45_v37 = vmul.f32 %v286_v2, %v22_v22  ;;  %v82_v41 = vmax.f32 %v66_v30, 0.0 }
   0x9   :  { %v213_v34 = vpack.c.bf16 %v77_v24, %v76_v23  ;;  %v80_v35 = vmax.f32 %v64_v25, 0.0  ;;  %v83_v42 = vmax.f32 %v67_v31, 0.0  ;;  %v46_v43 = vmul.f32 %v286_v2, %v23_v27 }
   0xa   :  { %v218_v40 = vpack.c.bf16 %v79_v29, %v78_v28  ;;  %v68_v46 = vadd.f32 %v293_v5, %v45_v37  ;;  %v47_v47 = vmul.f32 %v286_v2, %v24_v32  ;;  %v48_v48 = vmul.f32 %v286_v2, %v25_v33 }
   0xb   :  { %214 = vst [vmem:[%s394_s3] sm:$0xff] %v213_v34   ;;  %v223_v45 = vpack.c.bf16 %v81_v36, %v80_v35  ;;  %v228_v50 = vpack.c.bf16 %v83_v42, %v82_v41  ;;  %v69_v51 = vadd.f32 %v293_v5, %v46_v43  ;;  %v49_v52 = vmul.f32 %v286_v2, %v26_v38 }
   0xc   :  { %250 = vst [vmem:[%s394_s3 + $0x8] sm:$0xff] %v218_v40   ;;  %v50_v53 = vmul.f32 %v286_v2, %v27_v39  ;;  %v84_v54 = vmax.f32 %v68_v46, 0.0  ;;  %v70_v55 = vadd.f32 %v293_v5, %v47_v47  ;;  %v71_v56 = vadd.f32 %v293_v5, %v48_v48 }
   0xd   :  { %251 = vst [vmem:[%s394_s3 + $0x10] sm:$0xff] %v223_v45   ;;  %v51_v57 = vmul.f32 %v286_v2, %v28_v44  ;;  %252 = vst [vmem:[%s394_s3 + $0x18] sm:$0xff] %v228_v50   ;;  %v85_v58 = vmax.f32 %v69_v51, 0.0  ;;  %v72_v59 = vadd.f32 %v293_v5, %v49_v52  ;;  %v52_v61 = vmul.f32 %v286_v2, %v29_v49 }
   0xe   :  { %v73_v60 = vadd.f32 %v293_v5, %v50_v53  ;;  %v86_v62 = vmax.f32 %v70_v55, 0.0  ;;  %v87_v63 = vmax.f32 %v71_v56, 0.0 }
   0xf   :  { %v74_v0 = vadd.f32 %v293_v5, %v51_v57  ;;  %v233_v1 = vpack.c.bf16 %v85_v58, %v84_v54  ;;  %v88_v3 = vmax.f32 %v72_v59, 0.0  ;;  %v75_v6 = vadd.f32 %v293_v5, %v52_v61 }
  0x10   :  { %v89_v4 = vmax.f32 %v73_v60, 0.0  ;;  %v238_v7 = vpack.c.bf16 %v87_v63, %v86_v62 }
  0x11   :  { %v90_v8 = vmax.f32 %v74_v0, 0.0  ;;  %253 = vst [vmem:[%s394_s3 + $0x20] sm:$0xff] %v233_v1   ;;  %v91_v10 = vmax.f32 %v75_v6, 0.0 }
  0x12   :  { %v243_v9 = vpack.c.bf16 %v89_v4, %v88_v3  ;;  %254 = vst [vmem:[%s394_s3 + $0x28] sm:$0xff] %v238_v7  }
  0x13   :  { %v248_v2 = vpack.c.bf16 %v91_v10, %v90_v8 }
  0x14   :  { %255 = vst [vmem:[%s394_s3 + $0x30] sm:$0xff] %v243_v9  }
  0x15   :  { %256 = vst [vmem:[%s394_s3 + $0x38] sm:$0xff] %v248_v2  }

// kernel: encoder_forward.10
= control target key start
LH: loop header
LB: loop body
LE: loop exit
PB: predicated region body
PF: predicated region fallthrough
CT: control target
= control target key end

     0   :  { %s2907_s1 = inlined_call_operand.vmem [shape: bf16[1152,128], index: 1, kind: input, shape index: {}]   ;;  %s2908_s0 = inlined_call_operand.vmem [shape: bf16[128,1152], index: 0, kind: input, shape index: {}]   ;;  %s2909_s3 = inlined_call_operand.vmem [shape: f32[1,128], index: 3, kind: output, shape index: {1}]   ;;  %s2910_s4 = inlined_call_operand.vmem [shape: f32[1,128], index: 4, kind: output, shape index: {2}]   ;;  %s2911_s2 = inlined_call_operand.vmem [shape: f32[128,128], index: 2, kind: output, shape index: {0}]  }
   0x1   :  { %v2087_v0 = vld [vmem:[%s2907_s1 + $0x78] sm:$0xff]   ;;  %v2091_v4 = vld [vmem:[%s2907_s1 + $0x70] sm:$0xff]   ;;  %v2095_v8 = vld [vmem:[%s2907_s1 + $0x68] sm:$0xff]  }
   0x2   :  { %v2088_v1 = vld [vmem:[%s2907_s1 + $0xf8] sm:$0xff]   ;;  %1766 = vmatprep.subr.bf16.mxu0 %v2087_v0  ;;  %v2092_v5 = vld [vmem:[%s2907_s1 + $0xf0] sm:$0xff]   ;;  %v2096_v9 = vld [vmem:[%s2907_s1 + $0xe8] sm:$0xff]  }
   0x3   :  { %v2089_v2 = vld [vmem:[%s2907_s1 + $0x38] sm:$0xff]   ;;  %1830 = vmatprep.subr.bf16.mxu1 %v2088_v1  ;;  %v2093_v6 = vld [vmem:[%s2907_s1 + $0x30] sm:$0xff]   ;;  %v2097_v10 = vld [vmem:[%s2907_s1 + $0x28] sm:$0xff]  }
   0x4   :  { %v2090_v3 = vld [vmem:[%s2907_s1 + $0xb8] sm:$0xff]   ;;  %1767 = vmatpush3.bf16.msra.mxu0 %v2089_v2  ;;  %v2094_v7 = vld [vmem:[%s2907_s1 + $0xb0] sm:$0xff]   ;;  %v2098_v11 = vld [vmem:[%s2907_s1 + $0xa8] sm:$0xff]  }
   0x5   :  { %1831 = vmatpush3.bf16.msra.mxu1 %v2090_v3  ;;  %1768 = vmatprep.subr.bf16.mxu0 %v2091_v4  ;;  %v2099_v12 = vld [vmem:[%s2907_s1 + $0x60] sm:$0xff]   ;;  %v2103_v16 = vld [vmem:[%s2907_s1 + $0x58] sm:$0xff]   ;;  %v2107_v20 = vld [vmem:[%s2907_s1 + $0x50] sm:$0xff]  }
   0x6   :  { %1832 = vmatprep.subr.bf16.mxu1 %v2092_v5  ;;  %v2100_v13 = vld [vmem:[%s2907_s1 + $0xe0] sm:$0xff]   ;;  %v2104_v17 = vld [vmem:[%s2907_s1 + $0xd8] sm:$0xff]   ;;  %v2108_v21 = vld [vmem:[%s2907_s1 + $0xd0] sm:$0xff]  }
   0x7   :  { %v2101_v14 = vld [vmem:[%s2907_s1 + $0x20] sm:$0xff]   ;;  %v2105_v18 = vld [vmem:[%s2907_s1 + $0x18] sm:$0xff]   ;;  %v2109_v22 = vld [vmem:[%s2907_s1 + $0x10] sm:$0xff]  }
   0x8   :  { %1769 = vmatpush3.bf16.msra.mxu0 %v2093_v6  ;;  %v2102_v15 = vld [vmem:[%s2907_s1 + $0xa0] sm:$0xff]   ;;  %v2106_v19 = vld [vmem:[%s2907_s1 + $0x98] sm:$0xff]   ;;  %v2110_v23 = vld [vmem:[%s2907_s1 + $0x90] sm:$0xff]  }
   0x9   :  { %1833 = vmatpush3.bf16.msra.mxu1 %v2094_v7  ;;  %1770 = vmatprep.subr.bf16.mxu0 %v2095_v8  ;;  %v2111_v24 = vld [vmem:[%s2907_s1 + $0x48] sm:$0xff]   ;;  %v2115_v28 = vld [vmem:[%s2907_s1 + $0x40] sm:$0xff]   ;;  %v2125_v36 = vld [vmem:[%s2907_s1 + $0x178] sm:$0xff]  }
   0xa   :  { %1834 = vmatprep.subr.bf16.mxu1 %v2096_v9  ;;  %v2112_v25 = vld [vmem:[%s2907_s1 + $0xc8] sm:$0xff]   ;;  %v2116_v29 = vld [vmem:[%s2907_s1 + $0xc0] sm:$0xff]   ;;  %v2126_v37 = vld [vmem:[%s2907_s1 + $0x138] sm:$0xff]  }
   0xb   :  { %v2113_v26 = vld [vmem:[%s2907_s1 + $0x8] sm:$0xff]   ;;  %v2117_v30 = vld [vmem:[%s2907_s1] sm:$0xff]   ;;  %v2129_v39 = vld [vmem:[%s2908_s0 + $0x54] ss:$36 sps:$4 sm:$0xff]  }
   0xc   :  { %1771 = vmatpush3.bf16.msra.mxu0 %v2097_v10  ;;  %v2114_v27 = vld [vmem:[%s2907_s1 + $0x88] sm:$0xff]   ;;  %v2118_v31 = vld [vmem:[%s2907_s1 + $0x80] sm:$0xff]   ;;  %v2132_v41 = vld [vmem:[%s2908_s0 + $0x50] ss:$36 sps:$4 sm:$0xff]  }
   0xd   :  { %1835 = vmatpush3.bf16.msra.mxu1 %v2098_v11  ;;  %1772 = vmatprep.subr.bf16.mxu0 %v2099_v12  ;;  %v2119_v32 = vld [vmem:[%s2908_s0] ss:$36 sps:$4 sm:$0xff]   ;;  %v2122_v34 = vld [vmem:[%s2908_s0 + $0x8] ss:$36 sps:$4 sm:$0xff]   ;;  %v2133_v42 = vld [vmem:[%s2907_s1 + $0x170] sm:$0xff]  }
   0xe   :  { %1836 = vmatprep.subr.bf16.mxu1 %v2100_v13  ;;  %v2121_v33 = vld [vmem:[%s2908_s0 + $0x4] ss:$36 sps:$4 sm:$0xff]   ;;  %v2124_v35 = vld [vmem:[%s2908_s0 + $0xc] ss:$36 sps:$4 sm:$0xff]   ;;  %v2135_v44 = vld [vmem:[%s2908_s0 + $0x94] ss:$36 sps:$4 sm:$0xff]  }
   0xf   :  { %1071 = vmatprep.mubr.bf16.mxu0 %v2121_v33  ;;  %1168 = vmatprep.mubr.bf16.mxu1 %v2124_v35  ;;  %v2127_v38 = vld [vmem:[%s2908_s0 + $0x4c] ss:$36 sps:$4 sm:$0xff]   ;;  %v2137_v45 = vld [vmem:[%s2908_s0 + $0x9c] ss:$36 sps:$4 sm:$0xff]   ;;  %v2147_v53 = vld [vmem:[%s2908_s0 + $0xe4] ss:$36 sps:$4 sm:$0xff]  }
  0x10   :  { %1773 = vmatpush3.bf16.msra.mxu0 %v2101_v14  ;;  %v2131_v40 = vld [vmem:[%s2908_s0 + $0x48] ss:$36 sps:$4 sm:$0xff]   ;;  %v2134_v43 = vld [vmem:[%s2907_s1 + $0x130] sm:$0xff]   ;;  %v2142_v47 = vld [vmem:[%s2907_s1 + $0x1f8] sm:$0xff]  }
  0x11   :  { %1837 = vmatpush3.bf16.msra.mxu1 %v2102_v15  ;;  %1774 = vmatprep.subr.bf16.mxu0 %v2103_v16  ;;  %v2141_v46 = vld [vmem:[%s2907_s1 + $0x168] sm:$0xff]   ;;  %v2139_v48 = vld [vmem:[%s2908_s0 + $0x90] ss:$36 sps:$4 sm:$0xff]   ;;  %v2144_v50 = vld [vmem:[%s2907_s1 + $0x1b8] sm:$0xff]  }
  0x12   :  { %1838 = vmatprep.subr.bf16.mxu1 %v2104_v17  ;;  %v2143_v49 = vld [vmem:[%s2907_s1 + $0x128] sm:$0xff]   ;;  %v2140_v51 = vld [vmem:[%s2908_s0 + $0x98] ss:$36 sps:$4 sm:$0xff]   ;;  %v2151_v54 = vld [vmem:[%s2907_s1 + $0x160] sm:$0xff]  }
  0x13   :  { %v2145_v52 = vld [vmem:[%s2908_s0 + $0xdc] ss:$36 sps:$4 sm:$0xff]   ;;  %v2152_v55 = vld [vmem:[%s2907_s1 + $0x1f0] sm:$0xff]   ;;  %v2155_v60 = vld [vmem:[%s2908_s0 + $0x124] ss:$36 sps:$4 sm:$0xff]  }
  0x14   :  { %1775 = vmatpush3.bf16.msra.mxu0 %v2105_v18  ;;  %v2153_v56 = vld [vmem:[%s2907_s1 + $0x120] sm:$0xff]   ;;  %v2154_v57 = vld [vmem:[%s2907_s1 + $0x1b0] sm:$0xff]   ;;  %v2149_v58 = vld [vmem:[%s2908_s0 + $0xd8] ss:$36 sps:$4 sm:$0xff]  }
  0x15   :  { %1839 = vmatpush3.bf16.msra.mxu1 %v2106_v19  ;;  %1776 = vmatprep.subr.bf16.mxu0 %v2107_v20  ;;  %v2150_v59 = vld [vmem:[%s2908_s0 + $0xe0] ss:$36 sps:$4 sm:$0xff]   ;;  %v2157_v61 = vld [vmem:[%s2908_s0 + $0x12c] ss:$36 sps:$4 sm:$0xff]   ;;  %v2161_v62 = vld [vmem:[%s2907_s1 + $0x158] sm:$0xff]  }
  0x16   :  { %1840 = vmatprep.subr.bf16.mxu1 %v2108_v21  ;;  %v2162_v63 = vld [vmem:[%s2907_s1 + $0x1e8] sm:$0xff]   ;;  %v2163_v0 = vld [vmem:[%s2907_s1 + $0x118] sm:$0xff]   ;;  %v2159_v2 = vld [vmem:[%s2908_s0 + $0x120] ss:$36 sps:$4 sm:$0xff]  }
  0x17   :  { %v2164_v1 = vld [vmem:[%s2907_s1 + $0x1a8] sm:$0xff]   ;;  %v2167_v5 = vld [vmem:[%s2908_s0 + $0x174] ss:$36 sps:$4 sm:$0xff]   ;;  %v2172_v7 = vld [vmem:[%s2907_s1 + $0x1e0] sm:$0xff]  }
  0x18   :  { %1777 = vmatpush3.bf16.msra.mxu0 %v2109_v22  ;;  %v2160_v3 = vld [vmem:[%s2908_s0 + $0x128] ss:$36 sps:$4 sm:$0xff]   ;;  %v2171_v6 = vld [vmem:[%s2907_s1 + $0x150] sm:$0xff]   ;;  %v2174_v9 = vld [vmem:[%s2907_s1 + $0x1a0] sm:$0xff]  }
  0x19   :  { %1841 = vmatpush3.bf16.msra.mxu1 %v2110_v23  ;;  %1778 = vmatprep.subr.bf16.mxu0 %v2111_v24  ;;  %v2165_v4 = vld [vmem:[%s2908_s0 + $0x16c] ss:$36 sps:$4 sm:$0xff]   ;;  %v2175_v12 = vld [vmem:[%s2908_s0 + $0x1b4] ss:$36 sps:$4 sm:$0xff]   ;;  %v2177_v14 = vld [vmem:[%s2908_s0 + $0x1bc] ss:$36 sps:$4 sm:$0xff]  }
  0x1a   :  { %1842 = vmatprep.subr.bf16.mxu1 %v2112_v25  ;;  %v2173_v8 = vld [vmem:[%s2907_s1 + $0x110] sm:$0xff]   ;;  %v2169_v10 = vld [vmem:[%s2908_s0 + $0x168] ss:$36 sps:$4 sm:$0xff]   ;;  %v2182_v15 = vld [vmem:[%s2907_s1 + $0x1d8] sm:$0xff]  }
  0x1b   :  { %v2170_v11 = vld [vmem:[%s2908_s0 + $0x170] ss:$36 sps:$4 sm:$0xff]   ;;  %v2181_v13 = vld [vmem:[%s2907_s1 + $0x148] sm:$0xff]   ;;  %v2184_v17 = vld [vmem:[%s2907_s1 + $0x198] sm:$0xff]  }
  0x1c   :  { %1779 = vmatpush3.bf16.msra.mxu0 %v2113_v26  ;;  %v2183_v16 = vld [vmem:[%s2907_s1 + $0x108] sm:$0xff]   ;;  %v2185_v18 = vld [vmem:[%s2907_s1 + $0x1d0] sm:$0xff]   ;;  %v2180_v21 = vld [vmem:[%s2908_s0 + $0x1b8] ss:$36 sps:$4 sm:$0xff]  }
  0x1d   :  { %1843 = vmatpush3.bf16.msra.mxu1 %v2114_v27  ;;  %1780 = vmatprep.subr.bf16.mxu0 %v2115_v28  ;;  %v2186_v19 = vld [vmem:[%s2907_s1 + $0x190] sm:$0xff]   ;;  %v2187_v22 = vld [vmem:[%s2908_s0 + $0x1fc] ss:$36 sps:$4 sm:$0xff]   ;;  %v2189_v23 = vld [vmem:[%s2908_s0 + $0x204] ss:$36 sps:$4 sm:$0xff]  }
  0x1e   :  { %1844 = vmatprep.subr.bf16.mxu1 %v2116_v29  ;;  %v2179_v20 = vld [vmem:[%s2908_s0 + $0x1b0] ss:$36 sps:$4 sm:$0xff]   ;;  %v2193_v24 = vld [vmem:[%s2907_s1 + $0x140] sm:$0xff]   ;;  %v2194_v25 = vld [vmem:[%s2907_s1 + $0x1c8] sm:$0xff]  }
  0x1f   :  { %v2195_v26 = vld [vmem:[%s2907_s1 + $0x100] sm:$0xff]   ;;  %v2196_v27 = vld [vmem:[%s2907_s1 + $0x188] sm:$0xff]   ;;  %v2191_v29 = vld [vmem:[%s2908_s0 + $0x1f8] ss:$36 sps:$4 sm:$0xff]  }
  0x20   :  { %1781 = vmatpush3.bf16.msra.mxu0 %v2117_v30  ;;  %v2197_v28 = vld [vmem:[%s2907_s1 + $0x1c0] sm:$0xff]   ;;  %v2201_v33 = vld [vmem:[%s2908_s0 + $0x14] ss:$36 sps:$4 sm:$0xff]  }
  0x21   :  { %1845 = vmatpush3.bf16.msra.mxu1 %v2118_v31  ;;  %1894 = vmatprep.subr.bf16.mxu0 %v2125_v36  ;;  %v2192_v30 = vld [vmem:[%s2908_s0 + $0x200] ss:$36 sps:$4 sm:$0xff]   ;;  %v2199_v35 = vld [vmem:[%s2908_s0 + $0x10] ss:$36 sps:$4 sm:$0xff]   ;;  %v2202_v36 = vld [vmem:[%s2908_s0 + $0x18] ss:$36 sps:$4 sm:$0xff]  }
  0x22   :  { %1958 = vmatprep.subr.bf16.mxu1 %v2142_v47  ;;  %v2198_v31 = vld [vmem:[%s2907_s1 + $0x180] sm:$0xff]  }
  0x23   :  { %1072 = vmatmul.mubr.bf16.vlgmr.msra.gmra.mxu0 %v2119_v32  ;;  %v2205_v32 = vld [vmem:[%s2907_s1 + $0x238] sm:$0xff]   ;;  %v2217_v47 = vld [vmem:[%s2908_s0 + $0xa0] ss:$36 sps:$4 sm:$0xff]  }
  0x24   :  { %1169 = vmatmul.mubr.bf16.vlgmr.msra.gmra.mxu1 %v2122_v34  ;;  %1895 = vmatpush3.bf16.msra.mxu0 %v2126_v37  ;;  %v2204_v34 = vld [vmem:[%s2908_s0 + $0x1c] ss:$36 sps:$4 sm:$0xff]  }
  0x25   :  { %1079 = vmatprep.mubr.bf16.mxu0 %v2127_v38  ;;  %1176 = vmatprep.mubr.bf16.mxu1 %v2129_v39  ;;  %v2206_v37 = vld [vmem:[%s2908_s0 + $0x5c] ss:$36 sps:$4 sm:$0xff]   ;;  %v2208_v38 = vld [vmem:[%s2908_s0 + $0x64] ss:$36 sps:$4 sm:$0xff]   ;;  %v2212_v39 = vld [vmem:[%s2907_s1 + $0x230] sm:$0xff]  }
  0x26   :  { %1896 = vmatprep.subr.bf16.mxu0 %v2133_v42  ;;  %1959 = vmatpush3.bf16.msra.mxu1 %v2144_v50  ;;  %v2211_v42 = vld [vmem:[%s2908_s0 + $0x60] ss:$36 sps:$4 sm:$0xff]   ;;  %v2222_v50 = vld [vmem:[%s2908_s0 + $0xf4] ss:$36 sps:$4 sm:$0xff]  }
  0x27   :  { %1960 = vmatprep.subr.bf16.mxu1 %v2152_v55  ;;  %v2227_v55 = vld [vmem:[%s2908_s0 + $0x134] ss:$36 sps:$4 sm:$0xff]  }
  0x28   :  { %1897 = vmatpush3.bf16.msra.mxu0 %v2134_v43  ;;  %v2213_v43 = vld [vmem:[%s2908_s0 + $0xa4] ss:$36 sps:$4 sm:$0xff]  }
  0x29   :  { %1898 = vmatprep.subr.bf16.mxu0 %v2141_v46  ;;  %v2233_v46 = vld [vmem:[%s2907_s1 + $0x218] sm:$0xff]  }
  0x2a   :  { %1961 = vmatpush3.bf16.msra.mxu1 %v2154_v57  ;;  %v2254_v57 = vld [vmem:[%s2907_s1 + $0x200] sm:$0xff]  }
  0x2b   :  { %1080 = vmatmul.mubr.bf16.gmra.mxu0 %v2131_v40  ;;  %1962 = vmatprep.subr.bf16.mxu1 %v2162_v63  ;;  %v2219_v40 = vld [vmem:[%s2907_s1 + $0x228] sm:$0xff]   ;;  %v2239_v63 = vld [vmem:[%s2908_s0 + $0x180] ss:$36 sps:$4 sm:$0xff]  }
  0x2c   :  { %1177 = vmatmul.mubr.bf16.gmra.mxu1 %v2132_v41  ;;  %1087 = vmatprep.mubr.bf16.mxu0 %v2135_v44  ;;  %v2210_v41 = vld [vmem:[%s2908_s0 + $0x58] ss:$36 sps:$4 sm:$0xff]   ;;  %v2215_v44 = vld [vmem:[%s2908_s0 + $0xac] ss:$36 sps:$4 sm:$0xff]  }
  0x2d   :  { %1184 = vmatprep.mubr.bf16.mxu1 %v2137_v45  ;;  %1899 = vmatpush3.bf16.msra.mxu0 %v2143_v49  ;;  %v2226_v45 = vld [vmem:[%s2907_s1 + $0x220] sm:$0xff]   ;;  %v2220_v49 = vld [vmem:[%s2908_s0 + $0xec] ss:$36 sps:$4 sm:$0xff]  }
  0x2e   :  { %1900 = vmatprep.subr.bf16.mxu0 %v2151_v54  ;;  %1963 = vmatpush3.bf16.msra.mxu1 %v2164_v1  ;;  %v2225_v54 = vld [vmem:[%s2908_s0 + $0xf0] ss:$36 sps:$4 sm:$0xff]  }
  0x2f   :  { %1964 = vmatprep.subr.bf16.mxu1 %v2172_v7  ;;  %v2243_v1 = vld [vmem:[%s2908_s0 + $0x1cc] ss:$36 sps:$4 sm:$0xff]  }
  0x30   :  { %v2253_v7 = vld [vmem:[%s2908_s0 + $0x210] ss:$36 sps:$4 sm:$0xff]  }
  0x31   :  { %1901 = vmatpush3.bf16.msra.mxu0 %v2153_v56  ;;  %v2229_v56 = vld [vmem:[%s2908_s0 + $0x13c] ss:$36 sps:$4 sm:$0xff]  }
  0x32   :  { %1902 = vmatprep.subr.bf16.mxu0 %v2161_v62  ;;  %1965 = vmatpush3.bf16.msra.mxu1 %v2174_v9  ;;  %v2238_v62 = vld [vmem:[%s2908_s0 + $0x178] ss:$36 sps:$4 sm:$0xff]   ;;  %v2256_v9 = vld [vmem:[%s2908_s0 + $0x140] ss:$36 sps:$4 sm:$0xff]  }
  0x33   :  { %1088 = vmatmul.mubr.bf16.gmra.mxu0 %v2139_v48  ;;  %1966 = vmatprep.subr.bf16.mxu1 %v2182_v15  ;;  %v2218_v48 = vld [vmem:[%s2908_s0 + $0xa8] ss:$36 sps:$4 sm:$0xff]   ;;  %v2262_v15 = vld [vmem:[%s2908_s0 + $0x218] ss:$36 sps:$4 sm:$0xff]  }
  0x34   :  { %1185 = vmatmul.mubr.bf16.gmra.mxu1 %v2140_v51  ;;  %1095 = vmatprep.mubr.bf16.mxu0 %v2145_v52  ;;  %v2240_v51 = vld [vmem:[%s2907_s1 + $0x210] sm:$0xff]   ;;  %v2224_v52 = vld [vmem:[%s2908_s0 + $0xe8] ss:$36 sps:$4 sm:$0xff]  }
  0x35   :  { %1192 = vmatprep.mubr.bf16.mxu1 %v2147_v53  ;;  %1903 = vmatpush3.bf16.msra.mxu0 %v2163_v0  ;;  %v2247_v53 = vld [vmem:[%s2907_s1 + $0x208] sm:$0xff]  }
  0x36   :  { %1904 = vmatprep.subr.bf16.mxu0 %v2171_v6  ;;  %1967 = vmatpush3.bf16.msra.mxu1 %v2184_v17  ;;  %v2241_v0 = vld [vmem:[%s2908_s0 + $0x1c4] ss:$36 sps:$4 sm:$0xff]  }
  0x37   :  { %1968 = vmatprep.subr.bf16.mxu1 %v2185_v18  ;;  %v2252_v6 = vld [vmem:[%s2908_s0 + $0x208] ss:$36 sps:$4 sm:$0xff]  }
  0x39   :  { %1905 = vmatpush3.bf16.msra.mxu0 %v2173_v8  ;;  %v2255_v8 = vld [vmem:[%s2908_s0 + $0x20] ss:$36 sps:$4 sm:$0xff]  }
  0x3a   :  { %1906 = vmatprep.subr.bf16.mxu0 %v2181_v13  ;;  %1969 = vmatpush3.bf16.msra.mxu1 %v2186_v19  ;;  %v2260_v13 = vld [vmem:[%s2908_s0 + $0x1d0] ss:$36 sps:$4 sm:$0xff]  }
  0x3b   :  { %1096 = vmatmul.mubr.bf16.gmra.mxu0 %v2149_v58  ;;  %1970 = vmatprep.subr.bf16.mxu1 %v2194_v25  ;;  %v2231_v58 = vld [vmem:[%s2908_s0 + $0x130] ss:$36 sps:$4 sm:$0xff]  }
  0x3c   :  { %1193 = vmatmul.mubr.bf16.gmra.mxu1 %v2150_v59  ;;  %1103 = vmatprep.mubr.bf16.mxu0 %v2155_v60  ;;  %v2232_v59 = vld [vmem:[%s2908_s0 + $0x138] ss:$36 sps:$4 sm:$0xff]  }
  0x3d   :  { %1200 = vmatprep.mubr.bf16.mxu1 %v2157_v61  ;;  %1907 = vmatpush3.bf16.msra.mxu0 %v2183_v16  ;;  %v2234_v60 = vld [vmem:[%s2908_s0 + $0x17c] ss:$36 sps:$4 sm:$0xff]   ;;  %v2236_v61 = vld [vmem:[%s2908_s0 + $0x184] ss:$36 sps:$4 sm:$0xff]  }
  0x3e   :  { %1908 = vmatprep.subr.bf16.mxu0 %v2193_v24  ;;  %1971 = vmatpush3.bf16.msra.mxu1 %v2196_v27 }
  0x3f   :  { %1972 = vmatprep.subr.bf16.mxu1 %v2197_v28 }
  0x41   :  { %1909 = vmatpush3.bf16.msra.mxu0 %v2195_v26 }
  0x42   :  { %2038 = vmatprep.subr.bf16.mxu0 %v2205_v32  ;;  %1973 = vmatpush3.bf16.msra.mxu1 %v2198_v31 }
  0x43   :  { %1104 = vmatmul.mubr.bf16.gmra.mxu0 %v2159_v2  ;;  %2070 = vmatprep.subr.bf16.mxu1 %v2205_v32  ;;  %v2245_v2 = vld [vmem:[%s2908_s0 + $0x1c0] ss:$36 sps:$4 sm:$0xff]  }
  0x44   :  { %1201 = vmatmul.mubr.bf16.gmra.mxu1 %v2160_v3  ;;  %1111 = vmatprep.mubr.bf16.mxu0 %v2165_v4  ;;  %v2246_v3 = vld [vmem:[%s2908_s0 + $0x1c8] ss:$36 sps:$4 sm:$0xff]  }
  0x45   :  { %1208 = vmatprep.mubr.bf16.mxu1 %v2167_v5  ;;  %v2248_v4 = vld [vmem:[%s2908_s0 + $0x20c] ss:$36 sps:$4 sm:$0xff]   ;;  %v2250_v5 = vld [vmem:[%s2908_s0 + $0x214] ss:$36 sps:$4 sm:$0xff]  }
  0x4b   :  { %1112 = vmatmul.mubr.bf16.gmra.mxu0 %v2169_v10  ;;  %v2257_v10 = vld [vmem:[%s2908_s0 + $0x68] ss:$36 sps:$4 sm:$0xff]  }
  0x4c   :  { %1209 = vmatmul.mubr.bf16.gmra.mxu1 %v2170_v11  ;;  %1119 = vmatprep.mubr.bf16.mxu0 %v2175_v12  ;;  %v2258_v11 = vld [vmem:[%s2908_s0 + $0x188] ss:$36 sps:$4 sm:$0xff]   ;;  %v2259_v12 = vld [vmem:[%s2908_s0 + $0xb0] ss:$36 sps:$4 sm:$0xff]  }
  0x4d   :  { %1216 = vmatprep.mubr.bf16.mxu1 %v2177_v14  ;;  %v2261_v14 = vld [vmem:[%s2908_s0 + $0xf8] ss:$36 sps:$4 sm:$0xff]  }
  0x53   :  { %1120 = vmatmul.mubr.bf16.gmra.mxu0 %v2179_v20 }
  0x54   :  { %1217 = vmatmul.mubr.bf16.gmra.mxu1 %v2180_v21  ;;  %1127 = vmatprep.mubr.bf16.mxu0 %v2187_v22 }
  0x55   :  { %1224 = vmatprep.mubr.bf16.mxu1 %v2189_v23 }
  0x5b   :  { %1128 = vmatmul.mubr.bf16.gmra.mxu0 %v2191_v29 }
  0x5c   :  { %1225 = vmatmul.mubr.bf16.gmra.mxu1 %v2192_v30  ;;  %1265 = vmatprep.mubr.bf16.mxu0 %v2201_v33 }
  0x5d   :  { %1362 = vmatprep.mubr.bf16.mxu1 %v2204_v34 }
  0x63   :  { %1266 = vmatmul.mubr.bf16.vlgmr.msra.gmra.mxu0 %v2199_v35 }
  0x64   :  { %1363 = vmatmul.mubr.bf16.vlgmr.msra.gmra.mxu1 %v2202_v36  ;;  %2039 = vmatpush3.bf16.msra.mxu0 %v2205_v32 }
  0x65   :  { %1273 = vmatprep.mubr.bf16.mxu0 %v2206_v37  ;;  %1370 = vmatprep.mubr.bf16.mxu1 %v2208_v38 }
  0x66   :  { %2040 = vmatprep.subr.bf16.mxu0 %v2212_v39  ;;  %2078 = vmatpush3.bf16.msra.mxu1 %v2205_v32 }
  0x67   :  { %2071 = vmatprep.subr.bf16.mxu1 %v2212_v39 }
  0x68   :  { %2041 = vmatpush3.bf16.msra.mxu0 %v2212_v39 }
  0x69   :  { %2042 = vmatprep.subr.bf16.mxu0 %v2219_v40 }
  0x6a   :  { %2079 = vmatpush3.bf16.msra.mxu1 %v2212_v39 }
  0x6b   :  { %1274 = vmatmul.mubr.bf16.gmra.mxu0 %v2210_v41  ;;  %2072 = vmatprep.subr.bf16.mxu1 %v2219_v40 }
  0x6c   :  { %1371 = vmatmul.mubr.bf16.gmra.mxu1 %v2211_v42  ;;  %1281 = vmatprep.mubr.bf16.mxu0 %v2213_v43 }
  0x6d   :  { %1378 = vmatprep.mubr.bf16.mxu1 %v2215_v44  ;;  %2043 = vmatpush3.bf16.msra.mxu0 %v2219_v40 }
  0x6e   :  { %2044 = vmatprep.subr.bf16.mxu0 %v2226_v45  ;;  %2080 = vmatpush3.bf16.msra.mxu1 %v2219_v40 }
  0x6f   :  { %2073 = vmatprep.subr.bf16.mxu1 %v2226_v45 }
  0x71   :  { %2045 = vmatpush3.bf16.msra.mxu0 %v2226_v45 }
  0x72   :  { %2046 = vmatprep.subr.bf16.mxu0 %v2233_v46  ;;  %2081 = vmatpush3.bf16.msra.mxu1 %v2226_v45 }
  0x73   :  { %1282 = vmatmul.mubr.bf16.gmra.mxu0 %v2217_v47  ;;  %2074 = vmatprep.subr.bf16.mxu1 %v2233_v46 }
  0x74   :  { %1379 = vmatmul.mubr.bf16.gmra.mxu1 %v2218_v48  ;;  %1289 = vmatprep.mubr.bf16.mxu0 %v2220_v49 }
  0x75   :  { %1386 = vmatprep.mubr.bf16.mxu1 %v2222_v50  ;;  %2047 = vmatpush3.bf16.msra.mxu0 %v2233_v46 }
  0x76   :  { %2048 = vmatprep.subr.bf16.mxu0 %v2240_v51  ;;  %2082 = vmatpush3.bf16.msra.mxu1 %v2233_v46 }
  0x77   :  { %2075 = vmatprep.subr.bf16.mxu1 %v2240_v51 }
  0x79   :  { %2049 = vmatpush3.bf16.msra.mxu0 %v2240_v51 }
  0x7a   :  { %2050 = vmatprep.subr.bf16.mxu0 %v2247_v53  ;;  %2083 = vmatpush3.bf16.msra.mxu1 %v2240_v51 }
  0x7b   :  { %1290 = vmatmul.mubr.bf16.gmra.mxu0 %v2224_v52  ;;  %2076 = vmatprep.subr.bf16.mxu1 %v2247_v53 }
  0x7c   :  { %1387 = vmatmul.mubr.bf16.gmra.mxu1 %v2225_v54  ;;  %1297 = vmatprep.mubr.bf16.mxu0 %v2227_v55 }
  0x7d   :  { %1394 = vmatprep.mubr.bf16.mxu1 %v2229_v56  ;;  %2051 = vmatpush3.bf16.msra.mxu0 %v2247_v53 }
  0x7e   :  { %2052 = vmatprep.subr.bf16.mxu0 %v2254_v57  ;;  %2084 = vmatpush3.bf16.msra.mxu1 %v2247_v53 }
  0x7f   :  { %2077 = vmatprep.subr.bf16.mxu1 %v2254_v57 }
  0x81   :  { %2053 = vmatpush3.bf16.msra.mxu0 %v2254_v57 }
  0x82   :  { %2085 = vmatpush3.bf16.msra.mxu1 %v2254_v57 }
  0x83   :  { %1298 = vmatmul.mubr.bf16.gmra.mxu0 %v2231_v58 }
  0x84   :  { %1395 = vmatmul.mubr.bf16.gmra.mxu1 %v2232_v59  ;;  %1305 = vmatprep.mubr.bf16.mxu0 %v2234_v60 }
  0x85   :  { %1402 = vmatprep.mubr.bf16.mxu1 %v2236_v61  ;;  %v2263_v61 = vmov 0.0  }
  0x86   :  { %1544 = vst [vmem:[%s2909_s3] sm:$0x1] %v2263_v61  ;;  %1545 = vst [vmem:[%s2910_s4] sm:$0x1] %v2263_v61 }
  0x8b   :  { %1306 = vmatmul.mubr.bf16.gmra.mxu0 %v2238_v62 }
  0x8c   :  { %1403 = vmatmul.mubr.bf16.gmra.mxu1 %v2239_v63  ;;  %1313 = vmatprep.mubr.bf16.mxu0 %v2241_v0 }
  0x8d   :  { %1410 = vmatprep.mubr.bf16.mxu1 %v2243_v1 }
  0x93   :  { %1314 = vmatmul.mubr.bf16.gmra.mxu0 %v2245_v2 }
  0x94   :  { %1411 = vmatmul.mubr.bf16.gmra.mxu1 %v2246_v3  ;;  %1321 = vmatprep.mubr.bf16.mxu0 %v2248_v4 }
  0x95   :  { %1418 = vmatprep.mubr.bf16.mxu1 %v2250_v5 }
  0x9b   :  { %1322 = vmatmul.mubr.bf16.gmra.mxu0 %v2252_v6 }
  0x9c   :  { %1419 = vmatmul.mubr.bf16.gmra.mxu1 %v2253_v7  ;;  %2054 = vmatprep.mubr.bf16.mxu0 %v2255_v8 }
  0x9d   :  { %2062 = vmatprep.mubr.bf16.mxu1 %v2256_v9 }
  0xa3   :  { %2055 = vmatmul.mubr.bf16.vlgmr.msra.gmra.mxu0 %v2257_v10 }
  0xa4   :  { %2063 = vmatmul.mubr.bf16.vlgmr.msra.gmra.mxu1 %v2258_v11  ;;  %2058 = vmatprep.mubr.bf16.mxu0 %v2259_v12 }
  0xa5   :  { %2066 = vmatprep.mubr.bf16.mxu1 %v2260_v13 }
  0xab   :  { %2059 = vmatmul.mubr.bf16.gmra.mxu0 %v2261_v14 }
  0xac   :  { %2067 = vmatmul.mubr.bf16.gmra.mxu1 %v2262_v15 }
  0xe3   :  { %v1782_v16 = vpop.f32.mrf.mxu0 }
  0xe4   :  { %v1846_v17 = vpop.f32.mrf.mxu1 }
  0xe5   :  { %v1783_v18 = vpop.f32.mrf.mxu0 }
  0xe6   :  { %v1784_v19 = vadd.f32 %v1783_v18, %v1782_v16  ;;  %v1847_v20 = vpop.f32.mrf.mxu1 }
  0xe7   :  { %v1848_v21 = vadd.f32 %v1847_v20, %v1846_v17  ;;  %v1785_v22 = vpop.f32.mrf.mxu0 }
  0xe8   :  { %v1849_v23 = vpop.f32.mrf.mxu1 }
  0xe9   :  { %v2721_v24 = vadd.f32 %v1848_v21, %v1784_v19  ;;  %v1786_v25 = vpop.f32.mrf.mxu0 }
  0xea   :  { %v1787_v26 = vadd.f32 %v1786_v25, %v1785_v22  ;;  %v1850_v27 = vpop.f32.mrf.mxu1 }
  0xeb   :  { %v1851_v28 = vadd.f32 %v1850_v27, %v1849_v23  ;;  %v1788_v29 = vpop.f32.mrf.mxu0 }
  0xec   :  { %v1852_v30 = vpop.f32.mrf.mxu1 }
  0xed   :  { %v2723_v31 = vadd.f32 %v1851_v28, %v1787_v26  ;;  %v1789_v32 = vpop.f32.mrf.mxu0 }
  0xee   :  { %v1790_v33 = vadd.f32 %v1789_v32, %v1788_v29  ;;  %v1853_v34 = vpop.f32.mrf.mxu1 }
  0xef   :  { %v1854_v35 = vadd.f32 %v1853_v34, %v1852_v30  ;;  %v1791_v36 = vpop.f32.mrf.mxu0 }
  0xf0   :  { %v1855_v37 = vpop.f32.mrf.mxu1 }
  0xf1   :  { %v2725_v38 = vadd.f32 %v1854_v35, %v1790_v33  ;;  %v1792_v39 = vpop.f32.mrf.mxu0 }
  0xf2   :  { %v1793_v40 = vadd.f32 %v1792_v39, %v1791_v36  ;;  %v1856_v41 = vpop.f32.mrf.mxu1 }
  0xf3   :  { %v1857_v42 = vadd.f32 %v1856_v41, %v1855_v37  ;;  %v1794_v43 = vpop.f32.mrf.mxu0 }
  0xf4   :  { %v1858_v44 = vpop.f32.mrf.mxu1 }
  0xf5   :  { %v2727_v45 = vadd.f32 %v1857_v42, %v1793_v40  ;;  %v1795_v46 = vpop.f32.mrf.mxu0 }
  0xf6   :  { %v1796_v47 = vadd.f32 %v1795_v46, %v1794_v43  ;;  %v1859_v48 = vpop.f32.mrf.mxu1 }
  0xf7   :  { %v1860_v49 = vadd.f32 %v1859_v48, %v1858_v44  ;;  %v1797_v50 = vpop.f32.mrf.mxu0 }
  0xf8   :  { %v1861_v51 = vpop.f32.mrf.mxu1 }
  0xf9   :  { %v2729_v52 = vadd.f32 %v1860_v49, %v1796_v47  ;;  %v1798_v53 = vpop.f32.mrf.mxu0 }
  0xfa   :  { %v1799_v54 = vadd.f32 %v1798_v53, %v1797_v50  ;;  %v1862_v55 = vpop.f32.mrf.mxu1 }
  0xfb   :  { %v1863_v56 = vadd.f32 %v1862_v55, %v1861_v51  ;;  %v1800_v57 = vpop.f32.mrf.mxu0 }
  0xfc   :  { %v1864_v58 = vpop.f32.mrf.mxu1 }
  0xfd   :  { %v2731_v59 = vadd.f32 %v1863_v56, %v1799_v54  ;;  %v1801_v60 = vpop.f32.mrf.mxu0 }
  0xfe   :  { %v1802_v62 = vadd.f32 %v1801_v60, %v1800_v57  ;;  %v1865_v63 = vpop.f32.mrf.mxu1 }
  0xff   :  { %2912 = vst [vmem:[#allocation2_spill] sm:$0xff] %v2731_v59  ;;  %v1866_v0 = vadd.f32 %v1865_v63, %v1864_v58  ;;  %v1803_v1 = vpop.f32.mrf.mxu0 }
 0x100   :  { %v1867_v2 = vpop.f32.mrf.mxu1 }
 0x101   :  { %v2739_v3 = vadd.f32 %v1866_v0, %v1802_v62  ;;  %v1804_v4 = vpop.f32.mrf.mxu0 }
 0x102   :  { %v1805_v5 = vadd.f32 %v1804_v4, %v1803_v1  ;;  %v1868_v6 = vpop.f32.mrf.mxu1 }
 0x103   :  { %2913 = vst [vmem:[#allocation3_spill] sm:$0xff] %v2739_v3  ;;  %v1869_v7 = vadd.f32 %v1868_v6, %v1867_v2  ;;  %v1806_v8 = vpop.f32.mrf.mxu0 }
 0x104   :  { %v1870_v9 = vpop.f32.mrf.mxu1 }
 0x105   :  { %v2741_v10 = vadd.f32 %v1869_v7, %v1805_v5  ;;  %v1807_v11 = vpop.f32.mrf.mxu0 }
 0x106   :  { %v1808_v12 = vadd.f32 %v1807_v11, %v1806_v8  ;;  %v1871_v13 = vpop.f32.mrf.mxu1 }
 0x107   :  { %2914 = vst [vmem:[#allocation4_spill] sm:$0xff] %v2741_v10  ;;  %v1872_v14 = vadd.f32 %v1871_v13, %v1870_v9  ;;  %v1809_v15 = vpop.f32.mrf.mxu0 }
 0x108   :  { %v1873_v16 = vpop.f32.mrf.mxu1 }
 0x109   :  { %v2743_v17 = vadd.f32 %v1872_v14, %v1808_v12  ;;  %v1810_v18 = vpop.f32.mrf.mxu0 }
 0x10a   :  { %v1811_v19 = vadd.f32 %v1810_v18, %v1809_v15  ;;  %v1874_v20 = vpop.f32.mrf.mxu1 }
 0x10b   :  { %v1875_v21 = vadd.f32 %v1874_v20, %v1873_v16  ;;  %v1812_v22 = vpop.f32.mrf.mxu0 }
 0x10c   :  { %v1876_v23 = vpop.f32.mrf.mxu1 }
 0x10d   :  { %v2745_v25 = vadd.f32 %v1875_v21, %v1811_v19  ;;  %v1813_v26 = vpop.f32.mrf.mxu0 }
 0x10e   :  { %v1814_v27 = vadd.f32 %v1813_v26, %v1812_v22  ;;  %v1877_v28 = vpop.f32.mrf.mxu1 }
 0x10f   :  { %2915 = vst [vmem:[#allocation5_spill] sm:$0xff] %v2745_v25  ;;  %v1878_v29 = vadd.f32 %v1877_v28, %v1876_v23  ;;  %v1815_v30 = vpop.f32.mrf.mxu0 }
 0x110   :  { %v1879_v32 = vpop.f32.mrf.mxu1 }
 0x111   :  { %v2747_v33 = vadd.f32 %v1878_v29, %v1814_v27  ;;  %v1816_v34 = vpop.f32.mrf.mxu0 }
 0x112   :  { %v1817_v35 = vadd.f32 %v1816_v34, %v1815_v30  ;;  %v1880_v36 = vpop.f32.mrf.mxu1 }
 0x113   :  { %v1881_v37 = vadd.f32 %v1880_v36, %v1879_v32  ;;  %v1818_v39 = vpop.f32.mrf.mxu0 }
 0x114   :  { %v1882_v40 = vpop.f32.mrf.mxu1 }
 0x115   :  { %v2749_v41 = vadd.f32 %v1881_v37, %v1817_v35  ;;  %v1819_v42 = vpop.f32.mrf.mxu0 }
 0x116   :  { %v1820_v43 = vadd.f32 %v1819_v42, %v1818_v39  ;;  %v1883_v44 = vpop.f32.mrf.mxu1 }
 0x117   :  { %v1884_v46 = vadd.f32 %v1883_v44, %v1882_v40  ;;  %v1821_v47 = vpop.f32.mrf.mxu0 }
 0x118   :  { %v1885_v48 = vpop.f32.mrf.mxu1 }
 0x119   :  { %v2751_v49 = vadd.f32 %v1884_v46, %v1820_v43  ;;  %v1822_v50 = vpop.f32.mrf.mxu0 }
 0x11a   :  { %v1823_v51 = vadd.f32 %v1822_v50, %v1821_v47  ;;  %v1886_v53 = vpop.f32.mrf.mxu1 }
 0x11b   :  { %2916 = vst [vmem:[#allocation6_spill] sm:$0xff] %v2751_v49  ;;  %v1887_v54 = vadd.f32 %v1886_v53, %v1885_v48  ;;  %v1824_v55 = vpop.f32.mrf.mxu0 }
 0x11c   :  { %v1888_v56 = vpop.f32.mrf.mxu1 }
 0x11d   :  { %v2753_v57 = vadd.f32 %v1887_v54, %v1823_v51  ;;  %v1825_v58 = vpop.f32.mrf.mxu0 }
 0x11e   :  { %v1826_v60 = vadd.f32 %v1825_v58, %v1824_v55  ;;  %v1889_v61 = vpop.f32.mrf.mxu1 }
 0x11f   :  { %2917 = vst [vmem:[#allocation7_spill] sm:$0xff] %v2753_v57  ;;  %v1890_v62 = vadd.f32 %v1889_v61, %v1888_v56  ;;  %v1827_v63 = vpop.f32.mrf.mxu0 }
 0x120   :  { %v1891_v0 = vpop.f32.mrf.mxu1 }
 0x121   :  { %v2755_v1 = vadd.f32 %v1890_v62, %v1826_v60  ;;  %v1828_v2 = vpop.f32.mrf.mxu0 }
 0x122   :  { %v1829_v4 = vadd.f32 %v1828_v2, %v1827_v63  ;;  %v1892_v5 = vpop.f32.mrf.mxu1 }
 0x123   :  { %2918 = vst [vmem:[#allocation8_spill] sm:$0xff] %v2755_v1  ;;  %v1893_v6 = vadd.f32 %v1892_v5, %v1891_v0  ;;  %v1910_v7 = vpop.f32.mrf.mxu0 }
 0x124   :  { %v1974_v8 = vpop.f32.mrf.mxu1 }
 0x125   :  { %v2757_v9 = vadd.f32 %v1893_v6, %v1829_v4  ;;  %v1911_v11 = vpop.f32.mrf.mxu0 }
 0x126   :  { %v1975_v12 = vpop.f32.mrf.mxu1 }
 0x127   :  { %2919 = vst [vmem:[#allocation9_spill] sm:$0xff] %v2757_v9  ;;  %v1913_v13 = vpop.f32.mrf.mxu0  ;;  %v1976_v25 = vadd.f32 %v1975_v12, %v1974_v8 }
 0x128   :  { %v1977_v14 = vpop.f32.mrf.mxu1 }
 0x129   :  { %v1914_v15 = vpop.f32.mrf.mxu0 }
 0x12a   :  { %v1978_v16 = vpop.f32.mrf.mxu1  ;;  %v1915_v1 = vadd.f32 %v1914_v15, %v1913_v13 }
 0x12b   :  { %v1916_v18 = vpop.f32.mrf.mxu0 }
 0x12c   :  { %v1980_v19 = vpop.f32.mrf.mxu1 }
 0x12d   :  { %v1917_v20 = vpop.f32.mrf.mxu0 }
 0x12e   :  { %v1981_v21 = vpop.f32.mrf.mxu1 }
 0x12f   :  { %v1919_v22 = vpop.f32.mrf.mxu0 }
 0x130   :  { %v1983_v23 = vpop.f32.mrf.mxu1 }
 0x131   :  { %v1920_v26 = vpop.f32.mrf.mxu0 }
 0x132   :  { %v1984_v27 = vpop.f32.mrf.mxu1  ;;  %v1921_v10 = vadd.f32 %v1920_v26, %v1919_v22 }
 0x133   :  { %v1922_v28 = vpop.f32.mrf.mxu0 }
 0x134   :  { %v2759_v29 = vpop.f32.mrf.mxu1  ;;  %v1279_v15 = vadd.f32 %v1921_v10, %v2727_v45 }
 0x135   :  { %v1923_v30 = vpop.f32.mrf.mxu0 }
 0x136   :  { %v2761_v32 = vpop.f32.mrf.mxu1 }
 0x137   :  { %v2763_v34 = vpop.f32.mrf.mxu0 }
 0x138   :  { %v2765_v35 = vpop.f32.mrf.mxu1 }
 0x139   :  { %2920 = vst [vmem:[#allocation10_spill] sm:$0xff] %v2765_v35  ;;  %v2767_v36 = vpop.f32.mrf.mxu0 }
 0x13a   :  { %v2769_v37 = vpop.f32.mrf.mxu1 }
 0x13b   :  { %2921 = vst [vmem:[#allocation11_spill] sm:$0xff] %v2769_v37  ;;  %v1928_v39 = vpop.f32.mrf.mxu0  ;;  %v1912_v37 = vadd.f32 %v1911_v11, %v1910_v7  ;;  %v1982_v11 = vadd.f32 %v1981_v21, %v1980_v19  ;;  %v1988_v21 = vadd.f32 %v2761_v32, %v2759_v29 }
 0x13c   :  { %v2771_v40 = vpop.f32.mrf.mxu1 }
 0x13d   :  { %2922 = vst [vmem:[#allocation12_spill] sm:$0xff] %v2771_v40  ;;  %v1929_v42 = vpop.f32.mrf.mxu0  ;;  %v1271_v40 = vadd.f32 %v1915_v1, %v2723_v31 }
 0x13e   :  { %v2773_v43 = vpop.f32.mrf.mxu1 }
 0x13f   :  { %2923 = vst [vmem:[#allocation13_spill] sm:$0xff] %v2773_v43  ;;  %v1931_v44 = vpop.f32.mrf.mxu0 }
 0x140   :  { %v2775_v46 = vpop.f32.mrf.mxu1 }
 0x141   :  { %2924 = vst [vmem:[#allocation14_spill] sm:$0xff] %v2775_v46  ;;  %v1932_v47 = vpop.f32.mrf.mxu0 }
 0x142   :  { %v2777_v48 = vpop.f32.mrf.mxu1 }
 0x143   :  { %2925 = vst [vmem:[#allocation15_spill] sm:$0xff] %v2777_v48  ;;  %v1934_v50 = vpop.f32.mrf.mxu0  ;;  %v1918_v48 = vadd.f32 %v1917_v20, %v1916_v18  ;;  %v1985_v18 = vadd.f32 %v1984_v27, %v1983_v23  ;;  %v1933_v23 = vadd.f32 %v1932_v47, %v1931_v44  ;;  %v2937_v47 = vld [vmem:[#allocation3_spill] sm:$0xff] }
 0x144   :  { %v1998_v51 = vpop.f32.mrf.mxu1 }
 0x145   :  { %v1935_v53 = vpop.f32.mrf.mxu0  ;;  %v1276_v7 = vadd.f32 %v1918_v48, %v2725_v38  ;;  %v1930_v38 = vadd.f32 %v1929_v42, %v1928_v39  ;;  %v1376_v10 = vadd.f32 %v1985_v18, %v1279_v15  ;;  %v2934_v48 = vld [vmem:[#allocation5_spill] sm:$0xff] }
 0x146   :  { %v1999_v54 = vpop.f32.mrf.mxu1  ;;  %v1936_v20 = vadd.f32 %v1935_v53, %v1934_v50  ;;  %v2933_v42 = vld [vmem:[#allocation13_spill] sm:$0xff] }
 0x147   :  { %v1937_v55 = vpop.f32.mrf.mxu0  ;;  %v1373_v31 = vadd.f32 %v1982_v11, %v1276_v7  ;;  %v2000_v19 = vadd.f32 %v1999_v54, %v1998_v51  ;;  %v1292_v53 = vadd.f32 %v1930_v38, %v2937_v47  ;;  %v2942_v7 = vld [vmem:[#allocation10_spill] sm:$0xff]  ;;  %v2943_v11 = vld [vmem:[#allocation11_spill] sm:$0xff] }
 0x148   :  { %v2779_v56 = vpop.f32.mrf.mxu1  ;;  %v1991_v15 = vadd.f32 %v2943_v11, %v2942_v7  ;;  %v2947_v38 = vld [vmem:[#allocation2_spill] sm:$0xff] }
 0x149   :  { %2926 = vst [vmem:[#allocation16_spill] sm:$0xff] %v2779_v56  ;;  %v1938_v58 = vpop.f32.mrf.mxu0  ;;  %v1268_v56 = vadd.f32 %v1912_v37, %v2721_v24 }
 0x14a   :  { %v2781_v60 = vpop.f32.mrf.mxu1  ;;  %v1939_v37 = vadd.f32 %v1938_v58, %v1937_v55  ;;  %v2940_v58 = vld [vmem:[#allocation15_spill] sm:$0xff] }
 0x14b   :  { %2927 = vst [vmem:[#allocation17_spill] sm:$0xff] %v2781_v60  ;;  %v1940_v61 = vpop.f32.mrf.mxu0  ;;  %v1365_v1 = vadd.f32 %v1976_v25, %v1268_v56  ;;  %v1927_v25 = vadd.f32 %v2767_v36, %v2763_v34  ;;  %v2939_v56 = vld [vmem:[#allocation14_spill] sm:$0xff] }
 0x14c   :  { %v2004_v62 = vpop.f32.mrf.mxu1  ;;  %v1303_v50 = vadd.f32 %v1939_v37, %v2934_v48 }
 0x14d   :  { %v1941_v63 = vpop.f32.mrf.mxu0 }
 0x14e   :  { %v2005_v0 = vpop.f32.mrf.mxu1  ;;  %v1942_v43 = vadd.f32 %v1941_v63, %v1940_v61 }
 0x14f   :  { %v1943_v2 = vpop.f32.mrf.mxu0  ;;  %v2006_v8 = vadd.f32 %v2005_v0, %v2004_v62 }
 0x150   :  { %v2007_v4 = vpop.f32.mrf.mxu1  ;;  %v1308_v24 = vadd.f32 %v1942_v43, %v2747_v33  ;;  %v2935_v51 = vld [vmem:[#allocation16_spill] sm:$0xff] }
 0x151   :  { %v1944_v5 = vpop.f32.mrf.mxu0 }
 0x152   :  { %v2008_v6 = vpop.f32.mrf.mxu1  ;;  %v1945_v26 = vadd.f32 %v1944_v5, %v1943_v2  ;;  %v2936_v29 = vld [vmem:[#allocation17_spill] sm:$0xff]  ;;  %v2941_v2 = vld [vmem:[#allocation8_spill] sm:$0xff] }
 0x153   :  { %v1946_v57 = vpop.f32.mrf.mxu0  ;;  %v2009_v33 = vadd.f32 %v2008_v6, %v2007_v4  ;;  %v2003_v32 = vadd.f32 %v2936_v29, %v2935_v51 }
 0x154   :  { %v2783_v9 = vpop.f32.mrf.mxu1  ;;  %v1311_v27 = vadd.f32 %v1945_v26, %v2749_v41 }
 0x155   :  { %2928 = vst [vmem:[#allocation18_spill] sm:$0xff] %v2783_v9  ;;  %v1947_v59 = vpop.f32.mrf.mxu0 }
 0x156   :  { %v2785_v49 = vpop.f32.mrf.mxu1  ;;  %v1948_v54 = vadd.f32 %v1947_v59, %v1946_v57  ;;  %v1408_v0 = vadd.f32 %v2009_v33, %v1311_v27 }
 0x157   :  { %2929 = vst [vmem:[#allocation19_spill] sm:$0xff] %v2785_v49  ;;  %v2787_v35 = vpop.f32.mrf.mxu0  ;;  %v1979_v49 = vadd.f32 %v1978_v16, %v1977_v14  ;;  %v1300_v16 = vadd.f32 %v1936_v20, %v2743_v17  ;;  %v2932_v17 = vld [vmem:[#allocation12_spill] sm:$0xff] }
 0x158   :  { %v2789_v46 = vpop.f32.mrf.mxu1  ;;  %v1994_v43 = vadd.f32 %v2933_v42, %v2932_v17  ;;  %v2949_v17 = vld [vmem:[#allocation7_spill] sm:$0xff] }
 0x159   :  { %2930 = vst [vmem:[#allocation20_spill] sm:$0xff] %v2789_v46  ;;  %v2791_v3 = vpop.f32.mrf.mxu0  ;;  %v1368_v14 = vadd.f32 %v1979_v49, %v1271_v40  ;;  %v1405_v40 = vadd.f32 %v2006_v8, %v1308_v24  ;;  %v1397_v34 = vadd.f32 %v2000_v19, %v1300_v16  ;;  %v1287_v16 = vadd.f32 %v1927_v25, %v2947_v38 }
 0x15a   :  { %v2793_v60 = vpop.f32.mrf.mxu1  ;;  %v1951_v37 = vadd.f32 %v2791_v3, %v2787_v35 }
 0x15b   :  { %2931 = vst [vmem:[#allocation21_spill] sm:$0xff] %v2793_v60  ;;  %v1952_v9 = vpop.f32.mrf.mxu0  ;;  %v1924_v60 = vadd.f32 %v1923_v30, %v1922_v28 }
 0x15c   :  { %v2016_v13 = vpop.f32.mrf.mxu1  ;;  %v2945_v24 = vld [vmem:[#allocation18_spill] sm:$0xff]  ;;  %v1319_v42 = vadd.f32 %v1951_v37, %v2949_v17 }
 0x15d   :  { %v1953_v22 = vpop.f32.mrf.mxu0  ;;  %v1284_v30 = vadd.f32 %v1924_v60, %v2729_v52  ;;  %v1997_v60 = vadd.f32 %v2940_v58, %v2939_v56 }
 0x15e   :  { %v2017_v46 = vpop.f32.mrf.mxu1  ;;  %v1954_v49 = vadd.f32 %v1953_v22, %v1952_v9  ;;  %v2938_v9 = vld [vmem:[#allocation4_spill] sm:$0xff]  ;;  %v1400_v22 = vadd.f32 %v2003_v32, %v1303_v50  ;;  %v2946_v8 = vld [vmem:[#allocation19_spill] sm:$0xff] }
 0x15f   :  { %v1955_v12 = vpop.f32.mrf.mxu0  ;;  %v1295_v36 = vadd.f32 %v1933_v23, %v2938_v9  ;;  %v2018_v5 = vadd.f32 %v2017_v46, %v2016_v13  ;;  %v1381_v46 = vadd.f32 %v1988_v21, %v1284_v30  ;;  %v2944_v13 = vld [vmem:[#allocation6_spill] sm:$0xff]  ;;  %v2948_v23 = vld [vmem:[#allocation9_spill] sm:$0xff]  ;;  %v1384_v9 = vadd.f32 %v1991_v15, %v1287_v16 }
 0x160   :  { %v2019_v61 = vpop.f32.mrf.mxu1  ;;  %v1324_v4 = vadd.f32 %v1954_v49, %v2941_v2  ;;  %v1316_v26 = vadd.f32 %v1948_v54, %v2944_v13 }
 0x161   :  { %v1956_v45 = vpop.f32.mrf.mxu0  ;;  %v1392_v21 = vadd.f32 %v1997_v60, %v1295_v36 }
 0x162   :  { %v2020_v28 = vpop.f32.mrf.mxu1  ;;  %v1957_v59 = vadd.f32 %v1956_v45, %v1955_v12  ;;  %v2012_v12 = vadd.f32 %v2946_v8, %v2945_v24  ;;  %v1421_v30 = vadd.f32 %v2018_v5, %v1324_v4 }
 0x163   :  { %v2056_v39 = vpop.f32.mrf.mxu0  ;;  %v2021_v35 = vadd.f32 %v2020_v28, %v2019_v61  ;;  %v2950_v61 = vld [vmem:[#allocation20_spill] sm:$0xff]  ;;  %v2951_v28 = vld [vmem:[#allocation21_spill] sm:$0xff] }
 0x164   :  { %v1470_v44 = vadd.f32 %v2056_v39, %v1373_v31  ;;  %v2064_v41 = vpop.f32.mrf.mxu1  ;;  %v1327_v3 = vadd.f32 %v1957_v59, %v2948_v23  ;;  %v1413_v51 = vadd.f32 %v2012_v12, %v1316_v26 }
 0x165   :  { %v2813_v52 = vadd.f32 %v2064_v41, %v1405_v40  ;;  %v1461_v55 = vpop.f32.mrf.mxu0 }
 0x166   :  { %1526 = vst [vmem:[%s2911_s2 + $0x10] sm:$0xff] %v1470_v44  ;;  %v1462_v62 = vadd.f32 %v1461_v55, %v1365_v1  ;;  %v1493_v63 = vpop.f32.mrf.mxu1  ;;  %v1573_v29 = vmul.f32 %v1470_v44, %v1470_v44 }
 0x167   :  { %1534 = vst [vmem:[%s2911_s2 + $0x50] sm:$0xff] %v2813_v52  ;;  %v2826_v57 = vadd.f32 %v1493_v63, %v1397_v34  ;;  %v2057_v6 = vpop.f32.mrf.mxu0  ;;  %v1424_v34 = vadd.f32 %v2021_v35, %v1327_v3 }
 0x168   :  { %1524 = vst [vmem:[%s2911_s2] sm:$0xff] %v1462_v62  ;;  %v1473_v18 = vadd.f32 %v2057_v6, %v1376_v10  ;;  %v2065_v20 = vpop.f32.mrf.mxu1  ;;  %v1389_v10 = vadd.f32 %v1994_v43, %v1292_v53  ;;  %v1571_v25 = vmul.f32 %v1462_v62, %v1462_v62  ;;  %v2015_v43 = vadd.f32 %v2951_v28, %v2950_v61 }
 0x169   :  { %1532 = vst [vmem:[%s2911_s2 + $0x40] sm:$0xff] %v2826_v57  ;;  %v2842_v31 = vadd.f32 %v2065_v20, %v1408_v0  ;;  %v1464_v1 = vpop.f32.mrf.mxu0  ;;  %v1579_v8 = vmul.f32 %v2826_v57, %v2826_v57 }
 0x16a   :  { %1527 = vst [vmem:[%s2911_s2 + $0x18] sm:$0xff] %v1473_v18  ;;  %v1465_v19 = vadd.f32 %v1464_v1, %v1368_v14  ;;  %v1496_v45 = vpop.f32.mrf.mxu1  ;;  %v1574_v36 = vmul.f32 %v1473_v18, %v1473_v18  ;;  %v1416_v0 = vadd.f32 %v2015_v43, %v1319_v42 }
 0x16b   :  { %1535 = vst [vmem:[%s2911_s2 + $0x58] sm:$0xff] %v2842_v31  ;;  %v1497_v27 = vadd.f32 %v1496_v45, %v1400_v22  ;;  %v2060_v33 = vpop.f32.mrf.mxu0 }
 0x16c   :  { %1525 = vst [vmem:[%s2911_s2 + $0x8] sm:$0xff] %v1465_v19  ;;  %v1547_v14 = vadd.f32 %v1465_v19, %v1462_v62  ;;  %v1572_v49 = vmul.f32 %v1465_v19, %v1465_v19  ;;  %v1486_v39 = vadd.f32 %v2060_v33, %v1389_v10  ;;  %v2068_v40 = vpop.f32.mrf.mxu1  ;;  %v1581_v19 = vmul.f32 %v2813_v52, %v2813_v52 }
 0x16d   :  { %1533 = vst [vmem:[%s2911_s2 + $0x48] sm:$0xff] %v1497_v27  ;;  %v1518_v48 = vadd.f32 %v2068_v40, %v1421_v30  ;;  %v1477_v50 = vpop.f32.mrf.mxu0  ;;  %v1580_v1 = vmul.f32 %v1497_v27, %v1497_v27 }
 0x16e   :  { %v1548_v32 = vadd.f32 %v1547_v14, %v1470_v44  ;;  %v1587_v41 = vadd.f32 %v1572_v49, %v1571_v25  ;;  %1530 = vst [vmem:[%s2911_s2 + $0x30] sm:$0xff] %v1486_v39  ;;  %v1478_v47 = vadd.f32 %v1477_v50, %v1381_v46  ;;  %v1509_v53 = vpop.f32.mrf.mxu1  ;;  %v1577_v20 = vmul.f32 %v1486_v39, %v1486_v39 }
 0x16f   :  { %1538 = vst [vmem:[%s2911_s2 + $0x70] sm:$0xff] %v1518_v48  ;;  %v1510_v54 = vadd.f32 %v1509_v53, %v1413_v51  ;;  %v2061_v55 = vpop.f32.mrf.mxu0  ;;  %v1585_v49 = vmul.f32 %v1518_v48, %v1518_v48 }
 0x170   :  { %v1588_v56 = vadd.f32 %v1587_v41, %v1573_v29  ;;  %1528 = vst [vmem:[%s2911_s2 + $0x20] sm:$0xff] %v1478_v47  ;;  %v1549_v44 = vadd.f32 %v1548_v32, %v1473_v18  ;;  %v1489_v58 = vadd.f32 %v2061_v55, %v1392_v21  ;;  %v2069_v60 = vpop.f32.mrf.mxu1  ;;  %v1575_v4 = vmul.f32 %v1478_v47, %v1478_v47 }
 0x171   :  { %1536 = vst [vmem:[%s2911_s2 + $0x60] sm:$0xff] %v1510_v54  ;;  %v1521_v62 = vadd.f32 %v2069_v60, %v1424_v34  ;;  %v1480_v63 = vpop.f32.mrf.mxu0  ;;  %v1582_v21 = vmul.f32 %v2842_v31, %v2842_v31  ;;  %v1583_v35 = vmul.f32 %v1510_v54, %v1510_v54 }
 0x172   :  { %v1550_v2 = vadd.f32 %v1549_v44, %v1478_v47  ;;  %v1589_v5 = vadd.f32 %v1588_v56, %v1574_v36  ;;  %1531 = vst [vmem:[%s2911_s2 + $0x38] sm:$0xff] %v1489_v58  ;;  %v1481_v59 = vadd.f32 %v1480_v63, %v1384_v9  ;;  %v1512_v6 = vpop.f32.mrf.mxu1  ;;  %v1578_v13 = vmul.f32 %v1489_v58, %v1489_v58  ;;  %v1546_v47 = vld [vmem:[%s2909_s3] sm:$0x1] }
 0x173   :  { %1539 = vst [vmem:[%s2911_s2 + $0x78] sm:$0xff] %v1521_v62  ;;  %v1513_v7 = vadd.f32 %v1512_v6, %v1416_v0  ;;  %v1586_v40 = vmul.f32 %v1521_v62, %v1521_v62 }
 0x174   :  { %v1590_v11 = vadd.f32 %v1589_v5, %v1575_v4  ;;  %1529 = vst [vmem:[%s2911_s2 + $0x28] sm:$0xff] %v1481_v59  ;;  %v1551_v15 = vadd.f32 %v1550_v2, %v1481_v59  ;;  %v1576_v18 = vmul.f32 %v1481_v59, %v1481_v59 }
 0x175   :  { %1537 = vst [vmem:[%s2911_s2 + $0x68] sm:$0xff] %v1513_v7  ;;  %v1584_v25 = vmul.f32 %v1513_v7, %v1513_v7 }
 0x176   :  { %v1552_v22 = vadd.f32 %v1551_v15, %v1486_v39  ;;  %v1591_v46 = vadd.f32 %v1590_v11, %v1576_v18 }
 0x178   :  { %v1553_v26 = vadd.f32 %v1552_v22, %v1489_v58  ;;  %v1592_v24 = vadd.f32 %v1591_v46, %v1577_v20 }
 0x17a   :  { %v1554_v12 = vadd.f32 %v1553_v26, %v2826_v57  ;;  %v1593_v37 = vadd.f32 %v1592_v24, %v1578_v13 }
 0x17c   :  { %v1594_v38 = vadd.f32 %v1593_v37, %v1579_v8  ;;  %v1555_v16 = vadd.f32 %v1554_v12, %v1497_v27 }
 0x17e   :  { %v1556_v45 = vadd.f32 %v1555_v16, %v2813_v52  ;;  %v1595_v10 = vadd.f32 %v1594_v38, %v1580_v1 }
 0x180   :  { %v1557_v23 = vadd.f32 %v1556_v45, %v2842_v31  ;;  %v1596_v3 = vadd.f32 %v1595_v10, %v1581_v19 }
 0x182   :  { %v1558_v33 = vadd.f32 %v1557_v23, %v1510_v54  ;;  %v1597_v30 = vadd.f32 %v1596_v3, %v1582_v21  ;;  %v1570_v54 = vld [vmem:[%s2910_s4] sm:$0x1] }
 0x184   :  { %v1559_v57 = vadd.f32 %v1558_v33, %v1513_v7  ;;  %v1598_v14 = vadd.f32 %v1597_v30, %v1583_v35 }
 0x186   :  { %v1560_v27 = vadd.f32 %v1559_v57, %v1518_v48  ;;  %v1599_v39 = vadd.f32 %v1598_v14, %v1584_v25 }
 0x188   :  { %v1561_v17 = vadd.f32 %v1560_v27, %v1521_v62  ;;  %v1600_v42 = vadd.f32 %v1599_v39, %v1585_v49 }
 0x18a   :  { %v1562_v52 = vrot.slane %v1561_v17, 4  ;;  %v1601_v61 = vadd.f32 %v1600_v42, %v1586_v40 }
 0x18c   :  { %v1563_v28 = vadd.f32 %v1562_v52, %v1561_v17  ;;  %v1602_v43 = vrot.slane %v1601_v61, 4 }
 0x18e   :  { %v1564_v50 = vrot.slane %v1563_v28, 2  ;;  %v1603_v51 = vadd.f32 %v1602_v43, %v1601_v61 }
 0x190   :  { %v1565_v31 = vadd.f32 %v1564_v50, %v1563_v28  ;;  %v1604_v29 = vrot.slane %v1603_v51, 2 }
 0x192   :  { %v1566_v32 = vrot.slane %v1565_v31, 1  ;;  %v1605_v41 = vadd.f32 %v1604_v29, %v1603_v51 }
 0x194   :  { %v1567_v53 = vadd.f32 %v1566_v32, %v1565_v31  ;;  %v1606_v48 = vrot.slane %v1605_v41, 1 }
 0x196   :  { %v1568_v55 = vadd.f32 %v1567_v53, %v1546_v47  ;;  %v1607_v34 = vadd.f32 %v1606_v48, %v1605_v41 }
 0x198   :  { %1569 = vst [vmem:[%s2909_s3] sm:$0x1] %v1568_v55  ;;  %v1608_v9 = vadd.f32 %v1607_v34, %v1570_v54 }
 0x19a   :  { %1609 = vst [vmem:[%s2910_s4] sm:$0x1] %v1608_v9 }

// kernel: encoder_forward.13
= control target key start
LH: loop header
LB: loop body
LE: loop exit
PB: predicated region body
PF: predicated region fallthrough
CT: control target
= control target key end

     0   :  { %v24_v0 = vlaneseq  ;;  %s172_s1 = inlined_call_operand.vmem [shape: f32[1,256], index: 1, kind: input, shape index: {}]   ;;  %s173_s2 = inlined_call_operand.vmem [shape: f32[1,256], index: 2, kind: input, shape index: {}]   ;;  %s174_s0 = inlined_call_operand.vmem [shape: f32[32,256], index: 0, kind: input, shape index: {}]   ;;  %s175_s3 = inlined_call_operand.vmem [shape: bf16[32,256], index: 3, kind: output, shape index: {}]  }
   0x1   :  { %v22_v2 = vld [vmem:[%s172_s1] sm:$0x3]  ;;  %v15_v5 = vld [vmem:[%s174_s0 + $0x8] sm:$0xff]  ;;  %v16_v8 = vld [vmem:[%s174_s0 + $0x10] sm:$0xff] }
   0x2   :  { %v25_v1 = vshrl.u32 %v24_v0, 7  ;;  %v42_v3 = vld [vmem:[%s173_s2] sm:$0x3]  ;;  %v17_v9 = vld [vmem:[%s174_s0 + $0x18] sm:$0xff]  ;;  %v19_v15 = vld [vmem:[%s174_s0 + $0x28] sm:$0xff] }
   0x3   :  { %v14_v4 = vld [vmem:[%s174_s0] sm:$0xff]  ;;  %v20_v16 = vld [vmem:[%s174_s0 + $0x30] sm:$0xff]  ;;  %v21_v17 = vld [vmem:[%s174_s0 + $0x38] sm:$0xff] }
   0x4   :  { %v26_v6 = vsub.s32 0, %v25_v1  ;;  %v30_v7 = vsub.s32 1, %v25_v1  ;;  %v18_v10 = vld [vmem:[%s174_s0 + $0x20] sm:$0xff] }
   0x6   :  { %v27_v11 = vrot.slane %v22_v2, %v26_v6  ;;  %v31_v12 = vrot.slane %v22_v2, %v30_v7  ;;  %v47_v13 = vrot.slane %v42_v3, %v26_v6  ;;  %v51_v14 = vrot.slane %v42_v3, %v30_v7 }
   0x8   :  { %v34_v18 = vmul.f32 %v27_v11, %v14_v4  ;;  %v35_v19 = vmul.f32 %v31_v12, %v15_v5  ;;  %v36_v20 = vmul.f32 %v27_v11, %v16_v8  ;;  %v37_v21 = vmul.f32 %v31_v12, %v17_v9 }
   0x9   :  { %v38_v22 = vmul.f32 %v27_v11, %v18_v10  ;;  %v39_v23 = vmul.f32 %v31_v12, %v19_v15  ;;  %v40_v24 = vmul.f32 %v27_v11, %v20_v16  ;;  %v41_v25 = vmul.f32 %v31_v12, %v21_v17 }
   0xa   :  { %v54_v26 = vadd.f32 %v47_v13, %v34_v18  ;;  %v55_v27 = vadd.f32 %v51_v14, %v35_v19  ;;  %v56_v28 = vadd.f32 %v47_v13, %v36_v20  ;;  %v57_v29 = vadd.f32 %v51_v14, %v37_v21 }
   0xb   :  { %v58_v30 = vadd.f32 %v47_v13, %v38_v22  ;;  %v59_v31 = vadd.f32 %v51_v14, %v39_v23  ;;  %v60_v32 = vadd.f32 %v47_v13, %v40_v24  ;;  %v61_v33 = vadd.f32 %v51_v14, %v41_v25 }
   0xc   :  { %v62_v34 = vmax.f32 %v54_v26, 0.0  ;;  %v63_v35 = vmax.f32 %v55_v27, 0.0  ;;  %v64_v36 = vmax.f32 %v56_v28, 0.0  ;;  %v65_v37 = vmax.f32 %v57_v29, 0.0 }
   0xd   :  { %v66_v38 = vmax.f32 %v58_v30, 0.0  ;;  %v67_v39 = vmax.f32 %v59_v31, 0.0  ;;  %v68_v40 = vmax.f32 %v60_v32, 0.0  ;;  %v69_v41 = vmax.f32 %v61_v33, 0.0 }
   0xe   :  { %v106_v42 = vpack.c.bf16 %v63_v35, %v62_v34  ;;  %v107_v43 = vpack.c.bf16 %v65_v37, %v64_v36 }
   0xf   :  { %v108_v44 = vpack.c.bf16 %v67_v39, %v66_v38  ;;  %v109_v45 = vpack.c.bf16 %v69_v41, %v68_v40 }
  0x10   :  { %94 = vst [vmem:[%s175_s3] sm:$0xff] %v106_v42  ;;  %95 = vst [vmem:[%s175_s3 + $0x8] sm:$0xff] %v107_v43 }
  0x11   :  { %96 = vst [vmem:[%s175_s3 + $0x10] sm:$0xff] %v108_v44  ;;  %97 = vst [vmem:[%s175_s3 + $0x18] sm:$0xff] %v109_v45 }

// kernel: encoder_forward.12
= control target key start
LH: loop header
LB: loop body
LE: loop exit
PB: predicated region body
PF: predicated region fallthrough
CT: control target
= control target key end

     0   :  { %s2369_s1 = inlined_call_operand.vmem [shape: bf16[1152,256], index: 1, kind: input, shape index: {}]   ;;  %s2370_s0 = inlined_call_operand.vmem [shape: bf16[32,1152], index: 0, kind: input, shape index: {}]   ;;  %s2371_s3 = inlined_call_operand.vmem [shape: f32[1,256], index: 3, kind: output, shape index: {1}]   ;;  %s2372_s4 = inlined_call_operand.vmem [shape: f32[1,256], index: 4, kind: output, shape index: {2}]   ;;  %s2373_s2 = inlined_call_operand.vmem [shape: f32[32,256], index: 2, kind: output, shape index: {0}]  }
   0x1   :  { %v1557_v0 = vld [vmem:[%s2369_s1 + $0x74] ss:$8 sps:$4 sm:$0xff]   ;;  %v1561_v2 = vld [vmem:[%s2369_s1 + $0x70] ss:$8 sps:$4 sm:$0xff]   ;;  %v1563_v4 = vld [vmem:[%s2369_s1 + $0x64] ss:$8 sps:$4 sm:$0xff]  }
   0x2   :  { %v1559_v1 = vld [vmem:[%s2369_s1 + $0x174] ss:$8 sps:$4 sm:$0xff]   ;;  %991 = vmatprep.subr.bf16.mxu0 %v1557_v0  ;;  %v1562_v3 = vld [vmem:[%s2369_s1 + $0x170] ss:$8 sps:$4 sm:$0xff]   ;;  %v1565_v5 = vld [vmem:[%s2369_s1 + $0x164] ss:$8 sps:$4 sm:$0xff]  }
   0x3   :  { %1044 = vmatprep.subr.bf16.mxu1 %v1559_v1  ;;  %992 = vmatpush1.bf16.msra.mxu0 %v1561_v2  ;;  %v1567_v6 = vld [vmem:[%s2369_s1 + $0x60] ss:$8 sps:$4 sm:$0xff]   ;;  %v1569_v8 = vld [vmem:[%s2369_s1 + $0x54] ss:$8 sps:$4 sm:$0xff]   ;;  %v1573_v10 = vld [vmem:[%s2369_s1 + $0x50] ss:$8 sps:$4 sm:$0xff]  }
   0x4   :  { %1045 = vmatpush1.bf16.msra.mxu1 %v1562_v3  ;;  %993 = vmatprep.subr.bf16.mxu0 %v1563_v4  ;;  %v1568_v7 = vld [vmem:[%s2369_s1 + $0x160] ss:$8 sps:$4 sm:$0xff]   ;;  %v1571_v9 = vld [vmem:[%s2369_s1 + $0x154] ss:$8 sps:$4 sm:$0xff]   ;;  %v1574_v11 = vld [vmem:[%s2369_s1 + $0x150] ss:$8 sps:$4 sm:$0xff]  }
   0x5   :  { %1046 = vmatprep.subr.bf16.mxu1 %v1565_v5  ;;  %v1575_v12 = vld [vmem:[%s2369_s1 + $0x44] ss:$8 sps:$4 sm:$0xff]   ;;  %v1579_v14 = vld [vmem:[%s2369_s1 + $0x40] ss:$8 sps:$4 sm:$0xff]   ;;  %v1581_v16 = vld [vmem:[%s2369_s1 + $0x34] ss:$8 sps:$4 sm:$0xff]  }
   0x6   :  { %v1577_v13 = vld [vmem:[%s2369_s1 + $0x144] ss:$8 sps:$4 sm:$0xff]   ;;  %v1580_v15 = vld [vmem:[%s2369_s1 + $0x140] ss:$8 sps:$4 sm:$0xff]   ;;  %v1583_v17 = vld [vmem:[%s2369_s1 + $0x134] ss:$8 sps:$4 sm:$0xff]  }
   0x7   :  { %994 = vmatpush1.bf16.msra.mxu0 %v1567_v6  ;;  %v1585_v18 = vld [vmem:[%s2369_s1 + $0x30] ss:$8 sps:$4 sm:$0xff]   ;;  %v1587_v20 = vld [vmem:[%s2369_s1 + $0x24] ss:$8 sps:$4 sm:$0xff]   ;;  %v1591_v22 = vld [vmem:[%s2369_s1 + $0x20] ss:$8 sps:$4 sm:$0xff]  }
   0x8   :  { %1047 = vmatpush1.bf16.msra.mxu1 %v1568_v7  ;;  %995 = vmatprep.subr.bf16.mxu0 %v1569_v8  ;;  %v1586_v19 = vld [vmem:[%s2369_s1 + $0x130] ss:$8 sps:$4 sm:$0xff]   ;;  %v1589_v21 = vld [vmem:[%s2369_s1 + $0x124] ss:$8 sps:$4 sm:$0xff]   ;;  %v1592_v23 = vld [vmem:[%s2369_s1 + $0x120] ss:$8 sps:$4 sm:$0xff]  }
   0x9   :  { %1048 = vmatprep.subr.bf16.mxu1 %v1571_v9  ;;  %v1593_v24 = vld [vmem:[%s2369_s1 + $0x14] ss:$8 sps:$4 sm:$0xff]   ;;  %v1597_v26 = vld [vmem:[%s2369_s1 + $0x10] ss:$8 sps:$4 sm:$0xff]   ;;  %v1599_v28 = vld [vmem:[%s2369_s1 + $0x4] ss:$8 sps:$4 sm:$0xff]  }
   0xa   :  { %v1595_v25 = vld [vmem:[%s2369_s1 + $0x114] ss:$8 sps:$4 sm:$0xff]   ;;  %v1598_v27 = vld [vmem:[%s2369_s1 + $0x110] ss:$8 sps:$4 sm:$0xff]   ;;  %v1601_v29 = vld [vmem:[%s2369_s1 + $0x104] ss:$8 sps:$4 sm:$0xff]  }
   0xb   :  { %996 = vmatpush1.bf16.msra.mxu0 %v1573_v10  ;;  %v1603_v30 = vld [vmem:[%s2369_s1] ss:$8 sps:$4 sm:$0xff]   ;;  %v1605_v32 = vld [vmem:[%s2369_s1 + $0xf4] ss:$8 sps:$4 sm:$0xff]   ;;  %v1609_v34 = vld [vmem:[%s2369_s1 + $0xf0] ss:$8 sps:$4 sm:$0xff]  }
   0xc   :  { %1049 = vmatpush1.bf16.msra.mxu1 %v1574_v11  ;;  %997 = vmatprep.subr.bf16.mxu0 %v1575_v12  ;;  %v1604_v31 = vld [vmem:[%s2369_s1 + $0x100] ss:$8 sps:$4 sm:$0xff]   ;;  %v1607_v33 = vld [vmem:[%s2369_s1 + $0x1f4] ss:$8 sps:$4 sm:$0xff]   ;;  %v1610_v35 = vld [vmem:[%s2369_s1 + $0x1f0] ss:$8 sps:$4 sm:$0xff]  }
   0xd   :  { %1050 = vmatprep.subr.bf16.mxu1 %v1577_v13  ;;  %v1611_v36 = vld [vmem:[%s2369_s1 + $0xe4] ss:$8 sps:$4 sm:$0xff]   ;;  %v1615_v38 = vld [vmem:[%s2369_s1 + $0xe0] ss:$8 sps:$4 sm:$0xff]   ;;  %v1617_v40 = vld [vmem:[%s2369_s1 + $0xd4] ss:$8 sps:$4 sm:$0xff]  }
   0xe   :  { %v1613_v37 = vld [vmem:[%s2369_s1 + $0x1e4] ss:$8 sps:$4 sm:$0xff]   ;;  %v1616_v39 = vld [vmem:[%s2369_s1 + $0x1e0] ss:$8 sps:$4 sm:$0xff]   ;;  %v1619_v41 = vld [vmem:[%s2369_s1 + $0x1d4] ss:$8 sps:$4 sm:$0xff]  }
   0xf   :  { %998 = vmatpush1.bf16.msra.mxu0 %v1579_v14  ;;  %v1621_v42 = vld [vmem:[%s2369_s1 + $0xd0] ss:$8 sps:$4 sm:$0xff]   ;;  %v1623_v44 = vld [vmem:[%s2369_s1 + $0xc4] ss:$8 sps:$4 sm:$0xff]   ;;  %v1627_v46 = vld [vmem:[%s2369_s1 + $0xc0] ss:$8 sps:$4 sm:$0xff]  }
  0x10   :  { %1051 = vmatpush1.bf16.msra.mxu1 %v1580_v15  ;;  %999 = vmatprep.subr.bf16.mxu0 %v1581_v16  ;;  %v1622_v43 = vld [vmem:[%s2369_s1 + $0x1d0] ss:$8 sps:$4 sm:$0xff]   ;;  %v1625_v45 = vld [vmem:[%s2369_s1 + $0x1c4] ss:$8 sps:$4 sm:$0xff]   ;;  %v1628_v47 = vld [vmem:[%s2369_s1 + $0x1c0] ss:$8 sps:$4 sm:$0xff]  }
  0x11   :  { %1052 = vmatprep.subr.bf16.mxu1 %v1583_v17  ;;  %v1629_v48 = vld [vmem:[%s2369_s1 + $0xb4] ss:$8 sps:$4 sm:$0xff]   ;;  %v1655_v49 = vld [vmem:[%s2370_s0 + $0x4] ss:$36 sps:$4 sm:$0xff]   ;;  %v1658_v51 = vld [vmem:[%s2370_s0 + $0xc] ss:$36 sps:$4 sm:$0xff]  }
  0x12   :  { %v1631_v50 = vld [vmem:[%s2369_s1 + $0x1b4] ss:$8 sps:$4 sm:$0xff]   ;;  %1023 = vmatprep.mubr.bf16.mxu0 %v1655_v49  ;;  %v1633_v52 = vld [vmem:[%s2369_s1 + $0xb0] ss:$8 sps:$4 sm:$0xff]   ;;  %1076 = vmatprep.mubr.bf16.mxu1 %v1658_v51  ;;  %v1635_v54 = vld [vmem:[%s2369_s1 + $0xa4] ss:$8 sps:$4 sm:$0xff]  }
  0x13   :  { %1000 = vmatpush1.bf16.msra.mxu0 %v1585_v18  ;;  %v1634_v53 = vld [vmem:[%s2369_s1 + $0x1b0] ss:$8 sps:$4 sm:$0xff]   ;;  %v1637_v55 = vld [vmem:[%s2369_s1 + $0x1a4] ss:$8 sps:$4 sm:$0xff]   ;;  %v1639_v56 = vld [vmem:[%s2369_s1 + $0xa0] ss:$8 sps:$4 sm:$0xff]  }
  0x14   :  { %1053 = vmatpush1.bf16.msra.mxu1 %v1586_v19  ;;  %1001 = vmatprep.subr.bf16.mxu0 %v1587_v20  ;;  %v1640_v57 = vld [vmem:[%s2369_s1 + $0x1a0] ss:$8 sps:$4 sm:$0xff]   ;;  %v1641_v58 = vld [vmem:[%s2369_s1 + $0x94] ss:$8 sps:$4 sm:$0xff]   ;;  %v1645_v60 = vld [vmem:[%s2369_s1 + $0x90] ss:$8 sps:$4 sm:$0xff]  }
  0x15   :  { %1054 = vmatprep.subr.bf16.mxu1 %v1589_v21  ;;  %v1643_v59 = vld [vmem:[%s2369_s1 + $0x194] ss:$8 sps:$4 sm:$0xff]   ;;  %v1646_v61 = vld [vmem:[%s2369_s1 + $0x190] ss:$8 sps:$4 sm:$0xff]   ;;  %v1647_v62 = vld [vmem:[%s2369_s1 + $0x84] ss:$8 sps:$4 sm:$0xff]  }
  0x16   :  { %v1649_v63 = vld [vmem:[%s2369_s1 + $0x184] ss:$8 sps:$4 sm:$0xff]   ;;  %v1651_v0 = vld [vmem:[%s2369_s1 + $0x80] ss:$8 sps:$4 sm:$0xff]   ;;  %v1661_v2 = vld [vmem:[%s2369_s1 + $0x274] ss:$8 sps:$4 sm:$0xff]  }
  0x17   :  { %1002 = vmatpush1.bf16.msra.mxu0 %v1591_v22  ;;  %v1652_v1 = vld [vmem:[%s2369_s1 + $0x180] ss:$8 sps:$4 sm:$0xff]   ;;  %v1664_v3 = vld [vmem:[%s2369_s1 + $0x374] ss:$8 sps:$4 sm:$0xff]   ;;  %v1659_v6 = vld [vmem:[%s2369_s1 + $0x270] ss:$8 sps:$4 sm:$0xff]  }
  0x18   :  { %1055 = vmatpush1.bf16.msra.mxu1 %v1592_v23  ;;  %1003 = vmatprep.subr.bf16.mxu0 %v1593_v24  ;;  %v1653_v4 = vld [vmem:[%s2370_s0] ss:$36 sps:$4 sm:$0xff]   ;;  %v1656_v5 = vld [vmem:[%s2370_s0 + $0x8] ss:$36 sps:$4 sm:$0xff]   ;;  %v1662_v7 = vld [vmem:[%s2369_s1 + $0x370] ss:$8 sps:$4 sm:$0xff]  }
  0x19   :  { %1056 = vmatprep.subr.bf16.mxu1 %v1595_v25  ;;  %v1667_v8 = vld [vmem:[%s2369_s1 + $0x264] ss:$8 sps:$4 sm:$0xff]   ;;  %v1665_v10 = vld [vmem:[%s2369_s1 + $0x260] ss:$8 sps:$4 sm:$0xff]   ;;  %v1673_v12 = vld [vmem:[%s2369_s1 + $0x254] ss:$8 sps:$4 sm:$0xff]  }
  0x1a   :  { %v1670_v9 = vld [vmem:[%s2369_s1 + $0x364] ss:$8 sps:$4 sm:$0xff]   ;;  %v1668_v11 = vld [vmem:[%s2369_s1 + $0x360] ss:$8 sps:$4 sm:$0xff]   ;;  %v1676_v13 = vld [vmem:[%s2369_s1 + $0x354] ss:$8 sps:$4 sm:$0xff]  }
  0x1b   :  { %1004 = vmatpush1.bf16.msra.mxu0 %v1597_v26  ;;  %v1671_v14 = vld [vmem:[%s2369_s1 + $0x250] ss:$8 sps:$4 sm:$0xff]   ;;  %v1679_v16 = vld [vmem:[%s2369_s1 + $0x244] ss:$8 sps:$4 sm:$0xff]   ;;  %v1677_v18 = vld [vmem:[%s2369_s1 + $0x240] ss:$8 sps:$4 sm:$0xff]  }
  0x1c   :  { %1057 = vmatpush1.bf16.msra.mxu1 %v1598_v27  ;;  %1005 = vmatprep.subr.bf16.mxu0 %v1599_v28  ;;  %v1674_v15 = vld [vmem:[%s2369_s1 + $0x350] ss:$8 sps:$4 sm:$0xff]   ;;  %v1682_v17 = vld [vmem:[%s2369_s1 + $0x344] ss:$8 sps:$4 sm:$0xff]   ;;  %v1680_v19 = vld [vmem:[%s2369_s1 + $0x340] ss:$8 sps:$4 sm:$0xff]  }
  0x1d   :  { %1058 = vmatprep.subr.bf16.mxu1 %v1601_v29  ;;  %v1685_v20 = vld [vmem:[%s2369_s1 + $0x234] ss:$8 sps:$4 sm:$0xff]   ;;  %v1683_v22 = vld [vmem:[%s2369_s1 + $0x230] ss:$8 sps:$4 sm:$0xff]   ;;  %v1691_v24 = vld [vmem:[%s2369_s1 + $0x224] ss:$8 sps:$4 sm:$0xff]  }
  0x1e   :  { %v1688_v21 = vld [vmem:[%s2369_s1 + $0x334] ss:$8 sps:$4 sm:$0xff]   ;;  %v1686_v23 = vld [vmem:[%s2369_s1 + $0x330] ss:$8 sps:$4 sm:$0xff]   ;;  %v1694_v25 = vld [vmem:[%s2369_s1 + $0x324] ss:$8 sps:$4 sm:$0xff]  }
  0x1f   :  { %1006 = vmatpush1.bf16.msra.mxu0 %v1603_v30  ;;  %v1737_v26 = vld [vmem:[%s2370_s0 + $0x4c] ss:$36 sps:$4 sm:$0xff]   ;;  %v1739_v27 = vld [vmem:[%s2370_s0 + $0x54] ss:$36 sps:$4 sm:$0xff]   ;;  %v1689_v30 = vld [vmem:[%s2369_s1 + $0x220] ss:$8 sps:$4 sm:$0xff]  }
  0x20   :  { %1059 = vmatpush1.bf16.msra.mxu1 %v1604_v31  ;;  %1007 = vmatprep.subr.bf16.mxu0 %v1605_v32  ;;  %v1741_v28 = vld [vmem:[%s2370_s0 + $0x48] ss:$36 sps:$4 sm:$0xff]   ;;  %v1742_v29 = vld [vmem:[%s2370_s0 + $0x50] ss:$36 sps:$4 sm:$0xff]  }
  0x21   :  { %1060 = vmatprep.subr.bf16.mxu1 %v1607_v33  ;;  %v1692_v31 = vld [vmem:[%s2369_s1 + $0x320] ss:$8 sps:$4 sm:$0xff]   ;;  %v1697_v32 = vld [vmem:[%s2369_s1 + $0x214] ss:$8 sps:$4 sm:$0xff]  }
  0x22   :  { %v1700_v33 = vld [vmem:[%s2369_s1 + $0x314] ss:$8 sps:$4 sm:$0xff]   ;;  %v1716_v49 = vld [vmem:[%s2369_s1 + $0x3e0] ss:$8 sps:$4 sm:$0xff]  }
  0x23   :  { %1008 = vmatpush2.bf16.msra.mxu0 %v1609_v34  ;;  %v1695_v34 = vld [vmem:[%s2369_s1 + $0x210] ss:$8 sps:$4 sm:$0xff]   ;;  %v1724_v51 = vld [vmem:[%s2369_s1 + $0x3d4] ss:$8 sps:$4 sm:$0xff]  }
  0x24   :  { %1061 = vmatpush2.bf16.msra.mxu1 %v1610_v35  ;;  %1009 = vmatprep.subr.bf16.mxu0 %v1611_v36  ;;  %v1698_v35 = vld [vmem:[%s2369_s1 + $0x310] ss:$8 sps:$4 sm:$0xff]   ;;  %v1703_v36 = vld [vmem:[%s2369_s1 + $0x204] ss:$8 sps:$4 sm:$0xff]  }
  0x25   :  { %1062 = vmatprep.subr.bf16.mxu1 %v1613_v37  ;;  %v1706_v37 = vld [vmem:[%s2369_s1 + $0x304] ss:$8 sps:$4 sm:$0xff]  }
  0x27   :  { %1010 = vmatpush2.bf16.msra.mxu0 %v1615_v38  ;;  %v1701_v38 = vld [vmem:[%s2369_s1 + $0x200] ss:$8 sps:$4 sm:$0xff]  }
  0x28   :  { %1063 = vmatpush2.bf16.msra.mxu1 %v1616_v39  ;;  %1011 = vmatprep.subr.bf16.mxu0 %v1617_v40  ;;  %v1704_v39 = vld [vmem:[%s2369_s1 + $0x300] ss:$8 sps:$4 sm:$0xff]   ;;  %v1709_v40 = vld [vmem:[%s2369_s1 + $0x2f4] ss:$8 sps:$4 sm:$0xff]  }
  0x29   :  { %1064 = vmatprep.subr.bf16.mxu1 %v1619_v41  ;;  %v1763_v41 = vld [vmem:[%s2370_s0 + $0x14] ss:$36 sps:$4 sm:$0xff]  }
  0x2b   :  { %1012 = vmatpush2.bf16.msra.mxu0 %v1621_v42  ;;  %v1712_v42 = vld [vmem:[%s2369_s1 + $0x3f4] ss:$8 sps:$4 sm:$0xff]  }
  0x2c   :  { %1065 = vmatpush2.bf16.msra.mxu1 %v1622_v43  ;;  %1013 = vmatprep.subr.bf16.mxu0 %v1623_v44  ;;  %v1766_v43 = vld [vmem:[%s2370_s0 + $0x1c] ss:$36 sps:$4 sm:$0xff]   ;;  %v1707_v44 = vld [vmem:[%s2369_s1 + $0x2f0] ss:$8 sps:$4 sm:$0xff]  }
  0x2d   :  { %1066 = vmatprep.subr.bf16.mxu1 %v1625_v45  ;;  %v1710_v45 = vld [vmem:[%s2369_s1 + $0x3f0] ss:$8 sps:$4 sm:$0xff]  }
  0x2f   :  { %1014 = vmatpush2.bf16.msra.mxu0 %v1627_v46  ;;  %v1715_v46 = vld [vmem:[%s2369_s1 + $0x2e4] ss:$8 sps:$4 sm:$0xff]  }
  0x30   :  { %1067 = vmatpush2.bf16.msra.mxu1 %v1628_v47  ;;  %1015 = vmatprep.subr.bf16.mxu0 %v1629_v48  ;;  %v1718_v47 = vld [vmem:[%s2369_s1 + $0x3e4] ss:$8 sps:$4 sm:$0xff]   ;;  %v1713_v48 = vld [vmem:[%s2369_s1 + $0x2e0] ss:$8 sps:$4 sm:$0xff]  }
  0x31   :  { %1068 = vmatprep.subr.bf16.mxu1 %v1631_v50  ;;  %v1721_v50 = vld [vmem:[%s2369_s1 + $0x2d4] ss:$8 sps:$4 sm:$0xff]  }
  0x33   :  { %1016 = vmatpush2.bf16.msra.mxu0 %v1633_v52  ;;  %v1719_v52 = vld [vmem:[%s2369_s1 + $0x2d0] ss:$8 sps:$4 sm:$0xff]  }
  0x34   :  { %1069 = vmatpush2.bf16.msra.mxu1 %v1634_v53  ;;  %1017 = vmatprep.subr.bf16.mxu0 %v1635_v54  ;;  %v1722_v53 = vld [vmem:[%s2369_s1 + $0x3d0] ss:$8 sps:$4 sm:$0xff]   ;;  %v1727_v54 = vld [vmem:[%s2369_s1 + $0x2c4] ss:$8 sps:$4 sm:$0xff]  }
  0x35   :  { %1070 = vmatprep.subr.bf16.mxu1 %v1637_v55  ;;  %v1730_v55 = vld [vmem:[%s2369_s1 + $0x3c4] ss:$8 sps:$4 sm:$0xff]  }
  0x37   :  { %1018 = vmatpush2.bf16.msra.mxu0 %v1639_v56  ;;  %v1725_v56 = vld [vmem:[%s2369_s1 + $0x2c0] ss:$8 sps:$4 sm:$0xff]  }
  0x38   :  { %1071 = vmatpush2.bf16.msra.mxu1 %v1640_v57  ;;  %1019 = vmatprep.subr.bf16.mxu0 %v1641_v58  ;;  %v1728_v57 = vld [vmem:[%s2369_s1 + $0x3c0] ss:$8 sps:$4 sm:$0xff]   ;;  %v1733_v58 = vld [vmem:[%s2369_s1 + $0x2b4] ss:$8 sps:$4 sm:$0xff]  }
  0x39   :  { %1072 = vmatprep.subr.bf16.mxu1 %v1643_v59  ;;  %v1736_v59 = vld [vmem:[%s2369_s1 + $0x3b4] ss:$8 sps:$4 sm:$0xff]  }
  0x3b   :  { %1020 = vmatpush2.bf16.msra.mxu0 %v1645_v60  ;;  %v1731_v60 = vld [vmem:[%s2369_s1 + $0x2b0] ss:$8 sps:$4 sm:$0xff]  }
  0x3c   :  { %1073 = vmatpush2.bf16.msra.mxu1 %v1646_v61  ;;  %1021 = vmatprep.subr.bf16.mxu0 %v1647_v62  ;;  %v1734_v61 = vld [vmem:[%s2369_s1 + $0x3b0] ss:$8 sps:$4 sm:$0xff]   ;;  %v1745_v62 = vld [vmem:[%s2369_s1 + $0x2a4] ss:$8 sps:$4 sm:$0xff]  }
  0x3d   :  { %1074 = vmatprep.subr.bf16.mxu1 %v1649_v63  ;;  %v1748_v63 = vld [vmem:[%s2369_s1 + $0x3a4] ss:$8 sps:$4 sm:$0xff]  }
  0x3f   :  { %1022 = vmatpush2.bf16.msra.mxu0 %v1651_v0  ;;  %v1743_v0 = vld [vmem:[%s2369_s1 + $0x2a0] ss:$8 sps:$4 sm:$0xff]  }
  0x40   :  { %1075 = vmatpush2.bf16.msra.mxu1 %v1652_v1  ;;  %1097 = vmatprep.subr.bf16.mxu0 %v1661_v2  ;;  %v1746_v1 = vld [vmem:[%s2369_s1 + $0x3a0] ss:$8 sps:$4 sm:$0xff]   ;;  %v1751_v2 = vld [vmem:[%s2369_s1 + $0x294] ss:$8 sps:$4 sm:$0xff]  }
  0x41   :  { %1150 = vmatprep.subr.bf16.mxu1 %v1664_v3  ;;  %v1754_v3 = vld [vmem:[%s2369_s1 + $0x394] ss:$8 sps:$4 sm:$0xff]  }
  0x42   :  { %1024 = vmatmul.mubr.bf16.vlgmr.msra.gmra.mxu0 %v1653_v4  ;;  %v1749_v4 = vld [vmem:[%s2369_s1 + $0x290] ss:$8 sps:$4 sm:$0xff]  }
  0x43   :  { %1077 = vmatmul.mubr.bf16.vlgmr.msra.gmra.mxu1 %v1656_v5  ;;  %1098 = vmatpush1.bf16.msra.mxu0 %v1659_v6  ;;  %v1752_v5 = vld [vmem:[%s2369_s1 + $0x390] ss:$8 sps:$4 sm:$0xff]   ;;  %v1757_v6 = vld [vmem:[%s2369_s1 + $0x284] ss:$8 sps:$4 sm:$0xff]  }
  0x44   :  { %1151 = vmatpush1.bf16.msra.mxu1 %v1662_v7  ;;  %1099 = vmatprep.subr.bf16.mxu0 %v1667_v8  ;;  %v1760_v7 = vld [vmem:[%s2369_s1 + $0x384] ss:$8 sps:$4 sm:$0xff]   ;;  %v1755_v8 = vld [vmem:[%s2369_s1 + $0x280] ss:$8 sps:$4 sm:$0xff]  }
  0x45   :  { %1152 = vmatprep.subr.bf16.mxu1 %v1670_v9  ;;  %1033 = vmatprep.mubr.bf16.mxu0 %v1737_v26  ;;  %v1758_v9 = vld [vmem:[%s2369_s1 + $0x380] ss:$8 sps:$4 sm:$0xff]   ;;  %v1785_v26 = vld [vmem:[%s2369_s1 + $0x430] ss:$8 sps:$4 sm:$0xff]  }
  0x46   :  { %1086 = vmatprep.mubr.bf16.mxu1 %v1739_v27  ;;  %v1790_v27 = vld [vmem:[%s2369_s1 + $0x424] ss:$8 sps:$4 sm:$0xff]  }
  0x47   :  { %1100 = vmatpush1.bf16.msra.mxu0 %v1665_v10  ;;  %v1769_v10 = vld [vmem:[%s2369_s1 + $0x474] ss:$8 sps:$4 sm:$0xff]  }
  0x48   :  { %1153 = vmatpush1.bf16.msra.mxu1 %v1668_v11  ;;  %1101 = vmatprep.subr.bf16.mxu0 %v1673_v12  ;;  %v1761_v11 = vld [vmem:[%s2370_s0 + $0x10] ss:$36 sps:$4 sm:$0xff]   ;;  %v1764_v12 = vld [vmem:[%s2370_s0 + $0x18] ss:$36 sps:$4 sm:$0xff]  }
  0x49   :  { %1154 = vmatprep.subr.bf16.mxu1 %v1676_v13  ;;  %v1767_v13 = vld [vmem:[%s2369_s1 + $0x470] ss:$8 sps:$4 sm:$0xff]  }
  0x4a   :  { %1034 = vmatmul.mubr.bf16.gmra.mxu0 %v1741_v28  ;;  %v1788_v28 = vld [vmem:[%s2369_s1 + $0x420] ss:$8 sps:$4 sm:$0xff]  }
  0x4b   :  { %1102 = vmatpush1.bf16.msra.mxu0 %v1671_v14  ;;  %1087 = vmatmul.mubr.bf16.gmra.mxu1 %v1742_v29  ;;  %v1772_v14 = vld [vmem:[%s2369_s1 + $0x464] ss:$8 sps:$4 sm:$0xff]   ;;  %v1793_v29 = vld [vmem:[%s2369_s1 + $0x414] ss:$8 sps:$4 sm:$0xff]  }
  0x4c   :  { %1155 = vmatpush1.bf16.msra.mxu1 %v1674_v15  ;;  %1103 = vmatprep.subr.bf16.mxu0 %v1679_v16  ;;  %v1773_v15 = vld [vmem:[%s2370_s0 + $0x5c] ss:$36 sps:$4 sm:$0xff]   ;;  %v1779_v16 = vld [vmem:[%s2370_s0 + $0x64] ss:$36 sps:$4 sm:$0xff]  }
  0x4d   :  { %1156 = vmatprep.subr.bf16.mxu1 %v1682_v17  ;;  %1129 = vmatprep.mubr.bf16.mxu0 %v1763_v41  ;;  %v1770_v17 = vld [vmem:[%s2369_s1 + $0x460] ss:$8 sps:$4 sm:$0xff]  }
  0x4e   :  { %1182 = vmatprep.mubr.bf16.mxu1 %v1766_v43 }
  0x4f   :  { %1104 = vmatpush1.bf16.msra.mxu0 %v1677_v18  ;;  %v1778_v18 = vld [vmem:[%s2369_s1 + $0x454] ss:$8 sps:$4 sm:$0xff]  }
  0x50   :  { %1157 = vmatpush1.bf16.msra.mxu1 %v1680_v19  ;;  %1105 = vmatprep.subr.bf16.mxu0 %v1685_v20  ;;  %v1775_v19 = vld [vmem:[%s2370_s0 + $0x58] ss:$36 sps:$4 sm:$0xff]   ;;  %v1781_v20 = vld [vmem:[%s2370_s0 + $0x60] ss:$36 sps:$4 sm:$0xff]  }
  0x51   :  { %1158 = vmatprep.subr.bf16.mxu1 %v1688_v21  ;;  %v1776_v21 = vld [vmem:[%s2369_s1 + $0x450] ss:$8 sps:$4 sm:$0xff]  }
  0x53   :  { %1106 = vmatpush1.bf16.msra.mxu0 %v1683_v22  ;;  %v1784_v22 = vld [vmem:[%s2369_s1 + $0x444] ss:$8 sps:$4 sm:$0xff]  }
  0x54   :  { %1159 = vmatpush1.bf16.msra.mxu1 %v1686_v23  ;;  %1107 = vmatprep.subr.bf16.mxu0 %v1691_v24  ;;  %v1782_v23 = vld [vmem:[%s2369_s1 + $0x440] ss:$8 sps:$4 sm:$0xff]   ;;  %v1787_v24 = vld [vmem:[%s2369_s1 + $0x434] ss:$8 sps:$4 sm:$0xff]  }
  0x55   :  { %1160 = vmatprep.subr.bf16.mxu1 %v1694_v25  ;;  %v1799_v25 = vmov 0  }
  0x57   :  { %1108 = vmatpush1.bf16.msra.mxu0 %v1689_v30  ;;  %v1791_v30 = vld [vmem:[%s2369_s1 + $0x410] ss:$8 sps:$4 sm:$0xff]  }
  0x58   :  { %1161 = vmatpush1.bf16.msra.mxu1 %v1692_v31  ;;  %1109 = vmatprep.subr.bf16.mxu0 %v1697_v32  ;;  %v1796_v31 = vld [vmem:[%s2369_s1 + $0x404] ss:$8 sps:$4 sm:$0xff]   ;;  %v1794_v32 = vld [vmem:[%s2369_s1 + $0x400] ss:$8 sps:$4 sm:$0xff]  }
  0x59   :  { %1162 = vmatprep.subr.bf16.mxu1 %v1700_v33  ;;  %v1797_v33 = vld [vmem:[%s2370_s0 + $0x20] ss:$36 sps:$4 sm:$0xff]  }
  0x5b   :  { %1110 = vmatpush1.bf16.msra.mxu0 %v1695_v34  ;;  %v1798_v34 = vld [vmem:[%s2370_s0 + $0x68] ss:$36 sps:$4 sm:$0xff]  }
  0x5c   :  { %1163 = vmatpush1.bf16.msra.mxu1 %v1698_v35  ;;  %1111 = vmatprep.subr.bf16.mxu0 %v1703_v36  ;;  %v1268_v35 = vlaneseq }
  0x5d   :  { %1164 = vmatprep.subr.bf16.mxu1 %v1706_v37  ;;  %v1800_v37 = vmov 0.0  }
  0x5e   :  { %vm2314_vm0 = vcmp.lt.s32.totalorder %v1268_v35, 256 }
  0x5f   :  { %1112 = vmatpush1.bf16.msra.mxu0 %v1701_v38  ;;  %1272 = vst.msk [vmem:[%s2371_s3] sm:$0x3] %vm2314_vm0, %v1800_v37  ;;  %1273 = vst.msk [vmem:[%s2372_s4] sm:$0x3] %vm2314_vm0, %v1800_v37 }
  0x60   :  { %1165 = vmatpush1.bf16.msra.mxu1 %v1704_v39  ;;  %1113 = vmatprep.subr.bf16.mxu0 %v1709_v40 }
  0x61   :  { %1166 = vmatprep.subr.bf16.mxu1 %v1712_v42 }
  0x63   :  { %1114 = vmatpush2.bf16.msra.mxu0 %v1707_v44 }
  0x64   :  { %1167 = vmatpush2.bf16.msra.mxu1 %v1710_v45  ;;  %1115 = vmatprep.subr.bf16.mxu0 %v1715_v46 }
  0x65   :  { %1168 = vmatprep.subr.bf16.mxu1 %v1718_v47 }
  0x67   :  { %1116 = vmatpush2.bf16.msra.mxu0 %v1713_v48 }
  0x68   :  { %1169 = vmatpush2.bf16.msra.mxu1 %v1716_v49  ;;  %1117 = vmatprep.subr.bf16.mxu0 %v1721_v50 }
  0x69   :  { %1170 = vmatprep.subr.bf16.mxu1 %v1724_v51 }
  0x6b   :  { %1118 = vmatpush2.bf16.msra.mxu0 %v1719_v52 }
  0x6c   :  { %1171 = vmatpush2.bf16.msra.mxu1 %v1722_v53  ;;  %1119 = vmatprep.subr.bf16.mxu0 %v1727_v54 }
  0x6d   :  { %1172 = vmatprep.subr.bf16.mxu1 %v1730_v55 }
  0x6f   :  { %1120 = vmatpush2.bf16.msra.mxu0 %v1725_v56 }
  0x70   :  { %1173 = vmatpush2.bf16.msra.mxu1 %v1728_v57  ;;  %1121 = vmatprep.subr.bf16.mxu0 %v1733_v58 }
  0x71   :  { %1174 = vmatprep.subr.bf16.mxu1 %v1736_v59 }
  0x73   :  { %1122 = vmatpush2.bf16.msra.mxu0 %v1731_v60 }
  0x74   :  { %1175 = vmatpush2.bf16.msra.mxu1 %v1734_v61  ;;  %1123 = vmatprep.subr.bf16.mxu0 %v1745_v62 }
  0x75   :  { %1176 = vmatprep.subr.bf16.mxu1 %v1748_v63 }
  0x77   :  { %1124 = vmatpush2.bf16.msra.mxu0 %v1743_v0 }
  0x78   :  { %1177 = vmatpush2.bf16.msra.mxu1 %v1746_v1  ;;  %1125 = vmatprep.subr.bf16.mxu0 %v1751_v2 }
  0x79   :  { %1178 = vmatprep.subr.bf16.mxu1 %v1754_v3 }
  0x7b   :  { %1126 = vmatpush2.bf16.msra.mxu0 %v1749_v4 }
  0x7c   :  { %1179 = vmatpush2.bf16.msra.mxu1 %v1752_v5  ;;  %1127 = vmatprep.subr.bf16.mxu0 %v1757_v6 }
  0x7d   :  { %1180 = vmatprep.subr.bf16.mxu1 %v1760_v7 }
  0x7f   :  { %1128 = vmatpush2.bf16.msra.mxu0 %v1755_v8 }
  0x80   :  { %1181 = vmatpush2.bf16.msra.mxu1 %v1758_v9  ;;  %1203 = vmatprep.subr.bf16.mxu0 %v1769_v10 }
  0x81   :  { %1538 = vmatprep.subr.bf16.mxu1 %v1769_v10 }
  0x82   :  { %1130 = vmatmul.mubr.bf16.vlgmr.msra.gmra.mxu0 %v1761_v11 }
  0x83   :  { %1183 = vmatmul.mubr.bf16.vlgmr.msra.gmra.mxu1 %v1764_v12  ;;  %1204 = vmatpush1.bf16.msra.mxu0 %v1767_v13 }
  0x84   :  { %1546 = vmatpush1.bf16.msra.mxu1 %v1767_v13  ;;  %1205 = vmatprep.subr.bf16.mxu0 %v1772_v14 }
  0x85   :  { %1539 = vmatprep.subr.bf16.mxu1 %v1772_v14  ;;  %1139 = vmatprep.mubr.bf16.mxu0 %v1773_v15 }
  0x86   :  { %1192 = vmatprep.mubr.bf16.mxu1 %v1779_v16 }
  0x87   :  { %1206 = vmatpush1.bf16.msra.mxu0 %v1770_v17 }
  0x88   :  { %1547 = vmatpush1.bf16.msra.mxu1 %v1770_v17  ;;  %1207 = vmatprep.subr.bf16.mxu0 %v1778_v18 }
  0x89   :  { %1540 = vmatprep.subr.bf16.mxu1 %v1778_v18 }
  0x8a   :  { %1140 = vmatmul.mubr.bf16.gmra.mxu0 %v1775_v19 }
  0x8b   :  { %1193 = vmatmul.mubr.bf16.gmra.mxu1 %v1781_v20  ;;  %1208 = vmatpush1.bf16.msra.mxu0 %v1776_v21 }
  0x8c   :  { %1548 = vmatpush1.bf16.msra.mxu1 %v1776_v21  ;;  %1209 = vmatprep.subr.bf16.mxu0 %v1784_v22 }
  0x8d   :  { %1541 = vmatprep.subr.bf16.mxu1 %v1784_v22  ;;  %1235 = vmatprep.mubr.bf16.mxu0 %v1799_v25 }
  0x8e   :  { %1245 = vmatprep.mubr.bf16.mxu1 %v1799_v25 }
  0x8f   :  { %1210 = vmatpush1.bf16.msra.mxu0 %v1782_v23 }
  0x90   :  { %1549 = vmatpush1.bf16.msra.mxu1 %v1782_v23  ;;  %1211 = vmatprep.subr.bf16.mxu0 %v1787_v24 }
  0x91   :  { %1542 = vmatprep.subr.bf16.mxu1 %v1787_v24 }
  0x93   :  { %1212 = vmatpush1.bf16.msra.mxu0 %v1785_v26 }
  0x94   :  { %1550 = vmatpush1.bf16.msra.mxu1 %v1785_v26  ;;  %1213 = vmatprep.subr.bf16.mxu0 %v1790_v27 }
  0x95   :  { %1543 = vmatprep.subr.bf16.mxu1 %v1790_v27 }
  0x97   :  { %1214 = vmatpush1.bf16.msra.mxu0 %v1788_v28 }
  0x98   :  { %1551 = vmatpush1.bf16.msra.mxu1 %v1788_v28  ;;  %1215 = vmatprep.subr.bf16.mxu0 %v1793_v29 }
  0x99   :  { %1544 = vmatprep.subr.bf16.mxu1 %v1793_v29 }
  0x9b   :  { %1216 = vmatpush1.bf16.msra.mxu0 %v1791_v30 }
  0x9c   :  { %1552 = vmatpush1.bf16.msra.mxu1 %v1791_v30  ;;  %1217 = vmatprep.subr.bf16.mxu0 %v1796_v31 }
  0x9d   :  { %1545 = vmatprep.subr.bf16.mxu1 %v1796_v31 }
  0x9f   :  { %1218 = vmatpush1.bf16.msra.mxu0 %v1794_v32 }
  0xa0   :  { %1553 = vmatpush1.bf16.msra.mxu1 %v1794_v32 }
  0xa2   :  { %1236 = vmatmul.mubr.bf16.vlgmr.msra.gmra.mxu0 %v1797_v33 }
  0xa3   :  { %1246 = vmatmul.mubr.bf16.vlgmr.msra.gmra.mxu1 %v1798_v34 }
 0x102   :  { %v1025_v38 = vpop.f32.mrf.mxu0 }
 0x103   :  { %v1078_v39 = vpop.f32.mrf.mxu1 }
 0x104   :  { %v1027_v40 = vpop.f32.mrf.mxu0  ;;  %v1079_v2 = vadd.f32 %v1078_v39, %v1025_v38 }
 0x105   :  { %v1080_v41 = vpop.f32.mrf.mxu1 }
 0x106   :  { %v1029_v42 = vpop.f32.mrf.mxu0  ;;  %v1081_v4 = vadd.f32 %v1080_v41, %v1027_v40 }
 0x107   :  { %v1082_v43 = vpop.f32.mrf.mxu1 }
 0x108   :  { %v1031_v44 = vpop.f32.mrf.mxu0  ;;  %v1083_v11 = vadd.f32 %v1082_v43, %v1029_v42 }
 0x109   :  { %v1084_v45 = vpop.f32.mrf.mxu1 }
 0x10a   :  { %v1035_v46 = vpop.f32.mrf.mxu0  ;;  %v1085_v14 = vadd.f32 %v1084_v45, %v1031_v44 }
 0x10b   :  { %v1088_v47 = vpop.f32.mrf.mxu1 }
 0x10c   :  { %v1037_v48 = vpop.f32.mrf.mxu0  ;;  %v1089_v3 = vadd.f32 %v1088_v47, %v1035_v46 }
 0x10d   :  { %v1090_v49 = vpop.f32.mrf.mxu1 }
 0x10e   :  { %v1039_v50 = vpop.f32.mrf.mxu0  ;;  %v1091_v7 = vadd.f32 %v1090_v49, %v1037_v48 }
 0x10f   :  { %v1092_v51 = vpop.f32.mrf.mxu1 }
 0x110   :  { %v1041_v52 = vpop.f32.mrf.mxu0  ;;  %v1093_v12 = vadd.f32 %v1092_v51, %v1039_v50 }
 0x111   :  { %v1094_v53 = vpop.f32.mrf.mxu1 }
 0x112   :  { %v1095_v21 = vadd.f32 %v1094_v53, %v1041_v52 }
 0x142   :  { %v1131_v54 = vpop.f32.mrf.mxu0 }
 0x143   :  { %v1184_v55 = vpop.f32.mrf.mxu1  ;;  %v1132_v8 = vadd.f32 %v1131_v54, %v1079_v2 }
 0x144   :  { %v1133_v56 = vpop.f32.mrf.mxu0 }
 0x145   :  { %v1186_v57 = vpop.f32.mrf.mxu1  ;;  %v1134_v10 = vadd.f32 %v1133_v56, %v1081_v4  ;;  %v1185_v17 = vadd.f32 %v1184_v55, %v1132_v8  ;;  %v1801_v8 = vmov 1966171168  }
 0x146   :  { %v1135_v58 = vpop.f32.mrf.mxu0 }
 0x147   :  { %v1188_v59 = vpop.f32.mrf.mxu1  ;;  %v1136_v18 = vadd.f32 %v1135_v58, %v1083_v11  ;;  %v1187_v22 = vadd.f32 %v1186_v57, %v1134_v10 }
 0x148   :  { %v1137_v60 = vpop.f32.mrf.mxu0 }
 0x149   :  { %v1190_v61 = vpop.f32.mrf.mxu1  ;;  %v1138_v25 = vadd.f32 %v1137_v60, %v1085_v14  ;;  %v1189_v32 = vadd.f32 %v1188_v59, %v1136_v18 }
 0x14a   :  { %v1141_v62 = vpop.f32.mrf.mxu0 }
 0x14b   :  { %v1194_v63 = vpop.f32.mrf.mxu1  ;;  %v1142_v9 = vadd.f32 %v1141_v62, %v1089_v3  ;;  %v1191_v40 = vadd.f32 %v1190_v61, %v1138_v25 }
 0x14c   :  { %v1143_v0 = vpop.f32.mrf.mxu0 }
 0x14d   :  { %v1196_v1 = vpop.f32.mrf.mxu1  ;;  %v1144_v13 = vadd.f32 %v1143_v0, %v1091_v7  ;;  %v1195_v19 = vadd.f32 %v1194_v63, %v1142_v9  ;;  %v1297_v9 = vunpack.c.l.s4 %v1801_v8 }
 0x14e   :  { %v1145_v5 = vpop.f32.mrf.mxu0 }
 0x14f   :  { %v1198_v6 = vpop.f32.mrf.mxu1  ;;  %v1146_v20 = vadd.f32 %v1145_v5, %v1093_v12  ;;  %v1197_v26 = vadd.f32 %v1196_v1, %v1144_v13  ;;  %v1298_v18 = vunpack.c.0.s8 %v1297_v9 }
 0x150   :  { %v1147_v15 = vpop.f32.mrf.mxu0 }
 0x151   :  { %v1200_v16 = vpop.f32.mrf.mxu1  ;;  %v1148_v29 = vadd.f32 %v1147_v15, %v1095_v21  ;;  %v1199_v33 = vadd.f32 %v1198_v6, %v1146_v20 }
 0x153   :  { %v1201_v43 = vadd.f32 %v1200_v16, %v1148_v29 }
 0x162   :  { %v1237_v23 = vpop.f32.mrf.mxu0 }
 0x163   :  { %v1247_v24 = vpop.f32.mrf.mxu1  ;;  %v1238_v27 = vadd.f32 %v1237_v23, %v1185_v17 }
 0x164   :  { %v1248_v28 = vadd.f32 %v1247_v24, %v1195_v19  ;;  %v1239_v30 = vpop.f32.mrf.mxu0  ;;  %v1300_v19 = vshrl.u32 %v1268_v35, 7  ;;  %v1274_v35 = vld [vmem:[%s2371_s3] sm:$0x3] }
 0x165   :  { %v1249_v31 = vpop.f32.mrf.mxu1  ;;  %1256 = vst [vmem:[%s2373_s2] sm:$0xff] %v1238_v27  ;;  %v1240_v34 = vadd.f32 %v1239_v30, %v1187_v22  ;;  %v1318_v46 = vmul.f32 %v1238_v27, %v1238_v27 }
 0x166   :  { %1260 = vst [vmem:[%s2373_s2 + $0x20] sm:$0xff] %v1248_v28  ;;  %v1250_v37 = vadd.f32 %v1249_v31, %v1197_v26  ;;  %v1241_v38 = vpop.f32.mrf.mxu0  ;;  %v1322_v50 = vmul.f32 %v1248_v28, %v1248_v28  ;;  %v1301_v29 = vsub.s32 %v1298_v18, %v1300_v19 }
 0x167   :  { %v1251_v39 = vpop.f32.mrf.mxu1  ;;  %1257 = vst [vmem:[%s2373_s2 + $0x8] sm:$0xff] %v1240_v34  ;;  %v1242_v41 = vadd.f32 %v1241_v38, %v1189_v32  ;;  %v1319_v51 = vmul.f32 %v1240_v34, %v1240_v34 }
 0x168   :  { %1261 = vst [vmem:[%s2373_s2 + $0x28] sm:$0xff] %v1250_v37  ;;  %v1252_v42 = vadd.f32 %v1251_v39, %v1199_v33  ;;  %v1243_v44 = vpop.f32.mrf.mxu0  ;;  %v1323_v57 = vmul.f32 %v1250_v37, %v1250_v37 }
 0x169   :  { %v1253_v45 = vpop.f32.mrf.mxu1  ;;  %1258 = vst [vmem:[%s2373_s2 + $0x10] sm:$0xff] %v1242_v41  ;;  %v1275_v47 = vadd.f32 %v1242_v41, %v1238_v27  ;;  %v1320_v48 = vmul.f32 %v1242_v41, %v1242_v41  ;;  %v1244_v49 = vadd.f32 %v1243_v44, %v1191_v40  ;;  %v1317_v40 = vld [vmem:[%s2372_s4] sm:$0x3] }
 0x16a   :  { %1262 = vst [vmem:[%s2373_s2 + $0x30] sm:$0xff] %v1252_v42  ;;  %v1254_v52 = vadd.f32 %v1253_v45, %v1201_v43  ;;  %v1324_v58 = vmul.f32 %v1252_v42, %v1252_v42 }
 0x16b   :  { %v1326_v53 = vadd.f32 %v1320_v48, %v1318_v46  ;;  %v1276_v54 = vadd.f32 %v1275_v47, %v1248_v28  ;;  %1259 = vst [vmem:[%s2373_s2 + $0x18] sm:$0xff] %v1244_v49  ;;  %v1284_v55 = vadd.f32 %v1244_v49, %v1240_v34  ;;  %v1321_v56 = vmul.f32 %v1244_v49, %v1244_v49 }
 0x16c   :  { %1263 = vst [vmem:[%s2373_s2 + $0x38] sm:$0xff] %v1254_v52  ;;  %v1325_v63 = vmul.f32 %v1254_v52, %v1254_v52 }
 0x16d   :  { %v1277_v59 = vadd.f32 %v1276_v54, %v1252_v42  ;;  %v1327_v60 = vadd.f32 %v1326_v53, %v1322_v50  ;;  %v1335_v61 = vadd.f32 %v1321_v56, %v1319_v51  ;;  %v1285_v62 = vadd.f32 %v1284_v55, %v1250_v37 }
 0x16f   :  { %v1278_v0 = vrot.slane %v1277_v59, 4  ;;  %v1328_v1 = vadd.f32 %v1327_v60, %v1324_v58  ;;  %v1286_v2 = vadd.f32 %v1285_v62, %v1254_v52  ;;  %v1336_v3 = vadd.f32 %v1335_v61, %v1323_v57 }
 0x171   :  { %v1279_v4 = vadd.f32 %v1278_v0, %v1277_v59  ;;  %v1329_v5 = vrot.slane %v1328_v1, 4  ;;  %v1287_v6 = vrot.slane %v1286_v2, 4  ;;  %v1337_v7 = vadd.f32 %v1336_v3, %v1325_v63 }
 0x173   :  { %v1280_v10 = vrot.slane %v1279_v4, 2  ;;  %v1330_v11 = vadd.f32 %v1329_v5, %v1328_v1  ;;  %v1288_v12 = vadd.f32 %v1287_v6, %v1286_v2  ;;  %v1338_v13 = vrot.slane %v1337_v7, 4 }
 0x175   :  { %v1281_v14 = vadd.f32 %v1280_v10, %v1279_v4  ;;  %v1331_v15 = vrot.slane %v1330_v11, 2  ;;  %v1289_v16 = vrot.slane %v1288_v12, 2  ;;  %v1339_v17 = vadd.f32 %v1338_v13, %v1337_v7 }
 0x177   :  { %v1282_v20 = vrot.slane %v1281_v14, 1  ;;  %v1332_v21 = vadd.f32 %v1331_v15, %v1330_v11  ;;  %v1290_v22 = vadd.f32 %v1289_v16, %v1288_v12  ;;  %v1340_v23 = vrot.slane %v1339_v17, 2 }
 0x179   :  { %v1333_v24 = vrot.slane %v1332_v21, 1  ;;  %v1291_v25 = vrot.slane %v1290_v22, 1  ;;  %v1341_v26 = vadd.f32 %v1340_v23, %v1339_v17  ;;  %v1283_v27 = vadd.f32 %v1282_v20, %v1281_v14 }
 0x17b   :  { %v1292_v28 = vadd.f32 %v1291_v25, %v1290_v22  ;;  %v1342_v30 = vrot.slane %v1341_v26, 1  ;;  %v1334_v31 = vadd.f32 %v1333_v24, %v1332_v21 }
 0x17d   :  { %v1295_v32 = vcombine.low %v1283_v27, %v1292_v28  ;;  %v1343_v33 = vadd.f32 %v1342_v30, %v1341_v26 }
 0x17f   :  { %v1302_v34 = vrot.slane %v1295_v32, %v1301_v29  ;;  %v1346_v37 = vcombine.low %v1334_v31, %v1343_v33 }
 0x181   :  { %v1309_v38 = vrot.slane %v1302_v34, %v1301_v29  ;;  %v1353_v39 = vrot.slane %v1346_v37, %v1301_v29 }
 0x183   :  { %v1311_v41 = vadd.f32 %v1309_v38, %v1274_v35  ;;  %v1360_v42 = vrot.slane %v1353_v39, %v1301_v29 }
 0x185   :  { %1316 = vst.msk [vmem:[%s2371_s3] sm:$0x3] %vm2314_vm0, %v1311_v41  ;;  %v1362_v43 = vadd.f32 %v1360_v42, %v1317_v40 }
 0x187   :  { %1363 = vst.msk [vmem:[%s2372_s4] sm:$0x3] %vm2314_vm0, %v1362_v43 }

// kernel: encoder_forward.15
= control target key start
LH: loop header
LB: loop body
LE: loop exit
PB: predicated region body
PF: predicated region fallthrough
CT: control target
= control target key end

     0   :  { %v20_v0 = vlaneseq  ;;  %s144_s1 = inlined_call_operand.vmem [shape: f32[1,512], index: 1, kind: input, shape index: {}]   ;;  %s145_s2 = inlined_call_operand.vmem [shape: f32[1,512], index: 2, kind: input, shape index: {}]   ;;  %s146_s0 = inlined_call_operand.vmem [shape: f32[8,512], index: 0, kind: input, shape index: {}]   ;;  %s147_s3 = inlined_call_operand.vmem [shape: bf16[8,512], index: 3, kind: output, shape index: {}]  }
   0x1   :  { %v18_v2 = vld [vmem:[%s144_s1] sm:$0xf]  ;;  %v15_v9 = vld [vmem:[%s146_s0 + $0x8] sm:$0xff]  ;;  %v16_v14 = vld [vmem:[%s146_s0 + $0x10] sm:$0xff] }
   0x2   :  { %v21_v1 = vshrl.u32 %v20_v0, 7  ;;  %v44_v3 = vld [vmem:[%s145_s2] sm:$0xf]  ;;  %v17_v15 = vld [vmem:[%s146_s0 + $0x18] sm:$0xff] }
   0x3   :  { %v14_v8 = vld [vmem:[%s146_s0] sm:$0xff] }
   0x4   :  { %v22_v4 = vsub.s32 0, %v21_v1  ;;  %v26_v5 = vsub.s32 1, %v21_v1  ;;  %v30_v6 = vsub.s32 2, %v21_v1  ;;  %v34_v7 = vsub.s32 3, %v21_v1 }
   0x6   :  { %v23_v10 = vrot.slane %v18_v2, %v22_v4  ;;  %v27_v11 = vrot.slane %v18_v2, %v26_v5  ;;  %v49_v12 = vrot.slane %v44_v3, %v22_v4  ;;  %v53_v13 = vrot.slane %v44_v3, %v26_v5 }
   0x7   :  { %v31_v16 = vrot.slane %v18_v2, %v30_v6  ;;  %v35_v17 = vrot.slane %v18_v2, %v34_v7  ;;  %v57_v18 = vrot.slane %v44_v3, %v30_v6  ;;  %v61_v19 = vrot.slane %v44_v3, %v34_v7 }
   0x8   :  { %v40_v20 = vmul.f32 %v23_v10, %v14_v8  ;;  %v41_v21 = vmul.f32 %v27_v11, %v15_v9 }
   0x9   :  { %v42_v22 = vmul.f32 %v31_v16, %v16_v14  ;;  %v43_v23 = vmul.f32 %v35_v17, %v17_v15 }
   0xa   :  { %v66_v24 = vadd.f32 %v49_v12, %v40_v20  ;;  %v67_v25 = vadd.f32 %v53_v13, %v41_v21 }
   0xb   :  { %v68_v26 = vadd.f32 %v57_v18, %v42_v22  ;;  %v69_v27 = vadd.f32 %v61_v19, %v43_v23 }
   0xc   :  { %v70_v28 = vmax.f32 %v66_v24, 0.0  ;;  %v71_v29 = vmax.f32 %v67_v25, 0.0 }
   0xd   :  { %v72_v30 = vmax.f32 %v68_v26, 0.0  ;;  %v73_v31 = vmax.f32 %v69_v27, 0.0 }
   0xe   :  { %v98_v32 = vpack.c.bf16 %v71_v29, %v70_v28 }
   0xf   :  { %v99_v33 = vpack.c.bf16 %v73_v31, %v72_v30 }
  0x10   :  { %90 = vst [vmem:[%s147_s3] sm:$0xff] %v98_v32 }
  0x11   :  { %91 = vst [vmem:[%s147_s3 + $0x8] sm:$0xff] %v99_v33 }

// kernel: encoder_forward.14
= control target key start
LH: loop header
LB: loop body
LE: loop exit
PB: predicated region body
PF: predicated region fallthrough
CT: control target
= control target key end

     0   :  { %s7896_s1 = inlined_call_operand.vmem [shape: bf16[2304,512], index: 1, kind: input, shape index: {}]   ;;  %s7897_s0 = inlined_call_operand.vmem [shape: bf16[8,2304], index: 0, kind: input, shape index: {}]   ;;  %s7898_s2 = inlined_call_operand.vmem [shape: f32[8,512], index: 2, kind: output, shape index: {0}]   ;;  %s7899_s3 = inlined_call_operand.vmem [shape: f32[1,512], index: 3, kind: output, shape index: {1}]   ;;  %s7900_s4 = inlined_call_operand.vmem [shape: f32[1,512], index: 4, kind: output, shape index: {2}]  }
   0x1   :  { %v5022_v0 = vld [vmem:[%s7896_s1 + $0xe4] ss:$16 sps:$4 sm:$0xff]   ;;  %v5026_v2 = vld [vmem:[%s7896_s1 + $0xe0] ss:$16 sps:$4 sm:$0xff]   ;;  %v15_v48 = vld [vmem:[%s7897_s0 + $0x8] sm:$0xff] }
   0x2   :  { %v5024_v1 = vld [vmem:[%s7896_s1 + $0x2e4] ss:$16 sps:$4 sm:$0xff]   ;;  %3542 = vmatprep.subr.bf16.mxu0 %v5022_v0  ;;  %v5027_v3 = vld [vmem:[%s7896_s1 + $0x2e0] ss:$16 sps:$4 sm:$0xff]   ;;  %v6083_v51 = vcombine.high %v15_v48, %v15_v48 }
   0x3   :  { %3583 = vmatprep.subr.bf16.mxu1 %v5024_v1  ;;  %v5028_v4 = vld [vmem:[%s7896_s1 + $0xc4] ss:$16 sps:$4 sm:$0xff]   ;;  %3543 = vmatpush1.bf16.msra.mxu0 %v5026_v2  ;;  %v5032_v6 = vld [vmem:[%s7896_s1 + $0xc0] ss:$16 sps:$4 sm:$0xff]  }
   0x4   :  { %3584 = vmatpush1.bf16.msra.mxu1 %v5027_v3  ;;  %v5030_v5 = vld [vmem:[%s7896_s1 + $0x2c4] ss:$16 sps:$4 sm:$0xff]   ;;  %3544 = vmatprep.subr.bf16.mxu0 %v5028_v4  ;;  %v5033_v7 = vld [vmem:[%s7896_s1 + $0x2c0] ss:$16 sps:$4 sm:$0xff]  }
   0x5   :  { %3585 = vmatprep.subr.bf16.mxu1 %v5030_v5  ;;  %v5034_v8 = vld [vmem:[%s7896_s1 + $0xa4] ss:$16 sps:$4 sm:$0xff]   ;;  %v5038_v10 = vld [vmem:[%s7896_s1 + $0xa0] ss:$16 sps:$4 sm:$0xff]   ;;  %3615 = vmatprep.mubr.bf16.mxu1 %v6083_v51 }
   0x6   :  { %v5036_v9 = vld [vmem:[%s7896_s1 + $0x2a4] ss:$16 sps:$4 sm:$0xff]   ;;  %v5039_v11 = vld [vmem:[%s7896_s1 + $0x2a0] ss:$16 sps:$4 sm:$0xff]  }
   0x7   :  { %3545 = vmatpush1.bf16.msra.mxu0 %v5032_v6  ;;  %v5040_v12 = vld [vmem:[%s7896_s1 + $0x84] ss:$16 sps:$4 sm:$0xff]   ;;  %v5044_v14 = vld [vmem:[%s7896_s1 + $0x80] ss:$16 sps:$4 sm:$0xff]  }
   0x8   :  { %3586 = vmatpush1.bf16.msra.mxu1 %v5033_v7  ;;  %3546 = vmatprep.subr.bf16.mxu0 %v5034_v8  ;;  %v5042_v13 = vld [vmem:[%s7896_s1 + $0x284] ss:$16 sps:$4 sm:$0xff]   ;;  %v5045_v15 = vld [vmem:[%s7896_s1 + $0x280] ss:$16 sps:$4 sm:$0xff]   ;;  %v6143_v7 = vcombine.low %v15_v48, %v15_v48 }
   0x9   :  { %3587 = vmatprep.subr.bf16.mxu1 %v5036_v9  ;;  %v5046_v16 = vld [vmem:[%s7896_s1 + $0x64] ss:$16 sps:$4 sm:$0xff]   ;;  %v5050_v18 = vld [vmem:[%s7896_s1 + $0x60] ss:$16 sps:$4 sm:$0xff]  }
   0xa   :  { %v5048_v17 = vld [vmem:[%s7896_s1 + $0x264] ss:$16 sps:$4 sm:$0xff]   ;;  %v5051_v19 = vld [vmem:[%s7896_s1 + $0x260] ss:$16 sps:$4 sm:$0xff]  }
   0xb   :  { %3547 = vmatpush1.bf16.msra.mxu0 %v5038_v10  ;;  %v5052_v20 = vld [vmem:[%s7896_s1 + $0x44] ss:$16 sps:$4 sm:$0xff]   ;;  %v5056_v22 = vld [vmem:[%s7896_s1 + $0x40] ss:$16 sps:$4 sm:$0xff]  }
   0xc   :  { %3588 = vmatpush1.bf16.msra.mxu1 %v5039_v11  ;;  %3548 = vmatprep.subr.bf16.mxu0 %v5040_v12  ;;  %v5054_v21 = vld [vmem:[%s7896_s1 + $0x244] ss:$16 sps:$4 sm:$0xff]   ;;  %v5057_v23 = vld [vmem:[%s7896_s1 + $0x240] ss:$16 sps:$4 sm:$0xff]  }
   0xd   :  { %3589 = vmatprep.subr.bf16.mxu1 %v5042_v13  ;;  %v5058_v24 = vld [vmem:[%s7896_s1 + $0x24] ss:$16 sps:$4 sm:$0xff]   ;;  %v5062_v26 = vld [vmem:[%s7896_s1 + $0x20] ss:$16 sps:$4 sm:$0xff]  }
   0xe   :  { %v5060_v25 = vld [vmem:[%s7896_s1 + $0x224] ss:$16 sps:$4 sm:$0xff]   ;;  %v5063_v27 = vld [vmem:[%s7896_s1 + $0x220] ss:$16 sps:$4 sm:$0xff]  }
   0xf   :  { %3549 = vmatpush1.bf16.msra.mxu0 %v5044_v14  ;;  %v5064_v28 = vld [vmem:[%s7896_s1 + $0x4] ss:$16 sps:$4 sm:$0xff]   ;;  %v5068_v30 = vld [vmem:[%s7896_s1] ss:$16 sps:$4 sm:$0xff]  }
  0x10   :  { %3590 = vmatpush1.bf16.msra.mxu1 %v5045_v15  ;;  %3550 = vmatprep.subr.bf16.mxu0 %v5046_v16  ;;  %v5066_v29 = vld [vmem:[%s7896_s1 + $0x204] ss:$16 sps:$4 sm:$0xff]   ;;  %v5069_v31 = vld [vmem:[%s7896_s1 + $0x200] ss:$16 sps:$4 sm:$0xff]  }
  0x11   :  { %3591 = vmatprep.subr.bf16.mxu1 %v5048_v17  ;;  %v5070_v32 = vld [vmem:[%s7896_s1 + $0x1e4] ss:$16 sps:$4 sm:$0xff]   ;;  %v5074_v34 = vld [vmem:[%s7896_s1 + $0x1e0] ss:$16 sps:$4 sm:$0xff]  }
  0x12   :  { %v5072_v33 = vld [vmem:[%s7896_s1 + $0x3e4] ss:$16 sps:$4 sm:$0xff]   ;;  %v5075_v35 = vld [vmem:[%s7896_s1 + $0x3e0] ss:$16 sps:$4 sm:$0xff]  }
  0x13   :  { %3551 = vmatpush1.bf16.msra.mxu0 %v5050_v18  ;;  %v5076_v36 = vld [vmem:[%s7896_s1 + $0x1c4] ss:$16 sps:$4 sm:$0xff]   ;;  %v5080_v38 = vld [vmem:[%s7896_s1 + $0x1c0] ss:$16 sps:$4 sm:$0xff]  }
  0x14   :  { %3592 = vmatpush1.bf16.msra.mxu1 %v5051_v19  ;;  %3552 = vmatprep.subr.bf16.mxu0 %v5052_v20  ;;  %v5078_v37 = vld [vmem:[%s7896_s1 + $0x3c4] ss:$16 sps:$4 sm:$0xff]   ;;  %v5081_v39 = vld [vmem:[%s7896_s1 + $0x3c0] ss:$16 sps:$4 sm:$0xff]  }
  0x15   :  { %3593 = vmatprep.subr.bf16.mxu1 %v5054_v21  ;;  %v5082_v40 = vld [vmem:[%s7896_s1 + $0x1a4] ss:$16 sps:$4 sm:$0xff]   ;;  %v5086_v42 = vld [vmem:[%s7896_s1 + $0x1a0] ss:$16 sps:$4 sm:$0xff]  }
  0x16   :  { %v5084_v41 = vld [vmem:[%s7896_s1 + $0x3a4] ss:$16 sps:$4 sm:$0xff]   ;;  %v5087_v43 = vld [vmem:[%s7896_s1 + $0x3a0] ss:$16 sps:$4 sm:$0xff]  }
  0x17   :  { %3553 = vmatpush1.bf16.msra.mxu0 %v5056_v22  ;;  %v5088_v44 = vld [vmem:[%s7896_s1 + $0x184] ss:$16 sps:$4 sm:$0xff]   ;;  %v5092_v49 = vld [vmem:[%s7896_s1 + $0x180] ss:$16 sps:$4 sm:$0xff]  }
  0x18   :  { %3594 = vmatpush1.bf16.msra.mxu1 %v5057_v23  ;;  %3554 = vmatprep.subr.bf16.mxu0 %v5058_v24  ;;  %v5090_v45 = vld [vmem:[%s7896_s1 + $0x384] ss:$16 sps:$4 sm:$0xff]   ;;  %v5093_v50 = vld [vmem:[%s7896_s1 + $0x380] ss:$16 sps:$4 sm:$0xff]  }
  0x19   :  { %3595 = vmatprep.subr.bf16.mxu1 %v5060_v25  ;;  %v14_v46 = vld [vmem:[%s7897_s0] sm:$0xff] }
  0x1a   :  { %v6072_v47 = vcombine.high %v14_v46, %v14_v46  ;;  %v5094_v52 = vld [vmem:[%s7896_s1 + $0x164] ss:$16 sps:$4 sm:$0xff]   ;;  %v5098_v54 = vld [vmem:[%s7896_s1 + $0x160] ss:$16 sps:$4 sm:$0xff]   ;;  %v6141_v6 = vcombine.low %v14_v46, %v14_v46 }
  0x1b   :  { %3555 = vmatpush1.bf16.msra.mxu0 %v5062_v26  ;;  %v5096_v53 = vld [vmem:[%s7896_s1 + $0x364] ss:$16 sps:$4 sm:$0xff]   ;;  %v5099_v55 = vld [vmem:[%s7896_s1 + $0x360] ss:$16 sps:$4 sm:$0xff]  }
  0x1c   :  { %3596 = vmatpush1.bf16.msra.mxu1 %v5063_v27  ;;  %3556 = vmatprep.subr.bf16.mxu0 %v5064_v28  ;;  %v5100_v56 = vld [vmem:[%s7896_s1 + $0x144] ss:$16 sps:$4 sm:$0xff]   ;;  %v5104_v58 = vld [vmem:[%s7896_s1 + $0x140] ss:$16 sps:$4 sm:$0xff]  }
  0x1d   :  { %3597 = vmatprep.subr.bf16.mxu1 %v5066_v29  ;;  %3574 = vmatprep.mubr.bf16.mxu0 %v6072_v47  ;;  %v5102_v57 = vld [vmem:[%s7896_s1 + $0x344] ss:$16 sps:$4 sm:$0xff]   ;;  %v5105_v59 = vld [vmem:[%s7896_s1 + $0x340] ss:$16 sps:$4 sm:$0xff]  }
  0x1e   :  { %v5106_v60 = vld [vmem:[%s7896_s1 + $0x124] ss:$16 sps:$4 sm:$0xff]   ;;  %v5110_v62 = vld [vmem:[%s7896_s1 + $0x120] ss:$16 sps:$4 sm:$0xff]  }
  0x1f   :  { %3557 = vmatpush1.bf16.msra.mxu0 %v5068_v30  ;;  %v5108_v61 = vld [vmem:[%s7896_s1 + $0x324] ss:$16 sps:$4 sm:$0xff]   ;;  %v5111_v63 = vld [vmem:[%s7896_s1 + $0x320] ss:$16 sps:$4 sm:$0xff]  }
  0x20   :  { %3598 = vmatpush1.bf16.msra.mxu1 %v5069_v31  ;;  %3558 = vmatprep.subr.bf16.mxu0 %v5070_v32  ;;  %v5112_v0 = vld [vmem:[%s7896_s1 + $0x104] ss:$16 sps:$4 sm:$0xff]   ;;  %v5116_v2 = vld [vmem:[%s7896_s1 + $0x100] ss:$16 sps:$4 sm:$0xff]  }
  0x21   :  { %3599 = vmatprep.subr.bf16.mxu1 %v5072_v33  ;;  %v5114_v1 = vld [vmem:[%s7896_s1 + $0x304] ss:$16 sps:$4 sm:$0xff]   ;;  %v5117_v3 = vld [vmem:[%s7896_s1 + $0x300] ss:$16 sps:$4 sm:$0xff]   ;;  %v6227_v33 = vld [vmem:[%s7897_s0 + $0x18] sm:$0xff] }
  0x22   :  { %v5124_v4 = vld [vmem:[%s7896_s1 + $0x4e4] ss:$16 sps:$4 sm:$0xff]   ;;  %v5122_v8 = vld [vmem:[%s7896_s1 + $0x4e0] ss:$16 sps:$4 sm:$0xff]  }
  0x23   :  { %3559 = vmatpush2.bf16.msra.mxu0 %v5074_v34  ;;  %v5127_v5 = vld [vmem:[%s7896_s1 + $0x6e4] ss:$16 sps:$4 sm:$0xff]   ;;  %v5125_v9 = vld [vmem:[%s7896_s1 + $0x6e0] ss:$16 sps:$4 sm:$0xff]  }
  0x24   :  { %3600 = vmatpush2.bf16.msra.mxu1 %v5075_v35  ;;  %3560 = vmatprep.subr.bf16.mxu0 %v5076_v36  ;;  %v5130_v10 = vld [vmem:[%s7896_s1 + $0x4c4] ss:$16 sps:$4 sm:$0xff]   ;;  %v5128_v12 = vld [vmem:[%s7896_s1 + $0x4c0] ss:$16 sps:$4 sm:$0xff]  }
  0x25   :  { %3601 = vmatprep.subr.bf16.mxu1 %v5078_v37  ;;  %v5133_v11 = vld [vmem:[%s7896_s1 + $0x6c4] ss:$16 sps:$4 sm:$0xff]   ;;  %v5131_v13 = vld [vmem:[%s7896_s1 + $0x6c0] ss:$16 sps:$4 sm:$0xff]   ;;  %v6241_v37 = vcombine.high %v6227_v33, %v6227_v33 }
  0x26   :  { %v5136_v14 = vld [vmem:[%s7896_s1 + $0x4a4] ss:$16 sps:$4 sm:$0xff]   ;;  %v5134_v16 = vld [vmem:[%s7896_s1 + $0x4a0] ss:$16 sps:$4 sm:$0xff]  }
  0x27   :  { %3561 = vmatpush2.bf16.msra.mxu0 %v5080_v38  ;;  %v5139_v15 = vld [vmem:[%s7896_s1 + $0x6a4] ss:$16 sps:$4 sm:$0xff]   ;;  %v5137_v17 = vld [vmem:[%s7896_s1 + $0x6a0] ss:$16 sps:$4 sm:$0xff]  }
  0x28   :  { %3602 = vmatpush2.bf16.msra.mxu1 %v5081_v39  ;;  %3562 = vmatprep.subr.bf16.mxu0 %v5082_v40  ;;  %v5142_v18 = vld [vmem:[%s7896_s1 + $0x484] ss:$16 sps:$4 sm:$0xff]   ;;  %v5140_v20 = vld [vmem:[%s7896_s1 + $0x480] ss:$16 sps:$4 sm:$0xff]  }
  0x29   :  { %3603 = vmatprep.subr.bf16.mxu1 %v5084_v41  ;;  %v5145_v19 = vld [vmem:[%s7896_s1 + $0x684] ss:$16 sps:$4 sm:$0xff]   ;;  %v5143_v21 = vld [vmem:[%s7896_s1 + $0x680] ss:$16 sps:$4 sm:$0xff]  }
  0x2a   :  { %v5148_v22 = vld [vmem:[%s7896_s1 + $0x464] ss:$16 sps:$4 sm:$0xff]   ;;  %v5146_v24 = vld [vmem:[%s7896_s1 + $0x460] ss:$16 sps:$4 sm:$0xff]  }
  0x2b   :  { %3563 = vmatpush2.bf16.msra.mxu0 %v5086_v42  ;;  %v5151_v23 = vld [vmem:[%s7896_s1 + $0x664] ss:$16 sps:$4 sm:$0xff]   ;;  %v5149_v25 = vld [vmem:[%s7896_s1 + $0x660] ss:$16 sps:$4 sm:$0xff]  }
  0x2c   :  { %3604 = vmatpush2.bf16.msra.mxu1 %v5087_v43  ;;  %3564 = vmatprep.subr.bf16.mxu0 %v5088_v44  ;;  %v5154_v26 = vld [vmem:[%s7896_s1 + $0x444] ss:$16 sps:$4 sm:$0xff]   ;;  %v5152_v28 = vld [vmem:[%s7896_s1 + $0x440] ss:$16 sps:$4 sm:$0xff]  }
  0x2d   :  { %3605 = vmatprep.subr.bf16.mxu1 %v5090_v45  ;;  %v5157_v27 = vld [vmem:[%s7896_s1 + $0x644] ss:$16 sps:$4 sm:$0xff]   ;;  %v5155_v29 = vld [vmem:[%s7896_s1 + $0x640] ss:$16 sps:$4 sm:$0xff]  }
  0x2e   :  { %v5160_v30 = vld [vmem:[%s7896_s1 + $0x424] ss:$16 sps:$4 sm:$0xff]   ;;  %v5158_v34 = vld [vmem:[%s7896_s1 + $0x420] ss:$16 sps:$4 sm:$0xff]  }
  0x2f   :  { %3565 = vmatpush2.bf16.msra.mxu0 %v5092_v49  ;;  %v5163_v31 = vld [vmem:[%s7896_s1 + $0x624] ss:$16 sps:$4 sm:$0xff]   ;;  %v5161_v35 = vld [vmem:[%s7896_s1 + $0x620] ss:$16 sps:$4 sm:$0xff]  }
  0x30   :  { %3606 = vmatpush2.bf16.msra.mxu1 %v5093_v50  ;;  %3566 = vmatprep.subr.bf16.mxu0 %v5094_v52  ;;  %v6222_v32 = vld [vmem:[%s7897_s0 + $0x10] sm:$0xff] }
  0x31   :  { %3607 = vmatprep.subr.bf16.mxu1 %v5096_v53  ;;  %v6237_v36 = vcombine.high %v6222_v32, %v6222_v32  ;;  %v5166_v38 = vld [vmem:[%s7896_s1 + $0x404] ss:$16 sps:$4 sm:$0xff]   ;;  %v5164_v40 = vld [vmem:[%s7896_s1 + $0x400] ss:$16 sps:$4 sm:$0xff]  }
  0x32   :  { %v5169_v39 = vld [vmem:[%s7896_s1 + $0x604] ss:$16 sps:$4 sm:$0xff]   ;;  %v5167_v41 = vld [vmem:[%s7896_s1 + $0x600] ss:$16 sps:$4 sm:$0xff]  }
  0x33   :  { %3567 = vmatpush2.bf16.msra.mxu0 %v5098_v54  ;;  %v5172_v42 = vld [vmem:[%s7896_s1 + $0x5e4] ss:$16 sps:$4 sm:$0xff]   ;;  %v5170_v44 = vld [vmem:[%s7896_s1 + $0x5e0] ss:$16 sps:$4 sm:$0xff]  }
  0x34   :  { %3608 = vmatpush2.bf16.msra.mxu1 %v5099_v55  ;;  %3568 = vmatprep.subr.bf16.mxu0 %v5100_v56  ;;  %v5175_v43 = vld [vmem:[%s7896_s1 + $0x7e4] ss:$16 sps:$4 sm:$0xff]   ;;  %v5173_v45 = vld [vmem:[%s7896_s1 + $0x7e0] ss:$16 sps:$4 sm:$0xff]  }
  0x35   :  { %3609 = vmatprep.subr.bf16.mxu1 %v5102_v57  ;;  %v5178_v46 = vld [vmem:[%s7896_s1 + $0x5c4] ss:$16 sps:$4 sm:$0xff]   ;;  %v5176_v49 = vld [vmem:[%s7896_s1 + $0x5c0] ss:$16 sps:$4 sm:$0xff]  }
  0x36   :  { %v5181_v48 = vld [vmem:[%s7896_s1 + $0x7c4] ss:$16 sps:$4 sm:$0xff]   ;;  %v5179_v50 = vld [vmem:[%s7896_s1 + $0x7c0] ss:$16 sps:$4 sm:$0xff]  }
  0x37   :  { %3569 = vmatpush2.bf16.msra.mxu0 %v5104_v58  ;;  %v5184_v52 = vld [vmem:[%s7896_s1 + $0x5a4] ss:$16 sps:$4 sm:$0xff]   ;;  %v5182_v54 = vld [vmem:[%s7896_s1 + $0x5a0] ss:$16 sps:$4 sm:$0xff]  }
  0x38   :  { %3610 = vmatpush2.bf16.msra.mxu1 %v5105_v59  ;;  %3570 = vmatprep.subr.bf16.mxu0 %v5106_v60  ;;  %v5187_v53 = vld [vmem:[%s7896_s1 + $0x7a4] ss:$16 sps:$4 sm:$0xff]   ;;  %v5185_v55 = vld [vmem:[%s7896_s1 + $0x7a0] ss:$16 sps:$4 sm:$0xff]  }
  0x39   :  { %3611 = vmatprep.subr.bf16.mxu1 %v5108_v61  ;;  %v5190_v56 = vld [vmem:[%s7896_s1 + $0x584] ss:$16 sps:$4 sm:$0xff]   ;;  %v5188_v58 = vld [vmem:[%s7896_s1 + $0x580] ss:$16 sps:$4 sm:$0xff]  }
  0x3a   :  { %v5193_v57 = vld [vmem:[%s7896_s1 + $0x784] ss:$16 sps:$4 sm:$0xff]   ;;  %v5191_v59 = vld [vmem:[%s7896_s1 + $0x780] ss:$16 sps:$4 sm:$0xff]  }
  0x3b   :  { %3571 = vmatpush2.bf16.msra.mxu0 %v5110_v62  ;;  %v5196_v60 = vld [vmem:[%s7896_s1 + $0x564] ss:$16 sps:$4 sm:$0xff]   ;;  %v5194_v62 = vld [vmem:[%s7896_s1 + $0x560] ss:$16 sps:$4 sm:$0xff]  }
  0x3c   :  { %3612 = vmatpush2.bf16.msra.mxu1 %v5111_v63  ;;  %3572 = vmatprep.subr.bf16.mxu0 %v5112_v0  ;;  %v5199_v61 = vld [vmem:[%s7896_s1 + $0x764] ss:$16 sps:$4 sm:$0xff]   ;;  %v5197_v63 = vld [vmem:[%s7896_s1 + $0x760] ss:$16 sps:$4 sm:$0xff]  }
  0x3d   :  { %3613 = vmatprep.subr.bf16.mxu1 %v5114_v1  ;;  %v5202_v0 = vld [vmem:[%s7896_s1 + $0x544] ss:$16 sps:$4 sm:$0xff]  }
  0x3e   :  { %v5205_v1 = vld [vmem:[%s7896_s1 + $0x744] ss:$16 sps:$4 sm:$0xff]  }
  0x3f   :  { %3573 = vmatpush2.bf16.msra.mxu0 %v5116_v2  ;;  %v5200_v2 = vld [vmem:[%s7896_s1 + $0x540] ss:$16 sps:$4 sm:$0xff]  }
  0x40   :  { %3614 = vmatpush2.bf16.msra.mxu1 %v5117_v3  ;;  %3624 = vmatprep.subr.bf16.mxu0 %v5124_v4  ;;  %v5203_v3 = vld [vmem:[%s7896_s1 + $0x740] ss:$16 sps:$4 sm:$0xff]   ;;  %v5208_v4 = vld [vmem:[%s7896_s1 + $0x524] ss:$16 sps:$4 sm:$0xff]  }
  0x41   :  { %3665 = vmatprep.subr.bf16.mxu1 %v5127_v5  ;;  %v5211_v5 = vld [vmem:[%s7896_s1 + $0x724] ss:$16 sps:$4 sm:$0xff]  }
  0x42   :  { %3575 = vmatmul.mubr.bf16.vlgmr.msra.gmra.mxu0 %v6141_v6 }
  0x43   :  { %3616 = vmatmul.mubr.bf16.vlgmr.msra.gmra.mxu1 %v6143_v7  ;;  %3625 = vmatpush1.bf16.msra.mxu0 %v5122_v8  ;;  %v5206_v8 = vld [vmem:[%s7896_s1 + $0x520] ss:$16 sps:$4 sm:$0xff]  }
  0x44   :  { %3666 = vmatpush1.bf16.msra.mxu1 %v5125_v9  ;;  %3626 = vmatprep.subr.bf16.mxu0 %v5130_v10  ;;  %v5209_v9 = vld [vmem:[%s7896_s1 + $0x720] ss:$16 sps:$4 sm:$0xff]   ;;  %v5214_v10 = vld [vmem:[%s7896_s1 + $0x504] ss:$16 sps:$4 sm:$0xff]  }
  0x45   :  { %3667 = vmatprep.subr.bf16.mxu1 %v5133_v11  ;;  %3656 = vmatprep.mubr.bf16.mxu0 %v6237_v36  ;;  %v5217_v11 = vld [vmem:[%s7896_s1 + $0x704] ss:$16 sps:$4 sm:$0xff]  }
  0x46   :  { %3697 = vmatprep.mubr.bf16.mxu1 %v6241_v37 }
  0x47   :  { %3627 = vmatpush1.bf16.msra.mxu0 %v5128_v12  ;;  %v5212_v12 = vld [vmem:[%s7896_s1 + $0x500] ss:$16 sps:$4 sm:$0xff]  }
  0x48   :  { %3668 = vmatpush1.bf16.msra.mxu1 %v5131_v13  ;;  %3628 = vmatprep.subr.bf16.mxu0 %v5136_v14  ;;  %v5215_v13 = vld [vmem:[%s7896_s1 + $0x700] ss:$16 sps:$4 sm:$0xff]   ;;  %v5224_v14 = vld [vmem:[%s7896_s1 + $0x8e4] ss:$16 sps:$4 sm:$0xff]  }
  0x49   :  { %3669 = vmatprep.subr.bf16.mxu1 %v5139_v15  ;;  %v5227_v15 = vld [vmem:[%s7896_s1 + $0xae4] ss:$16 sps:$4 sm:$0xff]  }
  0x4b   :  { %3629 = vmatpush1.bf16.msra.mxu0 %v5134_v16  ;;  %v6361_v16 = vcombine.low %v6222_v32, %v6222_v32  ;;  %v5242_v32 = vld [vmem:[%s7896_s1 + $0x884] ss:$16 sps:$4 sm:$0xff]  }
  0x4c   :  { %3670 = vmatpush1.bf16.msra.mxu1 %v5137_v17  ;;  %3630 = vmatprep.subr.bf16.mxu0 %v5142_v18  ;;  %v6365_v17 = vcombine.low %v6227_v33, %v6227_v33  ;;  %v5222_v18 = vld [vmem:[%s7896_s1 + $0x8e0] ss:$16 sps:$4 sm:$0xff]   ;;  %v5245_v33 = vld [vmem:[%s7896_s1 + $0xa84] ss:$16 sps:$4 sm:$0xff]  }
  0x4d   :  { %3671 = vmatprep.subr.bf16.mxu1 %v5145_v19  ;;  %v5225_v19 = vld [vmem:[%s7896_s1 + $0xae0] ss:$16 sps:$4 sm:$0xff]  }
  0x4f   :  { %3631 = vmatpush1.bf16.msra.mxu0 %v5140_v20  ;;  %v5230_v20 = vld [vmem:[%s7896_s1 + $0x8c4] ss:$16 sps:$4 sm:$0xff]  }
  0x50   :  { %3672 = vmatpush1.bf16.msra.mxu1 %v5143_v21  ;;  %3632 = vmatprep.subr.bf16.mxu0 %v5148_v22  ;;  %v5233_v21 = vld [vmem:[%s7896_s1 + $0xac4] ss:$16 sps:$4 sm:$0xff]  }
  0x51   :  { %3673 = vmatprep.subr.bf16.mxu1 %v5151_v23  ;;  %v6382_v22 = vld [vmem:[%s7897_s0 + $0x20] sm:$0xff]  ;;  %v6387_v23 = vld [vmem:[%s7897_s0 + $0x28] sm:$0xff] }
  0x53   :  { %3633 = vmatpush1.bf16.msra.mxu0 %v5146_v24  ;;  %v6391_v24 = vcombine.high %v6382_v22, %v6382_v22 }
  0x54   :  { %3674 = vmatpush1.bf16.msra.mxu1 %v5149_v25  ;;  %3634 = vmatprep.subr.bf16.mxu0 %v5154_v26  ;;  %v6395_v25 = vcombine.high %v6387_v23, %v6387_v23  ;;  %v5228_v26 = vld [vmem:[%s7896_s1 + $0x8c0] ss:$16 sps:$4 sm:$0xff]  }
  0x55   :  { %3675 = vmatprep.subr.bf16.mxu1 %v5157_v27  ;;  %v5231_v27 = vld [vmem:[%s7896_s1 + $0xac0] ss:$16 sps:$4 sm:$0xff]  }
  0x57   :  { %3635 = vmatpush1.bf16.msra.mxu0 %v5152_v28  ;;  %v5236_v28 = vld [vmem:[%s7896_s1 + $0x8a4] ss:$16 sps:$4 sm:$0xff]  }
  0x58   :  { %3676 = vmatpush1.bf16.msra.mxu1 %v5155_v29  ;;  %3636 = vmatprep.subr.bf16.mxu0 %v5160_v30  ;;  %v5239_v29 = vld [vmem:[%s7896_s1 + $0xaa4] ss:$16 sps:$4 sm:$0xff]   ;;  %v5234_v30 = vld [vmem:[%s7896_s1 + $0x8a0] ss:$16 sps:$4 sm:$0xff]  }
  0x59   :  { %3677 = vmatprep.subr.bf16.mxu1 %v5163_v31  ;;  %v5237_v31 = vld [vmem:[%s7896_s1 + $0xaa0] ss:$16 sps:$4 sm:$0xff]  }
  0x5b   :  { %3637 = vmatpush1.bf16.msra.mxu0 %v5158_v34  ;;  %v5240_v34 = vld [vmem:[%s7896_s1 + $0x880] ss:$16 sps:$4 sm:$0xff]  }
  0x5c   :  { %3678 = vmatpush1.bf16.msra.mxu1 %v5161_v35  ;;  %3638 = vmatprep.subr.bf16.mxu0 %v5166_v38  ;;  %v5243_v35 = vld [vmem:[%s7896_s1 + $0xa80] ss:$16 sps:$4 sm:$0xff]   ;;  %v5248_v38 = vld [vmem:[%s7896_s1 + $0x864] ss:$16 sps:$4 sm:$0xff]  }
  0x5d   :  { %3679 = vmatprep.subr.bf16.mxu1 %v5169_v39  ;;  %v5251_v39 = vld [vmem:[%s7896_s1 + $0xa64] ss:$16 sps:$4 sm:$0xff]  }
  0x5f   :  { %3639 = vmatpush1.bf16.msra.mxu0 %v5164_v40  ;;  %v5246_v40 = vld [vmem:[%s7896_s1 + $0x860] ss:$16 sps:$4 sm:$0xff]  }
  0x60   :  { %3680 = vmatpush1.bf16.msra.mxu1 %v5167_v41  ;;  %3640 = vmatprep.subr.bf16.mxu0 %v5172_v42  ;;  %v5249_v41 = vld [vmem:[%s7896_s1 + $0xa60] ss:$16 sps:$4 sm:$0xff]   ;;  %v5254_v42 = vld [vmem:[%s7896_s1 + $0x844] ss:$16 sps:$4 sm:$0xff]  }
  0x61   :  { %3681 = vmatprep.subr.bf16.mxu1 %v5175_v43  ;;  %v5257_v43 = vld [vmem:[%s7896_s1 + $0xa44] ss:$16 sps:$4 sm:$0xff]  }
  0x63   :  { %3641 = vmatpush2.bf16.msra.mxu0 %v5170_v44  ;;  %v5252_v44 = vld [vmem:[%s7896_s1 + $0x840] ss:$16 sps:$4 sm:$0xff]  }
  0x64   :  { %3682 = vmatpush2.bf16.msra.mxu1 %v5173_v45  ;;  %3642 = vmatprep.subr.bf16.mxu0 %v5178_v46  ;;  %v5255_v45 = vld [vmem:[%s7896_s1 + $0xa40] ss:$16 sps:$4 sm:$0xff]   ;;  %v5260_v46 = vld [vmem:[%s7896_s1 + $0x824] ss:$16 sps:$4 sm:$0xff]  }
  0x65   :  { %3683 = vmatprep.subr.bf16.mxu1 %v5181_v48  ;;  %v5263_v48 = vld [vmem:[%s7896_s1 + $0xa24] ss:$16 sps:$4 sm:$0xff]  }
  0x67   :  { %3643 = vmatpush2.bf16.msra.mxu0 %v5176_v49  ;;  %v5258_v49 = vld [vmem:[%s7896_s1 + $0x820] ss:$16 sps:$4 sm:$0xff]  }
  0x68   :  { %3684 = vmatpush2.bf16.msra.mxu1 %v5179_v50  ;;  %3644 = vmatprep.subr.bf16.mxu0 %v5184_v52  ;;  %v5261_v50 = vld [vmem:[%s7896_s1 + $0xa20] ss:$16 sps:$4 sm:$0xff]   ;;  %v5266_v52 = vld [vmem:[%s7896_s1 + $0x804] ss:$16 sps:$4 sm:$0xff]  }
  0x69   :  { %3685 = vmatprep.subr.bf16.mxu1 %v5187_v53  ;;  %v5269_v53 = vld [vmem:[%s7896_s1 + $0xa04] ss:$16 sps:$4 sm:$0xff]  }
  0x6b   :  { %3645 = vmatpush2.bf16.msra.mxu0 %v5182_v54  ;;  %v5264_v54 = vld [vmem:[%s7896_s1 + $0x800] ss:$16 sps:$4 sm:$0xff]  }
  0x6c   :  { %3686 = vmatpush2.bf16.msra.mxu1 %v5185_v55  ;;  %3646 = vmatprep.subr.bf16.mxu0 %v5190_v56  ;;  %v5267_v55 = vld [vmem:[%s7896_s1 + $0xa00] ss:$16 sps:$4 sm:$0xff]   ;;  %v5272_v56 = vld [vmem:[%s7896_s1 + $0x9e4] ss:$16 sps:$4 sm:$0xff]  }
  0x6d   :  { %3687 = vmatprep.subr.bf16.mxu1 %v5193_v57  ;;  %v5275_v57 = vld [vmem:[%s7896_s1 + $0xbe4] ss:$16 sps:$4 sm:$0xff]  }
  0x6f   :  { %3647 = vmatpush2.bf16.msra.mxu0 %v5188_v58  ;;  %v5270_v58 = vld [vmem:[%s7896_s1 + $0x9e0] ss:$16 sps:$4 sm:$0xff]  }
  0x70   :  { %3688 = vmatpush2.bf16.msra.mxu1 %v5191_v59  ;;  %3648 = vmatprep.subr.bf16.mxu0 %v5196_v60  ;;  %v5273_v59 = vld [vmem:[%s7896_s1 + $0xbe0] ss:$16 sps:$4 sm:$0xff]   ;;  %v5278_v60 = vld [vmem:[%s7896_s1 + $0x9c4] ss:$16 sps:$4 sm:$0xff]  }
  0x71   :  { %3689 = vmatprep.subr.bf16.mxu1 %v5199_v61  ;;  %v5281_v61 = vld [vmem:[%s7896_s1 + $0xbc4] ss:$16 sps:$4 sm:$0xff]  }
  0x73   :  { %3649 = vmatpush2.bf16.msra.mxu0 %v5194_v62  ;;  %v5276_v62 = vld [vmem:[%s7896_s1 + $0x9c0] ss:$16 sps:$4 sm:$0xff]  }
  0x74   :  { %3690 = vmatpush2.bf16.msra.mxu1 %v5197_v63  ;;  %3650 = vmatprep.subr.bf16.mxu0 %v5202_v0  ;;  %v5279_v63 = vld [vmem:[%s7896_s1 + $0xbc0] ss:$16 sps:$4 sm:$0xff]   ;;  %v5284_v0 = vld [vmem:[%s7896_s1 + $0x9a4] ss:$16 sps:$4 sm:$0xff]  }
  0x75   :  { %3691 = vmatprep.subr.bf16.mxu1 %v5205_v1  ;;  %v5287_v1 = vld [vmem:[%s7896_s1 + $0xba4] ss:$16 sps:$4 sm:$0xff]  }
  0x77   :  { %3651 = vmatpush2.bf16.msra.mxu0 %v5200_v2  ;;  %v5282_v2 = vld [vmem:[%s7896_s1 + $0x9a0] ss:$16 sps:$4 sm:$0xff]  }
  0x78   :  { %3692 = vmatpush2.bf16.msra.mxu1 %v5203_v3  ;;  %3652 = vmatprep.subr.bf16.mxu0 %v5208_v4  ;;  %v5285_v3 = vld [vmem:[%s7896_s1 + $0xba0] ss:$16 sps:$4 sm:$0xff]   ;;  %v5290_v4 = vld [vmem:[%s7896_s1 + $0x984] ss:$16 sps:$4 sm:$0xff]  }
  0x79   :  { %3693 = vmatprep.subr.bf16.mxu1 %v5211_v5  ;;  %v5293_v5 = vld [vmem:[%s7896_s1 + $0xb84] ss:$16 sps:$4 sm:$0xff]  }
  0x7b   :  { %3653 = vmatpush2.bf16.msra.mxu0 %v5206_v8  ;;  %v5288_v8 = vld [vmem:[%s7896_s1 + $0x980] ss:$16 sps:$4 sm:$0xff]  }
  0x7c   :  { %3694 = vmatpush2.bf16.msra.mxu1 %v5209_v9  ;;  %3654 = vmatprep.subr.bf16.mxu0 %v5214_v10  ;;  %v5291_v9 = vld [vmem:[%s7896_s1 + $0xb80] ss:$16 sps:$4 sm:$0xff]   ;;  %v5296_v10 = vld [vmem:[%s7896_s1 + $0x964] ss:$16 sps:$4 sm:$0xff]  }
  0x7d   :  { %3695 = vmatprep.subr.bf16.mxu1 %v5217_v11  ;;  %v5299_v11 = vld [vmem:[%s7896_s1 + $0xb64] ss:$16 sps:$4 sm:$0xff]  }
  0x7f   :  { %3655 = vmatpush2.bf16.msra.mxu0 %v5212_v12  ;;  %v5294_v12 = vld [vmem:[%s7896_s1 + $0x960] ss:$16 sps:$4 sm:$0xff]  }
  0x80   :  { %3696 = vmatpush2.bf16.msra.mxu1 %v5215_v13  ;;  %3706 = vmatprep.subr.bf16.mxu0 %v5224_v14  ;;  %v5297_v13 = vld [vmem:[%s7896_s1 + $0xb60] ss:$16 sps:$4 sm:$0xff]   ;;  %v5302_v14 = vld [vmem:[%s7896_s1 + $0x944] ss:$16 sps:$4 sm:$0xff]  }
  0x81   :  { %3747 = vmatprep.subr.bf16.mxu1 %v5227_v15  ;;  %v5305_v15 = vld [vmem:[%s7896_s1 + $0xb44] ss:$16 sps:$4 sm:$0xff]  }
  0x82   :  { %3657 = vmatmul.mubr.bf16.vlgmr.msra.gmra.mxu0 %v6361_v16 }
  0x83   :  { %3698 = vmatmul.mubr.bf16.vlgmr.msra.gmra.mxu1 %v6365_v17  ;;  %3707 = vmatpush1.bf16.msra.mxu0 %v5222_v18  ;;  %v5300_v18 = vld [vmem:[%s7896_s1 + $0x940] ss:$16 sps:$4 sm:$0xff]  }
  0x84   :  { %3748 = vmatpush1.bf16.msra.mxu1 %v5225_v19  ;;  %3708 = vmatprep.subr.bf16.mxu0 %v5230_v20  ;;  %v5303_v19 = vld [vmem:[%s7896_s1 + $0xb40] ss:$16 sps:$4 sm:$0xff]   ;;  %v5308_v20 = vld [vmem:[%s7896_s1 + $0x924] ss:$16 sps:$4 sm:$0xff]  }
  0x85   :  { %3749 = vmatprep.subr.bf16.mxu1 %v5233_v21  ;;  %3738 = vmatprep.mubr.bf16.mxu0 %v6391_v24  ;;  %v5311_v21 = vld [vmem:[%s7896_s1 + $0xb24] ss:$16 sps:$4 sm:$0xff]  }
  0x86   :  { %3779 = vmatprep.mubr.bf16.mxu1 %v6395_v25 }
  0x87   :  { %3709 = vmatpush1.bf16.msra.mxu0 %v5228_v26  ;;  %v5306_v26 = vld [vmem:[%s7896_s1 + $0x920] ss:$16 sps:$4 sm:$0xff]  }
  0x88   :  { %3750 = vmatpush1.bf16.msra.mxu1 %v5231_v27  ;;  %3710 = vmatprep.subr.bf16.mxu0 %v5236_v28  ;;  %v5309_v27 = vld [vmem:[%s7896_s1 + $0xb20] ss:$16 sps:$4 sm:$0xff]   ;;  %v5314_v28 = vld [vmem:[%s7896_s1 + $0x904] ss:$16 sps:$4 sm:$0xff]  }
  0x89   :  { %3751 = vmatprep.subr.bf16.mxu1 %v5239_v29  ;;  %v5317_v29 = vld [vmem:[%s7896_s1 + $0xb04] ss:$16 sps:$4 sm:$0xff]  }
  0x8b   :  { %3711 = vmatpush1.bf16.msra.mxu0 %v5234_v30  ;;  %v5312_v30 = vld [vmem:[%s7896_s1 + $0x900] ss:$16 sps:$4 sm:$0xff]  }
  0x8c   :  { %3752 = vmatpush1.bf16.msra.mxu1 %v5237_v31  ;;  %3712 = vmatprep.subr.bf16.mxu0 %v5242_v32  ;;  %v5315_v31 = vld [vmem:[%s7896_s1 + $0xb00] ss:$16 sps:$4 sm:$0xff]   ;;  %v5324_v32 = vld [vmem:[%s7896_s1 + $0xce4] ss:$16 sps:$4 sm:$0xff]  }
  0x8d   :  { %3753 = vmatprep.subr.bf16.mxu1 %v5245_v33  ;;  %v5327_v33 = vld [vmem:[%s7896_s1 + $0xee4] ss:$16 sps:$4 sm:$0xff]  }
  0x8f   :  { %3713 = vmatpush1.bf16.msra.mxu0 %v5240_v34  ;;  %v5322_v34 = vld [vmem:[%s7896_s1 + $0xce0] ss:$16 sps:$4 sm:$0xff]  }
  0x90   :  { %3754 = vmatpush1.bf16.msra.mxu1 %v5243_v35  ;;  %3714 = vmatprep.subr.bf16.mxu0 %v5248_v38  ;;  %v5325_v35 = vld [vmem:[%s7896_s1 + $0xee0] ss:$16 sps:$4 sm:$0xff]   ;;  %v6589_v38 = vcombine.low %v6382_v22, %v6382_v22  ;;  %v5330_v22 = vld [vmem:[%s7896_s1 + $0xcc4] ss:$16 sps:$4 sm:$0xff]  }
  0x91   :  { %3755 = vmatprep.subr.bf16.mxu1 %v5251_v39  ;;  %v6593_v39 = vcombine.low %v6387_v23, %v6387_v23  ;;  %v5333_v23 = vld [vmem:[%s7896_s1 + $0xec4] ss:$16 sps:$4 sm:$0xff]  }
  0x93   :  { %3715 = vmatpush1.bf16.msra.mxu0 %v5246_v40  ;;  %v6598_v40 = vld [vmem:[%s7897_s0 + $0x30] sm:$0xff] }
  0x94   :  { %3756 = vmatpush1.bf16.msra.mxu1 %v5249_v41  ;;  %3716 = vmatprep.subr.bf16.mxu0 %v5254_v42  ;;  %v6603_v41 = vld [vmem:[%s7897_s0 + $0x38] sm:$0xff]  ;;  %v6613_v42 = vcombine.high %v6598_v40, %v6598_v40 }
  0x95   :  { %3757 = vmatprep.subr.bf16.mxu1 %v5257_v43  ;;  %v6617_v43 = vcombine.high %v6603_v41, %v6603_v41 }
  0x97   :  { %3717 = vmatpush1.bf16.msra.mxu0 %v5252_v44  ;;  %v5328_v44 = vld [vmem:[%s7896_s1 + $0xcc0] ss:$16 sps:$4 sm:$0xff]  }
  0x98   :  { %3758 = vmatpush1.bf16.msra.mxu1 %v5255_v45  ;;  %3718 = vmatprep.subr.bf16.mxu0 %v5260_v46  ;;  %v5331_v45 = vld [vmem:[%s7896_s1 + $0xec0] ss:$16 sps:$4 sm:$0xff]   ;;  %v5336_v46 = vld [vmem:[%s7896_s1 + $0xca4] ss:$16 sps:$4 sm:$0xff]  }
  0x99   :  { %3759 = vmatprep.subr.bf16.mxu1 %v5263_v48  ;;  %v5339_v48 = vld [vmem:[%s7896_s1 + $0xea4] ss:$16 sps:$4 sm:$0xff]  }
  0x9b   :  { %3719 = vmatpush1.bf16.msra.mxu0 %v5258_v49  ;;  %v5334_v49 = vld [vmem:[%s7896_s1 + $0xca0] ss:$16 sps:$4 sm:$0xff]  }
  0x9c   :  { %3760 = vmatpush1.bf16.msra.mxu1 %v5261_v50  ;;  %3720 = vmatprep.subr.bf16.mxu0 %v5266_v52  ;;  %v5337_v50 = vld [vmem:[%s7896_s1 + $0xea0] ss:$16 sps:$4 sm:$0xff]   ;;  %v5342_v52 = vld [vmem:[%s7896_s1 + $0xc84] ss:$16 sps:$4 sm:$0xff]  }
  0x9d   :  { %3761 = vmatprep.subr.bf16.mxu1 %v5269_v53  ;;  %v5345_v53 = vld [vmem:[%s7896_s1 + $0xe84] ss:$16 sps:$4 sm:$0xff]  }
  0x9f   :  { %3721 = vmatpush1.bf16.msra.mxu0 %v5264_v54  ;;  %v5340_v54 = vld [vmem:[%s7896_s1 + $0xc80] ss:$16 sps:$4 sm:$0xff]  }
  0xa0   :  { %3762 = vmatpush1.bf16.msra.mxu1 %v5267_v55  ;;  %3722 = vmatprep.subr.bf16.mxu0 %v5272_v56  ;;  %v5343_v55 = vld [vmem:[%s7896_s1 + $0xe80] ss:$16 sps:$4 sm:$0xff]   ;;  %v5348_v56 = vld [vmem:[%s7896_s1 + $0xc64] ss:$16 sps:$4 sm:$0xff]  }
  0xa1   :  { %3763 = vmatprep.subr.bf16.mxu1 %v5275_v57  ;;  %v5351_v57 = vld [vmem:[%s7896_s1 + $0xe64] ss:$16 sps:$4 sm:$0xff]  }
  0xa3   :  { %3723 = vmatpush2.bf16.msra.mxu0 %v5270_v58  ;;  %v5346_v58 = vld [vmem:[%s7896_s1 + $0xc60] ss:$16 sps:$4 sm:$0xff]  }
  0xa4   :  { %3764 = vmatpush2.bf16.msra.mxu1 %v5273_v59  ;;  %3724 = vmatprep.subr.bf16.mxu0 %v5278_v60  ;;  %v5349_v59 = vld [vmem:[%s7896_s1 + $0xe60] ss:$16 sps:$4 sm:$0xff]   ;;  %v5354_v60 = vld [vmem:[%s7896_s1 + $0xc44] ss:$16 sps:$4 sm:$0xff]  }
  0xa5   :  { %3765 = vmatprep.subr.bf16.mxu1 %v5281_v61  ;;  %v5357_v61 = vld [vmem:[%s7896_s1 + $0xe44] ss:$16 sps:$4 sm:$0xff]  }
  0xa7   :  { %3725 = vmatpush2.bf16.msra.mxu0 %v5276_v62  ;;  %v5352_v62 = vld [vmem:[%s7896_s1 + $0xc40] ss:$16 sps:$4 sm:$0xff]  }
  0xa8   :  { %3766 = vmatpush2.bf16.msra.mxu1 %v5279_v63  ;;  %3726 = vmatprep.subr.bf16.mxu0 %v5284_v0  ;;  %v5355_v63 = vld [vmem:[%s7896_s1 + $0xe40] ss:$16 sps:$4 sm:$0xff]   ;;  %v5360_v0 = vld [vmem:[%s7896_s1 + $0xc24] ss:$16 sps:$4 sm:$0xff]  }
  0xa9   :  { %3767 = vmatprep.subr.bf16.mxu1 %v5287_v1  ;;  %v5363_v1 = vld [vmem:[%s7896_s1 + $0xe24] ss:$16 sps:$4 sm:$0xff]  }
  0xab   :  { %3727 = vmatpush2.bf16.msra.mxu0 %v5282_v2  ;;  %v5358_v2 = vld [vmem:[%s7896_s1 + $0xc20] ss:$16 sps:$4 sm:$0xff]  }
  0xac   :  { %3768 = vmatpush2.bf16.msra.mxu1 %v5285_v3  ;;  %3728 = vmatprep.subr.bf16.mxu0 %v5290_v4  ;;  %v5361_v3 = vld [vmem:[%s7896_s1 + $0xe20] ss:$16 sps:$4 sm:$0xff]   ;;  %v5366_v4 = vld [vmem:[%s7896_s1 + $0xc04] ss:$16 sps:$4 sm:$0xff]  }
  0xad   :  { %3769 = vmatprep.subr.bf16.mxu1 %v5293_v5  ;;  %v5369_v5 = vld [vmem:[%s7896_s1 + $0xe04] ss:$16 sps:$4 sm:$0xff]  }
  0xaf   :  { %3729 = vmatpush2.bf16.msra.mxu0 %v5288_v8  ;;  %v5364_v8 = vld [vmem:[%s7896_s1 + $0xc00] ss:$16 sps:$4 sm:$0xff]  }
  0xb0   :  { %3770 = vmatpush2.bf16.msra.mxu1 %v5291_v9  ;;  %3730 = vmatprep.subr.bf16.mxu0 %v5296_v10  ;;  %v5367_v9 = vld [vmem:[%s7896_s1 + $0xe00] ss:$16 sps:$4 sm:$0xff]   ;;  %v5372_v10 = vld [vmem:[%s7896_s1 + $0xde4] ss:$16 sps:$4 sm:$0xff]  }
  0xb1   :  { %3771 = vmatprep.subr.bf16.mxu1 %v5299_v11  ;;  %v5375_v11 = vld [vmem:[%s7896_s1 + $0xfe4] ss:$16 sps:$4 sm:$0xff]  }
  0xb3   :  { %3731 = vmatpush2.bf16.msra.mxu0 %v5294_v12  ;;  %v5370_v12 = vld [vmem:[%s7896_s1 + $0xde0] ss:$16 sps:$4 sm:$0xff]  }
  0xb4   :  { %3772 = vmatpush2.bf16.msra.mxu1 %v5297_v13  ;;  %3732 = vmatprep.subr.bf16.mxu0 %v5302_v14  ;;  %v5373_v13 = vld [vmem:[%s7896_s1 + $0xfe0] ss:$16 sps:$4 sm:$0xff]   ;;  %v5378_v14 = vld [vmem:[%s7896_s1 + $0xdc4] ss:$16 sps:$4 sm:$0xff]  }
  0xb5   :  { %3773 = vmatprep.subr.bf16.mxu1 %v5305_v15  ;;  %v5381_v15 = vld [vmem:[%s7896_s1 + $0xfc4] ss:$16 sps:$4 sm:$0xff]  }
  0xb7   :  { %3733 = vmatpush2.bf16.msra.mxu0 %v5300_v18  ;;  %v5376_v18 = vld [vmem:[%s7896_s1 + $0xdc0] ss:$16 sps:$4 sm:$0xff]  }
  0xb8   :  { %3774 = vmatpush2.bf16.msra.mxu1 %v5303_v19  ;;  %3734 = vmatprep.subr.bf16.mxu0 %v5308_v20  ;;  %v5379_v19 = vld [vmem:[%s7896_s1 + $0xfc0] ss:$16 sps:$4 sm:$0xff]   ;;  %v5384_v20 = vld [vmem:[%s7896_s1 + $0xda4] ss:$16 sps:$4 sm:$0xff]  }
  0xb9   :  { %3775 = vmatprep.subr.bf16.mxu1 %v5311_v21  ;;  %v5387_v21 = vld [vmem:[%s7896_s1 + $0xfa4] ss:$16 sps:$4 sm:$0xff]  }
  0xbb   :  { %3735 = vmatpush2.bf16.msra.mxu0 %v5306_v26  ;;  %v5382_v26 = vld [vmem:[%s7896_s1 + $0xda0] ss:$16 sps:$4 sm:$0xff]  }
  0xbc   :  { %3776 = vmatpush2.bf16.msra.mxu1 %v5309_v27  ;;  %3736 = vmatprep.subr.bf16.mxu0 %v5314_v28  ;;  %v5385_v27 = vld [vmem:[%s7896_s1 + $0xfa0] ss:$16 sps:$4 sm:$0xff]   ;;  %v5390_v28 = vld [vmem:[%s7896_s1 + $0xd84] ss:$16 sps:$4 sm:$0xff]  }
  0xbd   :  { %3777 = vmatprep.subr.bf16.mxu1 %v5317_v29  ;;  %v5393_v29 = vld [vmem:[%s7896_s1 + $0xf84] ss:$16 sps:$4 sm:$0xff]  }
  0xbf   :  { %3737 = vmatpush2.bf16.msra.mxu0 %v5312_v30  ;;  %v5388_v30 = vld [vmem:[%s7896_s1 + $0xd80] ss:$16 sps:$4 sm:$0xff]  }
  0xc0   :  { %3778 = vmatpush2.bf16.msra.mxu1 %v5315_v31  ;;  %3788 = vmatprep.subr.bf16.mxu0 %v5324_v32  ;;  %v5391_v31 = vld [vmem:[%s7896_s1 + $0xf80] ss:$16 sps:$4 sm:$0xff]   ;;  %v5396_v32 = vld [vmem:[%s7896_s1 + $0xd64] ss:$16 sps:$4 sm:$0xff]  }
  0xc1   :  { %3829 = vmatprep.subr.bf16.mxu1 %v5327_v33  ;;  %v5399_v33 = vld [vmem:[%s7896_s1 + $0xf64] ss:$16 sps:$4 sm:$0xff]  }
  0xc2   :  { %3739 = vmatmul.mubr.bf16.vlgmr.msra.gmra.mxu0 %v6589_v38 }
  0xc3   :  { %3780 = vmatmul.mubr.bf16.vlgmr.msra.gmra.mxu1 %v6593_v39  ;;  %3789 = vmatpush1.bf16.msra.mxu0 %v5322_v34  ;;  %v5394_v34 = vld [vmem:[%s7896_s1 + $0xd60] ss:$16 sps:$4 sm:$0xff]  }
  0xc4   :  { %3830 = vmatpush1.bf16.msra.mxu1 %v5325_v35  ;;  %3790 = vmatprep.subr.bf16.mxu0 %v5330_v22  ;;  %v5397_v35 = vld [vmem:[%s7896_s1 + $0xf60] ss:$16 sps:$4 sm:$0xff]   ;;  %v5402_v22 = vld [vmem:[%s7896_s1 + $0xd44] ss:$16 sps:$4 sm:$0xff]  }
  0xc5   :  { %3831 = vmatprep.subr.bf16.mxu1 %v5333_v23  ;;  %3820 = vmatprep.mubr.bf16.mxu0 %v6613_v42  ;;  %v5405_v23 = vld [vmem:[%s7896_s1 + $0xf44] ss:$16 sps:$4 sm:$0xff]  }
  0xc6   :  { %3861 = vmatprep.mubr.bf16.mxu1 %v6617_v43 }
  0xc7   :  { %3791 = vmatpush1.bf16.msra.mxu0 %v5328_v44  ;;  %v5400_v44 = vld [vmem:[%s7896_s1 + $0xd40] ss:$16 sps:$4 sm:$0xff]  }
  0xc8   :  { %3832 = vmatpush1.bf16.msra.mxu1 %v5331_v45  ;;  %3792 = vmatprep.subr.bf16.mxu0 %v5336_v46  ;;  %v5403_v45 = vld [vmem:[%s7896_s1 + $0xf40] ss:$16 sps:$4 sm:$0xff]   ;;  %v5408_v46 = vld [vmem:[%s7896_s1 + $0xd24] ss:$16 sps:$4 sm:$0xff]  }
  0xc9   :  { %3833 = vmatprep.subr.bf16.mxu1 %v5339_v48  ;;  %v5411_v48 = vld [vmem:[%s7896_s1 + $0xf24] ss:$16 sps:$4 sm:$0xff]  }
  0xcb   :  { %3793 = vmatpush1.bf16.msra.mxu0 %v5334_v49  ;;  %v5406_v49 = vld [vmem:[%s7896_s1 + $0xd20] ss:$16 sps:$4 sm:$0xff]  }
  0xcc   :  { %3834 = vmatpush1.bf16.msra.mxu1 %v5337_v50  ;;  %3794 = vmatprep.subr.bf16.mxu0 %v5342_v52  ;;  %v5409_v50 = vld [vmem:[%s7896_s1 + $0xf20] ss:$16 sps:$4 sm:$0xff]   ;;  %v5414_v52 = vld [vmem:[%s7896_s1 + $0xd04] ss:$16 sps:$4 sm:$0xff]  }
  0xcd   :  { %3835 = vmatprep.subr.bf16.mxu1 %v5345_v53  ;;  %v5417_v53 = vld [vmem:[%s7896_s1 + $0xf04] ss:$16 sps:$4 sm:$0xff]  }
  0xcf   :  { %3795 = vmatpush1.bf16.msra.mxu0 %v5340_v54  ;;  %v5412_v54 = vld [vmem:[%s7896_s1 + $0xd00] ss:$16 sps:$4 sm:$0xff]  }
  0xd0   :  { %3836 = vmatpush1.bf16.msra.mxu1 %v5343_v55  ;;  %3796 = vmatprep.subr.bf16.mxu0 %v5348_v56  ;;  %v5415_v55 = vld [vmem:[%s7896_s1 + $0xf00] ss:$16 sps:$4 sm:$0xff]   ;;  %v5424_v56 = vld [vmem:[%s7896_s1 + $0x10e4] ss:$16 sps:$4 sm:$0xff]  }
  0xd1   :  { %3837 = vmatprep.subr.bf16.mxu1 %v5351_v57  ;;  %v5427_v57 = vld [vmem:[%s7896_s1 + $0xec] ss:$16 sps:$4 sm:$0xff]  }
  0xd3   :  { %3797 = vmatpush1.bf16.msra.mxu0 %v5346_v58  ;;  %v5422_v58 = vld [vmem:[%s7896_s1 + $0x10e0] ss:$16 sps:$4 sm:$0xff]  }
  0xd4   :  { %3838 = vmatpush1.bf16.msra.mxu1 %v5349_v59  ;;  %3798 = vmatprep.subr.bf16.mxu0 %v5354_v60  ;;  %v6808_v59 = vcombine.low %v6598_v40, %v6598_v40  ;;  %v6812_v60 = vcombine.low %v6603_v41, %v6603_v41  ;;  %v5430_v40 = vld [vmem:[%s7896_s1 + $0x10c4] ss:$16 sps:$4 sm:$0xff]   ;;  %v5433_v41 = vld [vmem:[%s7896_s1 + $0xcc] ss:$16 sps:$4 sm:$0xff]  }
  0xd5   :  { %3839 = vmatprep.subr.bf16.mxu1 %v5357_v61  ;;  %v6817_v61 = vld [vmem:[%s7897_s0 + $0x40] sm:$0xff] }
  0xd7   :  { %3799 = vmatpush1.bf16.msra.mxu0 %v5352_v62  ;;  %v5425_v62 = vld [vmem:[%s7896_s1 + $0xe8] ss:$16 sps:$4 sm:$0xff]  }
  0xd8   :  { %3840 = vmatpush1.bf16.msra.mxu1 %v5355_v63  ;;  %3800 = vmatprep.subr.bf16.mxu0 %v5360_v0  ;;  %v6830_v63 = vcombine.high %v6817_v61, %v6817_v61 }
  0xd9   :  { %3841 = vmatprep.subr.bf16.mxu1 %v5363_v1 }
  0xdb   :  { %3801 = vmatpush1.bf16.msra.mxu0 %v5358_v2  ;;  %v5428_v2 = vld [vmem:[%s7896_s1 + $0x10c0] ss:$16 sps:$4 sm:$0xff]  }
  0xdc   :  { %3842 = vmatpush1.bf16.msra.mxu1 %v5361_v3  ;;  %3802 = vmatprep.subr.bf16.mxu0 %v5366_v4  ;;  %v5431_v4 = vld [vmem:[%s7896_s1 + $0xc8] ss:$16 sps:$4 sm:$0xff]  }
  0xdd   :  { %3843 = vmatprep.subr.bf16.mxu1 %v5369_v5 }
  0xdf   :  { %3803 = vmatpush1.bf16.msra.mxu0 %v5364_v8 }
  0xe0   :  { %3844 = vmatpush1.bf16.msra.mxu1 %v5367_v9  ;;  %3804 = vmatprep.subr.bf16.mxu0 %v5372_v10  ;;  %v5436_v9 = vld [vmem:[%s7896_s1 + $0x10a4] ss:$16 sps:$4 sm:$0xff]   ;;  %v5439_v10 = vld [vmem:[%s7896_s1 + $0xac] ss:$16 sps:$4 sm:$0xff]  }
  0xe1   :  { %3845 = vmatprep.subr.bf16.mxu1 %v5375_v11 }
  0xe3   :  { %3805 = vmatpush2.bf16.msra.mxu0 %v5370_v12 }
  0xe4   :  { %3846 = vmatpush2.bf16.msra.mxu1 %v5373_v13  ;;  %3806 = vmatprep.subr.bf16.mxu0 %v5378_v14  ;;  %v5434_v14 = vld [vmem:[%s7896_s1 + $0x10a0] ss:$16 sps:$4 sm:$0xff]  }
  0xe5   :  { %3847 = vmatprep.subr.bf16.mxu1 %v5381_v15  ;;  %v5437_v15 = vld [vmem:[%s7896_s1 + $0xa8] ss:$16 sps:$4 sm:$0xff]  }
  0xe7   :  { %3807 = vmatpush2.bf16.msra.mxu0 %v5376_v18 }
  0xe8   :  { %3848 = vmatpush2.bf16.msra.mxu1 %v5379_v19  ;;  %3808 = vmatprep.subr.bf16.mxu0 %v5384_v20  ;;  %v5445_v20 = vld [vmem:[%s7896_s1 + $0x8c] ss:$16 sps:$4 sm:$0xff]  }
  0xe9   :  { %3849 = vmatprep.subr.bf16.mxu1 %v5387_v21  ;;  %v5440_v21 = vld [vmem:[%s7896_s1 + $0x1080] ss:$16 sps:$4 sm:$0xff]  }
  0xeb   :  { %3809 = vmatpush2.bf16.msra.mxu0 %v5382_v26  ;;  %v5443_v26 = vld [vmem:[%s7896_s1 + $0x88] ss:$16 sps:$4 sm:$0xff]  }
  0xec   :  { %3850 = vmatpush2.bf16.msra.mxu1 %v5385_v27  ;;  %3810 = vmatprep.subr.bf16.mxu0 %v5390_v28  ;;  %v5448_v27 = vld [vmem:[%s7896_s1 + $0x1064] ss:$16 sps:$4 sm:$0xff]   ;;  %v5451_v28 = vld [vmem:[%s7896_s1 + $0x6c] ss:$16 sps:$4 sm:$0xff]  }
  0xed   :  { %3851 = vmatprep.subr.bf16.mxu1 %v5393_v29  ;;  %v5446_v29 = vld [vmem:[%s7896_s1 + $0x1060] ss:$16 sps:$4 sm:$0xff]  }
  0xef   :  { %3811 = vmatpush2.bf16.msra.mxu0 %v5388_v30  ;;  %v5449_v30 = vld [vmem:[%s7896_s1 + $0x68] ss:$16 sps:$4 sm:$0xff]  }
  0xf0   :  { %3852 = vmatpush2.bf16.msra.mxu1 %v5391_v31  ;;  %3812 = vmatprep.subr.bf16.mxu0 %v5396_v32  ;;  %v5454_v31 = vld [vmem:[%s7896_s1 + $0x1044] ss:$16 sps:$4 sm:$0xff]   ;;  %v5457_v32 = vld [vmem:[%s7896_s1 + $0x4c] ss:$16 sps:$4 sm:$0xff]  }
  0xf1   :  { %3853 = vmatprep.subr.bf16.mxu1 %v5399_v33  ;;  %v5452_v33 = vld [vmem:[%s7896_s1 + $0x1040] ss:$16 sps:$4 sm:$0xff]  }
  0xf3   :  { %3813 = vmatpush2.bf16.msra.mxu0 %v5394_v34  ;;  %v5455_v34 = vld [vmem:[%s7896_s1 + $0x48] ss:$16 sps:$4 sm:$0xff]  }
  0xf4   :  { %3854 = vmatpush2.bf16.msra.mxu1 %v5397_v35  ;;  %3814 = vmatprep.subr.bf16.mxu0 %v5402_v22  ;;  %v5460_v35 = vld [vmem:[%s7896_s1 + $0x1024] ss:$16 sps:$4 sm:$0xff]   ;;  %v5463_v22 = vld [vmem:[%s7896_s1 + $0x2c] ss:$16 sps:$4 sm:$0xff]  }
  0xf5   :  { %3855 = vmatprep.subr.bf16.mxu1 %v5405_v23  ;;  %v5458_v23 = vld [vmem:[%s7896_s1 + $0x1020] ss:$16 sps:$4 sm:$0xff]  }
  0xf7   :  { %3815 = vmatpush2.bf16.msra.mxu0 %v5400_v44  ;;  %v5461_v44 = vld [vmem:[%s7896_s1 + $0x28] ss:$16 sps:$4 sm:$0xff]  }
  0xf8   :  { %3856 = vmatpush2.bf16.msra.mxu1 %v5403_v45  ;;  %3816 = vmatprep.subr.bf16.mxu0 %v5408_v46  ;;  %v5466_v45 = vld [vmem:[%s7896_s1 + $0x1004] ss:$16 sps:$4 sm:$0xff]   ;;  %v5469_v46 = vld [vmem:[%s7896_s1 + $0xc] ss:$16 sps:$4 sm:$0xff]  }
  0xf9   :  { %3857 = vmatprep.subr.bf16.mxu1 %v5411_v48  ;;  %v5464_v48 = vld [vmem:[%s7896_s1 + $0x1000] ss:$16 sps:$4 sm:$0xff]  }
  0xfb   :  { %3817 = vmatpush2.bf16.msra.mxu0 %v5406_v49  ;;  %v5467_v49 = vld [vmem:[%s7896_s1 + $0x8] ss:$16 sps:$4 sm:$0xff]  }
  0xfc   :  { %3858 = vmatpush2.bf16.msra.mxu1 %v5409_v50  ;;  %3818 = vmatprep.subr.bf16.mxu0 %v5414_v52  ;;  %v5472_v50 = vld [vmem:[%s7896_s1 + $0x11e4] ss:$16 sps:$4 sm:$0xff]   ;;  %v5475_v52 = vld [vmem:[%s7896_s1 + $0x1ec] ss:$16 sps:$4 sm:$0xff]  }
  0xfd   :  { %3859 = vmatprep.subr.bf16.mxu1 %v5417_v53  ;;  %v5470_v53 = vld [vmem:[%s7896_s1 + $0x11e0] ss:$16 sps:$4 sm:$0xff]  }
  0xff   :  { %3819 = vmatpush2.bf16.msra.mxu0 %v5412_v54  ;;  %v5473_v54 = vld [vmem:[%s7896_s1 + $0x1e8] ss:$16 sps:$4 sm:$0xff]  }
 0x100   :  { %3860 = vmatpush2.bf16.msra.mxu1 %v5415_v55  ;;  %3870 = vmatprep.subr.bf16.mxu0 %v5424_v56  ;;  %v5478_v55 = vld [vmem:[%s7896_s1 + $0x11c4] ss:$16 sps:$4 sm:$0xff]   ;;  %v5481_v56 = vld [vmem:[%s7896_s1 + $0x1cc] ss:$16 sps:$4 sm:$0xff]  }
 0x101   :  { %3911 = vmatprep.subr.bf16.mxu1 %v5427_v57  ;;  %v5476_v57 = vld [vmem:[%s7896_s1 + $0x11c0] ss:$16 sps:$4 sm:$0xff]  }
 0x102   :  { %v3576_v0 = vpop.f32.mrf.mxu0  ;;  %3821 = vmatmul.mubr.bf16.vlgmr.msra.gmra.mxu0 %v6808_v59 }
 0x103   :  { %v3617_v1 = vpop.f32.mrf.mxu1  ;;  %3862 = vmatmul.mubr.bf16.vlgmr.msra.gmra.mxu1 %v6812_v60  ;;  %3871 = vmatpush1.bf16.msra.mxu0 %v5422_v58  ;;  %v5479_v58 = vld [vmem:[%s7896_s1 + $0x1c8] ss:$16 sps:$4 sm:$0xff]  }
 0x104   :  { %v6837_v3 = vadd.f32 %v3617_v1, %v3576_v0  ;;  %3912 = vmatpush1.bf16.msra.mxu1 %v5425_v62  ;;  %v3578_v5 = vpop.f32.mrf.mxu0  ;;  %3872 = vmatprep.subr.bf16.mxu0 %v5430_v40  ;;  %v5484_v62 = vld [vmem:[%s7896_s1 + $0x11a4] ss:$16 sps:$4 sm:$0xff]   ;;  %v5487_v40 = vld [vmem:[%s7896_s1 + $0x1ac] ss:$16 sps:$4 sm:$0xff]   ;;  %v5485_v0 = vld [vmem:[%s7896_s1 + $0x1a8] ss:$16 sps:$4 sm:$0xff]  }
 0x105   :  { %v3619_v8 = vpop.f32.mrf.mxu1  ;;  %3913 = vmatprep.subr.bf16.mxu1 %v5433_v41  ;;  %3902 = vmatprep.mubr.bf16.mxu0 %v6830_v63  ;;  %v5482_v41 = vld [vmem:[%s7896_s1 + $0x11a0] ss:$16 sps:$4 sm:$0xff]   ;;  %v5490_v1 = vld [vmem:[%s7896_s1 + $0x1184] ss:$16 sps:$4 sm:$0xff]  }
 0x106   :  { %v6848_v11 = vadd.f32 %v3619_v8, %v3578_v5  ;;  %3943 = vmatprep.mubr.bf16.mxu1 %v6072_v47  ;;  %v3580_v12 = vpop.f32.mrf.mxu0  ;;  %v5442_v47 = vld [vmem:[%s7896_s1 + $0x1084] ss:$16 sps:$4 sm:$0xff]   ;;  %v5491_v5 = vld [vmem:[%s7896_s1 + $0x188] ss:$16 sps:$4 sm:$0xff]  }
 0x107   :  { %v3621_v13 = vpop.f32.mrf.mxu1  ;;  %3873 = vmatpush1.bf16.msra.mxu0 %v5428_v2  ;;  %v5493_v2 = vld [vmem:[%s7896_s1 + $0x18c] ss:$16 sps:$4 sm:$0xff]   ;;  %v5496_v8 = vld [vmem:[%s7896_s1 + $0x1164] ss:$16 sps:$4 sm:$0xff]   ;;  %v5497_v12 = vld [vmem:[%s7896_s1 + $0x168] ss:$16 sps:$4 sm:$0xff]  }
 0x108   :  { %3914 = vmatpush1.bf16.msra.mxu1 %v5431_v4  ;;  %v3581_v18 = vpop.f32.mrf.mxu0  ;;  %3874 = vmatprep.subr.bf16.mxu0 %v5436_v9  ;;  %v5488_v4 = vld [vmem:[%s7896_s1 + $0x1180] ss:$16 sps:$4 sm:$0xff]   ;;  %v5499_v9 = vld [vmem:[%s7896_s1 + $0x16c] ss:$16 sps:$4 sm:$0xff]   ;;  %v5502_v13 = vld [vmem:[%s7896_s1 + $0x1144] ss:$16 sps:$4 sm:$0xff]  }
 0x109   :  { %v3622_v19 = vpop.f32.mrf.mxu1  ;;  %3915 = vmatprep.subr.bf16.mxu1 %v5439_v10  ;;  %v5494_v10 = vld [vmem:[%s7896_s1 + $0x1160] ss:$16 sps:$4 sm:$0xff]   ;;  %v5503_v18 = vld [vmem:[%s7896_s1 + $0x148] ss:$16 sps:$4 sm:$0xff]  }
 0x10a   :  { %v5508_v19 = vld [vmem:[%s7896_s1 + $0x1124] ss:$16 sps:$4 sm:$0xff]  }
 0x10b   :  { %3875 = vmatpush1.bf16.msra.mxu0 %v5434_v14  ;;  %v5505_v14 = vld [vmem:[%s7896_s1 + $0x14c] ss:$16 sps:$4 sm:$0xff]  }
 0x10c   :  { %3916 = vmatpush1.bf16.msra.mxu1 %v5437_v15  ;;  %3876 = vmatprep.subr.bf16.mxu0 %v5442_v47  ;;  %v5500_v15 = vld [vmem:[%s7896_s1 + $0x1140] ss:$16 sps:$4 sm:$0xff]   ;;  %v5511_v47 = vld [vmem:[%s7896_s1 + $0x12c] ss:$16 sps:$4 sm:$0xff]  }
 0x10d   :  { %3917 = vmatprep.subr.bf16.mxu1 %v5445_v20  ;;  %v5506_v20 = vld [vmem:[%s7896_s1 + $0x1120] ss:$16 sps:$4 sm:$0xff]  }
 0x10f   :  { %3877 = vmatpush1.bf16.msra.mxu0 %v5440_v21  ;;  %v5509_v21 = vld [vmem:[%s7896_s1 + $0x128] ss:$16 sps:$4 sm:$0xff]  }
 0x110   :  { %3918 = vmatpush1.bf16.msra.mxu1 %v5443_v26  ;;  %3878 = vmatprep.subr.bf16.mxu0 %v5448_v27  ;;  %v5514_v26 = vld [vmem:[%s7896_s1 + $0x1104] ss:$16 sps:$4 sm:$0xff]   ;;  %v5517_v27 = vld [vmem:[%s7896_s1 + $0x10c] ss:$16 sps:$4 sm:$0xff]  }
 0x111   :  { %3919 = vmatprep.subr.bf16.mxu1 %v5451_v28  ;;  %v5512_v28 = vld [vmem:[%s7896_s1 + $0x1100] ss:$16 sps:$4 sm:$0xff]  }
 0x113   :  { %3879 = vmatpush1.bf16.msra.mxu0 %v5446_v29  ;;  %v5515_v29 = vld [vmem:[%s7896_s1 + $0x108] ss:$16 sps:$4 sm:$0xff]  }
 0x114   :  { %3920 = vmatpush1.bf16.msra.mxu1 %v5449_v30  ;;  %3880 = vmatprep.subr.bf16.mxu0 %v5454_v31  ;;  %v5522_v30 = vld [vmem:[%s7896_s1 + $0x2ec] ss:$16 sps:$4 sm:$0xff]  }
 0x115   :  { %3921 = vmatprep.subr.bf16.mxu1 %v5457_v32  ;;  %v5525_v31 = vld [vmem:[%s7896_s1 + $0x4ec] ss:$16 sps:$4 sm:$0xff]   ;;  %v5520_v32 = vld [vmem:[%s7896_s1 + $0x2e8] ss:$16 sps:$4 sm:$0xff]  }
 0x117   :  { %3881 = vmatpush1.bf16.msra.mxu0 %v5452_v33  ;;  %v5523_v33 = vld [vmem:[%s7896_s1 + $0x4e8] ss:$16 sps:$4 sm:$0xff]  }
 0x118   :  { %3922 = vmatpush1.bf16.msra.mxu1 %v5455_v34  ;;  %3882 = vmatprep.subr.bf16.mxu0 %v5460_v35  ;;  %v7028_v34 = vcombine.low %v6817_v61, %v6817_v61  ;;  %v5528_v35 = vld [vmem:[%s7896_s1 + $0x2cc] ss:$16 sps:$4 sm:$0xff]   ;;  %v5529_v61 = vld [vmem:[%s7896_s1 + $0x4c8] ss:$16 sps:$4 sm:$0xff]  }
 0x119   :  { %3923 = vmatprep.subr.bf16.mxu1 %v5463_v22  ;;  %v5531_v22 = vld [vmem:[%s7896_s1 + $0x4cc] ss:$16 sps:$4 sm:$0xff]  }
 0x11b   :  { %3883 = vmatpush1.bf16.msra.mxu0 %v5458_v23  ;;  %v5526_v23 = vld [vmem:[%s7896_s1 + $0x2c8] ss:$16 sps:$4 sm:$0xff]  }
 0x11c   :  { %3924 = vmatpush1.bf16.msra.mxu1 %v5461_v44  ;;  %3884 = vmatprep.subr.bf16.mxu0 %v5466_v45 }
 0x11d   :  { %3925 = vmatprep.subr.bf16.mxu1 %v5469_v46 }
 0x11f   :  { %3885 = vmatpush1.bf16.msra.mxu0 %v5464_v48 }
 0x120   :  { %3926 = vmatpush1.bf16.msra.mxu1 %v5467_v49  ;;  %3886 = vmatprep.subr.bf16.mxu0 %v5472_v50  ;;  %v5534_v50 = vld [vmem:[%s7896_s1 + $0x2ac] ss:$16 sps:$4 sm:$0xff]  }
 0x121   :  { %3927 = vmatprep.subr.bf16.mxu1 %v5475_v52  ;;  %v5537_v52 = vld [vmem:[%s7896_s1 + $0x4ac] ss:$16 sps:$4 sm:$0xff]  }
 0x123   :  { %3887 = vmatpush2.bf16.msra.mxu0 %v5470_v53 }
 0x124   :  { %3928 = vmatpush2.bf16.msra.mxu1 %v5473_v54  ;;  %3888 = vmatprep.subr.bf16.mxu0 %v5478_v55  ;;  %v5535_v54 = vld [vmem:[%s7896_s1 + $0x4a8] ss:$16 sps:$4 sm:$0xff]  }
 0x125   :  { %3929 = vmatprep.subr.bf16.mxu1 %v5481_v56 }
 0x127   :  { %3889 = vmatpush2.bf16.msra.mxu0 %v5476_v57 }
 0x128   :  { %3930 = vmatpush2.bf16.msra.mxu1 %v5479_v58  ;;  %3890 = vmatprep.subr.bf16.mxu0 %v5484_v62  ;;  %v5540_v62 = vld [vmem:[%s7896_s1 + $0x28c] ss:$16 sps:$4 sm:$0xff]  }
 0x129   :  { %3931 = vmatprep.subr.bf16.mxu1 %v5487_v40  ;;  %v5541_v40 = vld [vmem:[%s7896_s1 + $0x488] ss:$16 sps:$4 sm:$0xff]  }
 0x12b   :  { %3891 = vmatpush2.bf16.msra.mxu0 %v5482_v41  ;;  %v5546_v41 = vld [vmem:[%s7896_s1 + $0x26c] ss:$16 sps:$4 sm:$0xff]  }
 0x12c   :  { %3932 = vmatpush2.bf16.msra.mxu1 %v5485_v0  ;;  %3892 = vmatprep.subr.bf16.mxu0 %v5490_v1  ;;  %v5549_v0 = vld [vmem:[%s7896_s1 + $0x46c] ss:$16 sps:$4 sm:$0xff]   ;;  %v5544_v1 = vld [vmem:[%s7896_s1 + $0x268] ss:$16 sps:$4 sm:$0xff]  }
 0x12d   :  { %3933 = vmatprep.subr.bf16.mxu1 %v5493_v2  ;;  %v5547_v2 = vld [vmem:[%s7896_s1 + $0x468] ss:$16 sps:$4 sm:$0xff]  }
 0x12f   :  { %3893 = vmatpush2.bf16.msra.mxu0 %v5488_v4  ;;  %v5552_v4 = vld [vmem:[%s7896_s1 + $0x24c] ss:$16 sps:$4 sm:$0xff]  }
 0x130   :  { %3934 = vmatpush2.bf16.msra.mxu1 %v5491_v5  ;;  %3894 = vmatprep.subr.bf16.mxu0 %v5496_v8  ;;  %v5555_v5 = vld [vmem:[%s7896_s1 + $0x44c] ss:$16 sps:$4 sm:$0xff]   ;;  %v5550_v8 = vld [vmem:[%s7896_s1 + $0x248] ss:$16 sps:$4 sm:$0xff]  }
 0x131   :  { %3935 = vmatprep.subr.bf16.mxu1 %v5499_v9  ;;  %v5553_v9 = vld [vmem:[%s7896_s1 + $0x448] ss:$16 sps:$4 sm:$0xff]  }
 0x133   :  { %3895 = vmatpush2.bf16.msra.mxu0 %v5494_v10  ;;  %v5558_v10 = vld [vmem:[%s7896_s1 + $0x22c] ss:$16 sps:$4 sm:$0xff]  }
 0x134   :  { %3936 = vmatpush2.bf16.msra.mxu1 %v5497_v12  ;;  %3896 = vmatprep.subr.bf16.mxu0 %v5502_v13  ;;  %v5561_v12 = vld [vmem:[%s7896_s1 + $0x42c] ss:$16 sps:$4 sm:$0xff]   ;;  %v5556_v13 = vld [vmem:[%s7896_s1 + $0x228] ss:$16 sps:$4 sm:$0xff]  }
 0x135   :  { %3937 = vmatprep.subr.bf16.mxu1 %v5505_v14  ;;  %v5559_v14 = vld [vmem:[%s7896_s1 + $0x428] ss:$16 sps:$4 sm:$0xff]  }
 0x137   :  { %3897 = vmatpush2.bf16.msra.mxu0 %v5500_v15  ;;  %v5564_v15 = vld [vmem:[%s7896_s1 + $0x20c] ss:$16 sps:$4 sm:$0xff]  }
 0x138   :  { %3938 = vmatpush2.bf16.msra.mxu1 %v5503_v18  ;;  %3898 = vmatprep.subr.bf16.mxu0 %v5508_v19  ;;  %v5567_v18 = vld [vmem:[%s7896_s1 + $0x40c] ss:$16 sps:$4 sm:$0xff]   ;;  %v5562_v19 = vld [vmem:[%s7896_s1 + $0x208] ss:$16 sps:$4 sm:$0xff]  }
 0x139   :  { %3939 = vmatprep.subr.bf16.mxu1 %v5511_v47  ;;  %v5565_v47 = vld [vmem:[%s7896_s1 + $0x408] ss:$16 sps:$4 sm:$0xff]  }
 0x13b   :  { %3899 = vmatpush2.bf16.msra.mxu0 %v5506_v20  ;;  %v5570_v20 = vld [vmem:[%s7896_s1 + $0x3ec] ss:$16 sps:$4 sm:$0xff]  }
 0x13c   :  { %3940 = vmatpush2.bf16.msra.mxu1 %v5509_v21  ;;  %3900 = vmatprep.subr.bf16.mxu0 %v5514_v26  ;;  %v5573_v21 = vld [vmem:[%s7896_s1 + $0x5ec] ss:$16 sps:$4 sm:$0xff]   ;;  %v5568_v26 = vld [vmem:[%s7896_s1 + $0x3e8] ss:$16 sps:$4 sm:$0xff]  }
 0x13d   :  { %3941 = vmatprep.subr.bf16.mxu1 %v5517_v27  ;;  %v5571_v27 = vld [vmem:[%s7896_s1 + $0x5e8] ss:$16 sps:$4 sm:$0xff]  }
 0x13f   :  { %3901 = vmatpush2.bf16.msra.mxu0 %v5512_v28  ;;  %v5576_v28 = vld [vmem:[%s7896_s1 + $0x3cc] ss:$16 sps:$4 sm:$0xff]  }
 0x140   :  { %3942 = vmatpush2.bf16.msra.mxu1 %v5515_v29  ;;  %3952 = vmatprep.subr.bf16.mxu0 %v5522_v30  ;;  %v5579_v29 = vld [vmem:[%s7896_s1 + $0x5cc] ss:$16 sps:$4 sm:$0xff]   ;;  %v5574_v30 = vld [vmem:[%s7896_s1 + $0x3c8] ss:$16 sps:$4 sm:$0xff]  }
 0x141   :  { %3993 = vmatprep.subr.bf16.mxu1 %v5525_v31  ;;  %v5577_v31 = vld [vmem:[%s7896_s1 + $0x5c8] ss:$16 sps:$4 sm:$0xff]  }
 0x142   :  { %v3658_v44 = vpop.f32.mrf.mxu0  ;;  %3903 = vmatmul.mubr.bf16.vlgmr.msra.gmra.mxu0 %v7028_v34 }
 0x143   :  { %v3699_v45 = vpop.f32.mrf.mxu1  ;;  %3944 = vmatmul.mubr.bf16.vlgmr.msra.gmra.mxu1 %v6141_v6  ;;  %v3659_v46 = vadd.f32 %v3658_v44, %v6837_v3  ;;  %3953 = vmatpush1.bf16.msra.mxu0 %v5520_v32  ;;  %v5532_v3 = vld [vmem:[%s7896_s1 + $0x2a8] ss:$16 sps:$4 sm:$0xff]   ;;  %v5582_v32 = vld [vmem:[%s7896_s1 + $0x3ac] ss:$16 sps:$4 sm:$0xff]  }
 0x144   :  { %3994 = vmatpush1.bf16.msra.mxu1 %v5523_v33  ;;  %v3660_v48 = vpop.f32.mrf.mxu0  ;;  %3954 = vmatprep.subr.bf16.mxu0 %v5528_v35  ;;  %v5585_v33 = vld [vmem:[%s7896_s1 + $0x5ac] ss:$16 sps:$4 sm:$0xff]   ;;  %v5580_v35 = vld [vmem:[%s7896_s1 + $0x3a8] ss:$16 sps:$4 sm:$0xff]  }
 0x145   :  { %v3701_v49 = vpop.f32.mrf.mxu1  ;;  %3995 = vmatprep.subr.bf16.mxu1 %v5531_v22  ;;  %v7051_v53 = vadd.f32 %v3699_v45, %v3659_v46  ;;  %v3661_v6 = vadd.f32 %v3660_v48, %v6848_v11  ;;  %3984 = vmatprep.mubr.bf16.mxu0 %v6083_v51  ;;  %v5543_v51 = vld [vmem:[%s7896_s1 + $0x48c] ss:$16 sps:$4 sm:$0xff]   ;;  %v5583_v22 = vld [vmem:[%s7896_s1 + $0x5a8] ss:$16 sps:$4 sm:$0xff]  }
 0x146   :  { %4025 = vmatprep.mubr.bf16.mxu1 %v6237_v36  ;;  %v3662_v55 = vpop.f32.mrf.mxu0  ;;  %v5538_v36 = vld [vmem:[%s7896_s1 + $0x288] ss:$16 sps:$4 sm:$0xff]   ;;  %v5594_v46 = vld [vmem:[%s7896_s1 + $0x36c] ss:$16 sps:$4 sm:$0xff]  }
 0x147   :  { %v3703_v56 = vpop.f32.mrf.mxu1  ;;  %v7062_v57 = vadd.f32 %v3701_v49, %v3661_v6  ;;  %3955 = vmatpush1.bf16.msra.mxu0 %v5526_v23  ;;  %v5588_v23 = vld [vmem:[%s7896_s1 + $0x38c] ss:$16 sps:$4 sm:$0xff]   ;;  %v5586_v44 = vld [vmem:[%s7896_s1 + $0x388] ss:$16 sps:$4 sm:$0xff]  }
 0x148   :  { %3996 = vmatpush1.bf16.msra.mxu1 %v5529_v61  ;;  %v3663_v58 = vpop.f32.mrf.mxu0  ;;  %3956 = vmatprep.subr.bf16.mxu0 %v5534_v50  ;;  %v5591_v61 = vld [vmem:[%s7896_s1 + $0x58c] ss:$16 sps:$4 sm:$0xff]   ;;  %v5589_v45 = vld [vmem:[%s7896_s1 + $0x588] ss:$16 sps:$4 sm:$0xff]  }
 0x149   :  { %v3704_v11 = vpop.f32.mrf.mxu1  ;;  %3997 = vmatprep.subr.bf16.mxu1 %v5537_v52  ;;  %v5597_v48 = vld [vmem:[%s7896_s1 + $0x56c] ss:$16 sps:$4 sm:$0xff]   ;;  %v5592_v49 = vld [vmem:[%s7896_s1 + $0x368] ss:$16 sps:$4 sm:$0xff]  }
 0x14a   :  { %v5595_v50 = vld [vmem:[%s7896_s1 + $0x568] ss:$16 sps:$4 sm:$0xff]   ;;  %v5600_v52 = vld [vmem:[%s7896_s1 + $0x34c] ss:$16 sps:$4 sm:$0xff]  }
 0x14b   :  { %3957 = vmatpush1.bf16.msra.mxu0 %v5532_v3  ;;  %v5603_v6 = vld [vmem:[%s7896_s1 + $0x54c] ss:$16 sps:$4 sm:$0xff]   ;;  %v5598_v3 = vld [vmem:[%s7896_s1 + $0x348] ss:$16 sps:$4 sm:$0xff]  }
 0x14c   :  { %3998 = vmatpush1.bf16.msra.mxu1 %v5535_v54  ;;  %3958 = vmatprep.subr.bf16.mxu0 %v5540_v62  ;;  %v5601_v54 = vld [vmem:[%s7896_s1 + $0x548] ss:$16 sps:$4 sm:$0xff]   ;;  %v5606_v55 = vld [vmem:[%s7896_s1 + $0x32c] ss:$16 sps:$4 sm:$0xff]  }
 0x14d   :  { %3999 = vmatprep.subr.bf16.mxu1 %v5543_v51  ;;  %v5609_v56 = vld [vmem:[%s7896_s1 + $0x52c] ss:$16 sps:$4 sm:$0xff]   ;;  %v5604_v58 = vld [vmem:[%s7896_s1 + $0x328] ss:$16 sps:$4 sm:$0xff]  }
 0x14e   :  { %v5607_v11 = vld [vmem:[%s7896_s1 + $0x528] ss:$16 sps:$4 sm:$0xff]   ;;  %v5612_v62 = vld [vmem:[%s7896_s1 + $0x30c] ss:$16 sps:$4 sm:$0xff]  }
 0x14f   :  { %3959 = vmatpush1.bf16.msra.mxu0 %v5538_v36  ;;  %v5615_v51 = vld [vmem:[%s7896_s1 + $0x50c] ss:$16 sps:$4 sm:$0xff]   ;;  %v5610_v36 = vld [vmem:[%s7896_s1 + $0x308] ss:$16 sps:$4 sm:$0xff]  }
 0x150   :  { %4000 = vmatpush1.bf16.msra.mxu1 %v5541_v40  ;;  %3960 = vmatprep.subr.bf16.mxu0 %v5546_v41  ;;  %v5613_v40 = vld [vmem:[%s7896_s1 + $0x508] ss:$16 sps:$4 sm:$0xff]   ;;  %v5618_v41 = vld [vmem:[%s7896_s1 + $0x6ec] ss:$16 sps:$4 sm:$0xff]  }
 0x151   :  { %4001 = vmatprep.subr.bf16.mxu1 %v5549_v0  ;;  %v5621_v0 = vld [vmem:[%s7896_s1 + $0x8ec] ss:$16 sps:$4 sm:$0xff]  }
 0x153   :  { %3961 = vmatpush1.bf16.msra.mxu0 %v5544_v1  ;;  %v5616_v1 = vld [vmem:[%s7896_s1 + $0x6e8] ss:$16 sps:$4 sm:$0xff]  }
 0x154   :  { %4002 = vmatpush1.bf16.msra.mxu1 %v5547_v2  ;;  %3962 = vmatprep.subr.bf16.mxu0 %v5552_v4  ;;  %v5619_v2 = vld [vmem:[%s7896_s1 + $0x8e8] ss:$16 sps:$4 sm:$0xff]   ;;  %v5624_v4 = vld [vmem:[%s7896_s1 + $0x6cc] ss:$16 sps:$4 sm:$0xff]  }
 0x155   :  { %4003 = vmatprep.subr.bf16.mxu1 %v5555_v5  ;;  %v5627_v5 = vld [vmem:[%s7896_s1 + $0x8cc] ss:$16 sps:$4 sm:$0xff]  }
 0x157   :  { %3963 = vmatpush1.bf16.msra.mxu0 %v5550_v8 }
 0x158   :  { %4004 = vmatpush1.bf16.msra.mxu1 %v5553_v9  ;;  %3964 = vmatprep.subr.bf16.mxu0 %v5558_v10 }
 0x159   :  { %4005 = vmatprep.subr.bf16.mxu1 %v5561_v12  ;;  %v5622_v12 = vld [vmem:[%s7896_s1 + $0x6c8] ss:$16 sps:$4 sm:$0xff]  }
 0x15b   :  { %3965 = vmatpush1.bf16.msra.mxu0 %v5556_v13  ;;  %v5625_v13 = vld [vmem:[%s7896_s1 + $0x8c8] ss:$16 sps:$4 sm:$0xff]  }
 0x15c   :  { %4006 = vmatpush1.bf16.msra.mxu1 %v5559_v14  ;;  %3966 = vmatprep.subr.bf16.mxu0 %v5564_v15 }
 0x15d   :  { %4007 = vmatprep.subr.bf16.mxu1 %v5567_v18 }
 0x15f   :  { %3967 = vmatpush1.bf16.msra.mxu0 %v5562_v19 }
 0x160   :  { %4008 = vmatpush1.bf16.msra.mxu1 %v5565_v47  ;;  %3968 = vmatprep.subr.bf16.mxu0 %v5570_v20 }
 0x161   :  { %4009 = vmatprep.subr.bf16.mxu1 %v5573_v21  ;;  %v5628_v21 = vld [vmem:[%s7896_s1 + $0x6a8] ss:$16 sps:$4 sm:$0xff]  }
 0x163   :  { %3969 = vmatpush2.bf16.msra.mxu0 %v5568_v26  ;;  %v5631_v26 = vld [vmem:[%s7896_s1 + $0x8a8] ss:$16 sps:$4 sm:$0xff]  }
 0x164   :  { %4010 = vmatpush2.bf16.msra.mxu1 %v5571_v27  ;;  %3970 = vmatprep.subr.bf16.mxu0 %v5576_v28  ;;  %v5634_v28 = vld [vmem:[%s7896_s1 + $0x688] ss:$16 sps:$4 sm:$0xff]  }
 0x165   :  { %4011 = vmatprep.subr.bf16.mxu1 %v5579_v29  ;;  %v5637_v29 = vld [vmem:[%s7896_s1 + $0x888] ss:$16 sps:$4 sm:$0xff]  }
 0x167   :  { %3971 = vmatpush2.bf16.msra.mxu0 %v5574_v30  ;;  %v5642_v30 = vld [vmem:[%s7896_s1 + $0x66c] ss:$16 sps:$4 sm:$0xff]  }
 0x168   :  { %4012 = vmatpush2.bf16.msra.mxu1 %v5577_v31  ;;  %3972 = vmatprep.subr.bf16.mxu0 %v5582_v32  ;;  %v5645_v31 = vld [vmem:[%s7896_s1 + $0x86c] ss:$16 sps:$4 sm:$0xff]   ;;  %v5640_v32 = vld [vmem:[%s7896_s1 + $0x668] ss:$16 sps:$4 sm:$0xff]  }
 0x169   :  { %4013 = vmatprep.subr.bf16.mxu1 %v5585_v33  ;;  %v5643_v33 = vld [vmem:[%s7896_s1 + $0x868] ss:$16 sps:$4 sm:$0xff]  }
 0x16b   :  { %3973 = vmatpush2.bf16.msra.mxu0 %v5580_v35  ;;  %v5648_v35 = vld [vmem:[%s7896_s1 + $0x64c] ss:$16 sps:$4 sm:$0xff]  }
 0x16c   :  { %4014 = vmatpush2.bf16.msra.mxu1 %v5583_v22  ;;  %3974 = vmatprep.subr.bf16.mxu0 %v5588_v23  ;;  %v5651_v22 = vld [vmem:[%s7896_s1 + $0x84c] ss:$16 sps:$4 sm:$0xff]   ;;  %v5646_v23 = vld [vmem:[%s7896_s1 + $0x648] ss:$16 sps:$4 sm:$0xff]  }
 0x16d   :  { %4015 = vmatprep.subr.bf16.mxu1 %v5591_v61  ;;  %v5649_v61 = vld [vmem:[%s7896_s1 + $0x848] ss:$16 sps:$4 sm:$0xff]  }
 0x16f   :  { %3975 = vmatpush2.bf16.msra.mxu0 %v5586_v44  ;;  %v5654_v44 = vld [vmem:[%s7896_s1 + $0x62c] ss:$16 sps:$4 sm:$0xff]  }
 0x170   :  { %4016 = vmatpush2.bf16.msra.mxu1 %v5589_v45  ;;  %3976 = vmatprep.subr.bf16.mxu0 %v5594_v46  ;;  %v5657_v45 = vld [vmem:[%s7896_s1 + $0x82c] ss:$16 sps:$4 sm:$0xff]   ;;  %v5652_v46 = vld [vmem:[%s7896_s1 + $0x628] ss:$16 sps:$4 sm:$0xff]  }
 0x171   :  { %4017 = vmatprep.subr.bf16.mxu1 %v5597_v48  ;;  %v5655_v48 = vld [vmem:[%s7896_s1 + $0x828] ss:$16 sps:$4 sm:$0xff]  }
 0x173   :  { %3977 = vmatpush2.bf16.msra.mxu0 %v5592_v49  ;;  %v5660_v49 = vld [vmem:[%s7896_s1 + $0x60c] ss:$16 sps:$4 sm:$0xff]  }
 0x174   :  { %4018 = vmatpush2.bf16.msra.mxu1 %v5595_v50  ;;  %3978 = vmatprep.subr.bf16.mxu0 %v5600_v52  ;;  %v5663_v50 = vld [vmem:[%s7896_s1 + $0x80c] ss:$16 sps:$4 sm:$0xff]   ;;  %v5658_v52 = vld [vmem:[%s7896_s1 + $0x608] ss:$16 sps:$4 sm:$0xff]  }
 0x175   :  { %4019 = vmatprep.subr.bf16.mxu1 %v5603_v6  ;;  %v5661_v6 = vld [vmem:[%s7896_s1 + $0x808] ss:$16 sps:$4 sm:$0xff]  }
 0x177   :  { %3979 = vmatpush2.bf16.msra.mxu0 %v5598_v3  ;;  %v5666_v3 = vld [vmem:[%s7896_s1 + $0x7ec] ss:$16 sps:$4 sm:$0xff]  }
 0x178   :  { %4020 = vmatpush2.bf16.msra.mxu1 %v5601_v54  ;;  %3980 = vmatprep.subr.bf16.mxu0 %v5606_v55  ;;  %v5669_v54 = vld [vmem:[%s7896_s1 + $0x9ec] ss:$16 sps:$4 sm:$0xff]   ;;  %v5664_v55 = vld [vmem:[%s7896_s1 + $0x7e8] ss:$16 sps:$4 sm:$0xff]  }
 0x179   :  { %4021 = vmatprep.subr.bf16.mxu1 %v5609_v56  ;;  %v5667_v56 = vld [vmem:[%s7896_s1 + $0x9e8] ss:$16 sps:$4 sm:$0xff]  }
 0x17b   :  { %3981 = vmatpush2.bf16.msra.mxu0 %v5604_v58  ;;  %v5672_v58 = vld [vmem:[%s7896_s1 + $0x7cc] ss:$16 sps:$4 sm:$0xff]  }
 0x17c   :  { %4022 = vmatpush2.bf16.msra.mxu1 %v5607_v11  ;;  %3982 = vmatprep.subr.bf16.mxu0 %v5612_v62  ;;  %v5675_v11 = vld [vmem:[%s7896_s1 + $0x9cc] ss:$16 sps:$4 sm:$0xff]   ;;  %v5670_v62 = vld [vmem:[%s7896_s1 + $0x7c8] ss:$16 sps:$4 sm:$0xff]  }
 0x17d   :  { %4023 = vmatprep.subr.bf16.mxu1 %v5615_v51  ;;  %v5673_v51 = vld [vmem:[%s7896_s1 + $0x9c8] ss:$16 sps:$4 sm:$0xff]  }
 0x17f   :  { %3983 = vmatpush2.bf16.msra.mxu0 %v5610_v36  ;;  %v5678_v36 = vld [vmem:[%s7896_s1 + $0x7ac] ss:$16 sps:$4 sm:$0xff]  }
 0x180   :  { %4024 = vmatpush2.bf16.msra.mxu1 %v5613_v40  ;;  %4034 = vmatprep.subr.bf16.mxu0 %v5618_v41  ;;  %v5681_v40 = vld [vmem:[%s7896_s1 + $0x9ac] ss:$16 sps:$4 sm:$0xff]   ;;  %v5676_v41 = vld [vmem:[%s7896_s1 + $0x7a8] ss:$16 sps:$4 sm:$0xff]  }
 0x181   :  { %4075 = vmatprep.subr.bf16.mxu1 %v5621_v0  ;;  %v5679_v0 = vld [vmem:[%s7896_s1 + $0x9a8] ss:$16 sps:$4 sm:$0xff]  }
 0x182   :  { %v3740_v8 = vpop.f32.mrf.mxu0  ;;  %3985 = vmatmul.mubr.bf16.vlgmr.msra.gmra.mxu0 %v6143_v7  ;;  %v5630_v7 = vld [vmem:[%s7896_s1 + $0x6ac] ss:$16 sps:$4 sm:$0xff]  }
 0x183   :  { %v3781_v9 = vpop.f32.mrf.mxu1  ;;  %4026 = vmatmul.mubr.bf16.vlgmr.msra.gmra.mxu1 %v6361_v16  ;;  %v3741_v10 = vadd.f32 %v3740_v8, %v7051_v53  ;;  %4035 = vmatpush1.bf16.msra.mxu0 %v5616_v1  ;;  %v5633_v16 = vld [vmem:[%s7896_s1 + $0x8ac] ss:$16 sps:$4 sm:$0xff]  }
 0x184   :  { %4076 = vmatpush1.bf16.msra.mxu1 %v5619_v2  ;;  %v3742_v14 = vpop.f32.mrf.mxu0  ;;  %4036 = vmatprep.subr.bf16.mxu0 %v5624_v4  ;;  %v5684_v1 = vld [vmem:[%s7896_s1 + $0x78c] ss:$16 sps:$4 sm:$0xff]   ;;  %v5682_v4 = vld [vmem:[%s7896_s1 + $0x788] ss:$16 sps:$4 sm:$0xff]  }
 0x185   :  { %v3783_v15 = vpop.f32.mrf.mxu1  ;;  %4077 = vmatprep.subr.bf16.mxu1 %v5627_v5  ;;  %v7253_v53 = vadd.f32 %v3781_v9, %v3741_v10  ;;  %v3743_v18 = vadd.f32 %v3742_v14, %v7062_v57  ;;  %4066 = vmatprep.mubr.bf16.mxu0 %v6241_v37  ;;  %v5636_v37 = vld [vmem:[%s7896_s1 + $0x68c] ss:$16 sps:$4 sm:$0xff]   ;;  %v5685_v5 = vld [vmem:[%s7896_s1 + $0x988] ss:$16 sps:$4 sm:$0xff]  }
 0x186   :  { %4107 = vmatprep.mubr.bf16.mxu1 %v6391_v24  ;;  %v3744_v19 = vpop.f32.mrf.mxu0  ;;  %v5639_v24 = vld [vmem:[%s7896_s1 + $0x88c] ss:$16 sps:$4 sm:$0xff]   ;;  %v5688_v10 = vld [vmem:[%s7896_s1 + $0x768] ss:$16 sps:$4 sm:$0xff]  }
 0x187   :  { %v3785_v47 = vpop.f32.mrf.mxu1  ;;  %v7258_v20 = vadd.f32 %v3783_v15, %v3743_v18  ;;  %4037 = vmatpush1.bf16.msra.mxu0 %v5622_v12  ;;  %v5687_v2 = vld [vmem:[%s7896_s1 + $0x98c] ss:$16 sps:$4 sm:$0xff]   ;;  %v5691_v12 = vld [vmem:[%s7896_s1 + $0x968] ss:$16 sps:$4 sm:$0xff]  }
 0x188   :  { %4078 = vmatpush1.bf16.msra.mxu1 %v5625_v13  ;;  %v3745_v27 = vpop.f32.mrf.mxu0  ;;  %4038 = vmatprep.subr.bf16.mxu0 %v5630_v7  ;;  %v5690_v8 = vld [vmem:[%s7896_s1 + $0x76c] ss:$16 sps:$4 sm:$0xff]   ;;  %v5694_v15 = vld [vmem:[%s7896_s1 + $0x748] ss:$16 sps:$4 sm:$0xff]  }
 0x189   :  { %v3786_v57 = vpop.f32.mrf.mxu1  ;;  %4079 = vmatprep.subr.bf16.mxu1 %v5633_v16  ;;  %v5693_v9 = vld [vmem:[%s7896_s1 + $0x96c] ss:$16 sps:$4 sm:$0xff]   ;;  %v5697_v7 = vld [vmem:[%s7896_s1 + $0x948] ss:$16 sps:$4 sm:$0xff]  }
 0x18a   :  { %v5696_v13 = vld [vmem:[%s7896_s1 + $0x74c] ss:$16 sps:$4 sm:$0xff]   ;;  %v5700_v19 = vld [vmem:[%s7896_s1 + $0x728] ss:$16 sps:$4 sm:$0xff]  }
 0x18b   :  { %4039 = vmatpush1.bf16.msra.mxu0 %v5628_v21  ;;  %v5699_v14 = vld [vmem:[%s7896_s1 + $0x94c] ss:$16 sps:$4 sm:$0xff]   ;;  %v5703_v47 = vld [vmem:[%s7896_s1 + $0x928] ss:$16 sps:$4 sm:$0xff]  }
 0x18c   :  { %4080 = vmatpush1.bf16.msra.mxu1 %v5631_v26  ;;  %4040 = vmatprep.subr.bf16.mxu0 %v5636_v37  ;;  %v5702_v16 = vld [vmem:[%s7896_s1 + $0x72c] ss:$16 sps:$4 sm:$0xff]   ;;  %v5706_v27 = vld [vmem:[%s7896_s1 + $0x708] ss:$16 sps:$4 sm:$0xff]  }
 0x18d   :  { %4081 = vmatprep.subr.bf16.mxu1 %v5639_v24  ;;  %v5705_v18 = vld [vmem:[%s7896_s1 + $0x92c] ss:$16 sps:$4 sm:$0xff]   ;;  %v5709_v57 = vld [vmem:[%s7896_s1 + $0x908] ss:$16 sps:$4 sm:$0xff]  }
 0x18e   :  { %v5708_v21 = vld [vmem:[%s7896_s1 + $0x70c] ss:$16 sps:$4 sm:$0xff]  }
 0x18f   :  { %4041 = vmatpush1.bf16.msra.mxu0 %v5634_v28  ;;  %v5711_v26 = vld [vmem:[%s7896_s1 + $0x90c] ss:$16 sps:$4 sm:$0xff]   ;;  %v5712_v28 = vld [vmem:[%s7896_s1 + $0xae8] ss:$16 sps:$4 sm:$0xff]  }
 0x190   :  { %4082 = vmatpush1.bf16.msra.mxu1 %v5637_v29  ;;  %4042 = vmatprep.subr.bf16.mxu0 %v5642_v30  ;;  %v5714_v37 = vld [vmem:[%s7896_s1 + $0xaec] ss:$16 sps:$4 sm:$0xff]   ;;  %v5715_v29 = vld [vmem:[%s7896_s1 + $0xce8] ss:$16 sps:$4 sm:$0xff]  }
 0x191   :  { %4083 = vmatprep.subr.bf16.mxu1 %v5645_v31  ;;  %v5717_v24 = vld [vmem:[%s7896_s1 + $0xcec] ss:$16 sps:$4 sm:$0xff]  }
 0x192   :  { %v5720_v30 = vld [vmem:[%s7896_s1 + $0xacc] ss:$16 sps:$4 sm:$0xff]  }
 0x193   :  { %4043 = vmatpush1.bf16.msra.mxu0 %v5640_v32  ;;  %v5723_v31 = vld [vmem:[%s7896_s1 + $0xccc] ss:$16 sps:$4 sm:$0xff]  }
 0x194   :  { %4084 = vmatpush1.bf16.msra.mxu1 %v5643_v33  ;;  %4044 = vmatprep.subr.bf16.mxu0 %v5648_v35  ;;  %v5718_v35 = vld [vmem:[%s7896_s1 + $0xac8] ss:$16 sps:$4 sm:$0xff]  }
 0x195   :  { %4085 = vmatprep.subr.bf16.mxu1 %v5651_v22  ;;  %v5721_v22 = vld [vmem:[%s7896_s1 + $0xcc8] ss:$16 sps:$4 sm:$0xff]  }
 0x197   :  { %4045 = vmatpush1.bf16.msra.mxu0 %v5646_v23 }
 0x198   :  { %4086 = vmatpush1.bf16.msra.mxu1 %v5649_v61  ;;  %4046 = vmatprep.subr.bf16.mxu0 %v5654_v44 }
 0x199   :  { %4087 = vmatprep.subr.bf16.mxu1 %v5657_v45 }
 0x19b   :  { %4047 = vmatpush1.bf16.msra.mxu0 %v5652_v46  ;;  %v5724_v46 = vld [vmem:[%s7896_s1 + $0xaa8] ss:$16 sps:$4 sm:$0xff]  }
 0x19c   :  { %4088 = vmatpush1.bf16.msra.mxu1 %v5655_v48  ;;  %4048 = vmatprep.subr.bf16.mxu0 %v5660_v49  ;;  %v5727_v48 = vld [vmem:[%s7896_s1 + $0xca8] ss:$16 sps:$4 sm:$0xff]  }
 0x19d   :  { %4089 = vmatprep.subr.bf16.mxu1 %v5663_v50 }
 0x19f   :  { %4049 = vmatpush1.bf16.msra.mxu0 %v5658_v52  ;;  %v5730_v52 = vld [vmem:[%s7896_s1 + $0xa88] ss:$16 sps:$4 sm:$0xff]  }
 0x1a0   :  { %4090 = vmatpush1.bf16.msra.mxu1 %v5661_v6  ;;  %4050 = vmatprep.subr.bf16.mxu0 %v5666_v3  ;;  %v5733_v6 = vld [vmem:[%s7896_s1 + $0xc88] ss:$16 sps:$4 sm:$0xff]   ;;  %v5738_v3 = vld [vmem:[%s7896_s1 + $0xa6c] ss:$16 sps:$4 sm:$0xff]  }
 0x1a1   :  { %4091 = vmatprep.subr.bf16.mxu1 %v5669_v54  ;;  %v5741_v54 = vld [vmem:[%s7896_s1 + $0xc6c] ss:$16 sps:$4 sm:$0xff]  }
 0x1a3   :  { %4051 = vmatpush2.bf16.msra.mxu0 %v5664_v55  ;;  %v5736_v55 = vld [vmem:[%s7896_s1 + $0xa68] ss:$16 sps:$4 sm:$0xff]  }
 0x1a4   :  { %4092 = vmatpush2.bf16.msra.mxu1 %v5667_v56  ;;  %4052 = vmatprep.subr.bf16.mxu0 %v5672_v58  ;;  %v5739_v56 = vld [vmem:[%s7896_s1 + $0xc68] ss:$16 sps:$4 sm:$0xff]   ;;  %v5744_v58 = vld [vmem:[%s7896_s1 + $0xa4c] ss:$16 sps:$4 sm:$0xff]  }
 0x1a5   :  { %4093 = vmatprep.subr.bf16.mxu1 %v5675_v11  ;;  %v5747_v11 = vld [vmem:[%s7896_s1 + $0xc4c] ss:$16 sps:$4 sm:$0xff]  }
 0x1a7   :  { %4053 = vmatpush2.bf16.msra.mxu0 %v5670_v62  ;;  %v5742_v62 = vld [vmem:[%s7896_s1 + $0xa48] ss:$16 sps:$4 sm:$0xff]  }
 0x1a8   :  { %4094 = vmatpush2.bf16.msra.mxu1 %v5673_v51  ;;  %4054 = vmatprep.subr.bf16.mxu0 %v5678_v36  ;;  %v5745_v51 = vld [vmem:[%s7896_s1 + $0xc48] ss:$16 sps:$4 sm:$0xff]   ;;  %v5750_v36 = vld [vmem:[%s7896_s1 + $0xa2c] ss:$16 sps:$4 sm:$0xff]  }
 0x1a9   :  { %4095 = vmatprep.subr.bf16.mxu1 %v5681_v40  ;;  %v5753_v40 = vld [vmem:[%s7896_s1 + $0xc2c] ss:$16 sps:$4 sm:$0xff]  }
 0x1ab   :  { %4055 = vmatpush2.bf16.msra.mxu0 %v5676_v41  ;;  %v5748_v41 = vld [vmem:[%s7896_s1 + $0xa28] ss:$16 sps:$4 sm:$0xff]  }
 0x1ac   :  { %4096 = vmatpush2.bf16.msra.mxu1 %v5679_v0  ;;  %4056 = vmatprep.subr.bf16.mxu0 %v5684_v1  ;;  %v5751_v0 = vld [vmem:[%s7896_s1 + $0xc28] ss:$16 sps:$4 sm:$0xff]   ;;  %v5756_v1 = vld [vmem:[%s7896_s1 + $0xa0c] ss:$16 sps:$4 sm:$0xff]  }
 0x1ad   :  { %4097 = vmatprep.subr.bf16.mxu1 %v5687_v2  ;;  %v5759_v2 = vld [vmem:[%s7896_s1 + $0xc0c] ss:$16 sps:$4 sm:$0xff]  }
 0x1af   :  { %4057 = vmatpush2.bf16.msra.mxu0 %v5682_v4  ;;  %v5754_v4 = vld [vmem:[%s7896_s1 + $0xa08] ss:$16 sps:$4 sm:$0xff]  }
 0x1b0   :  { %4098 = vmatpush2.bf16.msra.mxu1 %v5685_v5  ;;  %4058 = vmatprep.subr.bf16.mxu0 %v5690_v8  ;;  %v5757_v5 = vld [vmem:[%s7896_s1 + $0xc08] ss:$16 sps:$4 sm:$0xff]   ;;  %v5762_v8 = vld [vmem:[%s7896_s1 + $0xbec] ss:$16 sps:$4 sm:$0xff]  }
 0x1b1   :  { %4099 = vmatprep.subr.bf16.mxu1 %v5693_v9  ;;  %v5765_v9 = vld [vmem:[%s7896_s1 + $0xdec] ss:$16 sps:$4 sm:$0xff]  }
 0x1b3   :  { %4059 = vmatpush2.bf16.msra.mxu0 %v5688_v10  ;;  %v5760_v10 = vld [vmem:[%s7896_s1 + $0xbe8] ss:$16 sps:$4 sm:$0xff]  }
 0x1b4   :  { %4100 = vmatpush2.bf16.msra.mxu1 %v5691_v12  ;;  %4060 = vmatprep.subr.bf16.mxu0 %v5696_v13  ;;  %v5763_v12 = vld [vmem:[%s7896_s1 + $0xde8] ss:$16 sps:$4 sm:$0xff]   ;;  %v5768_v13 = vld [vmem:[%s7896_s1 + $0xbcc] ss:$16 sps:$4 sm:$0xff]  }
 0x1b5   :  { %4101 = vmatprep.subr.bf16.mxu1 %v5699_v14  ;;  %v5771_v14 = vld [vmem:[%s7896_s1 + $0xdcc] ss:$16 sps:$4 sm:$0xff]  }
 0x1b7   :  { %4061 = vmatpush2.bf16.msra.mxu0 %v5694_v15  ;;  %v5766_v15 = vld [vmem:[%s7896_s1 + $0xbc8] ss:$16 sps:$4 sm:$0xff]  }
 0x1b8   :  { %4102 = vmatpush2.bf16.msra.mxu1 %v5697_v7  ;;  %4062 = vmatprep.subr.bf16.mxu0 %v5702_v16  ;;  %v5769_v7 = vld [vmem:[%s7896_s1 + $0xdc8] ss:$16 sps:$4 sm:$0xff]   ;;  %v5774_v16 = vld [vmem:[%s7896_s1 + $0xbac] ss:$16 sps:$4 sm:$0xff]  }
 0x1b9   :  { %4103 = vmatprep.subr.bf16.mxu1 %v5705_v18  ;;  %v5777_v18 = vld [vmem:[%s7896_s1 + $0xdac] ss:$16 sps:$4 sm:$0xff]  }
 0x1bb   :  { %4063 = vmatpush2.bf16.msra.mxu0 %v5700_v19  ;;  %v5772_v19 = vld [vmem:[%s7896_s1 + $0xba8] ss:$16 sps:$4 sm:$0xff]  }
 0x1bc   :  { %4104 = vmatpush2.bf16.msra.mxu1 %v5703_v47  ;;  %4064 = vmatprep.subr.bf16.mxu0 %v5708_v21  ;;  %v5775_v47 = vld [vmem:[%s7896_s1 + $0xda8] ss:$16 sps:$4 sm:$0xff]   ;;  %v5780_v21 = vld [vmem:[%s7896_s1 + $0xb8c] ss:$16 sps:$4 sm:$0xff]  }
 0x1bd   :  { %4105 = vmatprep.subr.bf16.mxu1 %v5711_v26  ;;  %v5783_v26 = vld [vmem:[%s7896_s1 + $0xd8c] ss:$16 sps:$4 sm:$0xff]  }
 0x1bf   :  { %4065 = vmatpush2.bf16.msra.mxu0 %v5706_v27  ;;  %v5778_v27 = vld [vmem:[%s7896_s1 + $0xb88] ss:$16 sps:$4 sm:$0xff]  }
 0x1c0   :  { %4106 = vmatpush2.bf16.msra.mxu1 %v5709_v57  ;;  %4116 = vmatprep.subr.bf16.mxu0 %v5714_v37  ;;  %v5781_v57 = vld [vmem:[%s7896_s1 + $0xd88] ss:$16 sps:$4 sm:$0xff]   ;;  %v5786_v37 = vld [vmem:[%s7896_s1 + $0xb6c] ss:$16 sps:$4 sm:$0xff]  }
 0x1c1   :  { %4157 = vmatprep.subr.bf16.mxu1 %v5717_v24  ;;  %v5789_v24 = vld [vmem:[%s7896_s1 + $0xd6c] ss:$16 sps:$4 sm:$0xff]  }
 0x1c2   :  { %v7440_v32 = vpop.f32.mrf.mxu0  ;;  %4067 = vmatmul.mubr.bf16.vlgmr.msra.gmra.mxu0 %v6365_v17  ;;  %v5726_v17 = vld [vmem:[%s7896_s1 + $0xaac] ss:$16 sps:$4 sm:$0xff]  }
 0x1c3   :  { %v7442_v33 = vpop.f32.mrf.mxu1  ;;  %4108 = vmatmul.mubr.bf16.vlgmr.msra.gmra.mxu1 %v6589_v38  ;;  %4117 = vmatpush1.bf16.msra.mxu0 %v5712_v28  ;;  %v5729_v38 = vld [vmem:[%s7896_s1 + $0xcac] ss:$16 sps:$4 sm:$0xff]   ;;  %v5784_v28 = vld [vmem:[%s7896_s1 + $0xb68] ss:$16 sps:$4 sm:$0xff]  }
 0x1c4   :  { %4158 = vmatpush1.bf16.msra.mxu1 %v5715_v29  ;;  %v7452_v23 = vpop.f32.mrf.mxu0  ;;  %4118 = vmatprep.subr.bf16.mxu0 %v5720_v30  ;;  %v5787_v29 = vld [vmem:[%s7896_s1 + $0xd68] ss:$16 sps:$4 sm:$0xff]   ;;  %v5792_v30 = vld [vmem:[%s7896_s1 + $0xb4c] ss:$16 sps:$4 sm:$0xff]  }
 0x1c5   :  { %v7454_v61 = vpop.f32.mrf.mxu1  ;;  %4159 = vmatprep.subr.bf16.mxu1 %v5723_v31  ;;  %4148 = vmatprep.mubr.bf16.mxu0 %v6395_v25  ;;  %v5732_v25 = vld [vmem:[%s7896_s1 + $0xa8c] ss:$16 sps:$4 sm:$0xff]  }
 0x1c6   :  { %4189 = vmatprep.mubr.bf16.mxu1 %v6613_v42  ;;  %v3826_v44 = vpop.f32.mrf.mxu0  ;;  %v5735_v42 = vld [vmem:[%s7896_s1 + $0xc8c] ss:$16 sps:$4 sm:$0xff]  }
 0x1c7   :  { %v3867_v45 = vpop.f32.mrf.mxu1  ;;  %4119 = vmatpush1.bf16.msra.mxu0 %v5718_v35  ;;  %v5795_v31 = vld [vmem:[%s7896_s1 + $0xd4c] ss:$16 sps:$4 sm:$0xff]   ;;  %v5790_v35 = vld [vmem:[%s7896_s1 + $0xb48] ss:$16 sps:$4 sm:$0xff]  }
 0x1c8   :  { %4160 = vmatpush1.bf16.msra.mxu1 %v5721_v22  ;;  %v3827_v49 = vpop.f32.mrf.mxu0  ;;  %4120 = vmatprep.subr.bf16.mxu0 %v5726_v17  ;;  %v5793_v22 = vld [vmem:[%s7896_s1 + $0xd48] ss:$16 sps:$4 sm:$0xff]   ;;  %v5798_v17 = vld [vmem:[%s7896_s1 + $0xb2c] ss:$16 sps:$4 sm:$0xff]  }
 0x1c9   :  { %v3868_v50 = vpop.f32.mrf.mxu1  ;;  %4161 = vmatprep.subr.bf16.mxu1 %v5729_v38  ;;  %v5801_v38 = vld [vmem:[%s7896_s1 + $0xd2c] ss:$16 sps:$4 sm:$0xff]   ;;  %v5796_v44 = vld [vmem:[%s7896_s1 + $0xb28] ss:$16 sps:$4 sm:$0xff]  }
 0x1ca   :  { %v5799_v45 = vld [vmem:[%s7896_s1 + $0xd28] ss:$16 sps:$4 sm:$0xff]  }
 0x1cb   :  { %4121 = vmatpush1.bf16.msra.mxu0 %v5724_v46  ;;  %v5804_v46 = vld [vmem:[%s7896_s1 + $0xb0c] ss:$16 sps:$4 sm:$0xff]   ;;  %v5802_v49 = vld [vmem:[%s7896_s1 + $0xb08] ss:$16 sps:$4 sm:$0xff]  }
 0x1cc   :  { %4162 = vmatpush1.bf16.msra.mxu1 %v5727_v48  ;;  %4122 = vmatprep.subr.bf16.mxu0 %v5732_v25  ;;  %v5807_v48 = vld [vmem:[%s7896_s1 + $0xd0c] ss:$16 sps:$4 sm:$0xff]   ;;  %v5805_v50 = vld [vmem:[%s7896_s1 + $0xd08] ss:$16 sps:$4 sm:$0xff]  }
 0x1cd   :  { %4163 = vmatprep.subr.bf16.mxu1 %v5735_v42  ;;  %v5810_v25 = vld [vmem:[%s7896_s1 + $0xeec] ss:$16 sps:$4 sm:$0xff]  }
 0x1ce   :  { %v5813_v42 = vld [vmem:[%s7896_s1 + $0x10ec] ss:$16 sps:$4 sm:$0xff]  }
 0x1cf   :  { %4123 = vmatpush1.bf16.msra.mxu0 %v5730_v52  ;;  %v3823_v52 = vadd.f32 %v7440_v32, %v7253_v53  ;;  %v5819_v53 = vld [vmem:[%s7896_s1 + $0x10cc] ss:$16 sps:$4 sm:$0xff]  }
 0x1d0   :  { %4164 = vmatpush1.bf16.msra.mxu1 %v5733_v6  ;;  %4124 = vmatprep.subr.bf16.mxu0 %v5738_v3  ;;  %v3825_v6 = vadd.f32 %v7452_v23, %v7258_v20  ;;  %v5808_v3 = vld [vmem:[%s7896_s1 + $0xee8] ss:$16 sps:$4 sm:$0xff]  }
 0x1d1   :  { %4165 = vmatprep.subr.bf16.mxu1 %v5741_v54  ;;  %v5811_v54 = vld [vmem:[%s7896_s1 + $0x10e8] ss:$16 sps:$4 sm:$0xff]   ;;  %v3864_v20 = vadd.f32 %v7442_v33, %v3823_v52 }
 0x1d2   :  { %v5817_v33 = vld [vmem:[%s7896_s1 + $0x10c8] ss:$16 sps:$4 sm:$0xff]  }
 0x1d3   :  { %4125 = vmatpush1.bf16.msra.mxu0 %v5736_v55  ;;  %v5816_v55 = vld [vmem:[%s7896_s1 + $0xecc] ss:$16 sps:$4 sm:$0xff]   ;;  %v5841_v52 = vld [vmem:[%s7896_s1 + $0x1048] ss:$16 sps:$4 sm:$0xff]  }
 0x1d4   :  { %4166 = vmatpush1.bf16.msra.mxu1 %v5739_v56  ;;  %4126 = vmatprep.subr.bf16.mxu0 %v5744_v58  ;;  %v3866_v56 = vadd.f32 %v7454_v61, %v3825_v6  ;;  %v5846_v6 = vld [vmem:[%s7896_s1 + $0xe2c] ss:$16 sps:$4 sm:$0xff]  }
 0x1d5   :  { %4167 = vmatprep.subr.bf16.mxu1 %v5747_v11  ;;  %v5814_v11 = vld [vmem:[%s7896_s1 + $0xec8] ss:$16 sps:$4 sm:$0xff]  }
 0x1d7   :  { %4127 = vmatpush1.bf16.msra.mxu0 %v5742_v62 }
 0x1d8   :  { %4168 = vmatpush1.bf16.msra.mxu1 %v5745_v51  ;;  %4128 = vmatprep.subr.bf16.mxu0 %v5750_v36 }
 0x1d9   :  { %4169 = vmatprep.subr.bf16.mxu1 %v5753_v40 }
 0x1db   :  { %4129 = vmatpush1.bf16.msra.mxu0 %v5748_v41 }
 0x1dc   :  { %4170 = vmatpush1.bf16.msra.mxu1 %v5751_v0  ;;  %4130 = vmatprep.subr.bf16.mxu0 %v5756_v1 }
 0x1dd   :  { %4171 = vmatprep.subr.bf16.mxu1 %v5759_v2 }
 0x1df   :  { %4131 = vmatpush1.bf16.msra.mxu0 %v5754_v4 }
 0x1e0   :  { %4172 = vmatpush1.bf16.msra.mxu1 %v5757_v5  ;;  %4132 = vmatprep.subr.bf16.mxu0 %v5762_v8  ;;  %v5820_v8 = vld [vmem:[%s7896_s1 + $0xea8] ss:$16 sps:$4 sm:$0xff]  }
 0x1e1   :  { %4173 = vmatprep.subr.bf16.mxu1 %v5765_v9 }
 0x1e3   :  { %4133 = vmatpush2.bf16.msra.mxu0 %v5760_v10  ;;  %v5828_v10 = vld [vmem:[%s7896_s1 + $0xe8c] ss:$16 sps:$4 sm:$0xff]  }
 0x1e4   :  { %4174 = vmatpush2.bf16.msra.mxu1 %v5763_v12  ;;  %4134 = vmatprep.subr.bf16.mxu0 %v5768_v13  ;;  %v5831_v12 = vld [vmem:[%s7896_s1 + $0x108c] ss:$16 sps:$4 sm:$0xff]  }
 0x1e5   :  { %4175 = vmatprep.subr.bf16.mxu1 %v5771_v14 }
 0x1e7   :  { %4135 = vmatpush2.bf16.msra.mxu0 %v5766_v15 }
 0x1e8   :  { %4176 = vmatpush2.bf16.msra.mxu1 %v5769_v7  ;;  %4136 = vmatprep.subr.bf16.mxu0 %v5774_v16 }
 0x1e9   :  { %4177 = vmatprep.subr.bf16.mxu1 %v5777_v18 }
 0x1eb   :  { %4137 = vmatpush2.bf16.msra.mxu0 %v5772_v19 }
 0x1ec   :  { %4178 = vmatpush2.bf16.msra.mxu1 %v5775_v47  ;;  %4138 = vmatprep.subr.bf16.mxu0 %v5780_v21  ;;  %v5826_v21 = vld [vmem:[%s7896_s1 + $0xe88] ss:$16 sps:$4 sm:$0xff]  }
 0x1ed   :  { %4179 = vmatprep.subr.bf16.mxu1 %v5783_v26  ;;  %v5829_v26 = vld [vmem:[%s7896_s1 + $0x1088] ss:$16 sps:$4 sm:$0xff]  }
 0x1ef   :  { %4139 = vmatpush2.bf16.msra.mxu0 %v5778_v27  ;;  %v5834_v27 = vld [vmem:[%s7896_s1 + $0xe6c] ss:$16 sps:$4 sm:$0xff]  }
 0x1f0   :  { %4180 = vmatpush2.bf16.msra.mxu1 %v5781_v57  ;;  %4140 = vmatprep.subr.bf16.mxu0 %v5786_v37  ;;  %v5837_v57 = vld [vmem:[%s7896_s1 + $0x106c] ss:$16 sps:$4 sm:$0xff]  }
 0x1f1   :  { %4181 = vmatprep.subr.bf16.mxu1 %v5789_v24 }
 0x1f3   :  { %4141 = vmatpush2.bf16.msra.mxu0 %v5784_v28 }
 0x1f4   :  { %4182 = vmatpush2.bf16.msra.mxu1 %v5787_v29  ;;  %4142 = vmatprep.subr.bf16.mxu0 %v5792_v30 }
 0x1f5   :  { %4183 = vmatprep.subr.bf16.mxu1 %v5795_v31 }
 0x1f7   :  { %4143 = vmatpush2.bf16.msra.mxu0 %v5790_v35 }
 0x1f8   :  { %4184 = vmatpush2.bf16.msra.mxu1 %v5793_v22  ;;  %4144 = vmatprep.subr.bf16.mxu0 %v5798_v17  ;;  %v5832_v22 = vld [vmem:[%s7896_s1 + $0xe68] ss:$16 sps:$4 sm:$0xff]  }
 0x1f9   :  { %4185 = vmatprep.subr.bf16.mxu1 %v5801_v38  ;;  %v5835_v17 = vld [vmem:[%s7896_s1 + $0x1068] ss:$16 sps:$4 sm:$0xff]   ;;  %v5840_v38 = vld [vmem:[%s7896_s1 + $0xe4c] ss:$16 sps:$4 sm:$0xff]  }
 0x1fb   :  { %4145 = vmatpush2.bf16.msra.mxu0 %v5796_v44  ;;  %v5843_v44 = vld [vmem:[%s7896_s1 + $0x104c] ss:$16 sps:$4 sm:$0xff]  }
 0x1fc   :  { %4186 = vmatpush2.bf16.msra.mxu1 %v5799_v45  ;;  %4146 = vmatprep.subr.bf16.mxu0 %v5804_v46 }
 0x1fd   :  { %4187 = vmatprep.subr.bf16.mxu1 %v5807_v48 }
 0x1ff   :  { %4147 = vmatpush2.bf16.msra.mxu0 %v5802_v49 }
 0x200   :  { %4188 = vmatpush2.bf16.msra.mxu1 %v5805_v50  ;;  %4198 = vmatprep.subr.bf16.mxu0 %v5810_v25 }
 0x201   :  { %4239 = vmatprep.subr.bf16.mxu1 %v5813_v42  ;;  %v5838_v42 = vld [vmem:[%s7896_s1 + $0xe48] ss:$16 sps:$4 sm:$0xff]  }
 0x202   :  { %v3904_v32 = vpop.f32.mrf.mxu0  ;;  %4149 = vmatmul.mubr.bf16.vlgmr.msra.gmra.mxu0 %v6593_v39  ;;  %v5822_v39 = vld [vmem:[%s7896_s1 + $0xeac] ss:$16 sps:$4 sm:$0xff]  }
 0x203   :  { %v7649_v23 = vpop.f32.mrf.mxu1  ;;  %4190 = vmatmul.mubr.bf16.vlgmr.msra.gmra.mxu1 %v6808_v59  ;;  %v3905_v58 = vadd.f32 %v3904_v32, %v3864_v20  ;;  %4199 = vmatpush1.bf16.msra.mxu0 %v5808_v3  ;;  %v5825_v59 = vld [vmem:[%s7896_s1 + $0x10ac] ss:$16 sps:$4 sm:$0xff]  }
 0x204   :  { %4240 = vmatpush1.bf16.msra.mxu1 %v5811_v54  ;;  %v3906_v62 = vpop.f32.mrf.mxu0  ;;  %4200 = vmatprep.subr.bf16.mxu0 %v5816_v55  ;;  %v5849_v3 = vld [vmem:[%s7896_s1 + $0x102c] ss:$16 sps:$4 sm:$0xff]   ;;  %v5844_v55 = vld [vmem:[%s7896_s1 + $0xe28] ss:$16 sps:$4 sm:$0xff]  }
 0x205   :  { %v7660_v51 = vpop.f32.mrf.mxu1  ;;  %4241 = vmatprep.subr.bf16.mxu1 %v5819_v53  ;;  %4280 = vst [vmem:[%s7898_s2] sm:$0xff] %v3905_v58  ;;  %v4295_v61 = vrot.slane %v3905_v58, 4  ;;  %v4355_v36 = vmul.f32 %v3905_v58, %v3905_v58  ;;  %v3907_v40 = vadd.f32 %v3906_v62, %v3866_v56  ;;  %4230 = vmatprep.mubr.bf16.mxu0 %v6617_v43  ;;  %v5823_v43 = vld [vmem:[%s7896_s1 + $0x10a8] ss:$16 sps:$4 sm:$0xff]   ;;  %v5852_v20 = vld [vmem:[%s7896_s1 + $0xe0c] ss:$16 sps:$4 sm:$0xff]  }
 0x206   :  { %4271 = vmatprep.mubr.bf16.mxu1 %v6830_v63  ;;  %v3908_v41 = vpop.f32.mrf.mxu0  ;;  %v5847_v53 = vld [vmem:[%s7896_s1 + $0x1028] ss:$16 sps:$4 sm:$0xff]   ;;  %v5855_v32 = vld [vmem:[%s7896_s1 + $0x100c] ss:$16 sps:$4 sm:$0xff]  }
 0x207   :  { %v3949_v0 = vpop.f32.mrf.mxu1  ;;  %v4296_v1 = vadd.f32 %v4295_v61, %v3905_v58  ;;  %v4359_v2 = vrot.slane %v4355_v36, 4  ;;  %4281 = vst [vmem:[%s7898_s2 + $0x8] sm:$0xff] %v3907_v40  ;;  %v4301_v4 = vrot.slane %v3907_v40, 4  ;;  %v4356_v5 = vmul.f32 %v3907_v40, %v3907_v40  ;;  %4201 = vmatpush1.bf16.msra.mxu0 %v5814_v11  ;;  %v5850_v56 = vld [vmem:[%s7896_s1 + $0xe08] ss:$16 sps:$4 sm:$0xff]  }
 0x208   :  { %4242 = vmatpush1.bf16.msra.mxu1 %v5817_v33  ;;  %v3909_v63 = vpop.f32.mrf.mxu0  ;;  %4202 = vmatprep.subr.bf16.mxu0 %v5822_v39  ;;  %v5853_v58 = vld [vmem:[%s7896_s1 + $0x1008] ss:$16 sps:$4 sm:$0xff]   ;;  %v5858_v11 = vld [vmem:[%s7896_s1 + $0xfec] ss:$16 sps:$4 sm:$0xff]  }
 0x209   :  { %v3950_v9 = vpop.f32.mrf.mxu1  ;;  %4243 = vmatprep.subr.bf16.mxu1 %v5825_v59  ;;  %v4297_v13 = vrot.slane %v4296_v1, 2  ;;  %v4360_v14 = vadd.f32 %v4359_v2, %v4355_v36  ;;  %v4302_v15 = vadd.f32 %v4301_v4, %v3907_v40  ;;  %v4365_v7 = vrot.slane %v4356_v5, 4  ;;  %v5861_v33 = vld [vmem:[%s7896_s1 + $0x11ec] ss:$16 sps:$4 sm:$0xff]   ;;  %v5856_v62 = vld [vmem:[%s7896_s1 + $0xfe8] ss:$16 sps:$4 sm:$0xff]  }
 0x20a   :  { %v5859_v39 = vld [vmem:[%s7896_s1 + $0x11e8] ss:$16 sps:$4 sm:$0xff]   ;;  %v5864_v59 = vld [vmem:[%s7896_s1 + $0xfcc] ss:$16 sps:$4 sm:$0xff]  }
 0x20b   :  { %v4298_v16 = vadd.f32 %v4297_v13, %v4296_v1  ;;  %v4361_v18 = vrot.slane %v4360_v14, 2  ;;  %v4303_v19 = vrot.slane %v4302_v15, 2  ;;  %v4366_v47 = vadd.f32 %v4365_v7, %v4356_v5  ;;  %4203 = vmatpush1.bf16.msra.mxu0 %v5820_v8  ;;  %v5867_v61 = vld [vmem:[%s7896_s1 + $0x11cc] ss:$16 sps:$4 sm:$0xff]   ;;  %v5862_v36 = vld [vmem:[%s7896_s1 + $0xfc8] ss:$16 sps:$4 sm:$0xff]  }
 0x20c   :  { %4244 = vmatpush1.bf16.msra.mxu1 %v5823_v43  ;;  %4204 = vmatprep.subr.bf16.mxu0 %v5828_v10  ;;  %v5865_v40 = vld [vmem:[%s7896_s1 + $0x11c8] ss:$16 sps:$4 sm:$0xff]   ;;  %v5870_v41 = vld [vmem:[%s7896_s1 + $0xfac] ss:$16 sps:$4 sm:$0xff]  }
 0x20d   :  { %4245 = vmatprep.subr.bf16.mxu1 %v5831_v12  ;;  %v4299_v37 = vrot.slane %v4298_v16, 1  ;;  %v4362_v24 = vadd.f32 %v4361_v18, %v4360_v14  ;;  %v4304_v28 = vadd.f32 %v4303_v19, %v4302_v15  ;;  %v4367_v29 = vrot.slane %v4366_v47, 2  ;;  %v5873_v0 = vld [vmem:[%s7896_s1 + $0x11ac] ss:$16 sps:$4 sm:$0xff]   ;;  %v5868_v1 = vld [vmem:[%s7896_s1 + $0xfa8] ss:$16 sps:$4 sm:$0xff]  }
 0x20e   :  { %v5871_v2 = vld [vmem:[%s7896_s1 + $0x11a8] ss:$16 sps:$4 sm:$0xff]   ;;  %v5876_v4 = vld [vmem:[%s7896_s1 + $0xf8c] ss:$16 sps:$4 sm:$0xff]  }
 0x20f   :  { %v4363_v30 = vrot.slane %v4362_v24, 1  ;;  %v4305_v31 = vrot.slane %v4304_v28, 1  ;;  %v4368_v35 = vadd.f32 %v4367_v29, %v4366_v47  ;;  %4205 = vmatpush1.bf16.msra.mxu0 %v5826_v21  ;;  %v7712_v45 = vadd.f32 %v4299_v37, %v4298_v16  ;;  %v5879_v5 = vld [vmem:[%s7896_s1 + $0x118c] ss:$16 sps:$4 sm:$0xff]   ;;  %v5874_v8 = vld [vmem:[%s7896_s1 + $0xf88] ss:$16 sps:$4 sm:$0xff]  }
 0x210   :  { %4246 = vmatpush1.bf16.msra.mxu1 %v5829_v26  ;;  %4206 = vmatprep.subr.bf16.mxu0 %v5834_v27  ;;  %v5877_v43 = vld [vmem:[%s7896_s1 + $0x1188] ss:$16 sps:$4 sm:$0xff]   ;;  %v5882_v63 = vld [vmem:[%s7896_s1 + $0xf6c] ss:$16 sps:$4 sm:$0xff]  }
 0x211   :  { %4247 = vmatprep.subr.bf16.mxu1 %v5837_v57  ;;  %v7714_v46 = vadd.f32 %v4305_v31, %v4304_v28  ;;  %v4369_v48 = vrot.slane %v4368_v35, 1  ;;  %v7716_v49 = vadd.f32 %v4363_v30, %v4362_v24  ;;  %v5885_v9 = vld [vmem:[%s7896_s1 + $0x116c] ss:$16 sps:$4 sm:$0xff]   ;;  %v5880_v10 = vld [vmem:[%s7896_s1 + $0xf68] ss:$16 sps:$4 sm:$0xff]  }
 0x212   :  { %v5883_v12 = vld [vmem:[%s7896_s1 + $0x1168] ss:$16 sps:$4 sm:$0xff]   ;;  %v5888_v13 = vld [vmem:[%s7896_s1 + $0xf4c] ss:$16 sps:$4 sm:$0xff]  }
 0x213   :  { %v4323_v50 = vcombine.low %v7712_v45, %v7714_v46  ;;  %v7720_v25 = vadd.f32 %v4369_v48, %v4368_v35  ;;  %4207 = vmatpush1.bf16.msra.mxu0 %v5832_v22  ;;  %v5891_v14 = vld [vmem:[%s7896_s1 + $0x114c] ss:$16 sps:$4 sm:$0xff]   ;;  %v5886_v15 = vld [vmem:[%s7896_s1 + $0xf48] ss:$16 sps:$4 sm:$0xff]  }
 0x214   :  { %4248 = vmatpush1.bf16.msra.mxu1 %v5835_v17  ;;  %4208 = vmatprep.subr.bf16.mxu0 %v5840_v38  ;;  %v5889_v7 = vld [vmem:[%s7896_s1 + $0x1148] ss:$16 sps:$4 sm:$0xff]   ;;  %v5894_v16 = vld [vmem:[%s7896_s1 + $0xf2c] ss:$16 sps:$4 sm:$0xff]  }
 0x215   :  { %4249 = vmatprep.subr.bf16.mxu1 %v5843_v44  ;;  %v4387_v54 = vcombine.low %v7716_v49, %v7720_v25  ;;  %v5897_v18 = vld [vmem:[%s7896_s1 + $0x112c] ss:$16 sps:$4 sm:$0xff]   ;;  %v5892_v19 = vld [vmem:[%s7896_s1 + $0xf28] ss:$16 sps:$4 sm:$0xff]  }
 0x216   :  { %v5895_v47 = vld [vmem:[%s7896_s1 + $0x1128] ss:$16 sps:$4 sm:$0xff]   ;;  %v5900_v21 = vld [vmem:[%s7896_s1 + $0xf0c] ss:$16 sps:$4 sm:$0xff]  }
 0x217   :  { %4209 = vmatpush1.bf16.msra.mxu0 %v5838_v42  ;;  %v5903_v26 = vld [vmem:[%s7896_s1 + $0x110c] ss:$16 sps:$4 sm:$0xff]   ;;  %v5898_v27 = vld [vmem:[%s7896_s1 + $0xf08] ss:$16 sps:$4 sm:$0xff]  }
 0x218   :  { %4250 = vmatpush1.bf16.msra.mxu1 %v5841_v52  ;;  %4210 = vmatprep.subr.bf16.mxu0 %v5846_v6  ;;  %v5901_v57 = vld [vmem:[%s7896_s1 + $0x1108] ss:$16 sps:$4 sm:$0xff]  }
 0x219   :  { %4251 = vmatprep.subr.bf16.mxu1 %v5849_v3 }
 0x21b   :  { %4211 = vmatpush1.bf16.msra.mxu0 %v5844_v55 }
 0x21c   :  { %4252 = vmatpush1.bf16.msra.mxu1 %v5847_v53  ;;  %4212 = vmatprep.subr.bf16.mxu0 %v5852_v20 }
 0x21d   :  { %4253 = vmatprep.subr.bf16.mxu1 %v5855_v32 }
 0x21f   :  { %4213 = vmatpush1.bf16.msra.mxu0 %v5850_v56 }
 0x220   :  { %4254 = vmatpush1.bf16.msra.mxu1 %v5853_v58  ;;  %4214 = vmatprep.subr.bf16.mxu0 %v5858_v11  ;;  %v4288_v58 = vlaneseq  ;;  %v5904_v11 = vmov 0.0  }
 0x221   :  { %4255 = vmatprep.subr.bf16.mxu1 %v5861_v33 }
 0x222   :  { %vm7854_vm0 = vcmp.lt.s32.totalorder %v4288_v58, 512 }
 0x223   :  { %4215 = vmatpush2.bf16.msra.mxu0 %v5856_v62  ;;  %4292 = vst.msk [vmem:[%s7899_s3] sm:$0xf] %vm7854_vm0, %v5904_v11  ;;  %4293 = vst.msk [vmem:[%s7900_s4] sm:$0xf] %vm7854_vm0, %v5904_v11 }
 0x224   :  { %4256 = vmatpush2.bf16.msra.mxu1 %v5859_v39  ;;  %4216 = vmatprep.subr.bf16.mxu0 %v5864_v59 }
 0x225   :  { %4257 = vmatprep.subr.bf16.mxu1 %v5867_v61 }
 0x227   :  { %4217 = vmatpush2.bf16.msra.mxu0 %v5862_v36 }
 0x228   :  { %4258 = vmatpush2.bf16.msra.mxu1 %v5865_v40  ;;  %4218 = vmatprep.subr.bf16.mxu0 %v5870_v41 }
 0x229   :  { %4259 = vmatprep.subr.bf16.mxu1 %v5873_v0 }
 0x22b   :  { %4219 = vmatpush2.bf16.msra.mxu0 %v5868_v1 }
 0x22c   :  { %4260 = vmatpush2.bf16.msra.mxu1 %v5871_v2  ;;  %4220 = vmatprep.subr.bf16.mxu0 %v5876_v4 }
 0x22d   :  { %4261 = vmatprep.subr.bf16.mxu1 %v5879_v5 }
 0x22f   :  { %4221 = vmatpush2.bf16.msra.mxu0 %v5874_v8 }
 0x230   :  { %4262 = vmatpush2.bf16.msra.mxu1 %v5877_v43  ;;  %4222 = vmatprep.subr.bf16.mxu0 %v5882_v63 }
 0x231   :  { %4263 = vmatprep.subr.bf16.mxu1 %v5885_v9 }
 0x233   :  { %4223 = vmatpush2.bf16.msra.mxu0 %v5880_v10 }
 0x234   :  { %4264 = vmatpush2.bf16.msra.mxu1 %v5883_v12  ;;  %4224 = vmatprep.subr.bf16.mxu0 %v5888_v13 }
 0x235   :  { %4265 = vmatprep.subr.bf16.mxu1 %v5891_v14 }
 0x237   :  { %4225 = vmatpush2.bf16.msra.mxu0 %v5886_v15 }
 0x238   :  { %4266 = vmatpush2.bf16.msra.mxu1 %v5889_v7  ;;  %4226 = vmatprep.subr.bf16.mxu0 %v5894_v16 }
 0x239   :  { %4267 = vmatprep.subr.bf16.mxu1 %v5897_v18 }
 0x23b   :  { %4227 = vmatpush2.bf16.msra.mxu0 %v5892_v19 }
 0x23c   :  { %4268 = vmatpush2.bf16.msra.mxu1 %v5895_v47  ;;  %4228 = vmatprep.subr.bf16.mxu0 %v5900_v21 }
 0x23d   :  { %4269 = vmatprep.subr.bf16.mxu1 %v5903_v26 }
 0x23f   :  { %4229 = vmatpush2.bf16.msra.mxu0 %v5898_v27 }
 0x240   :  { %4270 = vmatpush2.bf16.msra.mxu1 %v5901_v57  ;;  %v5905_v57 = vmov 1966171168  }
 0x242   :  { %v3986_v37 = vpop.f32.mrf.mxu0  ;;  %4231 = vmatmul.mubr.bf16.vlgmr.msra.gmra.mxu0 %v6812_v60 }
 0x243   :  { %v4027_v24 = vpop.f32.mrf.mxu1  ;;  %4272 = vmatmul.mubr.bf16.vlgmr.msra.gmra.mxu1 %v7028_v34  ;;  %v3987_v28 = vadd.f32 %v3986_v37, %v7649_v23  ;;  %v4326_v37 = vunpack.c.l.s4 %v5905_v57 }
 0x244   :  { %v3988_v29 = vpop.f32.mrf.mxu0 }
 0x245   :  { %v4029_v30 = vpop.f32.mrf.mxu1  ;;  %v4028_v31 = vadd.f32 %v4027_v24, %v3987_v28  ;;  %v3989_v35 = vadd.f32 %v3988_v29, %v7660_v51 }
 0x246   :  { %v3990_v22 = vpop.f32.mrf.mxu0 }
 0x247   :  { %v4031_v17 = vpop.f32.mrf.mxu1  ;;  %v4030_v38 = vadd.f32 %v4029_v30, %v3989_v35 }
 0x248   :  { %v3991_v44 = vpop.f32.mrf.mxu0 }
 0x249   :  { %v4032_v48 = vpop.f32.mrf.mxu1  ;;  %v4329_v44 = vshrl.u32 %v4288_v58, 7 }
 0x282   :  { %v4068_v42 = vpop.f32.mrf.mxu0 }
 0x283   :  { %v4109_v52 = vpop.f32.mrf.mxu1  ;;  %v4069_v6 = vadd.f32 %v4068_v42, %v4028_v31 }
 0x284   :  { %v4070_v3 = vpop.f32.mrf.mxu0 }
 0x285   :  { %v4111_v55 = vpop.f32.mrf.mxu1  ;;  %v4110_v60 = vadd.f32 %v4109_v52, %v4069_v6  ;;  %v4071_v53 = vadd.f32 %v4070_v3, %v4030_v38  ;;  %v4327_v38 = vunpack.c.0.s8 %v4326_v37 }
 0x286   :  { %v4072_v34 = vpop.f32.mrf.mxu0 }
 0x287   :  { %v4113_v20 = vpop.f32.mrf.mxu1  ;;  %v4112_v23 = vadd.f32 %v4111_v55, %v4071_v53  ;;  %v4330_v53 = vsub.s32 %v4327_v38, %v4329_v44 }
 0x288   :  { %v4073_v32 = vpop.f32.mrf.mxu0 }
 0x289   :  { %v4114_v56 = vpop.f32.mrf.mxu1 }
 0x2c2   :  { %v4150_v33 = vpop.f32.mrf.mxu0 }
 0x2c3   :  { %v4191_v62 = vpop.f32.mrf.mxu1  ;;  %v4151_v0 = vadd.f32 %v4150_v33, %v4110_v60  ;;  %v4331_v33 = vrot.slane %v4323_v50, %v4330_v53 }
 0x2c4   :  { %v4152_v39 = vpop.f32.mrf.mxu0 }
 0x2c5   :  { %v4193_v59 = vpop.f32.mrf.mxu1  ;;  %v4153_v1 = vadd.f32 %v4152_v39, %v4112_v23  ;;  %v4192_v2 = vadd.f32 %v4191_v62, %v4151_v0  ;;  %v4395_v39 = vrot.slane %v4387_v54, %v4330_v53  ;;  %v4354_v0 = vld [vmem:[%s7900_s4] sm:$0xf] }
 0x2c6   :  { %v4154_v61 = vpop.f32.mrf.mxu0 }
 0x2c7   :  { %v4195_v36 = vpop.f32.mrf.mxu1  ;;  %v4194_v8 = vadd.f32 %v4193_v59, %v4153_v1 }
 0x2c8   :  { %v4155_v40 = vpop.f32.mrf.mxu0  ;;  %v4294_v36 = vld [vmem:[%s7899_s3] sm:$0xf] }
 0x2c9   :  { %v4196_v41 = vpop.f32.mrf.mxu1 }
 0x302   :  { %v4232_v4 = vpop.f32.mrf.mxu0 }
 0x303   :  { %v4273_v5 = vpop.f32.mrf.mxu1  ;;  %v4233_v43 = vadd.f32 %v4232_v4, %v4192_v2 }
 0x304   :  { %v4234_v63 = vpop.f32.mrf.mxu0 }
 0x305   :  { %v4275_v9 = vpop.f32.mrf.mxu1  ;;  %v4274_v10 = vadd.f32 %v4273_v5, %v4233_v43  ;;  %v4235_v12 = vadd.f32 %v4234_v63, %v4194_v8 }
 0x306   :  { %v4236_v13 = vpop.f32.mrf.mxu0 }
 0x307   :  { %v4277_v14 = vpop.f32.mrf.mxu1  ;;  %4282 = vst [vmem:[%s7898_s2 + $0x10] sm:$0xff] %v4274_v10  ;;  %v4307_v15 = vrot.slane %v4274_v10, 4  ;;  %v4357_v7 = vmul.f32 %v4274_v10, %v4274_v10  ;;  %v4276_v16 = vadd.f32 %v4275_v9, %v4235_v12 }
 0x308   :  { %v4237_v18 = vpop.f32.mrf.mxu0 }
 0x309   :  { %v4278_v19 = vpop.f32.mrf.mxu1  ;;  %v4308_v47 = vadd.f32 %v4307_v15, %v4274_v10  ;;  %v4371_v21 = vrot.slane %v4357_v7, 4  ;;  %4283 = vst [vmem:[%s7898_s2 + $0x18] sm:$0xff] %v4276_v16  ;;  %v4313_v26 = vrot.slane %v4276_v16, 4  ;;  %v4358_v27 = vmul.f32 %v4276_v16, %v4276_v16 }
 0x30b   :  { %v4309_v24 = vrot.slane %v4308_v47, 2  ;;  %v4372_v28 = vadd.f32 %v4371_v21, %v4357_v7  ;;  %v4314_v29 = vadd.f32 %v4313_v26, %v4276_v16  ;;  %v4377_v30 = vrot.slane %v4358_v27, 4 }
 0x30d   :  { %v4310_v31 = vadd.f32 %v4309_v24, %v4308_v47  ;;  %v4373_v35 = vrot.slane %v4372_v28, 2  ;;  %v4315_v22 = vrot.slane %v4314_v29, 2  ;;  %v4378_v17 = vadd.f32 %v4377_v30, %v4358_v27 }
 0x30f   :  { %v4311_v48 = vrot.slane %v4310_v31, 1  ;;  %v4374_v42 = vadd.f32 %v4373_v35, %v4372_v28  ;;  %v4316_v52 = vadd.f32 %v4315_v22, %v4314_v29  ;;  %v4379_v6 = vrot.slane %v4378_v17, 2 }
 0x311   :  { %v4375_v3 = vrot.slane %v4374_v42, 1  ;;  %v4317_v55 = vrot.slane %v4316_v52, 1  ;;  %v4380_v60 = vadd.f32 %v4379_v6, %v4378_v17  ;;  %v4312_v34 = vadd.f32 %v4311_v48, %v4310_v31 }
 0x313   :  { %v4318_v20 = vadd.f32 %v4317_v55, %v4316_v52  ;;  %v4381_v23 = vrot.slane %v4380_v60, 1  ;;  %v4376_v32 = vadd.f32 %v4375_v3, %v4374_v42 }
 0x315   :  { %v4324_v56 = vcombine.low %v4312_v34, %v4318_v20  ;;  %v4382_v11 = vadd.f32 %v4381_v23, %v4380_v60 }
 0x317   :  { %v4338_v62 = vrot.slane %v4324_v56, %v4330_v53  ;;  %v4388_v58 = vcombine.low %v4376_v32, %v4382_v11 }
 0x319   :  { %v4339_v59 = vcombine.low %v4331_v33, %v4338_v62  ;;  %v4402_v61 = vrot.slane %v4388_v58, %v4330_v53 }
 0x31b   :  { %v4346_v40 = vrot.slane %v4339_v59, %v4330_v53  ;;  %v4403_v41 = vcombine.low %v4395_v39, %v4402_v61 }
 0x31d   :  { %v4348_v45 = vadd.f32 %v4346_v40, %v4294_v36  ;;  %v4410_v46 = vrot.slane %v4403_v41, %v4330_v53 }
 0x31f   :  { %4353 = vst.msk [vmem:[%s7899_s3] sm:$0xf] %vm7854_vm0, %v4348_v45  ;;  %v4412_v49 = vadd.f32 %v4410_v46, %v4354_v0 }
 0x321   :  { %4413 = vst.msk [vmem:[%s7900_s4] sm:$0xf] %vm7854_vm0, %v4412_v49 }

</bundles_post_ra>
